<compile_context>
chip_gen: v6e
topology: v6e:2x2x1
jax: 0.10.0
libtpu: 0.0.40
codegen_flags: <defaults>
</compile_context>

<pallas_src>
import functools

import jax
import jax.numpy as jnp
import numpy as np
from jax.experimental import pallas as pl
from jax.experimental.pallas import tpu as pltpu

NEG_INF = -1e9
LN_EPS = 1e-5
NEG_SLOPE = 0.2  # PyG GATConv default leaky-relu slope


def _residual_gat_kernel(
    # scalar prefetch (SMEM)
    nblk_ref,        # [Gi]          int32: number of non-empty column blocks per row block
    col_ref,         # [Gi*max_nb]   int32: compacted column-block indices (used by index_maps)
    # inputs (VMEM tiles)
    xl_ref,          # [H, TJ, C]    projected source features (mm_dtype)
    adj_ref,         # [TI, TJ]      0/1 adjacency block (mm_dtype; adj[i, j]=1 iff edge j -> i)
    a_dst_ref,       # [H, TI, 1]    per-destination attention logits (f32)
    a_src_ref,       # [H, 1, TJ]    per-source attention logits (f32)
    res_ref,         # [TI, C]       residual Linear output (f32, precomputed)
    b_gat_ref,       # [1, C]        GATConv bias (applied after head mean)
    gamma_ref,       # [1, C]        LayerNorm weight
    beta_ref,        # [1, C]        LayerNorm bias
    # output
    o_ref,           # [C, TI]       lane-dense (transposed) output tile
    # scratch (persist across the j reduction axis)
    m_s,             # VMEM [H, TI, 1]  running max (f32)
    l_s,             # VMEM [H, TI, 1]  running softmax denominator (f32)
    acc_s,           # VMEM [H, TI, C]  running (un-normalized) aggregation (f32)
    *,
    heads: int,
    out_channels: int,
    approx_recip: bool,
):
  del col_ref  # consumed by the index_maps only
  i = pl.program_id(0)
  jj = pl.program_id(1)
  C = out_channels
  ti = acc_s.shape[1]
  ew = xl_ref.dtype  # elementwise / matmul dtype (bf16 fast path, f32 strict path)

  # ---- init per destination-row tile (no matmuls left here) ----
  @pl.when(jj == 0)
  def _init():
    m_s[...] = jnp.full(m_s.shape, NEG_INF, jnp.float32)
    l_s[...] = jnp.zeros(l_s.shape, jnp.float32)
    acc_s[...] = jnp.zeros(acc_s.shape, jnp.float32)

  # ---- compacted grid: only padded trailing steps are skipped here ----
  @pl.when(jj < nblk_ref[i])
  def _block():
    # adjacency is already 0/1 in the elementwise dtype -> no convert pass and the
    # mask has the same packing as e/p (no cross-bitwidth mask relayout).
    edge_mask = adj_ref[...] > 0                                  # [TI, TJ]

    def head_body(h, carry):
      ad = a_dst_ref[h]                                           # [TI, 1] f32
      asr = a_src_ref[h]                                          # [1, TJ] f32
      e = (ad + asr).astype(ew)                                   # [TI, TJ] ew
      e = jnp.maximum(e, NEG_SLOPE * e)                           # leaky relu (slope in (0,1))
      e = jnp.where(edge_mask, e, NEG_INF)
      m_prev = m_s[h]                                             # [TI, 1] f32
      m_new = jnp.maximum(
          m_prev, jnp.max(e, axis=-1, keepdims=True).astype(jnp.float32))
      # load-bearing second mask: NEG_INF is finite, so fully-masked rows in this
      # block would otherwise contribute exp(0) == 1 weights.
      p = jnp.where(edge_mask, jnp.exp(e - m_new.astype(ew)), 0.0)  # [TI, TJ] ew
      alpha = jnp.exp(m_prev - m_new)                             # [TI, 1] f32
      l_s[h] = alpha * l_s[h] + jnp.sum(p, axis=-1, keepdims=True).astype(jnp.float32)
      acc_s[h] = alpha * acc_s[h] + jnp.dot(
          p, xl_ref[h], preferred_element_type=jnp.float32)       # [TI, C]
      m_s[h] = m_new
      return carry

    jax.lax.fori_loop(0, heads, head_body, 0, unroll=True)

  # ---- finalize: head mean + bias, LayerNorm, residual add, lane-dense store ----
  @pl.when(jj == pl.num_programs(1) - 1)
  def _finalize():
    def fin_body(h, out):
      l = l_s[h]
      l = jnp.where(l > 0.0, l, 1.0)  # guard: zero-degree node (no self-loop) -> output 0
      if approx_recip:
        inv = pl.reciprocal(l, approx=True)  # EUP slot, nearly free
      else:
        inv = 1.0 / l                        # exact path for the strict f32 check
      return out + acc_s[h] * inv

    out = jax.lax.fori_loop(0, heads, fin_body,
                            jnp.zeros((ti, C), jnp.float32), unroll=True)
    gat = out * (1.0 / heads) + b_gat_ref[...]                    # concat=False -> mean

    mu = jnp.mean(gat, axis=-1, keepdims=True)
    var = jnp.mean((gat - mu) ** 2, axis=-1, keepdims=True)
    normed = (gat - mu) * jax.lax.rsqrt(var + LN_EPS)
    normed = normed * gamma_ref[...] + beta_ref[...]
    # Dropout (feature + attention): eval-mode identity.
    # TODO(synk): train-mode stochastic dropout not implemented.
    y = normed + res_ref[...]                                     # [TI, C] f32

    # Lane-dense store: emit [C, TI] (C sublanes x 128 lanes).  The transpose is a
    # tiny eye(C) MXU dot (transpose-rhs matmul) instead of an XLU transpose of a
    # sub-128-wide tile; MXU is idle in the VPU-bound hot loop so this is free.
    eye_c = (jax.lax.broadcasted_iota(jnp.int32, (C, C), 0) ==
             jax.lax.broadcasted_iota(jnp.int32, (C, C), 1)).astype(jnp.float32)
    y_t = jax.lax.dot_general(eye_c, y, (((1,), (1,)), ((), ())),
                              preferred_element_type=jnp.float32)  # [C, TI]
    o_ref[...] = y_t.astype(o_ref.dtype)


def residual_gat_layer(x, adj_i8, params, *, heads, out_channels,
                       tile_i=128, tile_j=128, mm_dtype=jnp.bfloat16):
  """x: [N, Cin] f32; adj_i8: [N, N] 0/1 (adj[i, j] = 1 iff edge j -> i, self-loops set).

  mm_dtype = bf16: fast path for v6e/v7x (bf16 VPU/EUP/MXU, f32 accumulation).
  mm_dtype = f32 : strict path / v5e (no bf16 VPU/EUP on v5e).
  """
  n, cin = x.shape
  H, C = heads, out_channels
  assert params["w_gat"].shape == (cin, H * C)
  assert n % tile_i == 0 and n % tile_j == 0, "pad N to a multiple of the tile sizes"
  gi, gj = n // tile_i, n // tile_j

  # --- host glue: CSR-of-blocks for grid compaction (scalar prefetch) ---
  adj_host = (np.asarray(adj_i8) > 0)
  blk_nnz = adj_host.reshape(gi, tile_i, gj, tile_j).sum(axis=(1, 3))     # [gi, gj]
  nblk_np = (blk_nnz > 0).sum(axis=1).astype(np.int32)                    # [gi]
  max_nb = max(int(nblk_np.max()), 1)
  col_np = np.zeros((gi, max_nb), np.int32)
  for r in range(gi):
    cols = np.nonzero(blk_nnz[r] > 0)[0]
    if cols.size == 0:
      cols = np.zeros((1,), np.int64)
    col_np[r, :cols.size] = cols
    col_np[r, cols.size:] = cols[-1]   # pad with last valid col -> padded steps re-use the DMA
  # TODO(synk): on v7x (2 TCs) permute the i axis by nblk to balance non-empty work
  # across the cores; single-TC v5e/v6e are unaffected.
  nblk = jnp.asarray(nblk_np)
  col_idx = jnp.asarray(col_np.reshape(-1))

  # --- hoisted projections: one XLA matmul each instead of per-(i, j) in-kernel dots ---
  xl = x.astype(jnp.float32) @ params["w_gat"].astype(jnp.float32)        # [N, H*C]
  xlh = xl.reshape(n, H, C)
  xl3 = jnp.transpose(xlh, (1, 0, 2)).astype(mm_dtype)                    # [H, N, C]
  a_dst3 = jnp.einsum("nhc,hc->hn", xlh,
                      params["att_dst"].astype(jnp.float32))[..., None]   # [H, N, 1]
  a_src3 = jnp.einsum("nhc,hc->hn", xlh,
                      params["att_src"].astype(jnp.float32))[:, None, :]  # [H, 1, N]
  res = (x @ params["w_res"] + params["b_res"]).astype(jnp.float32)       # [N, C]
  # 0/1 adjacency in the elementwise dtype: in-kernel compare needs no convert pass.
  adj_ew = jnp.asarray(adj_host.astype(np.float32)).astype(mm_dtype)      # [N, N]

  kernel = functools.partial(
      _residual_gat_kernel, heads=H, out_channels=C,
      approx_recip=(jnp.dtype(mm_dtype) != jnp.dtype(jnp.float32)))

  grid_spec = pltpu.PrefetchScalarGridSpec(
      num_scalar_prefetch=2,
      grid=(gi, max_nb),
      in_specs=[
          pl.BlockSpec((H, tile_j, C),
                       lambda i, j, nblk, col: (0, col[i * max_nb + j], 0)),  # xl (src rows)
          pl.BlockSpec((tile_i, tile_j),
                       lambda i, j, nblk, col: (i, col[i * max_nb + j])),     # adjacency block
          pl.BlockSpec((H, tile_i, 1), lambda i, j, nblk, col: (0, i, 0)),    # a_dst
          pl.BlockSpec((H, 1, tile_j),
                       lambda i, j, nblk, col: (0, 0, col[i * max_nb + j])),  # a_src
          pl.BlockSpec((tile_i, C), lambda i, j, nblk, col: (i, 0)),          # residual tile
          # The three remaining constant operands are [1, C]; pl.Buffered(1) would
          # save ~2*C*4 bytes each -- negligible, so left at the default.
          pl.BlockSpec((1, C), lambda i, j, nblk, col: (0, 0)),               # b_gat
          pl.BlockSpec((1, C), lambda i, j, nblk, col: (0, 0)),               # gamma
          pl.BlockSpec((1, C), lambda i, j, nblk, col: (0, 0)),               # beta
      ],
      out_specs=pl.BlockSpec((C, tile_i), lambda i, j, nblk, col: (0, i)),    # lane-dense
      scratch_shapes=[
          pltpu.VMEM((H, tile_i, 1), jnp.float32),   # m
          pltpu.VMEM((H, tile_i, 1), jnp.float32),   # l
          pltpu.VMEM((H, tile_i, C), jnp.float32),   # acc
      ])

  # VMEM budget: double-buffered tiles + scratch + in-flight [TI,TJ] temporaries.
  # Kept well under v7x's 64 MiB physical VMEM; on v5e/v6e (128 MiB) tile_j can be
  # raised to 256-512 and this cap loosened.
  ewb = jnp.dtype(mm_dtype).itemsize
  blk_bytes = (
      2 * (H * tile_j * C * ewb)                       # xl3 tiles
      + 2 * (tile_i * tile_j * ewb)                    # adjacency block
      + 2 * (H * tile_i * 4 + H * tile_j * 4)          # a_dst / a_src
      + 2 * (tile_i * C * 4)                           # residual tile
      + 2 * (C * tile_i * 4)                           # output tile
      + H * tile_i * (2 + C) * 4                       # m/l/acc scratch
      + 6 * tile_i * tile_j * 4)                       # in-flight e/p/mask temporaries
  vmem_limit = int(min(max(blk_bytes + (8 << 20), 16 << 20), 48 << 20))

  nnz_blocks = int((blk_nnz > 0).sum())
  cost = pl.CostEstimate(
      flops=int(nnz_blocks * H * (2 * tile_i * tile_j * C + 8 * tile_i * tile_j)
                + gi * tile_i * 12 * C),
      transcendentals=int(nnz_blocks * H * tile_i * tile_j),
      bytes_accessed=int(
          nnz_blocks * (tile_i * tile_j + H * tile_j * C) * ewb
          + gi * (2 * tile_i * C * 4 + 2 * H * tile_i * 4)))

  out_t = pl.pallas_call(
      kernel,
      out_shape=jax.ShapeDtypeStruct((C, n), jnp.float32),
      grid_spec=grid_spec,
      compiler_params=pltpu.CompilerParams(
          dimension_semantics=("parallel", "arbitrary"),
          vmem_limit_bytes=vmem_limit),
      cost_estimate=cost,
  )(nblk, col_idx, xl3, adj_ew, a_dst3, a_src3, res,
    params["b_gat"].astype(jnp.float32), params["gamma"].astype(jnp.float32),
    params["beta"].astype(jnp.float32))
  return out_t.T  # back to [N, C]


def reference(x, adj, params, *, heads, out_channels):
  """Plain-JAX reference for the same (eval-mode) forward pass."""
  xl = x @ params["w_gat"]
  n = x.shape[0]
  acc = jnp.zeros((n, out_channels), jnp.float32)
  for h in range(heads):
    xh = xl[:, h * out_channels:(h + 1) * out_channels]
    a_src = params["att_src"][h]
    a_dst = params["att_dst"][h]
    alpha_dst = (xh * a_dst).sum(-1)[:, None]
    alpha_src = (xh * a_src).sum(-1)[None, :]
    e = alpha_dst + alpha_src
    e = jnp.where(e > 0, e, NEG_SLOPE * e)
    e = jnp.where(adj > 0, e, NEG_INF)
    attn = jax.nn.softmax(e, axis=-1)
    acc = acc + attn @ xh
  gat = acc / heads + params["b_gat"]
  mu = gat.mean(-1, keepdims=True)
  var = ((gat - mu) ** 2).mean(-1, keepdims=True)
  normed = (gat - mu) / jnp.sqrt(var + LN_EPS)
  normed = normed * params["gamma"] + params["beta"]
  res = x @ params["w_res"] + params["b_res"]
  return normed + res


if __name__ == "__main__":
  N, CIN, COUT, HEADS = 512, 32, 16, 4
  TILE = 128  # 4x4 adjacency block grid; several blocks are empty -> exercises compaction

  # --- deterministic synthetic graph: ring + skip-5 edges, plus self-loops ---
  src = np.concatenate([np.arange(N), np.arange(N)])
  dst = np.concatenate([(np.arange(N) + 1) % N, (np.arange(N) + 5) % N])
  adj_np = np.zeros((N, N), np.int8)
  adj_np[dst, src] = 1                       # adj[i, j]: edge j -> i
  adj_np[np.arange(N), np.arange(N)] = 1     # add_self_loops=True

  # --- deterministic parameter init ---
  key = jax.random.PRNGKey(0)
  ks = jax.random.split(key, 8)
  params = {
      "w_gat":  jax.random.normal(ks[0], (CIN, HEADS * COUT), jnp.float32) * 0.2,
      "att_src": jax.random.normal(ks[1], (HEADS, COUT), jnp.float32) * 0.2,
      "att_dst": jax.random.normal(ks[2], (HEADS, COUT), jnp.float32) * 0.2,
      "b_gat":  jax.random.normal(ks[3], (1, COUT), jnp.float32) * 0.1,
      "gamma":  jnp.ones((1, COUT), jnp.float32),
      "beta":   jnp.zeros((1, COUT), jnp.float32),
      "w_res":  jax.random.normal(ks[4], (CIN, COUT), jnp.float32) * 0.2,
      "b_res":  jax.random.normal(ks[5], (1, COUT), jnp.float32) * 0.1,
  }
  x = jax.random.normal(ks[6], (N, CIN), jnp.float32)

  ref = reference(x, jnp.asarray(adj_np, jnp.float32), params,
                  heads=HEADS, out_channels=COUT)
  ref = np.asarray(jax.block_until_ready(ref))

  # Strict correctness check: f32 elementwise / MXU path (also the v5e path).
  out_f32 = residual_gat_layer(x, adj_np, params, heads=HEADS, out_channels=COUT,
                               tile_i=TILE, tile_j=TILE, mm_dtype=jnp.float32)
  out_f32 = np.asarray(jax.block_until_ready(out_f32))
  np.testing.assert_allclose(out_f32, ref, atol=1e-4, rtol=1e-4)

  # Fast path (v6e/v7x): bf16 elementwise softmax + bf16 MXU operands, f32 accumulation.
  # Loose sanity tolerance (bf16 logits/exp/aggregation, error grows with node degree).
  out_bf16 = residual_gat_layer(x, adj_np, params, heads=HEADS, out_channels=COUT,
                                tile_i=TILE, tile_j=TILE, mm_dtype=jnp.bfloat16)
  out_bf16 = np.asarray(jax.block_until_ready(out_bf16))
  np.testing.assert_allclose(out_bf16, ref, atol=1e-1, rtol=1e-1)

  print("KERNEL_OK")
</pallas_src>

<mosaic_0001>
module attributes {stable_mosaic.version = 11 : i64} {
  func.func @_residual_gat_kernel(%arg0: i32, %arg1: i32, %arg2: memref<4xi32, #tpu.memory_space<smem>>, %arg3: memref<8xi32, #tpu.memory_space<smem>>, %arg4: memref<4x128x16xf32, #tpu.memory_space<vmem>>, %arg5: memref<128x128xf32, #tpu.memory_space<vmem>>, %arg6: memref<4x128x1xf32, #tpu.memory_space<vmem>>, %arg7: memref<4x1x128xf32, #tpu.memory_space<vmem>>, %arg8: memref<128x16xf32, #tpu.memory_space<vmem>>, %arg9: memref<1x16xf32, #tpu.memory_space<vmem>>, %arg10: memref<1x16xf32, #tpu.memory_space<vmem>>, %arg11: memref<1x16xf32, #tpu.memory_space<vmem>>, %arg12: memref<16x128xf32, #tpu.memory_space<vmem>>, %arg13: memref<4x128x1xf32, #tpu.memory_space<vmem>>, %arg14: memref<4x128x1xf32, #tpu.memory_space<vmem>>, %arg15: memref<4x128x16xf32, #tpu.memory_space<vmem>>) attributes {dimension_semantics = [#tpu.dimension_semantics<parallel>, #tpu.dimension_semantics<arbitrary>], iteration_bounds = array<i64: 4, 2>, scalar_prefetch = 2 : i64, scratch_operands = 3 : i64, tpu.core_type = #tpu.core_type<tc>, window_params = [{transform_indices = @transform_0, window_bounds = array<i64: 4, 128, 16>}, {transform_indices = @transform_1, window_bounds = array<i64: 128, 128>}, {transform_indices = @transform_2, window_bounds = array<i64: 4, 128, 1>}, {transform_indices = @transform_3, window_bounds = array<i64: 4, 1, 128>}, {transform_indices = @transform_4, window_bounds = array<i64: 128, 16>}, {pipeline_mode = #tpu.pipeline_mode<synchronous>, transform_indices = @transform_5, window_bounds = array<i64: 1, 16>}, {pipeline_mode = #tpu.pipeline_mode<synchronous>, transform_indices = @transform_6, window_bounds = array<i64: 1, 16>}, {pipeline_mode = #tpu.pipeline_mode<synchronous>, transform_indices = @transform_7, window_bounds = array<i64: 1, 16>}, {transform_indices = @transform_8, window_bounds = array<i64: 16, 128>}]} {
    %c0_i32 = arith.constant 0 : i32
    %0 = arith.cmpi eq, %arg1, %c0_i32 : i32
    %1 = arith.extui %0 : i1 to i32
    %c0_i32_0 = arith.constant 0 : i32
    %2 = arith.cmpi ne, %1, %c0_i32_0 : i32
    scf.if %2 {
      %cst = arith.constant -1.000000e+09 : f32
      %11 = vector.broadcast %cst : f32 to vector<4x128x1xf32>
      %c0 = arith.constant 0 : index
      %c0_3 = arith.constant 0 : index
      %c0_4 = arith.constant 0 : index
      %12 = vector.load %arg13[%c0, %c0_3, %c0_4] : memref<4x128x1xf32, #tpu.memory_space<vmem>>, vector<4x128x1xf32>
      tpu.vector_store %arg13[%c0, %c0_3, %c0_4], %11 {strides = array<i32>} : memref<4x128x1xf32, #tpu.memory_space<vmem>>, vector<4x128x1xf32>,
      %cst_5 = arith.constant 0.000000e+00 : f32
      %13 = vector.broadcast %cst_5 : f32 to vector<4x128x1xf32>
      %c0_6 = arith.constant 0 : index
      %c0_7 = arith.constant 0 : index
      %c0_8 = arith.constant 0 : index
      %14 = vector.load %arg14[%c0_6, %c0_7, %c0_8] : memref<4x128x1xf32, #tpu.memory_space<vmem>>, vector<4x128x1xf32>
      tpu.vector_store %arg14[%c0_6, %c0_7, %c0_8], %13 {strides = array<i32>} : memref<4x128x1xf32, #tpu.memory_space<vmem>>, vector<4x128x1xf32>,
      %cst_9 = arith.constant 0.000000e+00 : f32
      %15 = vector.broadcast %cst_9 : f32 to vector<4x128x16xf32>
      %c0_10 = arith.constant 0 : index
      %c0_11 = arith.constant 0 : index
      %c0_12 = arith.constant 0 : index
      %16 = vector.load %arg15[%c0_10, %c0_11, %c0_12] : memref<4x128x16xf32, #tpu.memory_space<vmem>>, vector<4x128x16xf32>
      tpu.vector_store %arg15[%c0_10, %c0_11, %c0_12], %15 {strides = array<i32>} : memref<4x128x16xf32, #tpu.memory_space<vmem>>, vector<4x128x16xf32>,
    } else {
    }
    %3 = arith.index_cast %arg0 : i32 to index
    %4 = memref.load %arg2[%3] : memref<4xi32, #tpu.memory_space<smem>>
    %5 = arith.cmpi slt, %arg1, %4 : i32
    %6 = arith.extui %5 : i1 to i32
    %c0_i32_1 = arith.constant 0 : i32
    %7 = arith.cmpi ne, %6, %c0_i32_1 : i32
    scf.if %7 {
      %c0 = arith.constant 0 : index
      %c0_3 = arith.constant 0 : index
      %11 = vector.load %arg5[%c0, %c0_3] : memref<128x128xf32, #tpu.memory_space<vmem>>, vector<128x128xf32>
      %cst = arith.constant 0.000000e+00 : f32
      %12 = vector.broadcast %cst : f32 to vector<128x128xf32>
      %13 = arith.cmpf ogt, %11, %12 : vector<128x128xf32>
      %c0_i32_4 = arith.constant 0 : i32
      %14 = arith.index_cast %c0_i32_4 : i32 to index
      %c0_5 = arith.constant 0 : index
      %c0_6 = arith.constant 0 : index
      %15 = vector.load %arg6[%14, %c0_5, %c0_6] : memref<4x128x1xf32, #tpu.memory_space<vmem>>, vector<1x128x1xf32>
      %16 = vector.shape_cast %15 : vector<1x128x1xf32> to vector<128x1xf32>
      %17 = arith.index_cast %c0_i32_4 : i32 to index
      %c0_7 = arith.constant 0 : index
      %c0_8 = arith.constant 0 : index
      %18 = vector.load %arg7[%17, %c0_7, %c0_8] : memref<4x1x128xf32, #tpu.memory_space<vmem>>, vector<1x1x128xf32>
      %19 = vector.shape_cast %18 : vector<1x1x128xf32> to vector<1x128xf32>
      %20 = vector.broadcast %16 : vector<128x1xf32> to vector<128x128xf32>
      %21 = vector.broadcast %19 : vector<1x128xf32> to vector<128x128xf32>
      %22 = arith.addf %20, %21 : vector<128x128xf32>
      %cst_9 = arith.constant 2.000000e-01 : f32
      %23 = vector.broadcast %cst_9 : f32 to vector<128x128xf32>
      %24 = arith.mulf %23, %22 : vector<128x128xf32>
      %25 = arith.maximumf %22, %24 : vector<128x128xf32>
      %cst_10 = arith.constant -1.000000e+09 : f32
      %26 = vector.broadcast %cst_10 : f32 to vector<128x128xf32>
      %27 = arith.select %13, %25, %26 : vector<128x128xi1>, vector<128x128xf32>
      %28 = arith.index_cast %c0_i32_4 : i32 to index
      %c0_11 = arith.constant 0 : index
      %c0_12 = arith.constant 0 : index
      %29 = vector.load %arg13[%28, %c0_11, %c0_12] : memref<4x128x1xf32, #tpu.memory_space<vmem>>, vector<1x128x1xf32>
      %30 = vector.shape_cast %29 : vector<1x128x1xf32> to vector<128x1xf32>
      %cst_13 = arith.constant dense<0xFF800000> : vector<128xf32>
      %31 = vector.multi_reduction <maximumf>, %27, %cst_13 [1] : vector<128x128xf32> to vector<128xf32>
      %32 = vector.shape_cast %31 : vector<128xf32> to vector<128x1xf32>
      %33 = arith.maximumf %30, %32 : vector<128x1xf32>
      %34 = vector.broadcast %33 : vector<128x1xf32> to vector<128x128xf32>
      %35 = arith.subf %27, %34 : vector<128x128xf32>
      %36 = math.exp %35 : vector<128x128xf32>
      %cst_14 = arith.constant 0.000000e+00 : f32
      %37 = vector.broadcast %cst_14 : f32 to vector<128x128xf32>
      %38 = arith.select %13, %36, %37 : vector<128x128xi1>, vector<128x128xf32>
      %39 = arith.subf %30, %33 : vector<128x1xf32>
      %40 = math.exp %39 : vector<128x1xf32>
      %41 = arith.index_cast %c0_i32_4 : i32 to index
      %c0_15 = arith.constant 0 : index
      %c0_16 = arith.constant 0 : index
      %42 = vector.load %arg14[%41, %c0_15, %c0_16] : memref<4x128x1xf32, #tpu.memory_space<vmem>>, vector<1x128x1xf32>
      %43 = vector.shape_cast %42 : vector<1x128x1xf32> to vector<128x1xf32>
      %44 = arith.mulf %40, %43 : vector<128x1xf32>
      %cst_17 = arith.constant dense<0.000000e+00> : vector<128xf32>
      %45 = vector.multi_reduction <add>, %38, %cst_17 [1] : vector<128x128xf32> to vector<128xf32>
      %46 = vector.shape_cast %45 : vector<128xf32> to vector<128x1xf32>
      %47 = arith.addf %44, %46 : vector<128x1xf32>
      %48 = arith.index_cast %c0_i32_4 : i32 to index
      %c0_18 = arith.constant 0 : index
      %c0_19 = arith.constant 0 : index
      %49 = vector.load %arg14[%48, %c0_18, %c0_19] : memref<4x128x1xf32, #tpu.memory_space<vmem>>, vector<1x128x1xf32>
      %50 = vector.shape_cast %49 : vector<1x128x1xf32> to vector<128x1xf32>
      %51 = vector.shape_cast %47 : vector<128x1xf32> to vector<1x128x1xf32>
      tpu.vector_store %arg14[%48, %c0_18, %c0_19], %51 {strides = array<i32>} : memref<4x128x1xf32, #tpu.memory_space<vmem>>, vector<1x128x1xf32>,
      %52 = arith.index_cast %c0_i32_4 : i32 to index
      %c0_20 = arith.constant 0 : index
      %c0_21 = arith.constant 0 : index
      %53 = vector.load %arg15[%52, %c0_20, %c0_21] : memref<4x128x16xf32, #tpu.memory_space<vmem>>, vector<1x128x16xf32>
      %54 = vector.shape_cast %53 : vector<1x128x16xf32> to vector<128x16xf32>
      %55 = vector.broadcast %40 : vector<128x1xf32> to vector<128x16xf32>
      %56 = arith.mulf %55, %54 : vector<128x16xf32>
      %57 = arith.index_cast %c0_i32_4 : i32 to index
      %c0_22 = arith.constant 0 : index
      %c0_23 = arith.constant 0 : index
      %58 = vector.load %arg4[%57, %c0_22, %c0_23] : memref<4x128x16xf32, #tpu.memory_space<vmem>>, vector<1x128x16xf32>
      %59 = vector.shape_cast %58 : vector<1x128x16xf32> to vector<128x16xf32>
      %cst_24 = arith.constant dense<0.000000e+00> : vector<128x16xf32>
      %60 = tpu.matmul %38, %59, %cst_24 {dimension_numbers = #tpu.dot_dimension_numbers<[1], [0], [0], [1], [0, 0, 1, 1], [], []>} : vector<128x128xf32>, vector<128x16xf32>, vector<128x16xf32> -> vector<128x16xf32>
      %61 = arith.addf %56, %60 : vector<128x16xf32>
      %62 = arith.index_cast %c0_i32_4 : i32 to index
      %c0_25 = arith.constant 0 : index
      %c0_26 = arith.constant 0 : index
      %63 = vector.load %arg15[%62, %c0_25, %c0_26] : memref<4x128x16xf32, #tpu.memory_space<vmem>>, vector<1x128x16xf32>
      %64 = vector.shape_cast %63 : vector<1x128x16xf32> to vector<128x16xf32>
      %65 = vector.shape_cast %61 : vector<128x16xf32> to vector<1x128x16xf32>
      tpu.vector_store %arg15[%62, %c0_25, %c0_26], %65 {strides = array<i32>} : memref<4x128x16xf32, #tpu.memory_space<vmem>>, vector<1x128x16xf32>,
      %66 = arith.index_cast %c0_i32_4 : i32 to index
      %c0_27 = arith.constant 0 : index
      %c0_28 = arith.constant 0 : index
      %67 = vector.load %arg13[%66, %c0_27, %c0_28] : memref<4x128x1xf32, #tpu.memory_space<vmem>>, vector<1x128x1xf32>
      %68 = vector.shape_cast %67 : vector<1x128x1xf32> to vector<128x1xf32>
      %69 = vector.shape_cast %33 : vector<128x1xf32> to vector<1x128x1xf32>
      tpu.vector_store %arg13[%66, %c0_27, %c0_28], %69 {strides = array<i32>} : memref<4x128x1xf32, #tpu.memory_space<vmem>>, vector<1x128x1xf32>,
      %c1_i32_29 = arith.constant 1 : i32
      %70 = arith.index_cast %c1_i32_29 : i32 to index
      %c0_30 = arith.constant 0 : index
      %c0_31 = arith.constant 0 : index
      %71 = vector.load %arg6[%70, %c0_30, %c0_31] : memref<4x128x1xf32, #tpu.memory_space<vmem>>, vector<1x128x1xf32>
      %72 = vector.shape_cast %71 : vector<1x128x1xf32> to vector<128x1xf32>
      %73 = arith.index_cast %c1_i32_29 : i32 to index
      %c0_32 = arith.constant 0 : index
      %c0_33 = arith.constant 0 : index
      %74 = vector.load %arg7[%73, %c0_32, %c0_33] : memref<4x1x128xf32, #tpu.memory_space<vmem>>, vector<1x1x128xf32>
      %75 = vector.shape_cast %74 : vector<1x1x128xf32> to vector<1x128xf32>
      %76 = vector.broadcast %72 : vector<128x1xf32> to vector<128x128xf32>
      %77 = vector.broadcast %75 : vector<1x128xf32> to vector<128x128xf32>
      %78 = arith.addf %76, %77 : vector<128x128xf32>
      %cst_34 = arith.constant 2.000000e-01 : f32
      %79 = vector.broadcast %cst_34 : f32 to vector<128x128xf32>
      %80 = arith.mulf %79, %78 : vector<128x128xf32>
      %81 = arith.maximumf %78, %80 : vector<128x128xf32>
      %cst_35 = arith.constant -1.000000e+09 : f32
      %82 = vector.broadcast %cst_35 : f32 to vector<128x128xf32>
      %83 = arith.select %13, %81, %82 : vector<128x128xi1>, vector<128x128xf32>
      %84 = arith.index_cast %c1_i32_29 : i32 to index
      %c0_36 = arith.constant 0 : index
      %c0_37 = arith.constant 0 : index
      %85 = vector.load %arg13[%84, %c0_36, %c0_37] : memref<4x128x1xf32, #tpu.memory_space<vmem>>, vector<1x128x1xf32>
      %86 = vector.shape_cast %85 : vector<1x128x1xf32> to vector<128x1xf32>
      %cst_38 = arith.constant dense<0xFF800000> : vector<128xf32>
      %87 = vector.multi_reduction <maximumf>, %83, %cst_38 [1] : vector<128x128xf32> to vector<128xf32>
      %88 = vector.shape_cast %87 : vector<128xf32> to vector<128x1xf32>
      %89 = arith.maximumf %86, %88 : vector<128x1xf32>
      %90 = vector.broadcast %89 : vector<128x1xf32> to vector<128x128xf32>
      %91 = arith.subf %83, %90 : vector<128x128xf32>
      %92 = math.exp %91 : vector<128x128xf32>
      %cst_39 = arith.constant 0.000000e+00 : f32
      %93 = vector.broadcast %cst_39 : f32 to vector<128x128xf32>
      %94 = arith.select %13, %92, %93 : vector<128x128xi1>, vector<128x128xf32>
      %95 = arith.subf %86, %89 : vector<128x1xf32>
      %96 = math.exp %95 : vector<128x1xf32>
      %97 = arith.index_cast %c1_i32_29 : i32 to index
      %c0_40 = arith.constant 0 : index
      %c0_41 = arith.constant 0 : index
      %98 = vector.load %arg14[%97, %c0_40, %c0_41] : memref<4x128x1xf32, #tpu.memory_space<vmem>>, vector<1x128x1xf32>
      %99 = vector.shape_cast %98 : vector<1x128x1xf32> to vector<128x1xf32>
      %100 = arith.mulf %96, %99 : vector<128x1xf32>
      %cst_42 = arith.constant dense<0.000000e+00> : vector<128xf32>
      %101 = vector.multi_reduction <add>, %94, %cst_42 [1] : vector<128x128xf32> to vector<128xf32>
      %102 = vector.shape_cast %101 : vector<128xf32> to vector<128x1xf32>
      %103 = arith.addf %100, %102 : vector<128x1xf32>
      %104 = arith.index_cast %c1_i32_29 : i32 to index
      %c0_43 = arith.constant 0 : index
      %c0_44 = arith.constant 0 : index
      %105 = vector.load %arg14[%104, %c0_43, %c0_44] : memref<4x128x1xf32, #tpu.memory_space<vmem>>, vector<1x128x1xf32>
      %106 = vector.shape_cast %105 : vector<1x128x1xf32> to vector<128x1xf32>
      %107 = vector.shape_cast %103 : vector<128x1xf32> to vector<1x128x1xf32>
      tpu.vector_store %arg14[%104, %c0_43, %c0_44], %107 {strides = array<i32>} : memref<4x128x1xf32, #tpu.memory_space<vmem>>, vector<1x128x1xf32>,
      %108 = arith.index_cast %c1_i32_29 : i32 to index
      %c0_45 = arith.constant 0 : index
      %c0_46 = arith.constant 0 : index
      %109 = vector.load %arg15[%108, %c0_45, %c0_46] : memref<4x128x16xf32, #tpu.memory_space<vmem>>, vector<1x128x16xf32>
      %110 = vector.shape_cast %109 : vector<1x128x16xf32> to vector<128x16xf32>
      %111 = vector.broadcast %96 : vector<128x1xf32> to vector<128x16xf32>
      %112 = arith.mulf %111, %110 : vector<128x16xf32>
      %113 = arith.index_cast %c1_i32_29 : i32 to index
      %c0_47 = arith.constant 0 : index
      %c0_48 = arith.constant 0 : index
      %114 = vector.load %arg4[%113, %c0_47, %c0_48] : memref<4x128x16xf32, #tpu.memory_space<vmem>>, vector<1x128x16xf32>
      %115 = vector.shape_cast %114 : vector<1x128x16xf32> to vector<128x16xf32>
      %cst_49 = arith.constant dense<0.000000e+00> : vector<128x16xf32>
      %116 = tpu.matmul %94, %115, %cst_49 {dimension_numbers = #tpu.dot_dimension_numbers<[1], [0], [0], [1], [0, 0, 1, 1], [], []>} : vector<128x128xf32>, vector<128x16xf32>, vector<128x16xf32> -> vector<128x16xf32>
      %117 = arith.addf %112, %116 : vector<128x16xf32>
      %118 = arith.index_cast %c1_i32_29 : i32 to index
      %c0_50 = arith.constant 0 : index
      %c0_51 = arith.constant 0 : index
      %119 = vector.load %arg15[%118, %c0_50, %c0_51] : memref<4x128x16xf32, #tpu.memory_space<vmem>>, vector<1x128x16xf32>
      %120 = vector.shape_cast %119 : vector<1x128x16xf32> to vector<128x16xf32>
      %121 = vector.shape_cast %117 : vector<128x16xf32> to vector<1x128x16xf32>
      tpu.vector_store %arg15[%118, %c0_50, %c0_51], %121 {strides = array<i32>} : memref<4x128x16xf32, #tpu.memory_space<vmem>>, vector<1x128x16xf32>,
      %122 = arith.index_cast %c1_i32_29 : i32 to index
      %c0_52 = arith.constant 0 : index
      %c0_53 = arith.constant 0 : index
      %123 = vector.load %arg13[%122, %c0_52, %c0_53] : memref<4x128x1xf32, #tpu.memory_space<vmem>>, vector<1x128x1xf32>
      %124 = vector.shape_cast %123 : vector<1x128x1xf32> to vector<128x1xf32>
      %125 = vector.shape_cast %89 : vector<128x1xf32> to vector<1x128x1xf32>
      tpu.vector_store %arg13[%122, %c0_52, %c0_53], %125 {strides = array<i32>} : memref<4x128x1xf32, #tpu.memory_space<vmem>>, vector<1x128x1xf32>,
      %c2_i32 = arith.constant 2 : i32
      %126 = arith.index_cast %c2_i32 : i32 to index
      %c0_54 = arith.constant 0 : index
      %c0_55 = arith.constant 0 : index
      %127 = vector.load %arg6[%126, %c0_54, %c0_55] : memref<4x128x1xf32, #tpu.memory_space<vmem>>, vector<1x128x1xf32>
      %128 = vector.shape_cast %127 : vector<1x128x1xf32> to vector<128x1xf32>
      %129 = arith.index_cast %c2_i32 : i32 to index
      %c0_56 = arith.constant 0 : index
      %c0_57 = arith.constant 0 : index
      %130 = vector.load %arg7[%129, %c0_56, %c0_57] : memref<4x1x128xf32, #tpu.memory_space<vmem>>, vector<1x1x128xf32>
      %131 = vector.shape_cast %130 : vector<1x1x128xf32> to vector<1x128xf32>
      %132 = vector.broadcast %128 : vector<128x1xf32> to vector<128x128xf32>
      %133 = vector.broadcast %131 : vector<1x128xf32> to vector<128x128xf32>
      %134 = arith.addf %132, %133 : vector<128x128xf32>
      %cst_58 = arith.constant 2.000000e-01 : f32
      %135 = vector.broadcast %cst_58 : f32 to vector<128x128xf32>
      %136 = arith.mulf %135, %134 : vector<128x128xf32>
      %137 = arith.maximumf %134, %136 : vector<128x128xf32>
      %cst_59 = arith.constant -1.000000e+09 : f32
      %138 = vector.broadcast %cst_59 : f32 to vector<128x128xf32>
      %139 = arith.select %13, %137, %138 : vector<128x128xi1>, vector<128x128xf32>
      %140 = arith.index_cast %c2_i32 : i32 to index
      %c0_60 = arith.constant 0 : index
      %c0_61 = arith.constant 0 : index
      %141 = vector.load %arg13[%140, %c0_60, %c0_61] : memref<4x128x1xf32, #tpu.memory_space<vmem>>, vector<1x128x1xf32>
      %142 = vector.shape_cast %141 : vector<1x128x1xf32> to vector<128x1xf32>
      %cst_62 = arith.constant dense<0xFF800000> : vector<128xf32>
      %143 = vector.multi_reduction <maximumf>, %139, %cst_62 [1] : vector<128x128xf32> to vector<128xf32>
      %144 = vector.shape_cast %143 : vector<128xf32> to vector<128x1xf32>
      %145 = arith.maximumf %142, %144 : vector<128x1xf32>
      %146 = vector.broadcast %145 : vector<128x1xf32> to vector<128x128xf32>
      %147 = arith.subf %139, %146 : vector<128x128xf32>
      %148 = math.exp %147 : vector<128x128xf32>
      %cst_63 = arith.constant 0.000000e+00 : f32
      %149 = vector.broadcast %cst_63 : f32 to vector<128x128xf32>
      %150 = arith.select %13, %148, %149 : vector<128x128xi1>, vector<128x128xf32>
      %151 = arith.subf %142, %145 : vector<128x1xf32>
      %152 = math.exp %151 : vector<128x1xf32>
      %153 = arith.index_cast %c2_i32 : i32 to index
      %c0_64 = arith.constant 0 : index
      %c0_65 = arith.constant 0 : index
      %154 = vector.load %arg14[%153, %c0_64, %c0_65] : memref<4x128x1xf32, #tpu.memory_space<vmem>>, vector<1x128x1xf32>
      %155 = vector.shape_cast %154 : vector<1x128x1xf32> to vector<128x1xf32>
      %156 = arith.mulf %152, %155 : vector<128x1xf32>
      %cst_66 = arith.constant dense<0.000000e+00> : vector<128xf32>
      %157 = vector.multi_reduction <add>, %150, %cst_66 [1] : vector<128x128xf32> to vector<128xf32>
      %158 = vector.shape_cast %157 : vector<128xf32> to vector<128x1xf32>
      %159 = arith.addf %156, %158 : vector<128x1xf32>
      %160 = arith.index_cast %c2_i32 : i32 to index
      %c0_67 = arith.constant 0 : index
      %c0_68 = arith.constant 0 : index
      %161 = vector.load %arg14[%160, %c0_67, %c0_68] : memref<4x128x1xf32, #tpu.memory_space<vmem>>, vector<1x128x1xf32>
      %162 = vector.shape_cast %161 : vector<1x128x1xf32> to vector<128x1xf32>
      %163 = vector.shape_cast %159 : vector<128x1xf32> to vector<1x128x1xf32>
      tpu.vector_store %arg14[%160, %c0_67, %c0_68], %163 {strides = array<i32>} : memref<4x128x1xf32, #tpu.memory_space<vmem>>, vector<1x128x1xf32>,
      %164 = arith.index_cast %c2_i32 : i32 to index
      %c0_69 = arith.constant 0 : index
      %c0_70 = arith.constant 0 : index
      %165 = vector.load %arg15[%164, %c0_69, %c0_70] : memref<4x128x16xf32, #tpu.memory_space<vmem>>, vector<1x128x16xf32>
      %166 = vector.shape_cast %165 : vector<1x128x16xf32> to vector<128x16xf32>
      %167 = vector.broadcast %152 : vector<128x1xf32> to vector<128x16xf32>
      %168 = arith.mulf %167, %166 : vector<128x16xf32>
      %169 = arith.index_cast %c2_i32 : i32 to index
      %c0_71 = arith.constant 0 : index
      %c0_72 = arith.constant 0 : index
      %170 = vector.load %arg4[%169, %c0_71, %c0_72] : memref<4x128x16xf32, #tpu.memory_space<vmem>>, vector<1x128x16xf32>
      %171 = vector.shape_cast %170 : vector<1x128x16xf32> to vector<128x16xf32>
      %cst_73 = arith.constant dense<0.000000e+00> : vector<128x16xf32>
      %172 = tpu.matmul %150, %171, %cst_73 {dimension_numbers = #tpu.dot_dimension_numbers<[1], [0], [0], [1], [0, 0, 1, 1], [], []>} : vector<128x128xf32>, vector<128x16xf32>, vector<128x16xf32> -> vector<128x16xf32>
      %173 = arith.addf %168, %172 : vector<128x16xf32>
      %174 = arith.index_cast %c2_i32 : i32 to index
      %c0_74 = arith.constant 0 : index
      %c0_75 = arith.constant 0 : index
      %175 = vector.load %arg15[%174, %c0_74, %c0_75] : memref<4x128x16xf32, #tpu.memory_space<vmem>>, vector<1x128x16xf32>
      %176 = vector.shape_cast %175 : vector<1x128x16xf32> to vector<128x16xf32>
      %177 = vector.shape_cast %173 : vector<128x16xf32> to vector<1x128x16xf32>
      tpu.vector_store %arg15[%174, %c0_74, %c0_75], %177 {strides = array<i32>} : memref<4x128x16xf32, #tpu.memory_space<vmem>>, vector<1x128x16xf32>,
      %178 = arith.index_cast %c2_i32 : i32 to index
      %c0_76 = arith.constant 0 : index
      %c0_77 = arith.constant 0 : index
      %179 = vector.load %arg13[%178, %c0_76, %c0_77] : memref<4x128x1xf32, #tpu.memory_space<vmem>>, vector<1x128x1xf32>
      %180 = vector.shape_cast %179 : vector<1x128x1xf32> to vector<128x1xf32>
      %181 = vector.shape_cast %145 : vector<128x1xf32> to vector<1x128x1xf32>
      tpu.vector_store %arg13[%178, %c0_76, %c0_77], %181 {strides = array<i32>} : memref<4x128x1xf32, #tpu.memory_space<vmem>>, vector<1x128x1xf32>,
      %c3_i32 = arith.constant 3 : i32
      %182 = arith.index_cast %c3_i32 : i32 to index
      %c0_78 = arith.constant 0 : index
      %c0_79 = arith.constant 0 : index
      %183 = vector.load %arg6[%182, %c0_78, %c0_79] : memref<4x128x1xf32, #tpu.memory_space<vmem>>, vector<1x128x1xf32>
      %184 = vector.shape_cast %183 : vector<1x128x1xf32> to vector<128x1xf32>
      %185 = arith.index_cast %c3_i32 : i32 to index
      %c0_80 = arith.constant 0 : index
      %c0_81 = arith.constant 0 : index
      %186 = vector.load %arg7[%185, %c0_80, %c0_81] : memref<4x1x128xf32, #tpu.memory_space<vmem>>, vector<1x1x128xf32>
      %187 = vector.shape_cast %186 : vector<1x1x128xf32> to vector<1x128xf32>
      %188 = vector.broadcast %184 : vector<128x1xf32> to vector<128x128xf32>
      %189 = vector.broadcast %187 : vector<1x128xf32> to vector<128x128xf32>
      %190 = arith.addf %188, %189 : vector<128x128xf32>
      %cst_82 = arith.constant 2.000000e-01 : f32
      %191 = vector.broadcast %cst_82 : f32 to vector<128x128xf32>
      %192 = arith.mulf %191, %190 : vector<128x128xf32>
      %193 = arith.maximumf %190, %192 : vector<128x128xf32>
      %cst_83 = arith.constant -1.000000e+09 : f32
      %194 = vector.broadcast %cst_83 : f32 to vector<128x128xf32>
      %195 = arith.select %13, %193, %194 : vector<128x128xi1>, vector<128x128xf32>
      %196 = arith.index_cast %c3_i32 : i32 to index
      %c0_84 = arith.constant 0 : index
      %c0_85 = arith.constant 0 : index
      %197 = vector.load %arg13[%196, %c0_84, %c0_85] : memref<4x128x1xf32, #tpu.memory_space<vmem>>, vector<1x128x1xf32>
      %198 = vector.shape_cast %197 : vector<1x128x1xf32> to vector<128x1xf32>
      %cst_86 = arith.constant dense<0xFF800000> : vector<128xf32>
      %199 = vector.multi_reduction <maximumf>, %195, %cst_86 [1] : vector<128x128xf32> to vector<128xf32>
      %200 = vector.shape_cast %199 : vector<128xf32> to vector<128x1xf32>
      %201 = arith.maximumf %198, %200 : vector<128x1xf32>
      %202 = vector.broadcast %201 : vector<128x1xf32> to vector<128x128xf32>
      %203 = arith.subf %195, %202 : vector<128x128xf32>
      %204 = math.exp %203 : vector<128x128xf32>
      %cst_87 = arith.constant 0.000000e+00 : f32
      %205 = vector.broadcast %cst_87 : f32 to vector<128x128xf32>
      %206 = arith.select %13, %204, %205 : vector<128x128xi1>, vector<128x128xf32>
      %207 = arith.subf %198, %201 : vector<128x1xf32>
      %208 = math.exp %207 : vector<128x1xf32>
      %209 = arith.index_cast %c3_i32 : i32 to index
      %c0_88 = arith.constant 0 : index
      %c0_89 = arith.constant 0 : index
      %210 = vector.load %arg14[%209, %c0_88, %c0_89] : memref<4x128x1xf32, #tpu.memory_space<vmem>>, vector<1x128x1xf32>
      %211 = vector.shape_cast %210 : vector<1x128x1xf32> to vector<128x1xf32>
      %212 = arith.mulf %208, %211 : vector<128x1xf32>
      %cst_90 = arith.constant dense<0.000000e+00> : vector<128xf32>
      %213 = vector.multi_reduction <add>, %206, %cst_90 [1] : vector<128x128xf32> to vector<128xf32>
      %214 = vector.shape_cast %213 : vector<128xf32> to vector<128x1xf32>
      %215 = arith.addf %212, %214 : vector<128x1xf32>
      %216 = arith.index_cast %c3_i32 : i32 to index
      %c0_91 = arith.constant 0 : index
      %c0_92 = arith.constant 0 : index
      %217 = vector.load %arg14[%216, %c0_91, %c0_92] : memref<4x128x1xf32, #tpu.memory_space<vmem>>, vector<1x128x1xf32>
      %218 = vector.shape_cast %217 : vector<1x128x1xf32> to vector<128x1xf32>
      %219 = vector.shape_cast %215 : vector<128x1xf32> to vector<1x128x1xf32>
      tpu.vector_store %arg14[%216, %c0_91, %c0_92], %219 {strides = array<i32>} : memref<4x128x1xf32, #tpu.memory_space<vmem>>, vector<1x128x1xf32>,
      %220 = arith.index_cast %c3_i32 : i32 to index
      %c0_93 = arith.constant 0 : index
      %c0_94 = arith.constant 0 : index
      %221 = vector.load %arg15[%220, %c0_93, %c0_94] : memref<4x128x16xf32, #tpu.memory_space<vmem>>, vector<1x128x16xf32>
      %222 = vector.shape_cast %221 : vector<1x128x16xf32> to vector<128x16xf32>
      %223 = vector.broadcast %208 : vector<128x1xf32> to vector<128x16xf32>
      %224 = arith.mulf %223, %222 : vector<128x16xf32>
      %225 = arith.index_cast %c3_i32 : i32 to index
      %c0_95 = arith.constant 0 : index
      %c0_96 = arith.constant 0 : index
      %226 = vector.load %arg4[%225, %c0_95, %c0_96] : memref<4x128x16xf32, #tpu.memory_space<vmem>>, vector<1x128x16xf32>
      %227 = vector.shape_cast %226 : vector<1x128x16xf32> to vector<128x16xf32>
      %cst_97 = arith.constant dense<0.000000e+00> : vector<128x16xf32>
      %228 = tpu.matmul %206, %227, %cst_97 {dimension_numbers = #tpu.dot_dimension_numbers<[1], [0], [0], [1], [0, 0, 1, 1], [], []>} : vector<128x128xf32>, vector<128x16xf32>, vector<128x16xf32> -> vector<128x16xf32>
      %229 = arith.addf %224, %228 : vector<128x16xf32>
      %230 = arith.index_cast %c3_i32 : i32 to index
      %c0_98 = arith.constant 0 : index
      %c0_99 = arith.constant 0 : index
      %231 = vector.load %arg15[%230, %c0_98, %c0_99] : memref<4x128x16xf32, #tpu.memory_space<vmem>>, vector<1x128x16xf32>
      %232 = vector.shape_cast %231 : vector<1x128x16xf32> to vector<128x16xf32>
      %233 = vector.shape_cast %229 : vector<128x16xf32> to vector<1x128x16xf32>
      tpu.vector_store %arg15[%230, %c0_98, %c0_99], %233 {strides = array<i32>} : memref<4x128x16xf32, #tpu.memory_space<vmem>>, vector<1x128x16xf32>,
      %234 = arith.index_cast %c3_i32 : i32 to index
      %c0_100 = arith.constant 0 : index
      %c0_101 = arith.constant 0 : index
      %235 = vector.load %arg13[%234, %c0_100, %c0_101] : memref<4x128x1xf32, #tpu.memory_space<vmem>>, vector<1x128x1xf32>
      %236 = vector.shape_cast %235 : vector<1x128x1xf32> to vector<128x1xf32>
      %237 = vector.shape_cast %201 : vector<128x1xf32> to vector<1x128x1xf32>
      tpu.vector_store %arg13[%234, %c0_100, %c0_101], %237 {strides = array<i32>} : memref<4x128x1xf32, #tpu.memory_space<vmem>>, vector<1x128x1xf32>,
      %c4_i32 = arith.constant 4 : i32
    } else {
    }
    %c1_i32 = arith.constant 1 : i32
    %8 = arith.cmpi eq, %arg1, %c1_i32 : i32
    %9 = arith.extui %8 : i1 to i32
    %c0_i32_2 = arith.constant 0 : i32
    %10 = arith.cmpi ne, %9, %c0_i32_2 : i32
    scf.if %10 {
      %cst = arith.constant 0.000000e+00 : f32
      %11 = vector.broadcast %cst : f32 to vector<128x16xf32>
      %c0_i32_3 = arith.constant 0 : i32
      %12 = arith.index_cast %c0_i32_3 : i32 to index
      %c0 = arith.constant 0 : index
      %c0_4 = arith.constant 0 : index
      %13 = vector.load %arg14[%12, %c0, %c0_4] : memref<4x128x1xf32, #tpu.memory_space<vmem>>, vector<1x128x1xf32>
      %14 = vector.shape_cast %13 : vector<1x128x1xf32> to vector<128x1xf32>
      %cst_5 = arith.constant 0.000000e+00 : f32
      %15 = vector.broadcast %cst_5 : f32 to vector<128x1xf32>
      %16 = arith.cmpf ogt, %14, %15 : vector<128x1xf32>
      %cst_6 = arith.constant 1.000000e+00 : f32
      %17 = vector.broadcast %cst_6 : f32 to vector<128x1xf32>
      %18 = arith.select %16, %14, %17 : vector<128x1xi1>, vector<128x1xf32>
      %cst_7 = arith.constant 1.000000e+00 : f32
      %19 = vector.broadcast %cst_7 : f32 to vector<128x1xf32>
      %20 = arith.divf %19, %18 : vector<128x1xf32>
      %21 = arith.index_cast %c0_i32_3 : i32 to index
      %c0_8 = arith.constant 0 : index
      %c0_9 = arith.constant 0 : index
      %22 = vector.load %arg15[%21, %c0_8, %c0_9] : memref<4x128x16xf32, #tpu.memory_space<vmem>>, vector<1x128x16xf32>
      %23 = vector.shape_cast %22 : vector<1x128x16xf32> to vector<128x16xf32>
      %24 = vector.broadcast %20 : vector<128x1xf32> to vector<128x16xf32>
      %25 = arith.mulf %23, %24 : vector<128x16xf32>
      %26 = arith.addf %11, %25 : vector<128x16xf32>
      %c1_i32_10 = arith.constant 1 : i32
      %27 = arith.index_cast %c1_i32_10 : i32 to index
      %c0_11 = arith.constant 0 : index
      %c0_12 = arith.constant 0 : index
      %28 = vector.load %arg14[%27, %c0_11, %c0_12] : memref<4x128x1xf32, #tpu.memory_space<vmem>>, vector<1x128x1xf32>
      %29 = vector.shape_cast %28 : vector<1x128x1xf32> to vector<128x1xf32>
      %cst_13 = arith.constant 0.000000e+00 : f32
      %30 = vector.broadcast %cst_13 : f32 to vector<128x1xf32>
      %31 = arith.cmpf ogt, %29, %30 : vector<128x1xf32>
      %cst_14 = arith.constant 1.000000e+00 : f32
      %32 = vector.broadcast %cst_14 : f32 to vector<128x1xf32>
      %33 = arith.select %31, %29, %32 : vector<128x1xi1>, vector<128x1xf32>
      %cst_15 = arith.constant 1.000000e+00 : f32
      %34 = vector.broadcast %cst_15 : f32 to vector<128x1xf32>
      %35 = arith.divf %34, %33 : vector<128x1xf32>
      %36 = arith.index_cast %c1_i32_10 : i32 to index
      %c0_16 = arith.constant 0 : index
      %c0_17 = arith.constant 0 : index
      %37 = vector.load %arg15[%36, %c0_16, %c0_17] : memref<4x128x16xf32, #tpu.memory_space<vmem>>, vector<1x128x16xf32>
      %38 = vector.shape_cast %37 : vector<1x128x16xf32> to vector<128x16xf32>
      %39 = vector.broadcast %35 : vector<128x1xf32> to vector<128x16xf32>
      %40 = arith.mulf %38, %39 : vector<128x16xf32>
      %41 = arith.addf %26, %40 : vector<128x16xf32>
      %c2_i32 = arith.constant 2 : i32
      %42 = arith.index_cast %c2_i32 : i32 to index
      %c0_18 = arith.constant 0 : index
      %c0_19 = arith.constant 0 : index
      %43 = vector.load %arg14[%42, %c0_18, %c0_19] : memref<4x128x1xf32, #tpu.memory_space<vmem>>, vector<1x128x1xf32>
      %44 = vector.shape_cast %43 : vector<1x128x1xf32> to vector<128x1xf32>
      %cst_20 = arith.constant 0.000000e+00 : f32
      %45 = vector.broadcast %cst_20 : f32 to vector<128x1xf32>
      %46 = arith.cmpf ogt, %44, %45 : vector<128x1xf32>
      %cst_21 = arith.constant 1.000000e+00 : f32
      %47 = vector.broadcast %cst_21 : f32 to vector<128x1xf32>
      %48 = arith.select %46, %44, %47 : vector<128x1xi1>, vector<128x1xf32>
      %cst_22 = arith.constant 1.000000e+00 : f32
      %49 = vector.broadcast %cst_22 : f32 to vector<128x1xf32>
      %50 = arith.divf %49, %48 : vector<128x1xf32>
      %51 = arith.index_cast %c2_i32 : i32 to index
      %c0_23 = arith.constant 0 : index
      %c0_24 = arith.constant 0 : index
      %52 = vector.load %arg15[%51, %c0_23, %c0_24] : memref<4x128x16xf32, #tpu.memory_space<vmem>>, vector<1x128x16xf32>
      %53 = vector.shape_cast %52 : vector<1x128x16xf32> to vector<128x16xf32>
      %54 = vector.broadcast %50 : vector<128x1xf32> to vector<128x16xf32>
      %55 = arith.mulf %53, %54 : vector<128x16xf32>
      %56 = arith.addf %41, %55 : vector<128x16xf32>
      %c3_i32 = arith.constant 3 : i32
      %57 = arith.index_cast %c3_i32 : i32 to index
      %c0_25 = arith.constant 0 : index
      %c0_26 = arith.constant 0 : index
      %58 = vector.load %arg14[%57, %c0_25, %c0_26] : memref<4x128x1xf32, #tpu.memory_space<vmem>>, vector<1x128x1xf32>
      %59 = vector.shape_cast %58 : vector<1x128x1xf32> to vector<128x1xf32>
      %cst_27 = arith.constant 0.000000e+00 : f32
      %60 = vector.broadcast %cst_27 : f32 to vector<128x1xf32>
      %61 = arith.cmpf ogt, %59, %60 : vector<128x1xf32>
      %cst_28 = arith.constant 1.000000e+00 : f32
      %62 = vector.broadcast %cst_28 : f32 to vector<128x1xf32>
      %63 = arith.select %61, %59, %62 : vector<128x1xi1>, vector<128x1xf32>
      %cst_29 = arith.constant 1.000000e+00 : f32
      %64 = vector.broadcast %cst_29 : f32 to vector<128x1xf32>
      %65 = arith.divf %64, %63 : vector<128x1xf32>
      %66 = arith.index_cast %c3_i32 : i32 to index
      %c0_30 = arith.constant 0 : index
      %c0_31 = arith.constant 0 : index
      %67 = vector.load %arg15[%66, %c0_30, %c0_31] : memref<4x128x16xf32, #tpu.memory_space<vmem>>, vector<1x128x16xf32>
      %68 = vector.shape_cast %67 : vector<1x128x16xf32> to vector<128x16xf32>
      %69 = vector.broadcast %65 : vector<128x1xf32> to vector<128x16xf32>
      %70 = arith.mulf %68, %69 : vector<128x16xf32>
      %71 = arith.addf %56, %70 : vector<128x16xf32>
      %c4_i32 = arith.constant 4 : i32
      %cst_32 = arith.constant 2.500000e-01 : f32
      %72 = vector.broadcast %cst_32 : f32 to vector<128x16xf32>
      %73 = arith.mulf %71, %72 : vector<128x16xf32>
      %c0_33 = arith.constant 0 : index
      %c0_34 = arith.constant 0 : index
      %74 = vector.load %arg9[%c0_33, %c0_34] : memref<1x16xf32, #tpu.memory_space<vmem>>, vector<1x16xf32>
      %75 = vector.broadcast %74 : vector<1x16xf32> to vector<128x16xf32>
      %76 = arith.addf %73, %75 : vector<128x16xf32>
      %cst_35 = arith.constant dense<0.000000e+00> : vector<128xf32>
      %77 = vector.multi_reduction <add>, %76, %cst_35 [1] : vector<128x16xf32> to vector<128xf32>
      %78 = vector.shape_cast %77 : vector<128xf32> to vector<128x1xf32>
      %cst_36 = arith.constant 1.600000e+01 : f32
      %79 = vector.broadcast %cst_36 : f32 to vector<128x1xf32>
      %80 = arith.divf %78, %79 : vector<128x1xf32>
      %81 = vector.broadcast %80 : vector<128x1xf32> to vector<128x16xf32>
      %82 = arith.subf %76, %81 : vector<128x16xf32>
      %83 = arith.mulf %82, %82 : vector<128x16xf32>
      %cst_37 = arith.constant dense<0.000000e+00> : vector<128xf32>
      %84 = vector.multi_reduction <add>, %83, %cst_37 [1] : vector<128x16xf32> to vector<128xf32>
      %85 = vector.shape_cast %84 : vector<128xf32> to vector<128x1xf32>
      %cst_38 = arith.constant 1.600000e+01 : f32
      %86 = vector.broadcast %cst_38 : f32 to vector<128x1xf32>
      %87 = arith.divf %85, %86 : vector<128x1xf32>
      %88 = vector.broadcast %80 : vector<128x1xf32> to vector<128x16xf32>
      %89 = arith.subf %76, %88 : vector<128x16xf32>
      %cst_39 = arith.constant 9.99999974E-6 : f32
      %90 = vector.broadcast %cst_39 : f32 to vector<128x1xf32>
      %91 = arith.addf %87, %90 : vector<128x1xf32>
      %92 = math.rsqrt %91 : vector<128x1xf32>
      %93 = vector.broadcast %92 : vector<128x1xf32> to vector<128x16xf32>
      %94 = arith.mulf %89, %93 : vector<128x16xf32>
      %c0_40 = arith.constant 0 : index
      %c0_41 = arith.constant 0 : index
      %95 = vector.load %arg10[%c0_40, %c0_41] : memref<1x16xf32, #tpu.memory_space<vmem>>, vector<1x16xf32>
      %96 = vector.broadcast %95 : vector<1x16xf32> to vector<128x16xf32>
      %97 = arith.mulf %94, %96 : vector<128x16xf32>
      %c0_42 = arith.constant 0 : index
      %c0_43 = arith.constant 0 : index
      %98 = vector.load %arg11[%c0_42, %c0_43] : memref<1x16xf32, #tpu.memory_space<vmem>>, vector<1x16xf32>
      %99 = vector.broadcast %98 : vector<1x16xf32> to vector<128x16xf32>
      %100 = arith.addf %97, %99 : vector<128x16xf32>
      %c0_44 = arith.constant 0 : index
      %c0_45 = arith.constant 0 : index
      %101 = vector.load %arg8[%c0_44, %c0_45] : memref<128x16xf32, #tpu.memory_space<vmem>>, vector<128x16xf32>
      %102 = arith.addf %100, %101 : vector<128x16xf32>
      %103 = tpu.iota {dimensions = array<i32: 0>} : vector<16x16xi32>
      %104 = tpu.iota {dimensions = array<i32: 1>} : vector<16x16xi32>
      %105 = arith.cmpi eq, %103, %104 : vector<16x16xi32>
      %106 = arith.extui %105 : vector<16x16xi1> to vector<16x16xi32>
      %107 = arith.sitofp %106 : vector<16x16xi32> to vector<16x16xf32>
      %cst_46 = arith.constant dense<0.000000e+00> : vector<16x128xf32>
      %108 = tpu.matmul %107, %102, %cst_46 {dimension_numbers = #tpu.dot_dimension_numbers<[1], [1], [0], [0], [0, 0, 1, 0], [], []>} : vector<16x16xf32>, vector<128x16xf32>, vector<16x128xf32> -> vector<16x128xf32>
      %c0_47 = arith.constant 0 : index
      %c0_48 = arith.constant 0 : index
      %109 = vector.load %arg12[%c0_47, %c0_48] : memref<16x128xf32, #tpu.memory_space<vmem>>, vector<16x128xf32>
      tpu.vector_store %arg12[%c0_47, %c0_48], %108 {strides = array<i32>} : memref<16x128xf32, #tpu.memory_space<vmem>>, vector<16x128xf32>,
    } else {
    }
    return
  }
  func.func @transform_0(%arg0: i32, %arg1: i32, %arg2: memref<4xi32, #tpu.memory_space<smem>>, %arg3: memref<8xi32, #tpu.memory_space<smem>>) -> (i32, i32, i32) {
    %c2_i32 = arith.constant 2 : i32
    %0 = arith.muli %arg0, %c2_i32 : i32
    %1 = arith.addi %0, %arg1 : i32
    %2 = arith.index_cast %1 : i32 to index
    %3 = memref.load %arg3[%2] : memref<8xi32, #tpu.memory_space<smem>>
    %c0_i32 = arith.constant 0 : i32
    %c0_i32_0 = arith.constant 0 : i32
    %c0_i32_1 = arith.constant 0 : i32
    return %c0_i32, %3, %c0_i32_0 : i32, i32, i32
  }
  func.func @transform_1(%arg0: i32, %arg1: i32, %arg2: memref<4xi32, #tpu.memory_space<smem>>, %arg3: memref<8xi32, #tpu.memory_space<smem>>) -> (i32, i32) {
    %c2_i32 = arith.constant 2 : i32
    %0 = arith.muli %arg0, %c2_i32 : i32
    %1 = arith.addi %0, %arg1 : i32
    %2 = arith.index_cast %1 : i32 to index
    %3 = memref.load %arg3[%2] : memref<8xi32, #tpu.memory_space<smem>>
    %c0_i32 = arith.constant 0 : i32
    return %arg0, %3 : i32, i32
  }
  func.func @transform_2(%arg0: i32, %arg1: i32, %arg2: memref<4xi32, #tpu.memory_space<smem>>, %arg3: memref<8xi32, #tpu.memory_space<smem>>) -> (i32, i32, i32) {
    %c0_i32 = arith.constant 0 : i32
    %c0_i32_0 = arith.constant 0 : i32
    %c0_i32_1 = arith.constant 0 : i32
    return %c0_i32, %arg0, %c0_i32_0 : i32, i32, i32
  }
  func.func @transform_3(%arg0: i32, %arg1: i32, %arg2: memref<4xi32, #tpu.memory_space<smem>>, %arg3: memref<8xi32, #tpu.memory_space<smem>>) -> (i32, i32, i32) {
    %c2_i32 = arith.constant 2 : i32
    %0 = arith.muli %arg0, %c2_i32 : i32
    %1 = arith.addi %0, %arg1 : i32
    %2 = arith.index_cast %1 : i32 to index
    %3 = memref.load %arg3[%2] : memref<8xi32, #tpu.memory_space<smem>>
    %c0_i32 = arith.constant 0 : i32
    %c0_i32_0 = arith.constant 0 : i32
    %c0_i32_1 = arith.constant 0 : i32
    return %c0_i32, %c0_i32_0, %3 : i32, i32, i32
  }
  func.func @transform_4(%arg0: i32, %arg1: i32, %arg2: memref<4xi32, #tpu.memory_space<smem>>, %arg3: memref<8xi32, #tpu.memory_space<smem>>) -> (i32, i32) {
    %c0_i32 = arith.constant 0 : i32
    %c0_i32_0 = arith.constant 0 : i32
    return %arg0, %c0_i32 : i32, i32
  }
  func.func @transform_5(%arg0: i32, %arg1: i32, %arg2: memref<4xi32, #tpu.memory_space<smem>>, %arg3: memref<8xi32, #tpu.memory_space<smem>>) -> (i32, i32) {
    %c0_i32 = arith.constant 0 : i32
    %c0_i32_0 = arith.constant 0 : i32
    %c0_i32_1 = arith.constant 0 : i32
    return %c0_i32, %c0_i32_0 : i32, i32
  }
  func.func @transform_6(%arg0: i32, %arg1: i32, %arg2: memref<4xi32, #tpu.memory_space<smem>>, %arg3: memref<8xi32, #tpu.memory_space<smem>>) -> (i32, i32) {
    %c0_i32 = arith.constant 0 : i32
    %c0_i32_0 = arith.constant 0 : i32
    %c0_i32_1 = arith.constant 0 : i32
    return %c0_i32, %c0_i32_0 : i32, i32
  }
  func.func @transform_7(%arg0: i32, %arg1: i32, %arg2: memref<4xi32, #tpu.memory_space<smem>>, %arg3: memref<8xi32, #tpu.memory_space<smem>>) -> (i32, i32) {
    %c0_i32 = arith.constant 0 : i32
    %c0_i32_0 = arith.constant 0 : i32
    %c0_i32_1 = arith.constant 0 : i32
    return %c0_i32, %c0_i32_0 : i32, i32
  }
  func.func @transform_8(%arg0: i32, %arg1: i32, %arg2: memref<4xi32, #tpu.memory_space<smem>>, %arg3: memref<8xi32, #tpu.memory_space<smem>>) -> (i32, i32) {
    %c0_i32 = arith.constant 0 : i32
    %c0_i32_0 = arith.constant 0 : i32
    return %c0_i32, %arg0 : i32, i32
  }
}

</mosaic_0001>

<bundles_post_ra>
// kernel: tpu_custom_call.1
= control target key start
LH: loop header
LB: loop body
LE: loop exit
PB: predicated region body
PF: predicated region fallthrough
CT: control target
= control target key end

     0   :  { %s11125_s0 = inlined_call_operand.vmem [shape: s32[4], index: 0, kind: input, shape index: {}]   ;;  %s11126_s2 = inlined_call_operand.vmem [shape: f32[4,512,16], index: 2, kind: input, shape index: {}]   ;;  %s11127_s3 = inlined_call_operand.vmem [shape: f32[512,512], index: 3, kind: input, shape index: {}]   ;;  %s11128_s4 = inlined_call_operand.vmem [shape: f32[4,512,1], index: 4, kind: input, shape index: {}]   ;;  %s11129_s5 = inlined_call_operand.vmem [shape: f32[4,1,512], index: 5, kind: input, shape index: {}]   ;;  %s11130_s6 = inlined_call_operand.vmem [shape: f32[512,16], index: 6, kind: input, shape index: {}]   ;;  %s11131_s7 = inlined_call_operand.vmem [shape: f32[1,16], index: 7, kind: input, shape index: {}]   ;;  %s11132_s8 = inlined_call_operand.vmem [shape: f32[1,16], index: 8, kind: input, shape index: {}]   ;;  %s11133_s9 = inlined_call_operand.vmem [shape: f32[1,16], index: 9, kind: input, shape index: {}]   ;;  %s11134_s10 = inlined_call_operand.hbm [shape: f32[16,512], index: 10, kind: output, shape index: {}]   ;;  %s11135_s1 = inlined_call_operand.vmem [shape: s32[8], index: 1, kind: input, shape index: {}]  }
   0x1   :  { %11262 = sst [smem:[#allocation85_spill]] %s11126_s2  ;;  %s15_s15 = sshll.u32 %s11125_s0, 4  ;;  %s16_s15 = int_to_ptr.vmem [resolvable:$true] %s15_s15 }
   0x2   :  { %11263 = sst [smem:[#allocation86_spill]] %s11127_s3  ;;  %s19_s18 = sshll.u32 %s11135_s1, 4  ;;  %s20_s18 = int_to_ptr.vmem [resolvable:$true] %s19_s18 }
   0x3   :  { %11264 = sst [smem:[#allocation87_spill]] %s11128_s4  ;;  %s7442_s19 = scalar_lea.vmem %s16_s15, 16 }
   0x4   :  { %11265 = sst [smem:[#allocation88_spill]] %s11129_s5  ;;  %p7443_p0 = scmp.ne.s32.totalorder %s16_s15, %s7442_s19 }
   0x5   :  { %11266 = sst [smem:[#allocation89_spill]] %s11130_s6  ;;  %p7447_p1 = scmp.lt.s32.totalorder %s16_s15, %s16_s15 }
   0x6   :  { %11267 = sst [smem:[#allocation90_spill]] %s11131_s7  ;;  %p7448_p2 = scmp.lt.s32.totalorder %s7442_s19, %s7442_s19 }
   0x7   :  { %11268 = sst [smem:[#allocation91_spill]] %s11132_s8 }
   0x8   :  { %11269 = sst [smem:[#allocation92_spill]] %s11133_s9  ;;  %p7449_p3 = por %p7448_p2, %p7447_p1 }
   0x9   :  { %11270 = sst [smem:[#allocation93_spill]] %s11134_s10 }
   0xa   :  { %p7450_p4 = pnand %p7449_p3, %p7443_p0 }
   0xc   :  { %7453 = shalt.err (!%p7450_p4)  }
   0xd   :  { %s7610_s20 = smov [#allocation6]   ;;  %s7454_s21 = scalar_lea.vmem %s20_s18, 16 }
   0xe   :  { %18 = dma.vmem_to_smem %s16_s15, 16, %s7610_s20, [#allocation5] }
   0xf   :  { %p7455_p5 = scmp.ne.s32.totalorder %s20_s18, %s7454_s21  ;;  %p7459_p6 = scmp.lt.s32.totalorder %s20_s18, %s20_s18 }
  0x10   :  { %p7460_p7 = scmp.lt.s32.totalorder %s7454_s21, %s7454_s21 }
  0x12   :  { %p7461_p8 = por %p7460_p7, %p7459_p6 }
  0x14   :  { %p7462_p9 = pnand %p7461_p8, %p7455_p5 }
  0x16   :  { %7465 = shalt.err (!%p7462_p9)  }
  0x17   :  { %s7611_s0 = smov [#allocation7]  }
  0x18   :  { %22 = dma.vmem_to_smem %s20_s18, 16, %s7611_s0, [#allocation5] }
  0x19   :  { %7548 = dma.done.wait [#allocation5], 32 }
  0x1a   :  { %7549 = vsyncadd [#allocation5], 4294967264 }
  0x1b   :  { %24 = sfence }
  0x1c   :  { %25 = vsyncpa [#allocation13], 0 }
  0x1d   :  { %27 = vsyncpa [#allocation13 + $0x1], 0  ;;  %s7682_s1 = smov 0   ;;  %s7684_s22 = smov 0  }
  0x1e   :  { %s7686_s23 = smov 0   ;;  %s7688_s24 = smov 0  }
  0x1f   :  { %s7690_s25 = smov 0   ;;  %s7692_s26 = smov 0  }
  0x20   :  { %s7694_s27 = smov 0   ;;  %s7696_s28 = smov 0  }
  0x21   :  { %s7698_s29 = smov 0   ;;  %s7700_s30 = smov 0  }
  0x22   :  { %s7702_s11 = smov 0   ;;  %s7704_s12 = smov 0  }
  0x23   :  { %s7706_s13 = smov 0   ;;  %s7708_s14 = smov 0  }
  0x24 LB: > { %11271 = sst [smem:[#allocation16_spill]] %s7560_s22  ;;  %s42_s17 = sadd.s32 1, %s7600_s12  ;;  %s7608_s14 = sphi %s7708_s14, %s33_s14   ;;  %s7604_s13 = sphi %s7706_s13, %s11714_s13   ;;  %s7600_s12 = sphi %s7704_s12, %s11726_s12   ;;  %s7596_s11 = sphi %s7702_s11, %s11712_s11   ;;  %s7592_s30 = sphi %s7700_s30, %s11725_s30   ;;  %s7588_s29 = sphi %s7698_s29, %s11724_s29   ;;  %s7584_s28 = sphi %s7696_s28, %s11723_s28   ;;  %s7580_s27 = sphi %s7694_s27, %s11722_s27   ;;  %s7576_s26 = sphi %s7692_s26, %s11721_s26   ;;  %s7572_s25 = sphi %s7690_s25, %s11720_s25   ;;  %s7568_s24 = sphi %s7688_s24, %s11719_s24   ;;  %s7564_s23 = sphi %s7686_s23, %s11718_s23   ;;  %s7560_s22 = sphi %s7684_s22, %s11717_s22   ;;  %s7556_s1 = sphi %s7682_s1, %s11716_s1  }
  0x25   : > { %11272 = sst [smem:[#allocation17_spill]] %s7576_s26  ;;  %s45_s18 = sadd.s32 1, %s7604_s13 }
  0x26   : > { %11273 = sst [smem:[#allocation18_spill]] %s7584_s28  ;;  %p43_p10 = scmp.ge.s32.totalorder %s42_s17, 2 }
  0x27   : > { %11274 = sst [smem:[#allocation19_spill]] %s7592_s30  ;;  %s6258_s19 = sshll.u32 %s7604_s13, 1 }
  0x28   : > { %11275 = sst [smem:[#allocation20_spill]] %s7596_s11  ;;  %s7758_s20 = sadd.s32 %s7600_s12, %s6258_s19 }
  0x29   : > { %11276 = sst [smem:[#allocation21_spill]] %s7600_s12  ;;  %s11728_s17 = smov (%p43_p10, %s42_s17), 0 }
  0x2a   : > { %11277 = sst [smem:[#allocation22_spill]] %s7604_s13  ;;  %s11730_s18 = smov (!%p43_p10, %s45_s18), %s7604_s13 }
  0x2b   : > { %11278 = sst [smem:[#allocation23_spill]] %s11728_s17  ;;  %p65_p11 = scmp.ne.s32.totalorder %s7588_s29, %s7584_s28 }
  0x2c   : > { %s51_s0 = sld [smem:[#allocation7 + %s7758_s20]]  ;;  %p47_p12 = scmp.ge.s32.totalorder %s11730_s18, 4 }
  0x2d   : > { %p66_p13 = scmp.eq.s32.totalorder %s7608_s14, 0  ;;  %s83_s16 = sld [smem:[#allocation7 + %s7758_s20]] }
  0x2e   : > { %s11732_s18 = smov (%p47_p12, %s11730_s18), 0  ;;  %p99_p1 = scmp.ne.s32.totalorder %s7580_s27, %s7576_s26 }
  0x2f   : > { %11279 = sst [smem:[#allocation24_spill]] %s11732_s18  ;;  %p7774_p0 = por %p66_p13, %p65_p11 }
  0x30   : > { %s6259_s15 = sshll.u32 %s11732_s18, 1  ;;  %s87_s12 = ssub.s32 %s7604_s13, %s11732_s18 }
  0x31   : > { %s53_s19 = sadd.s32 %s6259_s15, %s11728_s17  ;;  %p7786_p2 = por %p99_p1, %p66_p13 }
  0x32   : > { %s54_s9 = sld [smem:[#allocation7 + %s53_s19]]  ;;  %p116_p3 = scmp.eq.s32.totalorder %s87_s12, 0 }
  0x33   : > { %s86_s8 = sld [smem:[#allocation7 + %s53_s19]]  ;;  %s118_s7 = sadd.s32 1, %s7572_s25 }
  0x34   : > { %s7792_s30 = scalar_select %p116_p3, %s7572_s25, %s118_s7  }
  0x35   : > { %p125_p4 = scmp.ne.s32.totalorder %s7572_s25, %s7568_s24  ;;  %s143_s6 = sld [smem:[#allocation7 + %s7758_s20]] }
  0x36   : > { %11282 = sst [smem:[#allocation25_spill]] %s7792_s30  ;;  %s150_s18 = sadd.s32 1, %s7564_s23 }
  0x37   : > { %s146_s15 = sld [smem:[#allocation7 + %s53_s19]]  ;;  %p7803_p5 = por %p125_p4, %p66_p13 }
  0x38   : > { %p157_p6 = scmp.ne.s32.totalorder %s7564_s23, %s7560_s22  ;;  %s55_s7 = ssub.s32 %s51_s0, %s54_s9 }
  0x39   : > { %s11284_s30 = sadd.s32 4294967295, %s7608_s14   ;;  %p56_p8 = scmp.eq.s32.totalorder %s55_s7, 0 }
  0x3a   : > { %p276_p7 = scmp.eq.s32.totalorder %s11284_s30, 7  ;;  %s88_s11 = ssub.s32 %s83_s16, %s86_s8 }
  0x3b   : > { %s89_s26 = sor.u32 %s88_s11, %s87_s12  ;;  %p7813_p9 = por %p157_p6, %p66_p13 }
  0x3c   : > { %s11286_s28 = sadd.s32 1, %s7588_s29  ;;  %p90_p10 = scmp.eq.s32.totalorder %s89_s26, 0 }
  0x3d   : > { %s7820_s5 = scalar_select %p56_p8, %s7588_s29, %s11286_s28  }
  0x3e   : > { %s147_s4 = ssub.s32 %s143_s6, %s146_s15  ;;  %p7825_p12 = por %p276_p7, %p125_p4 }
  0x3f   : > { %p148_p11 = scmp.eq.s32.totalorder %s147_s4, 0  ;;  %s11288_s9 = sadd.s32 1, %s7580_s27 }
  0x40   : > { %s7832_s30 = scalar_select %p90_p10, %s7580_s27, %s11288_s9  }
  0x41   : > { %s7835_s8 = scalar_select %p148_p11, %s7564_s23, %s150_s18  }
  0x42   : > { %p281_p13 = scmp.ne.s32.totalorder %s7568_s24, %s7556_s1  ;;  %s11289_s11 = sadd.s32 4294967294, %s7608_s14  }
  0x43   : > { %p282_p1 = scmp.eq.s32.totalorder %s11289_s11, 7  ;;  %p6265_p6 = scmp.ge.s32.totalorder %s7608_s14, 8 }
  0x45   : > { %p7841_p3 = por %p282_p1, %p281_p13  ;;  %307 = sbr.rel (%p6265_p6) target bundleno = 196 (0xc4), region = 28 }
  0x4a   : > { %310 = sbr.rel (!%p7774_p0) target bundleno = 116 (0x74), region = 32  ;;  %s312_s4 = sand.u32 (%p7774_p0), 1, %s7588_s29  }
  0x4b   : > { %s317_s6 = sld [smem:[#allocation7 + %s7758_s20]] (%p7774_p0)  ;;  %s6266_s26 = sshll.u32 (%p7774_p0), %s312_s4, 9 }
  0x4c   : > { %s11291_s2 = sld [smem:[#allocation85_spill]] (%p7774_p0)  ;;  %s7858_s21 = scalar_lea.vmem (%p7774_p0), [#allocation8], %s6266_s26 }
  0x51   : > { %s6485_s28 = sshll.u32 %s317_s6, 7 }
  0x52   : > { %s7853_s0 = scalar_lea.vmem %s11291_s2, %s6485_s28 }
  0x53   : > { %v475_v0 = vld [vmem:[%s7853_s0] sm:$0xff]  ;;  %v477_v1 = vld [vmem:[%s7853_s0 + $0x8] sm:$0xff]  ;;  %v479_v2 = vld [vmem:[%s7853_s0 + $0x10] sm:$0xff] }
  0x54   : > { %476 = vst [vmem:[%s7858_s21] sm:$0xff] %v475_v0  ;;  %478 = vst [vmem:[%s7858_s21 + $0x8] sm:$0xff] %v477_v1  ;;  %v481_v3 = vld [vmem:[%s7853_s0 + $0x18] sm:$0xff]  ;;  %v483_v4 = vld [vmem:[%s7853_s0 + $0x20] sm:$0xff] }
  0x55   : > { %480 = vst [vmem:[%s7858_s21 + $0x10] sm:$0xff] %v479_v2  ;;  %v485_v5 = vld [vmem:[%s7853_s0 + $0x28] sm:$0xff]  ;;  %482 = vst [vmem:[%s7858_s21 + $0x18] sm:$0xff] %v481_v3  ;;  %v487_v6 = vld [vmem:[%s7853_s0 + $0x30] sm:$0xff] }
  0x56   : > { %484 = vst [vmem:[%s7858_s21 + $0x20] sm:$0xff] %v483_v4  ;;  %486 = vst [vmem:[%s7858_s21 + $0x28] sm:$0xff] %v485_v5  ;;  %v489_v7 = vld [vmem:[%s7853_s0 + $0x38] sm:$0xff]  ;;  %v491_v8 = vld [vmem:[%s7853_s0 + $0x40] sm:$0xff] }
  0x57   : > { %488 = vst [vmem:[%s7858_s21 + $0x30] sm:$0xff] %v487_v6  ;;  %490 = vst [vmem:[%s7858_s21 + $0x38] sm:$0xff] %v489_v7  ;;  %v493_v9 = vld [vmem:[%s7853_s0 + $0x48] sm:$0xff]  ;;  %v495_v10 = vld [vmem:[%s7853_s0 + $0x50] sm:$0xff] }
  0x58   : > { %492 = vst [vmem:[%s7858_s21 + $0x40] sm:$0xff] %v491_v8  ;;  %v497_v11 = vld [vmem:[%s7853_s0 + $0x58] sm:$0xff]  ;;  %494 = vst [vmem:[%s7858_s21 + $0x48] sm:$0xff] %v493_v9  ;;  %v499_v12 = vld [vmem:[%s7853_s0 + $0x60] sm:$0xff] }
  0x59   : > { %496 = vst [vmem:[%s7858_s21 + $0x50] sm:$0xff] %v495_v10  ;;  %498 = vst [vmem:[%s7858_s21 + $0x58] sm:$0xff] %v497_v11  ;;  %v501_v13 = vld [vmem:[%s7853_s0 + $0x68] sm:$0xff]  ;;  %v503_v14 = vld [vmem:[%s7853_s0 + $0x70] sm:$0xff] }
  0x5a   : > { %500 = vst [vmem:[%s7858_s21 + $0x60] sm:$0xff] %v499_v12  ;;  %502 = vst [vmem:[%s7858_s21 + $0x68] sm:$0xff] %v501_v13  ;;  %v505_v15 = vld [vmem:[%s7853_s0 + $0x78] sm:$0xff]  ;;  %v507_v16 = vld [vmem:[%s7853_s0 + $0x200] sm:$0xff] }
  0x5b   : > { %504 = vst [vmem:[%s7858_s21 + $0x70] sm:$0xff] %v503_v14  ;;  %v509_v17 = vld [vmem:[%s7853_s0 + $0x208] sm:$0xff]  ;;  %506 = vst [vmem:[%s7858_s21 + $0x78] sm:$0xff] %v505_v15  ;;  %v511_v18 = vld [vmem:[%s7853_s0 + $0x210] sm:$0xff] }
  0x5c   : > { %508 = vst [vmem:[%s7858_s21 + $0x80] sm:$0xff] %v507_v16  ;;  %510 = vst [vmem:[%s7858_s21 + $0x88] sm:$0xff] %v509_v17  ;;  %v513_v19 = vld [vmem:[%s7853_s0 + $0x218] sm:$0xff]  ;;  %v515_v20 = vld [vmem:[%s7853_s0 + $0x220] sm:$0xff] }
  0x5d   : > { %512 = vst [vmem:[%s7858_s21 + $0x90] sm:$0xff] %v511_v18  ;;  %514 = vst [vmem:[%s7858_s21 + $0x98] sm:$0xff] %v513_v19  ;;  %v517_v21 = vld [vmem:[%s7853_s0 + $0x228] sm:$0xff]  ;;  %v519_v22 = vld [vmem:[%s7853_s0 + $0x230] sm:$0xff] }
  0x5e   : > { %516 = vst [vmem:[%s7858_s21 + $0xa0] sm:$0xff] %v515_v20  ;;  %v521_v23 = vld [vmem:[%s7853_s0 + $0x238] sm:$0xff]  ;;  %518 = vst [vmem:[%s7858_s21 + $0xa8] sm:$0xff] %v517_v21  ;;  %v523_v24 = vld [vmem:[%s7853_s0 + $0x240] sm:$0xff] }
  0x5f   : > { %520 = vst [vmem:[%s7858_s21 + $0xb0] sm:$0xff] %v519_v22  ;;  %522 = vst [vmem:[%s7858_s21 + $0xb8] sm:$0xff] %v521_v23  ;;  %v525_v25 = vld [vmem:[%s7853_s0 + $0x248] sm:$0xff]  ;;  %v527_v26 = vld [vmem:[%s7853_s0 + $0x250] sm:$0xff] }
  0x60   : > { %524 = vst [vmem:[%s7858_s21 + $0xc0] sm:$0xff] %v523_v24  ;;  %526 = vst [vmem:[%s7858_s21 + $0xc8] sm:$0xff] %v525_v25  ;;  %v529_v27 = vld [vmem:[%s7853_s0 + $0x258] sm:$0xff]  ;;  %v531_v28 = vld [vmem:[%s7853_s0 + $0x260] sm:$0xff] }
  0x61   : > { %528 = vst [vmem:[%s7858_s21 + $0xd0] sm:$0xff] %v527_v26  ;;  %v533_v29 = vld [vmem:[%s7853_s0 + $0x268] sm:$0xff]  ;;  %530 = vst [vmem:[%s7858_s21 + $0xd8] sm:$0xff] %v529_v27  ;;  %v535_v30 = vld [vmem:[%s7853_s0 + $0x270] sm:$0xff] }
  0x62   : > { %532 = vst [vmem:[%s7858_s21 + $0xe0] sm:$0xff] %v531_v28  ;;  %534 = vst [vmem:[%s7858_s21 + $0xe8] sm:$0xff] %v533_v29  ;;  %v537_v31 = vld [vmem:[%s7853_s0 + $0x278] sm:$0xff]  ;;  %v539_v32 = vld [vmem:[%s7853_s0 + $0x400] sm:$0xff] }
  0x63   : > { %536 = vst [vmem:[%s7858_s21 + $0xf0] sm:$0xff] %v535_v30  ;;  %538 = vst [vmem:[%s7858_s21 + $0xf8] sm:$0xff] %v537_v31  ;;  %v541_v33 = vld [vmem:[%s7853_s0 + $0x408] sm:$0xff]  ;;  %v543_v34 = vld [vmem:[%s7853_s0 + $0x410] sm:$0xff] }
  0x64   : > { %540 = vst [vmem:[%s7858_s21 + $0x100] sm:$0xff] %v539_v32  ;;  %v545_v35 = vld [vmem:[%s7853_s0 + $0x418] sm:$0xff]  ;;  %542 = vst [vmem:[%s7858_s21 + $0x108] sm:$0xff] %v541_v33  ;;  %v547_v36 = vld [vmem:[%s7853_s0 + $0x420] sm:$0xff] }
  0x65   : > { %544 = vst [vmem:[%s7858_s21 + $0x110] sm:$0xff] %v543_v34  ;;  %546 = vst [vmem:[%s7858_s21 + $0x118] sm:$0xff] %v545_v35  ;;  %v549_v37 = vld [vmem:[%s7853_s0 + $0x428] sm:$0xff]  ;;  %v551_v38 = vld [vmem:[%s7853_s0 + $0x430] sm:$0xff] }
  0x66   : > { %548 = vst [vmem:[%s7858_s21 + $0x120] sm:$0xff] %v547_v36  ;;  %550 = vst [vmem:[%s7858_s21 + $0x128] sm:$0xff] %v549_v37  ;;  %v553_v39 = vld [vmem:[%s7853_s0 + $0x438] sm:$0xff]  ;;  %v555_v40 = vld [vmem:[%s7853_s0 + $0x440] sm:$0xff] }
  0x67   : > { %552 = vst [vmem:[%s7858_s21 + $0x130] sm:$0xff] %v551_v38  ;;  %v557_v41 = vld [vmem:[%s7853_s0 + $0x448] sm:$0xff]  ;;  %554 = vst [vmem:[%s7858_s21 + $0x138] sm:$0xff] %v553_v39  ;;  %v559_v42 = vld [vmem:[%s7853_s0 + $0x450] sm:$0xff] }
  0x68   : > { %556 = vst [vmem:[%s7858_s21 + $0x140] sm:$0xff] %v555_v40  ;;  %558 = vst [vmem:[%s7858_s21 + $0x148] sm:$0xff] %v557_v41  ;;  %v561_v43 = vld [vmem:[%s7853_s0 + $0x458] sm:$0xff]  ;;  %v563_v44 = vld [vmem:[%s7853_s0 + $0x460] sm:$0xff] }
  0x69   : > { %560 = vst [vmem:[%s7858_s21 + $0x150] sm:$0xff] %v559_v42  ;;  %562 = vst [vmem:[%s7858_s21 + $0x158] sm:$0xff] %v561_v43  ;;  %v565_v45 = vld [vmem:[%s7853_s0 + $0x468] sm:$0xff]  ;;  %v567_v46 = vld [vmem:[%s7853_s0 + $0x470] sm:$0xff] }
  0x6a   : > { %564 = vst [vmem:[%s7858_s21 + $0x160] sm:$0xff] %v563_v44  ;;  %v569_v47 = vld [vmem:[%s7853_s0 + $0x478] sm:$0xff]  ;;  %566 = vst [vmem:[%s7858_s21 + $0x168] sm:$0xff] %v565_v45  ;;  %v571_v48 = vld [vmem:[%s7853_s0 + $0x600] sm:$0xff] }
  0x6b   : > { %568 = vst [vmem:[%s7858_s21 + $0x170] sm:$0xff] %v567_v46  ;;  %570 = vst [vmem:[%s7858_s21 + $0x178] sm:$0xff] %v569_v47  ;;  %v573_v49 = vld [vmem:[%s7853_s0 + $0x608] sm:$0xff]  ;;  %v575_v50 = vld [vmem:[%s7853_s0 + $0x610] sm:$0xff] }
  0x6c   : > { %572 = vst [vmem:[%s7858_s21 + $0x180] sm:$0xff] %v571_v48  ;;  %574 = vst [vmem:[%s7858_s21 + $0x188] sm:$0xff] %v573_v49  ;;  %v577_v51 = vld [vmem:[%s7853_s0 + $0x618] sm:$0xff]  ;;  %v579_v52 = vld [vmem:[%s7853_s0 + $0x620] sm:$0xff] }
  0x6d   : > { %576 = vst [vmem:[%s7858_s21 + $0x190] sm:$0xff] %v575_v50  ;;  %v581_v53 = vld [vmem:[%s7853_s0 + $0x628] sm:$0xff]  ;;  %578 = vst [vmem:[%s7858_s21 + $0x198] sm:$0xff] %v577_v51  ;;  %v583_v54 = vld [vmem:[%s7853_s0 + $0x630] sm:$0xff] }
  0x6e   : > { %580 = vst [vmem:[%s7858_s21 + $0x1a0] sm:$0xff] %v579_v52  ;;  %582 = vst [vmem:[%s7858_s21 + $0x1a8] sm:$0xff] %v581_v53  ;;  %v585_v55 = vld [vmem:[%s7853_s0 + $0x638] sm:$0xff]  ;;  %v587_v56 = vld [vmem:[%s7853_s0 + $0x640] sm:$0xff] }
  0x6f   : > { %584 = vst [vmem:[%s7858_s21 + $0x1b0] sm:$0xff] %v583_v54  ;;  %586 = vst [vmem:[%s7858_s21 + $0x1b8] sm:$0xff] %v585_v55  ;;  %v589_v57 = vld [vmem:[%s7853_s0 + $0x648] sm:$0xff]  ;;  %v591_v58 = vld [vmem:[%s7853_s0 + $0x650] sm:$0xff] }
  0x70   : > { %588 = vst [vmem:[%s7858_s21 + $0x1c0] sm:$0xff] %v587_v56  ;;  %v593_v59 = vld [vmem:[%s7853_s0 + $0x658] sm:$0xff]  ;;  %590 = vst [vmem:[%s7858_s21 + $0x1c8] sm:$0xff] %v589_v57  ;;  %v595_v60 = vld [vmem:[%s7853_s0 + $0x660] sm:$0xff] }
  0x71   : > { %592 = vst [vmem:[%s7858_s21 + $0x1d0] sm:$0xff] %v591_v58  ;;  %594 = vst [vmem:[%s7858_s21 + $0x1d8] sm:$0xff] %v593_v59  ;;  %v597_v61 = vld [vmem:[%s7853_s0 + $0x668] sm:$0xff]  ;;  %v599_v62 = vld [vmem:[%s7853_s0 + $0x670] sm:$0xff] }
  0x72   : > { %596 = vst [vmem:[%s7858_s21 + $0x1e0] sm:$0xff] %v595_v60  ;;  %598 = vst [vmem:[%s7858_s21 + $0x1e8] sm:$0xff] %v597_v61  ;;  %v601_v63 = vld [vmem:[%s7853_s0 + $0x678] sm:$0xff] }
  0x73   : > { %600 = vst [vmem:[%s7858_s21 + $0x1f0] sm:$0xff] %v599_v62  ;;  %602 = vst [vmem:[%s7858_s21 + $0x1f8] sm:$0xff] %v601_v63 }
  0x74 PF: > { %608 = sbr.rel (!%p7786_p2) target bundleno = 142 (0x8e), region = 70  ;;  %s615_s15 = sld [smem:[#allocation7 + %s7758_s20]] (%p7786_p2) }
  0x75   : > { %s610_s7 = sand.u32 (%p7786_p2), 1, %s7580_s27   ;;  %s6486_s9 = sshll.u32 (%p7786_p2), %s7604_s13, 6 }
  0x76   : > { %s6270_s11 = sshll.u32 (%p7786_p2), %s610_s7, 7  ;;  %s11292_s3 = sld [smem:[#allocation86_spill]] (%p7786_p2) }
  0x77   : > { %s612_s10 = scalar_lea.vmem (%p7786_p2), [#allocation9], %s6270_s11 }
  0x7a   : > { %s618_s4 = sadd.s32 %s6486_s9, %s615_s15 }
  0x7b   : > { %s6274_s6 = sshll.u32 %s618_s4, 3 }
  0x7c   : > { %s7993_s16 = scalar_lea.vmem %s11292_s3, %s6274_s6 }
  0x7d   : > { %v679_v0 = vld [vmem:[%s7993_s16] sm:$0xff] }
  0x7e   : > { %v681_v1 = vld [vmem:[%s7993_s16 + $0x20] sm:$0xff]  ;;  %680 = vst [vmem:[%s612_s10] sm:$0xff] %v679_v0 }
  0x7f   : > { %v683_v2 = vld [vmem:[%s7993_s16 + $0x40] sm:$0xff]  ;;  %682 = vst [vmem:[%s612_s10 + $0x8] sm:$0xff] %v681_v1 }
  0x80   : > { %684 = vst [vmem:[%s612_s10 + $0x10] sm:$0xff] %v683_v2  ;;  %v685_v3 = vld [vmem:[%s7993_s16 + $0x60] sm:$0xff] }
  0x81   : > { %v687_v4 = vld [vmem:[%s7993_s16 + $0x80] sm:$0xff]  ;;  %686 = vst [vmem:[%s612_s10 + $0x18] sm:$0xff] %v685_v3 }
  0x82   : > { %v689_v5 = vld [vmem:[%s7993_s16 + $0xa0] sm:$0xff]  ;;  %688 = vst [vmem:[%s612_s10 + $0x20] sm:$0xff] %v687_v4 }
  0x83   : > { %690 = vst [vmem:[%s612_s10 + $0x28] sm:$0xff] %v689_v5  ;;  %v691_v6 = vld [vmem:[%s7993_s16 + $0xc0] sm:$0xff] }
  0x84   : > { %v693_v7 = vld [vmem:[%s7993_s16 + $0xe0] sm:$0xff]  ;;  %692 = vst [vmem:[%s612_s10 + $0x30] sm:$0xff] %v691_v6 }
  0x85   : > { %v695_v8 = vld [vmem:[%s7993_s16 + $0x100] sm:$0xff]  ;;  %694 = vst [vmem:[%s612_s10 + $0x38] sm:$0xff] %v693_v7 }
  0x86   : > { %696 = vst [vmem:[%s612_s10 + $0x40] sm:$0xff] %v695_v8  ;;  %v697_v9 = vld [vmem:[%s7993_s16 + $0x120] sm:$0xff] }
  0x87   : > { %v699_v10 = vld [vmem:[%s7993_s16 + $0x140] sm:$0xff]  ;;  %698 = vst [vmem:[%s612_s10 + $0x48] sm:$0xff] %v697_v9 }
  0x88   : > { %v701_v11 = vld [vmem:[%s7993_s16 + $0x160] sm:$0xff]  ;;  %700 = vst [vmem:[%s612_s10 + $0x50] sm:$0xff] %v699_v10 }
  0x89   : > { %702 = vst [vmem:[%s612_s10 + $0x58] sm:$0xff] %v701_v11  ;;  %v703_v12 = vld [vmem:[%s7993_s16 + $0x180] sm:$0xff] }
  0x8a   : > { %v705_v13 = vld [vmem:[%s7993_s16 + $0x1a0] sm:$0xff]  ;;  %704 = vst [vmem:[%s612_s10 + $0x60] sm:$0xff] %v703_v12 }
  0x8b   : > { %v707_v14 = vld [vmem:[%s7993_s16 + $0x1c0] sm:$0xff]  ;;  %706 = vst [vmem:[%s612_s10 + $0x68] sm:$0xff] %v705_v13 }
  0x8c   : > { %708 = vst [vmem:[%s612_s10 + $0x70] sm:$0xff] %v707_v14  ;;  %v709_v15 = vld [vmem:[%s7993_s16 + $0x1e0] sm:$0xff] }
  0x8d   : > { %710 = vst [vmem:[%s612_s10 + $0x78] sm:$0xff] %v709_v15 }
  0x8e PF: > { %716 = sbr.rel (!%p7803_p5) target bundleno = 184 (0xb8), region = 108  ;;  %s718_s18 = sand.u32 (%p7803_p5), 1, %s7572_s25  }
  0x8f   : > { %s6487_s0 = sshll.u32 (%p7803_p5), %s7604_s13, 7  ;;  %s6275_s21 = sshll.u32 (%p7803_p5), %s718_s18, 9 }
  0x90   : > { %s11293_s9 = sld [smem:[#allocation87_spill]] (%p7803_p5)  ;;  %s8023_s17 = scalar_lea.vmem (%p7803_p5), [#allocation10], %s6275_s21 }
  0x96   : > { %s8018_s11 = scalar_lea.vmem %s11293_s9, %s6487_s0 }
  0x97   : > { %v878_v16 = vld [vmem:[%s8018_s11] sm:$0xff]  ;;  %v880_v17 = vld [vmem:[%s8018_s11 + $0x8] sm:$0xff]  ;;  %v882_v18 = vld [vmem:[%s8018_s11 + $0x10] sm:$0xff] }
  0x98   : > { %879 = vst [vmem:[%s8023_s17] sm:$0xff] %v878_v16  ;;  %881 = vst [vmem:[%s8023_s17 + $0x8] sm:$0xff] %v880_v17  ;;  %v884_v19 = vld [vmem:[%s8018_s11 + $0x18] sm:$0xff]  ;;  %v886_v20 = vld [vmem:[%s8018_s11 + $0x20] sm:$0xff] }
  0x99   : > { %883 = vst [vmem:[%s8023_s17 + $0x10] sm:$0xff] %v882_v18  ;;  %v888_v21 = vld [vmem:[%s8018_s11 + $0x28] sm:$0xff]  ;;  %885 = vst [vmem:[%s8023_s17 + $0x18] sm:$0xff] %v884_v19  ;;  %v890_v22 = vld [vmem:[%s8018_s11 + $0x30] sm:$0xff] }
  0x9a   : > { %887 = vst [vmem:[%s8023_s17 + $0x20] sm:$0xff] %v886_v20  ;;  %889 = vst [vmem:[%s8023_s17 + $0x28] sm:$0xff] %v888_v21  ;;  %v892_v23 = vld [vmem:[%s8018_s11 + $0x38] sm:$0xff]  ;;  %v894_v24 = vld [vmem:[%s8018_s11 + $0x40] sm:$0xff] }
  0x9b   : > { %891 = vst [vmem:[%s8023_s17 + $0x30] sm:$0xff] %v890_v22  ;;  %893 = vst [vmem:[%s8023_s17 + $0x38] sm:$0xff] %v892_v23  ;;  %v896_v25 = vld [vmem:[%s8018_s11 + $0x48] sm:$0xff]  ;;  %v898_v26 = vld [vmem:[%s8018_s11 + $0x50] sm:$0xff] }
  0x9c   : > { %895 = vst [vmem:[%s8023_s17 + $0x40] sm:$0xff] %v894_v24  ;;  %v900_v27 = vld [vmem:[%s8018_s11 + $0x58] sm:$0xff]  ;;  %897 = vst [vmem:[%s8023_s17 + $0x48] sm:$0xff] %v896_v25  ;;  %v902_v28 = vld [vmem:[%s8018_s11 + $0x60] sm:$0xff] }
  0x9d   : > { %899 = vst [vmem:[%s8023_s17 + $0x50] sm:$0xff] %v898_v26  ;;  %901 = vst [vmem:[%s8023_s17 + $0x58] sm:$0xff] %v900_v27  ;;  %v904_v29 = vld [vmem:[%s8018_s11 + $0x68] sm:$0xff]  ;;  %v906_v30 = vld [vmem:[%s8018_s11 + $0x70] sm:$0xff] }
  0x9e   : > { %903 = vst [vmem:[%s8023_s17 + $0x60] sm:$0xff] %v902_v28  ;;  %905 = vst [vmem:[%s8023_s17 + $0x68] sm:$0xff] %v904_v29  ;;  %v908_v31 = vld [vmem:[%s8018_s11 + $0x78] sm:$0xff]  ;;  %v910_v32 = vld [vmem:[%s8018_s11 + $0x200] sm:$0xff] }
  0x9f   : > { %907 = vst [vmem:[%s8023_s17 + $0x70] sm:$0xff] %v906_v30  ;;  %v912_v33 = vld [vmem:[%s8018_s11 + $0x208] sm:$0xff]  ;;  %909 = vst [vmem:[%s8023_s17 + $0x78] sm:$0xff] %v908_v31  ;;  %v914_v34 = vld [vmem:[%s8018_s11 + $0x210] sm:$0xff] }
  0xa0   : > { %911 = vst [vmem:[%s8023_s17 + $0x80] sm:$0xff] %v910_v32  ;;  %913 = vst [vmem:[%s8023_s17 + $0x88] sm:$0xff] %v912_v33  ;;  %v916_v35 = vld [vmem:[%s8018_s11 + $0x218] sm:$0xff]  ;;  %v918_v36 = vld [vmem:[%s8018_s11 + $0x220] sm:$0xff] }
  0xa1   : > { %915 = vst [vmem:[%s8023_s17 + $0x90] sm:$0xff] %v914_v34  ;;  %917 = vst [vmem:[%s8023_s17 + $0x98] sm:$0xff] %v916_v35  ;;  %v920_v37 = vld [vmem:[%s8018_s11 + $0x228] sm:$0xff]  ;;  %v922_v38 = vld [vmem:[%s8018_s11 + $0x230] sm:$0xff] }
  0xa2   : > { %919 = vst [vmem:[%s8023_s17 + $0xa0] sm:$0xff] %v918_v36  ;;  %v924_v39 = vld [vmem:[%s8018_s11 + $0x238] sm:$0xff]  ;;  %921 = vst [vmem:[%s8023_s17 + $0xa8] sm:$0xff] %v920_v37  ;;  %v926_v40 = vld [vmem:[%s8018_s11 + $0x240] sm:$0xff] }
  0xa3   : > { %923 = vst [vmem:[%s8023_s17 + $0xb0] sm:$0xff] %v922_v38  ;;  %925 = vst [vmem:[%s8023_s17 + $0xb8] sm:$0xff] %v924_v39  ;;  %v928_v41 = vld [vmem:[%s8018_s11 + $0x248] sm:$0xff]  ;;  %v930_v42 = vld [vmem:[%s8018_s11 + $0x250] sm:$0xff] }
  0xa4   : > { %927 = vst [vmem:[%s8023_s17 + $0xc0] sm:$0xff] %v926_v40  ;;  %929 = vst [vmem:[%s8023_s17 + $0xc8] sm:$0xff] %v928_v41  ;;  %v932_v43 = vld [vmem:[%s8018_s11 + $0x258] sm:$0xff]  ;;  %v934_v44 = vld [vmem:[%s8018_s11 + $0x260] sm:$0xff] }
  0xa5   : > { %931 = vst [vmem:[%s8023_s17 + $0xd0] sm:$0xff] %v930_v42  ;;  %v936_v45 = vld [vmem:[%s8018_s11 + $0x268] sm:$0xff]  ;;  %933 = vst [vmem:[%s8023_s17 + $0xd8] sm:$0xff] %v932_v43  ;;  %v938_v46 = vld [vmem:[%s8018_s11 + $0x270] sm:$0xff] }
  0xa6   : > { %935 = vst [vmem:[%s8023_s17 + $0xe0] sm:$0xff] %v934_v44  ;;  %937 = vst [vmem:[%s8023_s17 + $0xe8] sm:$0xff] %v936_v45  ;;  %v940_v47 = vld [vmem:[%s8018_s11 + $0x278] sm:$0xff]  ;;  %v942_v48 = vld [vmem:[%s8018_s11 + $0x400] sm:$0xff] }
  0xa7   : > { %939 = vst [vmem:[%s8023_s17 + $0xf0] sm:$0xff] %v938_v46  ;;  %941 = vst [vmem:[%s8023_s17 + $0xf8] sm:$0xff] %v940_v47  ;;  %v944_v49 = vld [vmem:[%s8018_s11 + $0x408] sm:$0xff]  ;;  %v946_v50 = vld [vmem:[%s8018_s11 + $0x410] sm:$0xff] }
  0xa8   : > { %943 = vst [vmem:[%s8023_s17 + $0x100] sm:$0xff] %v942_v48  ;;  %v948_v51 = vld [vmem:[%s8018_s11 + $0x418] sm:$0xff]  ;;  %945 = vst [vmem:[%s8023_s17 + $0x108] sm:$0xff] %v944_v49  ;;  %v950_v52 = vld [vmem:[%s8018_s11 + $0x420] sm:$0xff] }
  0xa9   : > { %947 = vst [vmem:[%s8023_s17 + $0x110] sm:$0xff] %v946_v50  ;;  %949 = vst [vmem:[%s8023_s17 + $0x118] sm:$0xff] %v948_v51  ;;  %v952_v53 = vld [vmem:[%s8018_s11 + $0x428] sm:$0xff]  ;;  %v954_v54 = vld [vmem:[%s8018_s11 + $0x430] sm:$0xff] }
  0xaa   : > { %951 = vst [vmem:[%s8023_s17 + $0x120] sm:$0xff] %v950_v52  ;;  %953 = vst [vmem:[%s8023_s17 + $0x128] sm:$0xff] %v952_v53  ;;  %v956_v55 = vld [vmem:[%s8018_s11 + $0x438] sm:$0xff]  ;;  %v958_v56 = vld [vmem:[%s8018_s11 + $0x440] sm:$0xff] }
  0xab   : > { %955 = vst [vmem:[%s8023_s17 + $0x130] sm:$0xff] %v954_v54  ;;  %v960_v57 = vld [vmem:[%s8018_s11 + $0x448] sm:$0xff]  ;;  %957 = vst [vmem:[%s8023_s17 + $0x138] sm:$0xff] %v956_v55  ;;  %v962_v58 = vld [vmem:[%s8018_s11 + $0x450] sm:$0xff] }
  0xac   : > { %959 = vst [vmem:[%s8023_s17 + $0x140] sm:$0xff] %v958_v56  ;;  %961 = vst [vmem:[%s8023_s17 + $0x148] sm:$0xff] %v960_v57  ;;  %v964_v59 = vld [vmem:[%s8018_s11 + $0x458] sm:$0xff]  ;;  %v966_v60 = vld [vmem:[%s8018_s11 + $0x460] sm:$0xff] }
  0xad   : > { %963 = vst [vmem:[%s8023_s17 + $0x150] sm:$0xff] %v962_v58  ;;  %965 = vst [vmem:[%s8023_s17 + $0x158] sm:$0xff] %v964_v59  ;;  %v968_v61 = vld [vmem:[%s8018_s11 + $0x468] sm:$0xff]  ;;  %v970_v62 = vld [vmem:[%s8018_s11 + $0x470] sm:$0xff] }
  0xae   : > { %967 = vst [vmem:[%s8023_s17 + $0x160] sm:$0xff] %v966_v60  ;;  %v972_v63 = vld [vmem:[%s8018_s11 + $0x478] sm:$0xff]  ;;  %969 = vst [vmem:[%s8023_s17 + $0x168] sm:$0xff] %v968_v61  ;;  %v974_v0 = vld [vmem:[%s8018_s11 + $0x600] sm:$0xff] }
  0xaf   : > { %971 = vst [vmem:[%s8023_s17 + $0x170] sm:$0xff] %v970_v62  ;;  %973 = vst [vmem:[%s8023_s17 + $0x178] sm:$0xff] %v972_v63  ;;  %v976_v1 = vld [vmem:[%s8018_s11 + $0x608] sm:$0xff]  ;;  %v978_v2 = vld [vmem:[%s8018_s11 + $0x610] sm:$0xff] }
  0xb0   : > { %975 = vst [vmem:[%s8023_s17 + $0x180] sm:$0xff] %v974_v0  ;;  %977 = vst [vmem:[%s8023_s17 + $0x188] sm:$0xff] %v976_v1  ;;  %v980_v3 = vld [vmem:[%s8018_s11 + $0x618] sm:$0xff]  ;;  %v982_v4 = vld [vmem:[%s8018_s11 + $0x620] sm:$0xff] }
  0xb1   : > { %979 = vst [vmem:[%s8023_s17 + $0x190] sm:$0xff] %v978_v2  ;;  %v984_v5 = vld [vmem:[%s8018_s11 + $0x628] sm:$0xff]  ;;  %981 = vst [vmem:[%s8023_s17 + $0x198] sm:$0xff] %v980_v3  ;;  %v986_v6 = vld [vmem:[%s8018_s11 + $0x630] sm:$0xff] }
  0xb2   : > { %983 = vst [vmem:[%s8023_s17 + $0x1a0] sm:$0xff] %v982_v4  ;;  %985 = vst [vmem:[%s8023_s17 + $0x1a8] sm:$0xff] %v984_v5  ;;  %v988_v7 = vld [vmem:[%s8018_s11 + $0x638] sm:$0xff]  ;;  %v990_v8 = vld [vmem:[%s8018_s11 + $0x640] sm:$0xff] }
  0xb3   : > { %987 = vst [vmem:[%s8023_s17 + $0x1b0] sm:$0xff] %v986_v6  ;;  %989 = vst [vmem:[%s8023_s17 + $0x1b8] sm:$0xff] %v988_v7  ;;  %v992_v9 = vld [vmem:[%s8018_s11 + $0x648] sm:$0xff]  ;;  %v994_v10 = vld [vmem:[%s8018_s11 + $0x650] sm:$0xff] }
  0xb4   : > { %991 = vst [vmem:[%s8023_s17 + $0x1c0] sm:$0xff] %v990_v8  ;;  %v996_v11 = vld [vmem:[%s8018_s11 + $0x658] sm:$0xff]  ;;  %993 = vst [vmem:[%s8023_s17 + $0x1c8] sm:$0xff] %v992_v9  ;;  %v998_v12 = vld [vmem:[%s8018_s11 + $0x660] sm:$0xff] }
  0xb5   : > { %995 = vst [vmem:[%s8023_s17 + $0x1d0] sm:$0xff] %v994_v10  ;;  %997 = vst [vmem:[%s8023_s17 + $0x1d8] sm:$0xff] %v996_v11  ;;  %v1000_v13 = vld [vmem:[%s8018_s11 + $0x668] sm:$0xff]  ;;  %v1002_v14 = vld [vmem:[%s8018_s11 + $0x670] sm:$0xff] }
  0xb6   : > { %999 = vst [vmem:[%s8023_s17 + $0x1e0] sm:$0xff] %v998_v12  ;;  %1001 = vst [vmem:[%s8023_s17 + $0x1e8] sm:$0xff] %v1000_v13  ;;  %v1004_v15 = vld [vmem:[%s8018_s11 + $0x678] sm:$0xff] }
  0xb7   : > { %1003 = vst [vmem:[%s8023_s17 + $0x1f0] sm:$0xff] %v1002_v14  ;;  %1005 = vst [vmem:[%s8023_s17 + $0x1f8] sm:$0xff] %v1004_v15 }
  0xb8 PF: > { %1011 = sbr.rel (!%p7813_p9) target bundleno = 196 (0xc4), region = 146  ;;  %s1013_s4 = sand.u32 (%p7813_p9), 1, %s7564_s23  }
  0xb9   : > { %s1018_s6 = sld [smem:[#allocation7 + %s7758_s20]] (%p7813_p9)  ;;  %s6278_s26 = sshll.u32 (%p7813_p9), %s1013_s4, 2 }
  0xba   : > { %s11294_s10 = sld [smem:[#allocation88_spill]] (%p7813_p9)  ;;  %s1015_s0 = scalar_lea.vmem (%p7813_p9), [#allocation11], %s6278_s26 }
  0xc0   : > { %s1019_s18 = scalar_lea.vmem %s11294_s10, %s1018_s6 }
  0xc1   : > { %v1036_v16 = vld [vmem:[%s1019_s18] sm:$0x1]  ;;  %v1038_v17 = vld [vmem:[%s1019_s18 + $0x4] sm:$0x1]  ;;  %v1040_v18 = vld [vmem:[%s1019_s18 + $0x8] sm:$0x1] }
  0xc2   : > { %1037 = vst [vmem:[%s1015_s0] sm:$0x1] %v1036_v16  ;;  %1039 = vst [vmem:[%s1015_s0 + $0x1] sm:$0x1] %v1038_v17  ;;  %v1042_v19 = vld [vmem:[%s1019_s18 + $0xc] sm:$0x1] }
  0xc3   : > { %1041 = vst [vmem:[%s1015_s0 + $0x2] sm:$0x1] %v1040_v18  ;;  %1043 = vst [vmem:[%s1015_s0 + $0x3] sm:$0x1] %v1042_v19 }
  0xc4 PF: > { %p6280_p0 = scmp.ge.s32.totalorder %s7608_s14, 1  ;;  %p1075_p2 = scmp.lt.s32.totalorder %s7608_s14, 9 }
  0xc6   : > { %p1076_p4 = pnand %p6280_p0, %p1075_p2 }
  0xc7   : > { %s11295_s20 = sld [smem:[#allocation18_spill]] (!%p1076_p4)  ;;  %s8162_s4 = sand.u32 (!%p1076_p4), 1, %s7568_s24  }
  0xc8   : > { %1079 = sbr.rel (%p1076_p4) target bundleno = 3071 (0xbff), region = 184  ;;  %s11296_s19 = sld [smem:[#allocation17_spill]] (!%p1076_p4) }
  0xc9   : > { %s11297_s21 = sld [smem:[#allocation16_spill]] (!%p1076_p4)  ;;  %s6283_s26 = sshll.u32 (!%p1076_p4), %s8162_s4, 9 }
  0xca   : > { %s11298_s15 = sld [smem:[#allocation20_spill]] (!%p1076_p4)  ;;  %s6285_s16 = sshll.u32 (!%p1076_p4), %s8162_s4, 4 }
  0xcb   : > { %s11299_s3 = sld [smem:[#allocation89_spill]] (!%p1076_p4) }
  0xcd   : > { %s1082_s7 = sand.u32 1, %s11295_s20  }
  0xce   : > { %s1089_s9 = sand.u32 1, %s11296_s19   ;;  %s6281_s11 = sshll.u32 %s1082_s7, 9 }
  0xcf   : > { %s6282_s17 = sshll.u32 %s1089_s9, 7  ;;  %s1103_s6 = sand.u32 1, %s11297_s21  }
  0xd0   : > { %s6284_s28 = sshll.u32 %s1103_s6, 2  ;;  %s6286_s10 = sshll.u32 %s11298_s15, 4 }
  0xd1   : > { %p1166_p5 = scmp.lt.s32.totalorder %s6286_s10, 63  ;;  %s8173_s20 = scalar_lea.vmem [#allocation8], %s6281_s11 }
  0xd2   : > { %s8175_s19 = scalar_lea.vmem [#allocation9], %s6282_s17  ;;  %s8177_s7 = scalar_lea.vmem [#allocation10], %s6283_s26 }
  0xd3   : > { %s11734_s10 = smov (!%p1166_p5, %s6286_s10), 63  ;;  %s8179_s9 = scalar_lea.vmem [#allocation11], %s6284_s28 }
  0xd4   : > { %s6287_s18 = sshll.u32 %s11734_s10, 3  ;;  %s8181_s21 = scalar_lea.vmem [#allocation12], %s6285_s16 }
  0xd5   : > { %s8171_s13 = scalar_lea.vmem %s11299_s3, %s6287_s18  ;;  %s11300_s6 = sld [smem:[#allocation19_spill]] }
  0xdb   : > { %p6288_p7 = scmp.ne.s32.totalorder %s11300_s6, 0 }
  0xdd   : > { %1174 = sbr.rel (%p6288_p7) target bundleno = 323 (0x143), region = 204 }
  0xe2   : > { %vm1175_vm0 = vcmask 7168   ;;  %vm1304_vm1 = vcmask 130048   ;;  %v7612_v20 = vmov -1e+09   ;;  %v7613_v21 = vmov 0.0  }
  0xe3   : > { %1176 = vst.msk [vmem:[#allocation2] sm:$0xff] %vm1175_vm0, %v7612_v20  ;;  %1177 = vst.msk [vmem:[#allocation2 + $0x8] sm:$0xff] %vm1175_vm0, %v7612_v20 }
  0xe4   : > { %1178 = vst.msk [vmem:[#allocation2 + $0x10] sm:$0xff] %vm1175_vm0, %v7612_v20  ;;  %1179 = vst.msk [vmem:[#allocation2 + $0x18] sm:$0xff] %vm1175_vm0, %v7612_v20 }
  0xe5   : > { %1180 = vst.msk [vmem:[#allocation2 + $0x20] sm:$0xff] %vm1175_vm0, %v7612_v20  ;;  %1181 = vst.msk [vmem:[#allocation2 + $0x28] sm:$0xff] %vm1175_vm0, %v7612_v20 }
  0xe6   : > { %1182 = vst.msk [vmem:[#allocation2 + $0x30] sm:$0xff] %vm1175_vm0, %v7612_v20  ;;  %1183 = vst.msk [vmem:[#allocation2 + $0x38] sm:$0xff] %vm1175_vm0, %v7612_v20 }
  0xe7   : > { %1184 = vst.msk [vmem:[#allocation2 + $0x40] sm:$0xff] %vm1175_vm0, %v7612_v20  ;;  %1185 = vst.msk [vmem:[#allocation2 + $0x48] sm:$0xff] %vm1175_vm0, %v7612_v20 }
  0xe8   : > { %1186 = vst.msk [vmem:[#allocation2 + $0x50] sm:$0xff] %vm1175_vm0, %v7612_v20  ;;  %1187 = vst.msk [vmem:[#allocation2 + $0x58] sm:$0xff] %vm1175_vm0, %v7612_v20 }
  0xe9   : > { %1188 = vst.msk [vmem:[#allocation2 + $0x60] sm:$0xff] %vm1175_vm0, %v7612_v20  ;;  %1189 = vst.msk [vmem:[#allocation2 + $0x68] sm:$0xff] %vm1175_vm0, %v7612_v20 }
  0xea   : > { %1190 = vst.msk [vmem:[#allocation2 + $0x70] sm:$0xff] %vm1175_vm0, %v7612_v20  ;;  %1191 = vst.msk [vmem:[#allocation2 + $0x78] sm:$0xff] %vm1175_vm0, %v7612_v20 }
  0xeb   : > { %1192 = vst.msk [vmem:[#allocation2 + $0x80] sm:$0xff] %vm1175_vm0, %v7612_v20  ;;  %1193 = vst.msk [vmem:[#allocation2 + $0x88] sm:$0xff] %vm1175_vm0, %v7612_v20 }
  0xec   : > { %1194 = vst.msk [vmem:[#allocation2 + $0x90] sm:$0xff] %vm1175_vm0, %v7612_v20  ;;  %1195 = vst.msk [vmem:[#allocation2 + $0x98] sm:$0xff] %vm1175_vm0, %v7612_v20 }
  0xed   : > { %1196 = vst.msk [vmem:[#allocation2 + $0xa0] sm:$0xff] %vm1175_vm0, %v7612_v20  ;;  %1197 = vst.msk [vmem:[#allocation2 + $0xa8] sm:$0xff] %vm1175_vm0, %v7612_v20 }
  0xee   : > { %1198 = vst.msk [vmem:[#allocation2 + $0xb0] sm:$0xff] %vm1175_vm0, %v7612_v20  ;;  %1199 = vst.msk [vmem:[#allocation2 + $0xb8] sm:$0xff] %vm1175_vm0, %v7612_v20 }
  0xef   : > { %1200 = vst.msk [vmem:[#allocation2 + $0xc0] sm:$0xff] %vm1175_vm0, %v7612_v20  ;;  %1201 = vst.msk [vmem:[#allocation2 + $0xc8] sm:$0xff] %vm1175_vm0, %v7612_v20 }
  0xf0   : > { %1202 = vst.msk [vmem:[#allocation2 + $0xd0] sm:$0xff] %vm1175_vm0, %v7612_v20  ;;  %1203 = vst.msk [vmem:[#allocation2 + $0xd8] sm:$0xff] %vm1175_vm0, %v7612_v20 }
  0xf1   : > { %1204 = vst.msk [vmem:[#allocation2 + $0xe0] sm:$0xff] %vm1175_vm0, %v7612_v20  ;;  %1205 = vst.msk [vmem:[#allocation2 + $0xe8] sm:$0xff] %vm1175_vm0, %v7612_v20 }
  0xf2   : > { %1206 = vst.msk [vmem:[#allocation2 + $0xf0] sm:$0xff] %vm1175_vm0, %v7612_v20  ;;  %1207 = vst.msk [vmem:[#allocation2 + $0xf8] sm:$0xff] %vm1175_vm0, %v7612_v20 }
  0xf3   : > { %1208 = vst.msk [vmem:[#allocation2 + $0x100] sm:$0xff] %vm1175_vm0, %v7612_v20  ;;  %1209 = vst.msk [vmem:[#allocation2 + $0x108] sm:$0xff] %vm1175_vm0, %v7612_v20 }
  0xf4   : > { %1210 = vst.msk [vmem:[#allocation2 + $0x110] sm:$0xff] %vm1175_vm0, %v7612_v20  ;;  %1211 = vst.msk [vmem:[#allocation2 + $0x118] sm:$0xff] %vm1175_vm0, %v7612_v20 }
  0xf5   : > { %1212 = vst.msk [vmem:[#allocation2 + $0x120] sm:$0xff] %vm1175_vm0, %v7612_v20  ;;  %1213 = vst.msk [vmem:[#allocation2 + $0x128] sm:$0xff] %vm1175_vm0, %v7612_v20 }
  0xf6   : > { %1214 = vst.msk [vmem:[#allocation2 + $0x130] sm:$0xff] %vm1175_vm0, %v7612_v20  ;;  %1215 = vst.msk [vmem:[#allocation2 + $0x138] sm:$0xff] %vm1175_vm0, %v7612_v20 }
  0xf7   : > { %1216 = vst.msk [vmem:[#allocation2 + $0x140] sm:$0xff] %vm1175_vm0, %v7612_v20  ;;  %1217 = vst.msk [vmem:[#allocation2 + $0x148] sm:$0xff] %vm1175_vm0, %v7612_v20 }
  0xf8   : > { %1218 = vst.msk [vmem:[#allocation2 + $0x150] sm:$0xff] %vm1175_vm0, %v7612_v20  ;;  %1219 = vst.msk [vmem:[#allocation2 + $0x158] sm:$0xff] %vm1175_vm0, %v7612_v20 }
  0xf9   : > { %1220 = vst.msk [vmem:[#allocation2 + $0x160] sm:$0xff] %vm1175_vm0, %v7612_v20  ;;  %1221 = vst.msk [vmem:[#allocation2 + $0x168] sm:$0xff] %vm1175_vm0, %v7612_v20 }
  0xfa   : > { %1222 = vst.msk [vmem:[#allocation2 + $0x170] sm:$0xff] %vm1175_vm0, %v7612_v20  ;;  %1223 = vst.msk [vmem:[#allocation2 + $0x178] sm:$0xff] %vm1175_vm0, %v7612_v20 }
  0xfb   : > { %1224 = vst.msk [vmem:[#allocation2 + $0x180] sm:$0xff] %vm1175_vm0, %v7612_v20  ;;  %1225 = vst.msk [vmem:[#allocation2 + $0x188] sm:$0xff] %vm1175_vm0, %v7612_v20 }
  0xfc   : > { %1226 = vst.msk [vmem:[#allocation2 + $0x190] sm:$0xff] %vm1175_vm0, %v7612_v20  ;;  %1227 = vst.msk [vmem:[#allocation2 + $0x198] sm:$0xff] %vm1175_vm0, %v7612_v20 }
  0xfd   : > { %1228 = vst.msk [vmem:[#allocation2 + $0x1a0] sm:$0xff] %vm1175_vm0, %v7612_v20  ;;  %1229 = vst.msk [vmem:[#allocation2 + $0x1a8] sm:$0xff] %vm1175_vm0, %v7612_v20 }
  0xfe   : > { %1230 = vst.msk [vmem:[#allocation2 + $0x1b0] sm:$0xff] %vm1175_vm0, %v7612_v20  ;;  %1231 = vst.msk [vmem:[#allocation2 + $0x1b8] sm:$0xff] %vm1175_vm0, %v7612_v20 }
  0xff   : > { %1232 = vst.msk [vmem:[#allocation2 + $0x1c0] sm:$0xff] %vm1175_vm0, %v7612_v20  ;;  %1233 = vst.msk [vmem:[#allocation2 + $0x1c8] sm:$0xff] %vm1175_vm0, %v7612_v20 }
 0x100   : > { %1234 = vst.msk [vmem:[#allocation2 + $0x1d0] sm:$0xff] %vm1175_vm0, %v7612_v20  ;;  %1235 = vst.msk [vmem:[#allocation2 + $0x1d8] sm:$0xff] %vm1175_vm0, %v7612_v20 }
 0x101   : > { %1236 = vst.msk [vmem:[#allocation2 + $0x1e0] sm:$0xff] %vm1175_vm0, %v7612_v20  ;;  %1237 = vst.msk [vmem:[#allocation2 + $0x1e8] sm:$0xff] %vm1175_vm0, %v7612_v20 }
 0x102   : > { %1238 = vst.msk [vmem:[#allocation2 + $0x1f0] sm:$0xff] %vm1175_vm0, %v7612_v20  ;;  %1239 = vst.msk [vmem:[#allocation2 + $0x1f8] sm:$0xff] %vm1175_vm0, %v7612_v20 }
 0x103   : > { %1240 = vst.msk [vmem:[#allocation3] sm:$0xff] %vm1175_vm0, %v7613_v21  ;;  %1241 = vst.msk [vmem:[#allocation3 + $0x8] sm:$0xff] %vm1175_vm0, %v7613_v21 }
 0x104   : > { %1242 = vst.msk [vmem:[#allocation3 + $0x10] sm:$0xff] %vm1175_vm0, %v7613_v21  ;;  %1243 = vst.msk [vmem:[#allocation3 + $0x18] sm:$0xff] %vm1175_vm0, %v7613_v21 }
 0x105   : > { %1244 = vst.msk [vmem:[#allocation3 + $0x20] sm:$0xff] %vm1175_vm0, %v7613_v21  ;;  %1245 = vst.msk [vmem:[#allocation3 + $0x28] sm:$0xff] %vm1175_vm0, %v7613_v21 }
 0x106   : > { %1246 = vst.msk [vmem:[#allocation3 + $0x30] sm:$0xff] %vm1175_vm0, %v7613_v21  ;;  %1247 = vst.msk [vmem:[#allocation3 + $0x38] sm:$0xff] %vm1175_vm0, %v7613_v21 }
 0x107   : > { %1248 = vst.msk [vmem:[#allocation3 + $0x40] sm:$0xff] %vm1175_vm0, %v7613_v21  ;;  %1249 = vst.msk [vmem:[#allocation3 + $0x48] sm:$0xff] %vm1175_vm0, %v7613_v21 }
 0x108   : > { %1250 = vst.msk [vmem:[#allocation3 + $0x50] sm:$0xff] %vm1175_vm0, %v7613_v21  ;;  %1251 = vst.msk [vmem:[#allocation3 + $0x58] sm:$0xff] %vm1175_vm0, %v7613_v21 }
 0x109   : > { %1252 = vst.msk [vmem:[#allocation3 + $0x60] sm:$0xff] %vm1175_vm0, %v7613_v21  ;;  %1253 = vst.msk [vmem:[#allocation3 + $0x68] sm:$0xff] %vm1175_vm0, %v7613_v21 }
 0x10a   : > { %1254 = vst.msk [vmem:[#allocation3 + $0x70] sm:$0xff] %vm1175_vm0, %v7613_v21  ;;  %1255 = vst.msk [vmem:[#allocation3 + $0x78] sm:$0xff] %vm1175_vm0, %v7613_v21 }
 0x10b   : > { %1256 = vst.msk [vmem:[#allocation3 + $0x80] sm:$0xff] %vm1175_vm0, %v7613_v21  ;;  %1257 = vst.msk [vmem:[#allocation3 + $0x88] sm:$0xff] %vm1175_vm0, %v7613_v21 }
 0x10c   : > { %1258 = vst.msk [vmem:[#allocation3 + $0x90] sm:$0xff] %vm1175_vm0, %v7613_v21  ;;  %1259 = vst.msk [vmem:[#allocation3 + $0x98] sm:$0xff] %vm1175_vm0, %v7613_v21 }
 0x10d   : > { %1260 = vst.msk [vmem:[#allocation3 + $0xa0] sm:$0xff] %vm1175_vm0, %v7613_v21  ;;  %1261 = vst.msk [vmem:[#allocation3 + $0xa8] sm:$0xff] %vm1175_vm0, %v7613_v21 }
 0x10e   : > { %1262 = vst.msk [vmem:[#allocation3 + $0xb0] sm:$0xff] %vm1175_vm0, %v7613_v21  ;;  %1263 = vst.msk [vmem:[#allocation3 + $0xb8] sm:$0xff] %vm1175_vm0, %v7613_v21 }
 0x10f   : > { %1264 = vst.msk [vmem:[#allocation3 + $0xc0] sm:$0xff] %vm1175_vm0, %v7613_v21  ;;  %1265 = vst.msk [vmem:[#allocation3 + $0xc8] sm:$0xff] %vm1175_vm0, %v7613_v21 }
 0x110   : > { %1266 = vst.msk [vmem:[#allocation3 + $0xd0] sm:$0xff] %vm1175_vm0, %v7613_v21  ;;  %1267 = vst.msk [vmem:[#allocation3 + $0xd8] sm:$0xff] %vm1175_vm0, %v7613_v21 }
 0x111   : > { %1268 = vst.msk [vmem:[#allocation3 + $0xe0] sm:$0xff] %vm1175_vm0, %v7613_v21  ;;  %1269 = vst.msk [vmem:[#allocation3 + $0xe8] sm:$0xff] %vm1175_vm0, %v7613_v21 }
 0x112   : > { %1270 = vst.msk [vmem:[#allocation3 + $0xf0] sm:$0xff] %vm1175_vm0, %v7613_v21  ;;  %1271 = vst.msk [vmem:[#allocation3 + $0xf8] sm:$0xff] %vm1175_vm0, %v7613_v21 }
 0x113   : > { %1272 = vst.msk [vmem:[#allocation3 + $0x100] sm:$0xff] %vm1175_vm0, %v7613_v21  ;;  %1273 = vst.msk [vmem:[#allocation3 + $0x108] sm:$0xff] %vm1175_vm0, %v7613_v21 }
 0x114   : > { %1274 = vst.msk [vmem:[#allocation3 + $0x110] sm:$0xff] %vm1175_vm0, %v7613_v21  ;;  %1275 = vst.msk [vmem:[#allocation3 + $0x118] sm:$0xff] %vm1175_vm0, %v7613_v21 }
 0x115   : > { %1276 = vst.msk [vmem:[#allocation3 + $0x120] sm:$0xff] %vm1175_vm0, %v7613_v21  ;;  %1277 = vst.msk [vmem:[#allocation3 + $0x128] sm:$0xff] %vm1175_vm0, %v7613_v21 }
 0x116   : > { %1278 = vst.msk [vmem:[#allocation3 + $0x130] sm:$0xff] %vm1175_vm0, %v7613_v21  ;;  %1279 = vst.msk [vmem:[#allocation3 + $0x138] sm:$0xff] %vm1175_vm0, %v7613_v21 }
 0x117   : > { %1280 = vst.msk [vmem:[#allocation3 + $0x140] sm:$0xff] %vm1175_vm0, %v7613_v21  ;;  %1281 = vst.msk [vmem:[#allocation3 + $0x148] sm:$0xff] %vm1175_vm0, %v7613_v21 }
 0x118   : > { %1282 = vst.msk [vmem:[#allocation3 + $0x150] sm:$0xff] %vm1175_vm0, %v7613_v21  ;;  %1283 = vst.msk [vmem:[#allocation3 + $0x158] sm:$0xff] %vm1175_vm0, %v7613_v21 }
 0x119   : > { %1284 = vst.msk [vmem:[#allocation3 + $0x160] sm:$0xff] %vm1175_vm0, %v7613_v21  ;;  %1285 = vst.msk [vmem:[#allocation3 + $0x168] sm:$0xff] %vm1175_vm0, %v7613_v21 }
 0x11a   : > { %1286 = vst.msk [vmem:[#allocation3 + $0x170] sm:$0xff] %vm1175_vm0, %v7613_v21  ;;  %1287 = vst.msk [vmem:[#allocation3 + $0x178] sm:$0xff] %vm1175_vm0, %v7613_v21 }
 0x11b   : > { %1288 = vst.msk [vmem:[#allocation3 + $0x180] sm:$0xff] %vm1175_vm0, %v7613_v21  ;;  %1289 = vst.msk [vmem:[#allocation3 + $0x188] sm:$0xff] %vm1175_vm0, %v7613_v21 }
 0x11c   : > { %1290 = vst.msk [vmem:[#allocation3 + $0x190] sm:$0xff] %vm1175_vm0, %v7613_v21  ;;  %1291 = vst.msk [vmem:[#allocation3 + $0x198] sm:$0xff] %vm1175_vm0, %v7613_v21 }
 0x11d   : > { %1292 = vst.msk [vmem:[#allocation3 + $0x1a0] sm:$0xff] %vm1175_vm0, %v7613_v21  ;;  %1293 = vst.msk [vmem:[#allocation3 + $0x1a8] sm:$0xff] %vm1175_vm0, %v7613_v21 }
 0x11e   : > { %1294 = vst.msk [vmem:[#allocation3 + $0x1b0] sm:$0xff] %vm1175_vm0, %v7613_v21  ;;  %1295 = vst.msk [vmem:[#allocation3 + $0x1b8] sm:$0xff] %vm1175_vm0, %v7613_v21 }
 0x11f   : > { %1296 = vst.msk [vmem:[#allocation3 + $0x1c0] sm:$0xff] %vm1175_vm0, %v7613_v21  ;;  %1297 = vst.msk [vmem:[#allocation3 + $0x1c8] sm:$0xff] %vm1175_vm0, %v7613_v21 }
 0x120   : > { %1298 = vst.msk [vmem:[#allocation3 + $0x1d0] sm:$0xff] %vm1175_vm0, %v7613_v21  ;;  %1299 = vst.msk [vmem:[#allocation3 + $0x1d8] sm:$0xff] %vm1175_vm0, %v7613_v21 }
 0x121   : > { %1300 = vst.msk [vmem:[#allocation3 + $0x1e0] sm:$0xff] %vm1175_vm0, %v7613_v21  ;;  %1301 = vst.msk [vmem:[#allocation3 + $0x1e8] sm:$0xff] %vm1175_vm0, %v7613_v21 }
 0x122   : > { %1302 = vst.msk [vmem:[#allocation3 + $0x1f0] sm:$0xff] %vm1175_vm0, %v7613_v21  ;;  %1303 = vst.msk [vmem:[#allocation3 + $0x1f8] sm:$0xff] %vm1175_vm0, %v7613_v21 }
 0x123   : > { %1305 = vst.msk [vmem:[#allocation4] sm:$0xff] %vm1304_vm1, %v7613_v21  ;;  %1306 = vst.msk [vmem:[#allocation4 + $0x8] sm:$0xff] %vm1304_vm1, %v7613_v21 }
 0x124   : > { %1307 = vst.msk [vmem:[#allocation4 + $0x10] sm:$0xff] %vm1304_vm1, %v7613_v21  ;;  %1308 = vst.msk [vmem:[#allocation4 + $0x18] sm:$0xff] %vm1304_vm1, %v7613_v21 }
 0x125   : > { %1309 = vst.msk [vmem:[#allocation4 + $0x20] sm:$0xff] %vm1304_vm1, %v7613_v21  ;;  %1310 = vst.msk [vmem:[#allocation4 + $0x28] sm:$0xff] %vm1304_vm1, %v7613_v21 }
 0x126   : > { %1311 = vst.msk [vmem:[#allocation4 + $0x30] sm:$0xff] %vm1304_vm1, %v7613_v21  ;;  %1312 = vst.msk [vmem:[#allocation4 + $0x38] sm:$0xff] %vm1304_vm1, %v7613_v21 }
 0x127   : > { %1313 = vst.msk [vmem:[#allocation4 + $0x40] sm:$0xff] %vm1304_vm1, %v7613_v21  ;;  %1314 = vst.msk [vmem:[#allocation4 + $0x48] sm:$0xff] %vm1304_vm1, %v7613_v21 }
 0x128   : > { %1315 = vst.msk [vmem:[#allocation4 + $0x50] sm:$0xff] %vm1304_vm1, %v7613_v21  ;;  %1316 = vst.msk [vmem:[#allocation4 + $0x58] sm:$0xff] %vm1304_vm1, %v7613_v21 }
 0x129   : > { %1317 = vst.msk [vmem:[#allocation4 + $0x60] sm:$0xff] %vm1304_vm1, %v7613_v21  ;;  %1318 = vst.msk [vmem:[#allocation4 + $0x68] sm:$0xff] %vm1304_vm1, %v7613_v21 }
 0x12a   : > { %1319 = vst.msk [vmem:[#allocation4 + $0x70] sm:$0xff] %vm1304_vm1, %v7613_v21  ;;  %1320 = vst.msk [vmem:[#allocation4 + $0x78] sm:$0xff] %vm1304_vm1, %v7613_v21 }
 0x12b   : > { %1321 = vst.msk [vmem:[#allocation4 + $0x80] sm:$0xff] %vm1304_vm1, %v7613_v21  ;;  %1322 = vst.msk [vmem:[#allocation4 + $0x88] sm:$0xff] %vm1304_vm1, %v7613_v21 }
 0x12c   : > { %1323 = vst.msk [vmem:[#allocation4 + $0x90] sm:$0xff] %vm1304_vm1, %v7613_v21  ;;  %1324 = vst.msk [vmem:[#allocation4 + $0x98] sm:$0xff] %vm1304_vm1, %v7613_v21 }
 0x12d   : > { %1325 = vst.msk [vmem:[#allocation4 + $0xa0] sm:$0xff] %vm1304_vm1, %v7613_v21  ;;  %1326 = vst.msk [vmem:[#allocation4 + $0xa8] sm:$0xff] %vm1304_vm1, %v7613_v21 }
 0x12e   : > { %1327 = vst.msk [vmem:[#allocation4 + $0xb0] sm:$0xff] %vm1304_vm1, %v7613_v21  ;;  %1328 = vst.msk [vmem:[#allocation4 + $0xb8] sm:$0xff] %vm1304_vm1, %v7613_v21 }
 0x12f   : > { %1329 = vst.msk [vmem:[#allocation4 + $0xc0] sm:$0xff] %vm1304_vm1, %v7613_v21  ;;  %1330 = vst.msk [vmem:[#allocation4 + $0xc8] sm:$0xff] %vm1304_vm1, %v7613_v21 }
 0x130   : > { %1331 = vst.msk [vmem:[#allocation4 + $0xd0] sm:$0xff] %vm1304_vm1, %v7613_v21  ;;  %1332 = vst.msk [vmem:[#allocation4 + $0xd8] sm:$0xff] %vm1304_vm1, %v7613_v21 }
 0x131   : > { %1333 = vst.msk [vmem:[#allocation4 + $0xe0] sm:$0xff] %vm1304_vm1, %v7613_v21  ;;  %1334 = vst.msk [vmem:[#allocation4 + $0xe8] sm:$0xff] %vm1304_vm1, %v7613_v21 }
 0x132   : > { %1335 = vst.msk [vmem:[#allocation4 + $0xf0] sm:$0xff] %vm1304_vm1, %v7613_v21  ;;  %1336 = vst.msk [vmem:[#allocation4 + $0xf8] sm:$0xff] %vm1304_vm1, %v7613_v21 }
 0x133   : > { %1337 = vst.msk [vmem:[#allocation4 + $0x100] sm:$0xff] %vm1304_vm1, %v7613_v21  ;;  %1338 = vst.msk [vmem:[#allocation4 + $0x108] sm:$0xff] %vm1304_vm1, %v7613_v21 }
 0x134   : > { %1339 = vst.msk [vmem:[#allocation4 + $0x110] sm:$0xff] %vm1304_vm1, %v7613_v21  ;;  %1340 = vst.msk [vmem:[#allocation4 + $0x118] sm:$0xff] %vm1304_vm1, %v7613_v21 }
 0x135   : > { %1341 = vst.msk [vmem:[#allocation4 + $0x120] sm:$0xff] %vm1304_vm1, %v7613_v21  ;;  %1342 = vst.msk [vmem:[#allocation4 + $0x128] sm:$0xff] %vm1304_vm1, %v7613_v21 }
 0x136   : > { %1343 = vst.msk [vmem:[#allocation4 + $0x130] sm:$0xff] %vm1304_vm1, %v7613_v21  ;;  %1344 = vst.msk [vmem:[#allocation4 + $0x138] sm:$0xff] %vm1304_vm1, %v7613_v21 }
 0x137   : > { %1345 = vst.msk [vmem:[#allocation4 + $0x140] sm:$0xff] %vm1304_vm1, %v7613_v21  ;;  %1346 = vst.msk [vmem:[#allocation4 + $0x148] sm:$0xff] %vm1304_vm1, %v7613_v21 }
 0x138   : > { %1347 = vst.msk [vmem:[#allocation4 + $0x150] sm:$0xff] %vm1304_vm1, %v7613_v21  ;;  %1348 = vst.msk [vmem:[#allocation4 + $0x158] sm:$0xff] %vm1304_vm1, %v7613_v21 }
 0x139   : > { %1349 = vst.msk [vmem:[#allocation4 + $0x160] sm:$0xff] %vm1304_vm1, %v7613_v21  ;;  %1350 = vst.msk [vmem:[#allocation4 + $0x168] sm:$0xff] %vm1304_vm1, %v7613_v21 }
 0x13a   : > { %1351 = vst.msk [vmem:[#allocation4 + $0x170] sm:$0xff] %vm1304_vm1, %v7613_v21  ;;  %1352 = vst.msk [vmem:[#allocation4 + $0x178] sm:$0xff] %vm1304_vm1, %v7613_v21 }
 0x13b   : > { %1353 = vst.msk [vmem:[#allocation4 + $0x180] sm:$0xff] %vm1304_vm1, %v7613_v21  ;;  %1354 = vst.msk [vmem:[#allocation4 + $0x188] sm:$0xff] %vm1304_vm1, %v7613_v21 }
 0x13c   : > { %1355 = vst.msk [vmem:[#allocation4 + $0x190] sm:$0xff] %vm1304_vm1, %v7613_v21  ;;  %1356 = vst.msk [vmem:[#allocation4 + $0x198] sm:$0xff] %vm1304_vm1, %v7613_v21 }
 0x13d   : > { %1357 = vst.msk [vmem:[#allocation4 + $0x1a0] sm:$0xff] %vm1304_vm1, %v7613_v21  ;;  %1358 = vst.msk [vmem:[#allocation4 + $0x1a8] sm:$0xff] %vm1304_vm1, %v7613_v21 }
 0x13e   : > { %1359 = vst.msk [vmem:[#allocation4 + $0x1b0] sm:$0xff] %vm1304_vm1, %v7613_v21  ;;  %1360 = vst.msk [vmem:[#allocation4 + $0x1b8] sm:$0xff] %vm1304_vm1, %v7613_v21 }
 0x13f   : > { %1361 = vst.msk [vmem:[#allocation4 + $0x1c0] sm:$0xff] %vm1304_vm1, %v7613_v21  ;;  %1362 = vst.msk [vmem:[#allocation4 + $0x1c8] sm:$0xff] %vm1304_vm1, %v7613_v21 }
 0x140   : > { %1363 = vst.msk [vmem:[#allocation4 + $0x1d0] sm:$0xff] %vm1304_vm1, %v7613_v21  ;;  %1364 = vst.msk [vmem:[#allocation4 + $0x1d8] sm:$0xff] %vm1304_vm1, %v7613_v21 }
 0x141   : > { %1365 = vst.msk [vmem:[#allocation4 + $0x1e0] sm:$0xff] %vm1304_vm1, %v7613_v21  ;;  %1366 = vst.msk [vmem:[#allocation4 + $0x1e8] sm:$0xff] %vm1304_vm1, %v7613_v21 }
 0x142   : > { %1367 = vst.msk [vmem:[#allocation4 + $0x1f0] sm:$0xff] %vm1304_vm1, %v7613_v21  ;;  %1368 = vst.msk [vmem:[#allocation4 + $0x1f8] sm:$0xff] %vm1304_vm1, %v7613_v21 }
 0x143 PF: > { %s11301_s2 = sld [smem:[#allocation20_spill]] }
 0x144   : > { %s11302_s15 = sld [smem:[#allocation19_spill]] }
 0x149   : > { %s1369_s3 = sld [smem:[#allocation6 + %s11301_s2]] }
 0x14f   : > { %p6289_p8 = scmp.ge.s32.totalorder %s11302_s15, %s1369_s3 }
 0x151   : > { %1373 = sbr.rel (%p6289_p8) target bundleno = 2246 (0x8c6), region = 208 }
 0x156   : > { %v1408_v22 = vld [vmem:[%s8177_s7 + $0x10] sm:$0xff]  ;;  %v1406_v23 = vld [vmem:[%s8177_s7] sm:$0xff]  ;;  %v7614_v24 = vmov 0   ;;  %v1409_v25 = vld [vmem:[%s8177_s7 + $0x18] sm:$0xff] }
 0x157   : > { %7023 = vset.pattern.permute.xlu1 %v7614_v24  ;;  %7022 = vset.pattern.permute.xlu0 %v7614_v24  ;;  %v1407_v26 = vld [vmem:[%s8177_s7 + $0x8] sm:$0xff]  ;;  %v1410_v28 = vld [vmem:[%s8177_s7 + $0x20] sm:$0xff]  ;;  %v1413_v29 = vld [vmem:[%s8177_s7 + $0x38] sm:$0xff] }
 0x158   : > { %1435 = vperm.xlu1 %7023, %v1408_v22   ;;  %1425 = vperm.xlu0 %7022, %v1406_v23   ;;  %v1411_v27 = vld [vmem:[%s8177_s7 + $0x28] sm:$0xff]  ;;  %v1412_v30 = vld [vmem:[%s8177_s7 + $0x30] sm:$0xff]  ;;  %v1414_v32 = vld [vmem:[%s8177_s7 + $0x40] sm:$0xff] }
 0x159   : > { %v1415_v31 = vld [vmem:[%s8177_s7 + $0x48] sm:$0xff]  ;;  %v1417_v33 = vld [vmem:[%s8177_s7 + $0x58] sm:$0xff]  ;;  %v1416_v34 = vld [vmem:[%s8177_s7 + $0x50] sm:$0xff] }
 0x15a   : > { %v1419_v35 = vld [vmem:[%s8177_s7 + $0x68] sm:$0xff]  ;;  %v1418_v36 = vld [vmem:[%s8177_s7 + $0x60] sm:$0xff]  ;;  %v1421_v37 = vld [vmem:[%s8177_s7 + $0x78] sm:$0xff] }
 0x15b   : > { %v1420_v38 = vld [vmem:[%s8177_s7 + $0x70] sm:$0xff]  ;;  %v6308_v39 = vld [vmem:[%s8177_s7 + $0x88] sm:$0xff]  ;;  %v6307_v40 = vld [vmem:[%s8177_s7 + $0x80] sm:$0xff] }
 0x15c   : > { %1440 = vperm.xlu1 %7023, %v1409_v25   ;;  %1430 = vperm.xlu0 %7022, %v1407_v26   ;;  %v6310_v41 = vld [vmem:[%s8177_s7 + $0x98] sm:$0xff]  ;;  %v6309_v42 = vld [vmem:[%s8177_s7 + $0x90] sm:$0xff]  ;;  %v6312_v43 = vld [vmem:[%s8177_s7 + $0xa8] sm:$0xff] }
 0x15d   : > { %v6311_v44 = vld [vmem:[%s8177_s7 + $0xa0] sm:$0xff]  ;;  %v6314_v45 = vld [vmem:[%s8177_s7 + $0xb8] sm:$0xff]  ;;  %v6313_v46 = vld [vmem:[%s8177_s7 + $0xb0] sm:$0xff] }
 0x15e   : > { %v6316_v47 = vld [vmem:[%s8177_s7 + $0xc8] sm:$0xff]  ;;  %v6315_v48 = vld [vmem:[%s8177_s7 + $0xc0] sm:$0xff]  ;;  %v6318_v49 = vld [vmem:[%s8177_s7 + $0xd8] sm:$0xff] }
 0x15f   : > { %v6317_v50 = vld [vmem:[%s8177_s7 + $0xd0] sm:$0xff]  ;;  %v6320_v51 = vld [vmem:[%s8177_s7 + $0xe8] sm:$0xff]  ;;  %v6319_v52 = vld [vmem:[%s8177_s7 + $0xe0] sm:$0xff] }
 0x160   : > { %1450 = vperm.xlu1 %7023, %v1411_v27   ;;  %1445 = vperm.xlu0 %7022, %v1410_v28   ;;  %v6321_v53 = vld [vmem:[%s8177_s7 + $0xf0] sm:$0xff]  ;;  %v8602_v54 = vld [vmem:[%s8179_s9] ss:$0 sm:$0xff]  ;;  %v8616_v4 = vld [vmem:[%s8175_s19 + $0x8] sm:$0xff] }
 0x161   : > { %v8607_v59 = vld [vmem:[%s8175_s19] sm:$0xff]  ;;  %v8610_v62 = vld [vmem:[%s8175_s19 + $0x10] sm:$0xff]  ;;  %11304 = vst [vmem:[#allocation27_spill] sm:$0xff] %v8616_v4  ;;  %v8620_v6 = vld [vmem:[%s8175_s19 + $0x18] sm:$0xff]  ;;  %vm1391_vm4 = vcmp.gt.f32.partialorder %v8616_v4, 0.0 }
 0x162   : > { %11303 = vst [vmem:[#allocation26_spill] sm:$0xff] %v8607_v59  ;;  %vm11201_vm2 = vcmp.gt.f32.partialorder %v8607_v59, 0.0  ;;  %vm1392_vm3 = vcmp.gt.f32.partialorder %v8610_v62, 0.0  ;;  %v8631_v15 = vld [vmem:[%s8175_s19 + $0x20] sm:$0xff]  ;;  %vm1393_vm5 = vcmp.gt.f32.partialorder %v8620_v6, 0.0  ;;  %v8639_v18 = vld [vmem:[%s8175_s19 + $0x28] sm:$0xff] }
 0x163   : > { %11305 = vst [vmem:[#allocation28_spill] sm:$0xff] %v8631_v15  ;;  %vm1394_vm6 = vcmp.gt.f32.partialorder %v8631_v15, 0.0  ;;  %v8651_v27 = vld [vmem:[%s8175_s19 + $0x30] sm:$0xff]  ;;  %vm1395_vm7 = vcmp.gt.f32.partialorder %v8639_v18, 0.0 }
 0x164   : > { %1460 = vperm.xlu1 %7023, %v1413_v29   ;;  %1455 = vperm.xlu0 %7022, %v1412_v30   ;;  %11306 = vst [vmem:[#allocation29_spill] sm:$0xff] %v8651_v27  ;;  %v8659_v30 = vld [vmem:[%s8175_s19 + $0x38] sm:$0xff]  ;;  %vm1396_vm8 = vcmp.gt.f32.partialorder %v8651_v27, 0.0 }
 0x165   : > { %vm1397_vm9 = vcmp.gt.f32.partialorder %v8659_v30, 0.0 }
 0x168   : > { %1470 = vperm.xlu1 %7023, %v1415_v31   ;;  %1465 = vperm.xlu0 %7022, %v1414_v32  }
 0x16c   : > { %1480 = vperm.xlu1 %7023, %v1417_v33   ;;  %1475 = vperm.xlu0 %7022, %v1416_v34  }
 0x170   : > { %1490 = vperm.xlu1 %7023, %v1419_v35   ;;  %1485 = vperm.xlu0 %7022, %v1418_v36  }
 0x174   : > { %1500 = vperm.xlu1 %7023, %v1421_v37   ;;  %1495 = vperm.xlu0 %7022, %v1420_v38  }
 0x178   : > { %2274 = vperm.xlu1 %7023, %v6308_v39   ;;  %2269 = vperm.xlu0 %7022, %v6307_v40   ;;  %v8671_v39 = vld [vmem:[%s8175_s19 + $0x40] sm:$0xff] }
 0x179   : > { %11307 = vst [vmem:[#allocation30_spill] sm:$0xff] %v8671_v39  ;;  %vm1398_vm10 = vcmp.gt.f32.partialorder %v8671_v39, 0.0 }
 0x17c   : > { %2284 = vperm.xlu1 %7023, %v6310_v41   ;;  %2279 = vperm.xlu0 %7022, %v6309_v42   ;;  %v8679_v42 = vld [vmem:[%s8175_s19 + $0x48] sm:$0xff] }
 0x17d   : > { %vm1399_vm11 = vcmp.gt.f32.partialorder %v8679_v42, 0.0 }
 0x180   : > { %2294 = vperm.xlu1 %7023, %v6312_v43   ;;  %2289 = vperm.xlu0 %7022, %v6311_v44  }
 0x184   : > { %2304 = vperm.xlu1 %7023, %v6314_v45   ;;  %2299 = vperm.xlu0 %7022, %v6313_v46  }
 0x188   : > { %2314 = vperm.xlu1 %7023, %v6316_v47   ;;  %2309 = vperm.xlu0 %7022, %v6315_v48  }
 0x18c   : > { %2324 = vperm.xlu1 %7023, %v6318_v49   ;;  %2319 = vperm.xlu0 %7022, %v6317_v50  }
 0x190   : > { %2334 = vperm.xlu1 %7023, %v6320_v51   ;;  %2329 = vperm.xlu0 %7022, %v6319_v52   ;;  %v8691_v51 = vld [vmem:[%s8175_s19 + $0x50] sm:$0xff] }
 0x191   : > { %11308 = vst [vmem:[#allocation31_spill] sm:$0xff] %v8691_v51  ;;  %vm1400_vm12 = vcmp.gt.f32.partialorder %v8691_v51, 0.0 }
 0x194   : > { %2339 = vperm.xlu0 %7022, %v6321_v53  }
 0x1d3   : > { %v1436_v55 = vpop.permute.xlu1 %1435  ;;  %v1426_v56 = vpop.permute.xlu0 %1425 }
 0x1d4   : > { %v1511_v57 = vadd.f32 %v8602_v54, %v1436_v55  ;;  %v1509_v58 = vadd.f32 %v8602_v54, %v1426_v56  ;;  %v8699_v55 = vld [vmem:[%s8175_s19 + $0x58] sm:$0xff] }
 0x1d5   : > { %vm1401_vm13 = vcmp.gt.f32.partialorder %v8699_v55, 0.0 }
 0x1d6   : > { %v1527_v60 = vmul.f32 0.2, %v1511_v57  ;;  %v1525_v61 = vmul.f32 0.2, %v1509_v58 }
 0x1d7   : > { %v1441_v63 = vpop.permute.xlu1 %1440  ;;  %v1431_v0 = vpop.permute.xlu0 %1430 }
 0x1d8   : > { %v1512_v1 = vadd.f32 %v8602_v54, %v1441_v63  ;;  %v1510_v2 = vadd.f32 %v8602_v54, %v1431_v0  ;;  %v1541_v3 = vmax.f32 %v1509_v58, %v1525_v61  ;;  %v1543_v5 = vmax.f32 %v1511_v57, %v1527_v60 }
 0x1da   : > { %v1528_v7 = vmul.f32 0.2, %v1512_v1  ;;  %v1526_v8 = vmul.f32 0.2, %v1510_v2  ;;  %v8624_v9 = vsel %vm11201_vm2, %v1541_v3, -1e+09 }
 0x1db   : > { %v1451_v10 = vpop.permute.xlu1 %1450  ;;  %v1446_v11 = vpop.permute.xlu0 %1445  ;;  %1589 = vmax.xlane.f32.xlu0 %v8624_v9  ;;  %v8635_v16 = vsel %vm1392_vm3, %v1543_v5, -1e+09 }
 0x1dc   : > { %v1514_v12 = vadd.f32 %v8602_v54, %v1451_v10  ;;  %v1513_v13 = vadd.f32 %v8602_v54, %v1446_v11  ;;  %v1542_v14 = vmax.f32 %v1510_v2, %v1526_v8  ;;  %v1544_v17 = vmax.f32 %v1512_v1, %v1528_v7  ;;  %v8711_v2 = vld [vmem:[%s8175_s19 + $0x60] sm:$0xff]  ;;  %v8719_v7 = vld [vmem:[%s8175_s19 + $0x68] sm:$0xff] }
 0x1dd   : > { %11309 = vst [vmem:[#allocation32_spill] sm:$0xff] %v8711_v2  ;;  %11310 = vst [vmem:[#allocation33_spill] sm:$0xff] %v8719_v7  ;;  %vm11208_vm14 = vcmp.gt.f32.partialorder %v8711_v2, 0.0  ;;  %vm11207_vm15 = vcmp.gt.f32.partialorder %v8719_v7, 0.0 }
 0x1de   : > { %v1530_v19 = vmul.f32 0.2, %v1514_v12  ;;  %v1529_v20 = vmul.f32 0.2, %v1513_v13  ;;  %v8643_v21 = vsel %vm1391_vm4, %v1542_v14, -1e+09 }
 0x1df   : > { %v1461_v22 = vpop.permute.xlu1 %1460  ;;  %v1456_v23 = vpop.permute.xlu0 %1455  ;;  %1591 = vmax.xlane.f32.xlu1 %v8643_v21  ;;  %1593 = vmax.xlane.f32.xlu0 %v8635_v16  ;;  %v8655_v28 = vsel %vm1393_vm5, %v1544_v17, -1e+09 }
 0x1e0   : > { %v1516_v24 = vadd.f32 %v8602_v54, %v1461_v22  ;;  %v1515_v25 = vadd.f32 %v8602_v54, %v1456_v23  ;;  %v1545_v26 = vmax.f32 %v1513_v13, %v1529_v20  ;;  %v1546_v29 = vmax.f32 %v1514_v12, %v1530_v19  ;;  %v8731_v20 = vld [vmem:[%s8175_s19 + $0x70] sm:$0xff]  ;;  %v8734_v22 = vld [vmem:[%s8179_s9 + $0x1] ss:$0 sm:$0xff] }
 0x1e1   : > { %11312 = vst [vmem:[#allocation35_spill] sm:$0xff] %v8731_v20  ;;  %vm11144_vm0 = vcmp.gt.f32.partialorder %v8731_v20, 0.0  ;;  %v8888_v20 = vld [vmem:[#allocation2 + $0x50] sm:$0xff] }
 0x1e2   : > { %v1532_v31 = vmul.f32 0.2, %v1516_v24  ;;  %v1531_v32 = vmul.f32 0.2, %v1515_v25  ;;  %v8663_v33 = vsel %vm1394_vm6, %v1545_v26, -1e+09 }
 0x1e3   : > { %v1471_v34 = vpop.permute.xlu1 %1470  ;;  %v1466_v35 = vpop.permute.xlu0 %1465  ;;  %1597 = vmax.xlane.f32.xlu1 %v8663_v33  ;;  %1595 = vmax.xlane.f32.xlu0 %v8655_v28  ;;  %v8675_v40 = vsel %vm1395_vm7, %v1546_v29, -1e+09 }
 0x1e4   : > { %v1518_v36 = vadd.f32 %v8602_v54, %v1471_v34  ;;  %v1517_v37 = vadd.f32 %v8602_v54, %v1466_v35  ;;  %v1547_v38 = vmax.f32 %v1515_v25, %v1531_v32  ;;  %v1548_v41 = vmax.f32 %v1516_v24, %v1532_v31  ;;  %v8742_v25 = vld [vmem:[%s8175_s19 + $0x78] sm:$0xff] }
 0x1e5   : > { %11313 = vst [vmem:[#allocation36_spill] sm:$0xff] %v8742_v25  ;;  %vm11261_vm1 = vcmp.gt.f32.partialorder %v8742_v25, 0.0 }
 0x1e6   : > { %v1534_v43 = vmul.f32 0.2, %v1518_v36  ;;  %v1533_v44 = vmul.f32 0.2, %v1517_v37  ;;  %v8683_v45 = vsel %vm1396_vm8, %v1547_v38, -1e+09 }
 0x1e7   : > { %v1481_v46 = vpop.permute.xlu1 %1480  ;;  %v1476_v47 = vpop.permute.xlu0 %1475  ;;  %1601 = vmax.xlane.f32.xlu1 %v8683_v45  ;;  %1599 = vmax.xlane.f32.xlu0 %v8675_v40  ;;  %v8695_v52 = vsel %vm1397_vm9, %v1548_v41, -1e+09 }
 0x1e8   : > { %v1520_v48 = vadd.f32 %v8602_v54, %v1481_v46  ;;  %v1519_v49 = vadd.f32 %v8602_v54, %v1476_v47  ;;  %v1549_v50 = vmax.f32 %v1517_v37, %v1533_v44  ;;  %v1550_v53 = vmax.f32 %v1518_v36, %v1534_v43 }
 0x1ea   : > { %v1536_v56 = vmul.f32 0.2, %v1520_v48  ;;  %v1535_v57 = vmul.f32 0.2, %v1519_v49  ;;  %v8703_v58 = vsel %vm1398_vm10, %v1549_v50, -1e+09 }
 0x1eb   : > { %v1491_v60 = vpop.permute.xlu1 %1490  ;;  %v1486_v61 = vpop.permute.xlu0 %1485  ;;  %1605 = vmax.xlane.f32.xlu1 %v8703_v58  ;;  %1603 = vmax.xlane.f32.xlu0 %v8695_v52  ;;  %v8715_v3 = vsel %vm1399_vm11, %v1550_v53, -1e+09 }
 0x1ec   : > { %v1522_v63 = vadd.f32 %v8602_v54, %v1491_v60  ;;  %v1521_v0 = vadd.f32 %v8602_v54, %v1486_v61  ;;  %v1551_v1 = vmax.f32 %v1519_v49, %v1535_v57  ;;  %v1552_v5 = vmax.f32 %v1520_v48, %v1536_v56 }
 0x1ee   : > { %v1538_v8 = vmul.f32 0.2, %v1522_v63  ;;  %v1537_v10 = vmul.f32 0.2, %v1521_v0  ;;  %v8723_v11 = vsel %vm1400_vm12, %v1551_v1, -1e+09 }
 0x1ef   : > { %11311 = vst [vmem:[#allocation34_spill] sm:$0xff] %v8723_v11  ;;  %v1501_v12 = vpop.permute.xlu1 %1500  ;;  %v1496_v13 = vpop.permute.xlu0 %1495  ;;  %1609 = vmax.xlane.f32.xlu1 %v8723_v11  ;;  %1607 = vmax.xlane.f32.xlu0 %v8715_v3  ;;  %v8738_v23 = vsel %vm1401_vm13, %v1552_v5, -1e+09 }
 0x1f0   : > { %v1524_v14 = vadd.f32 %v8602_v54, %v1501_v12  ;;  %v1523_v17 = vadd.f32 %v8602_v54, %v1496_v13  ;;  %v1553_v19 = vmax.f32 %v1521_v0, %v1537_v10  ;;  %v1554_v24 = vmax.f32 %v1522_v63, %v1538_v8 }
 0x1f2   : > { %v1540_v26 = vmul.f32 0.2, %v1524_v14  ;;  %v1539_v29 = vmul.f32 0.2, %v1523_v17  ;;  %v8746_v31 = vsel %vm11208_vm14, %v1553_v19, -1e+09 }
 0x1f3   : > { %11314 = vst [vmem:[#allocation37_spill] sm:$0xff] %v8746_v31  ;;  %v2275_v54 = vpop.permute.xlu1 %2274  ;;  %v2270_v32 = vpop.permute.xlu0 %2269  ;;  %1613 = vmax.xlane.f32.xlu1 %v8746_v31  ;;  %1611 = vmax.xlane.f32.xlu0 %v8738_v23  ;;  %v8755_v37 = vsel %vm11207_vm15, %v1554_v24, -1e+09 }
 0x1f4   : > { %v2354_v34 = vadd.f32 %v8734_v22, %v2275_v54  ;;  %v2353_v35 = vadd.f32 %v8734_v22, %v2270_v32  ;;  %v1555_v36 = vmax.f32 %v1523_v17, %v1539_v29  ;;  %v1556_v38 = vmax.f32 %v1524_v14, %v1540_v26 }
 0x1f6   : > { %v2370_v41 = vmul.f32 0.2, %v2354_v34  ;;  %v2369_v43 = vmul.f32 0.2, %v2353_v35  ;;  %v8760_v44 = vsel %vm11144_vm0, %v1555_v36, -1e+09 }
 0x1f7   : > { %11315 = vst [vmem:[#allocation38_spill] sm:$0xff] %v8760_v44  ;;  %v2285_v46 = vpop.permute.xlu1 %2284  ;;  %v2280_v47 = vpop.permute.xlu0 %2279  ;;  %1617 = vmax.xlane.f32.xlu1 %v8760_v44  ;;  %1615 = vmax.xlane.f32.xlu0 %v8755_v37  ;;  %v8767_v50 = vsel %vm11261_vm1, %v1556_v38, -1e+09 }
 0x1f8   : > { %v2355_v48 = vadd.f32 %v8734_v22, %v2280_v47  ;;  %v2386_v49 = vmax.f32 %v2354_v34, %v2370_v41  ;;  %v2356_v53 = vadd.f32 %v8734_v22, %v2285_v46  ;;  %v2385_v60 = vmax.f32 %v2353_v35, %v2369_v43 }
 0x1fa   : > { %v2371_v56 = vmul.f32 0.2, %v2355_v48  ;;  %v8772_v57 = vsel %vm1391_vm4, %v2386_v49, -1e+09  ;;  %v2372_v5 = vmul.f32 0.2, %v2356_v53 }
 0x1fb   : > { %11316 = vst [vmem:[#allocation39_spill] sm:$0xff] %v8772_v57  ;;  %v2295_v61 = vpop.permute.xlu1 %2294  ;;  %v2290_v63 = vpop.permute.xlu0 %2289  ;;  %2436 = vmax.xlane.f32.xlu1 %v8772_v57  ;;  %1619 = vmax.xlane.f32.xlu0 %v8767_v50  ;;  %v8780_v10 = vsel %vm11201_vm2, %v2385_v60, -1e+09 }
 0x1fc   : > { %v2357_v0 = vadd.f32 %v8734_v22, %v2290_v63  ;;  %v2358_v1 = vadd.f32 %v8734_v22, %v2295_v61  ;;  %v2387_v12 = vmax.f32 %v2355_v48, %v2371_v56  ;;  %v2388_v34 = vmax.f32 %v2356_v53, %v2372_v5 }
 0x1fe   : > { %v2373_v8 = vmul.f32 0.2, %v2357_v0  ;;  %v2374_v24 = vmul.f32 0.2, %v2358_v1  ;;  %v8791_v32 = vsel %vm1392_vm3, %v2387_v12, -1e+09 }
 0x1ff   : > { %v2305_v13 = vpop.permute.xlu1 %2304  ;;  %v2300_v14 = vpop.permute.xlu0 %2299  ;;  %2434 = vmax.xlane.f32.xlu0 %v8780_v10  ;;  %v8803_v49 = vsel %vm1393_vm5, %v2388_v34, -1e+09 }
 0x200   : > { %v2359_v17 = vadd.f32 %v8734_v22, %v2300_v14  ;;  %v2389_v19 = vmax.f32 %v2357_v0, %v2373_v8  ;;  %v2360_v26 = vadd.f32 %v8734_v22, %v2305_v13  ;;  %v2390_v53 = vmax.f32 %v2358_v1, %v2374_v24 }
 0x202   : > { %v2375_v29 = vmul.f32 0.2, %v2359_v17  ;;  %v8787_v54 = vsel %vm1394_vm6, %v2389_v19, -1e+09  ;;  %v2376_v43 = vmul.f32 0.2, %v2360_v26 }
 0x203   : > { %11317 = vst [vmem:[#allocation40_spill] sm:$0xff] %v8787_v54  ;;  %v2315_v35 = vpop.permute.xlu1 %2314  ;;  %v2310_v36 = vpop.permute.xlu0 %2309  ;;  %2442 = vmax.xlane.f32.xlu1 %v8787_v54  ;;  %2438 = vmax.xlane.f32.xlu0 %v8791_v32  ;;  %v8815_v1 = vsel %vm1395_vm7, %v2390_v53, -1e+09 }
 0x204   : > { %v2361_v38 = vadd.f32 %v8734_v22, %v2310_v36  ;;  %v2391_v41 = vmax.f32 %v2359_v17, %v2375_v29  ;;  %v2362_v46 = vadd.f32 %v8734_v22, %v2315_v35  ;;  %v2392_v5 = vmax.f32 %v2360_v26, %v2376_v43 }
 0x206   : > { %v2377_v47 = vmul.f32 0.2, %v2361_v38  ;;  %v8799_v48 = vsel %vm1396_vm8, %v2391_v41, -1e+09  ;;  %v2378_v0 = vmul.f32 0.2, %v2362_v46 }
 0x207   : > { %11318 = vst [vmem:[#allocation41_spill] sm:$0xff] %v8799_v48  ;;  %v2325_v56 = vpop.permute.xlu1 %2324  ;;  %v2320_v60 = vpop.permute.xlu0 %2319  ;;  %2446 = vmax.xlane.f32.xlu1 %v8799_v48  ;;  %2440 = vmax.xlane.f32.xlu0 %v8803_v49  ;;  %v8822_v26 = vsel %vm1397_vm9, %v2392_v5, -1e+09 }
 0x208   : > { %v2363_v61 = vadd.f32 %v8734_v22, %v2320_v60  ;;  %v2393_v63 = vmax.f32 %v2361_v38, %v2377_v47  ;;  %v2364_v8 = vadd.f32 %v8734_v22, %v2325_v56  ;;  %11320 = vst [vmem:[#allocation43_spill] sm:$0xff] %v8822_v26  ;;  %v2394_v29 = vmax.f32 %v2362_v46, %v2378_v0 }
 0x20a   : > { %v2379_v12 = vmul.f32 0.2, %v2363_v61  ;;  %v8811_v13 = vsel %vm1398_vm10, %v2393_v63, -1e+09  ;;  %v2380_v34 = vmul.f32 0.2, %v2364_v8 }
 0x20b   : > { %11319 = vst [vmem:[#allocation42_spill] sm:$0xff] %v8811_v13  ;;  %v2335_v14 = vpop.permute.xlu1 %2334  ;;  %v2330_v17 = vpop.permute.xlu0 %2329  ;;  %2450 = vmax.xlane.f32.xlu1 %v8811_v13  ;;  %2444 = vmax.xlane.f32.xlu0 %v8815_v1  ;;  %v8834_v46 = vsel %vm1399_vm11, %v2394_v29, -1e+09  ;;  %v8858_v29 = vld [vmem:[#allocation2 + $0x8] sm:$0xff] }
 0x20c   : > { %v2365_v19 = vadd.f32 %v8734_v22, %v2330_v17  ;;  %v2395_v24 = vmax.f32 %v2363_v61, %v2379_v12  ;;  %v2366_v35 = vadd.f32 %v8734_v22, %v2335_v14  ;;  %11322 = vst [vmem:[#allocation45_spill] sm:$0xff] %v8834_v46  ;;  %v2396_v61 = vmax.f32 %v2364_v8, %v2380_v34  ;;  %v6322_v14 = vld [vmem:[%s8177_s7 + $0xf8] sm:$0xff]  ;;  %v1573_v17 = vld [vmem:[#allocation2] sm:$0xff]  ;;  %v1575_v34 = vld [vmem:[#allocation2 + $0x10] sm:$0xff] }
 0x20e   : > { %v2381_v36 = vmul.f32 0.2, %v2365_v19  ;;  %v8827_v38 = vsel %vm1400_vm12, %v2395_v24, -1e+09  ;;  %v2382_v53 = vmul.f32 0.2, %v2366_v35 }
 0x20f   : > { %11321 = vst [vmem:[#allocation44_spill] sm:$0xff] %v8827_v38  ;;  %v2340_v41 = vpop.permute.xlu0 %2339  ;;  %2454 = vmax.xlane.f32.xlu1 %v8827_v38  ;;  %2448 = vmax.xlane.f32.xlu0 %v8822_v26  ;;  %v8848_v5 = vsel %vm1401_vm13, %v2396_v61, -1e+09  ;;  %v8880_v38 = vld [vmem:[#allocation2 + $0x40] sm:$0xff]  ;;  %v9041_v26 = vld [vmem:[#allocation2 + $0xd8] sm:$0xff] }
 0x210   : > { %v2367_v43 = vadd.f32 %v8734_v22, %v2340_v41  ;;  %v2397_v47 = vmax.f32 %v2365_v19, %v2381_v36  ;;  %11325 = vst [vmem:[#allocation48_spill] sm:$0xff] %v8848_v5  ;;  %v2398_v12 = vmax.f32 %v2366_v35, %v2382_v53  ;;  %v1576_v53 = vld [vmem:[#allocation2 + $0x18] sm:$0xff]  ;;  %11349 = vst [vmem:[#allocation72_spill] sm:$0xff] %v9041_v26 }
 0x212   : > { %v2383_v56 = vmul.f32 0.2, %v2367_v43  ;;  %v8838_v60 = vsel %vm11208_vm14, %v2397_v47, -1e+09  ;;  %v8854_v8 = vsel %vm11207_vm15, %v2398_v12, -1e+09 }
 0x213   : > { %11323 = vst [vmem:[#allocation46_spill] sm:$0xff] %v8838_v60  ;;  %2458 = vmax.xlane.f32.xlu1 %v8838_v60  ;;  %2452 = vmax.xlane.f32.xlu0 %v8834_v46  ;;  %11326 = vst [vmem:[#allocation49_spill] sm:$0xff] %v8854_v8  ;;  %v8864_v47 = vld [vmem:[#allocation2 + $0x20] sm:$0xff] }
 0x214   : > { %v2399_v63 = vmax.f32 %v2367_v43, %v2383_v56 }
 0x216   : > { %v8844_v0 = vsel %vm11144_vm0, %v2399_v63, -1e+09  ;;  %vm11202_vm0 = vcmask 7168  }
 0x217   : > { %11324 = vst [vmem:[#allocation47_spill] sm:$0xff] %v8844_v0  ;;  %2462 = vmax.xlane.f32.xlu1 %v8844_v0  ;;  %2456 = vmax.xlane.f32.xlu0 %v8848_v5  ;;  %v8923_v5 = vld [vmem:[#allocation2 + $0x78] sm:$0xff] }
 0x21b   : > { %2460 = vmax.xlane.f32.xlu0 %v8854_v8 }
 0x228   : > { %2344 = vperm.xlu1 %7023, %v6322_v14   ;;  %v8872_v14 = vld [vmem:[#allocation2 + $0x30] sm:$0xff] }
 0x264   : > { %v1590_v19 = vpop.xlane.xlu0 %1589 }
 0x265   : > { %v1621_v24 = vmax.f32 %v1573_v17, %v1590_v19  ;;  %v1578_v19 = vld [vmem:[#allocation2 + $0x28] sm:$0xff] }
 0x267   : > { %2232 = vst.msk [vmem:[#allocation2] sm:$0xff] %vm11202_vm0, %v1621_v24  ;;  %1639 = vperm.xlu1 %7023, %v1621_v24   ;;  %v1781_v48 = vsub.f32 %v1573_v17, %v1621_v24 }
 0x268   : > { %v1592_v35 = vpop.xlane.xlu1 %1591  ;;  %v1594_v36 = vpop.xlane.xlu0 %1593 }
 0x269   : > { %v8862_v41 = vmax.f32 %v8858_v29, %v1592_v35  ;;  %v1623_v43 = vmax.f32 %v1575_v34, %v1594_v36  ;;  %v1797_v51 = vmul.f32 1.442695, %v1781_v48 }
 0x26b   : > { %2233 = vst.msk [vmem:[#allocation2 + $0x8] sm:$0xff] %vm11202_vm0, %v8862_v41  ;;  %2234 = vst.msk [vmem:[#allocation2 + $0x10] sm:$0xff] %vm11202_vm0, %v1623_v43  ;;  %1649 = vperm.xlu1 %7023, %v1623_v43   ;;  %v1783_v39 = vsub.f32 %v1575_v34, %v1623_v43  ;;  %7024 = vpow2.f32 %v1797_v51  ;;  %v8910_v43 = vld [vmem:[#allocation2 + $0x70] sm:$0xff] }
 0x26c   : > { %v1598_v56 = vpop.xlane.xlu1 %1597  ;;  %v1596_v61 = vpop.xlane.xlu0 %1595 }
 0x26d   : > { %v8870_v63 = vmax.f32 %v8864_v47, %v1598_v56  ;;  %v1624_v12 = vmax.f32 %v1576_v53, %v1596_v61  ;;  %v1580_v56 = vld [vmem:[#allocation2 + $0x38] sm:$0xff]  ;;  %v1801_v48 = vmul.f32 1.442695, %v1783_v39 }
 0x26f   : > { %2236 = vst.msk [vmem:[#allocation2 + $0x20] sm:$0xff] %vm11202_vm0, %v8870_v63  ;;  %2235 = vst.msk [vmem:[#allocation2 + $0x18] sm:$0xff] %vm11202_vm0, %v1624_v12  ;;  %1654 = vperm.xlu1 %7023, %v1624_v12   ;;  %v1784_v27 = vsub.f32 %v1576_v53, %v1624_v12  ;;  %7026 = vpow2.f32 %v1801_v48 }
 0x270   : > { %v1602_v35 = vpop.xlane.xlu1 %1601  ;;  %v1600_v36 = vpop.xlane.xlu0 %1599 }
 0x271   : > { %v8878_v0 = vmax.f32 %v8872_v14, %v1602_v35  ;;  %v1626_v60 = vmax.f32 %v1578_v19, %v1600_v36  ;;  %v8890_v35 = vld [vmem:[#allocation2 + $0x48] sm:$0xff]  ;;  %v1803_v53 = vmul.f32 1.442695, %v1784_v27 }
 0x273   : > { %2238 = vst.msk [vmem:[#allocation2 + $0x30] sm:$0xff] %vm11202_vm0, %v8878_v0  ;;  %2237 = vst.msk [vmem:[#allocation2 + $0x28] sm:$0xff] %vm11202_vm0, %v1626_v60  ;;  %1664 = vperm.xlu1 %7023, %v1626_v60   ;;  %v1786_v39 = vsub.f32 %v1578_v19, %v1626_v60  ;;  %7028 = vpow2.f32 %v1803_v53 }
 0x274   : > { %v1606_v61 = vpop.xlane.xlu1 %1605  ;;  %v1604_v13 = vpop.xlane.xlu0 %1603 }
 0x275   : > { %v8886_v54 = vmax.f32 %v8880_v38, %v1606_v61  ;;  %v1628_v57 = vmax.f32 %v1580_v56, %v1604_v13  ;;  %v8899_v13 = vld [vmem:[#allocation2 + $0x60] sm:$0xff]  ;;  %v8901_v61 = vld [vmem:[#allocation2 + $0x58] sm:$0xff]  ;;  %v1807_v48 = vmul.f32 1.442695, %v1786_v39 }
 0x276   : > { %v8943_v39 = vld [vmem:[#allocation2 + $0xa0] sm:$0xff] }
 0x277   : > { %2240 = vst.msk [vmem:[#allocation2 + $0x40] sm:$0xff] %vm11202_vm0, %v8886_v54  ;;  %2239 = vst.msk [vmem:[#allocation2 + $0x38] sm:$0xff] %vm11202_vm0, %v1628_v57  ;;  %1674 = vperm.xlu1 %7023, %v1628_v57   ;;  %v1788_v60 = vsub.f32 %v1580_v56, %v1628_v57  ;;  %7030 = vpow2.f32 %v1807_v48 }
 0x278   : > { %v1610_v36 = vpop.xlane.xlu1 %1609  ;;  %v1608_v2 = vpop.xlane.xlu0 %1607  ;;  %11330 = vst [vmem:[#allocation53_spill] sm:$0xff] %v8943_v39 }
 0x279   : > { %v8896_v17 = vmax.f32 %v8888_v20, %v1610_v36  ;;  %v1630_v24 = vmax.f32 %v8890_v35, %v1608_v2  ;;  %v8912_v36 = vld [vmem:[#allocation2 + $0x68] sm:$0xff]  ;;  %v1811_v53 = vmul.f32 1.442695, %v1788_v60  ;;  %v8941_v56 = vpop.eup %7024 }
 0x27a   : > { %11329 = vst [vmem:[#allocation52_spill] sm:$0xff] %v8941_v56 }
 0x27b   : > { %2242 = vst.msk [vmem:[#allocation2 + $0x50] sm:$0xff] %vm11202_vm0, %v8896_v17  ;;  %2241 = vst.msk [vmem:[#allocation2 + $0x48] sm:$0xff] %vm11202_vm0, %v1630_v24  ;;  %1684 = vperm.xlu1 %7023, %v1630_v24   ;;  %v1790_v46 = vsub.f32 %v8890_v35, %v1630_v24  ;;  %7032 = vpow2.f32 %v1811_v53 }
 0x27c   : > { %v1614_v8 = vpop.xlane.xlu1 %1613  ;;  %v1612_v44 = vpop.xlane.xlu0 %1611 }
 0x27d   : > { %v8907_v34 = vmax.f32 %v8899_v13, %v1614_v8  ;;  %v1632_v2 = vmax.f32 %v8901_v61, %v1612_v44  ;;  %v8921_v8 = vld [vmem:[#allocation2 + $0x88] sm:$0xff]  ;;  %v8959_v11 = vpop.eup %7026 }
 0x27e   : > { %11327 = vst [vmem:[#allocation50_spill] sm:$0xff] %v8921_v8  ;;  %11332 = vst [vmem:[#allocation55_spill] sm:$0xff] %v8959_v11 }
 0x27f   : > { %2244 = vst.msk [vmem:[#allocation2 + $0x60] sm:$0xff] %vm11202_vm0, %v8907_v34  ;;  %2243 = vst.msk [vmem:[#allocation2 + $0x58] sm:$0xff] %vm11202_vm0, %v1632_v2  ;;  %1694 = vperm.xlu1 %7023, %v1632_v2   ;;  %v1792_v48 = vsub.f32 %v8901_v61, %v1632_v2  ;;  %v8981_v61 = vld [vmem:[#allocation2 + $0xc0] sm:$0xff] }
 0x280   : > { %v1618_v12 = vpop.xlane.xlu1 %1617  ;;  %v1616_v15 = vpop.xlane.xlu0 %1615  ;;  %11337 = vst [vmem:[#allocation60_spill] sm:$0xff] %v8981_v61 }
 0x281   : > { %v8918_v51 = vmax.f32 %v8910_v43, %v1618_v12  ;;  %v1634_v44 = vmax.f32 %v8912_v36, %v1616_v15  ;;  %v8932_v12 = vld [vmem:[#allocation2 + $0x80] sm:$0xff] }
 0x282   : > { %11328 = vst [vmem:[#allocation51_spill] sm:$0xff] %v8932_v12 }
 0x283   : > { %2246 = vst.msk [vmem:[#allocation2 + $0x70] sm:$0xff] %vm11202_vm0, %v8918_v51  ;;  %2245 = vst.msk [vmem:[#allocation2 + $0x68] sm:$0xff] %vm11202_vm0, %v1634_v44  ;;  %1704 = vperm.xlu1 %7023, %v1634_v44  }
 0x284   : > { %v2437_v27 = vpop.xlane.xlu1 %2436  ;;  %v1620_v31 = vpop.xlane.xlu0 %1619 }
 0x285   : > { %v8929_v19 = vmax.f32 %v8921_v8, %v2437_v27  ;;  %v1636_v15 = vmax.f32 %v8923_v5, %v1620_v31  ;;  %v8945_v31 = vld [vmem:[#allocation2 + $0x90] sm:$0xff] }
 0x286   : > { %11331 = vst [vmem:[#allocation54_spill] sm:$0xff] %v8945_v31  ;;  %v8961_v27 = vld [vmem:[#allocation2 + $0xb0] sm:$0xff] }
 0x287   : > { %3079 = vst.msk [vmem:[#allocation2 + $0x88] sm:$0xff] %vm11202_vm0, %v8929_v19  ;;  %2247 = vst.msk [vmem:[#allocation2 + $0x78] sm:$0xff] %vm11202_vm0, %v1636_v15  ;;  %1714 = vperm.xlu1 %7023, %v1636_v15  }
 0x288   : > { %v2435_v4 = vpop.xlane.xlu0 %2434  ;;  %11333 = vst [vmem:[#allocation56_spill] sm:$0xff] %v8961_v27 }
 0x289   : > { %v8939_v57 = vmax.f32 %v8932_v12, %v2435_v4  ;;  %v1815_v4 = vmul.f32 1.442695, %v1790_v46  ;;  %v8963_v12 = vld [vmem:[#allocation2 + $0x98] sm:$0xff]  ;;  %v1819_v46 = vmul.f32 1.442695, %v1792_v48  ;;  %v9001_v48 = vld [vmem:[#allocation2 + $0xd0] sm:$0xff] }
 0x28a   : > { %11334 = vst [vmem:[#allocation57_spill] sm:$0xff] %v8963_v12  ;;  %11341 = vst [vmem:[#allocation64_spill] sm:$0xff] %v9001_v48 }
 0x28b   : > { %3078 = vst.msk [vmem:[#allocation2 + $0x80] sm:$0xff] %vm11202_vm0, %v8939_v57  ;;  %1944 = vperm.xlu1 %7023, %v8941_v56   ;;  %7034 = vpow2.f32 %v1815_v4 }
 0x28c   : > { %v2443_v35 = vpop.xlane.xlu1 %2442  ;;  %v2439_v24 = vpop.xlane.xlu0 %2438  ;;  %7036 = vpow2.f32 %v1819_v46  ;;  %v9022_v46 = vld [vmem:[#allocation2 + $0xc8] sm:$0xff] }
 0x28d   : > { %v8954_v60 = vmax.f32 %v8943_v39, %v2443_v35  ;;  %v8957_v8 = vmax.f32 %v8945_v31, %v2439_v24  ;;  %v8972_v35 = vpop.eup %7028  ;;  %v1794_v24 = vsub.f32 %v8912_v36, %v1634_v44  ;;  %v8983_v31 = vld [vmem:[#allocation2 + $0xa8] sm:$0xff]  ;;  %11345 = vst [vmem:[#allocation68_spill] sm:$0xff] %v9022_v46 }
 0x28e   : > { %11335 = vst [vmem:[#allocation58_spill] sm:$0xff] %v8972_v35  ;;  %11338 = vst [vmem:[#allocation61_spill] sm:$0xff] %v8983_v31 }
 0x28f   : > { %3082 = vst.msk [vmem:[#allocation2 + $0xa0] sm:$0xff] %vm11202_vm0, %v8954_v60  ;;  %3080 = vst.msk [vmem:[#allocation2 + $0x90] sm:$0xff] %vm11202_vm0, %v8957_v8  ;;  %1954 = vperm.xlu1 %7023, %v8959_v11   ;;  %v1823_v4 = vmul.f32 1.442695, %v1794_v24  ;;  %v8999_v11 = vpop.eup %7030 }
 0x290   : > { %v2447_v2 = vpop.xlane.xlu1 %2446  ;;  %v2441_v53 = vpop.xlane.xlu0 %2440  ;;  %11340 = vst [vmem:[#allocation63_spill] sm:$0xff] %v8999_v11 }
 0x291   : > { %v8976_v39 = vmax.f32 %v8961_v27, %v2447_v2  ;;  %v8979_v56 = vmax.f32 %v8963_v12, %v2441_v53  ;;  %v1796_v2 = vsub.f32 %v8923_v5, %v1636_v15  ;;  %v9003_v12 = vld [vmem:[#allocation2 + $0xb8] sm:$0xff]  ;;  %7038 = vpow2.f32 %v1823_v4 }
 0x292   : > { %11342 = vst [vmem:[#allocation65_spill] sm:$0xff] %v9003_v12 }
 0x293   : > { %11336 = vst [vmem:[#allocation59_spill] sm:$0xff] %v8976_v39  ;;  %3084 = vst.msk [vmem:[#allocation2 + $0xb0] sm:$0xff] %vm11202_vm0, %v8976_v39  ;;  %1959 = vperm.xlu1 %7023, %v8972_v35   ;;  %v1827_v24 = vmul.f32 1.442695, %v1796_v2  ;;  %v9020_v35 = vld [vmem:[#allocation2 + $0xe0] sm:$0xff] }
 0x294   : > { %3081 = vst.msk [vmem:[#allocation2 + $0x98] sm:$0xff] %vm11202_vm0, %v8979_v56  ;;  %v2451_v36 = vpop.xlane.xlu1 %2450  ;;  %v2445_v44 = vpop.xlane.xlu0 %2444  ;;  %11344 = vst [vmem:[#allocation67_spill] sm:$0xff] %v9020_v35 }
 0x295   : > { %v8994_v53 = vmax.f32 %v8981_v61, %v2451_v36  ;;  %v8997_v27 = vmax.f32 %v8983_v31, %v2445_v44  ;;  %v9018_v61 = vpop.eup %7032  ;;  %7040 = vpow2.f32 %v1827_v24  ;;  %v9039_v31 = vld [vmem:[#allocation2 + $0xf0] sm:$0xff] }
 0x296   : > { %11343 = vst [vmem:[#allocation66_spill] sm:$0xff] %v9018_v61  ;;  %11348 = vst [vmem:[#allocation71_spill] sm:$0xff] %v9039_v31 }
 0x297   : > { %11339 = vst [vmem:[#allocation62_spill] sm:$0xff] %v8994_v53  ;;  %3086 = vst.msk [vmem:[#allocation2 + $0xc0] sm:$0xff] %vm11202_vm0, %v8994_v53  ;;  %1969 = vperm.xlu1 %7023, %v8999_v11   ;;  %v1785_v11 = vsub.f32 %v8864_v47, %v8870_v63  ;;  %v1789_v47 = vsub.f32 %v8880_v38, %v8886_v54  ;;  %v1795_v38 = vsub.f32 %v8910_v43, %v8918_v51  ;;  %v6340_v43 = vld [vmem:[%s8173_s20 + $0xf8] sm:$0xff] }
 0x298   : > { %3083 = vst.msk [vmem:[#allocation2 + $0xa8] sm:$0xff] %vm11202_vm0, %v8997_v27  ;;  %v2455_v5 = vpop.xlane.xlu1 %2454  ;;  %v2449_v15 = vpop.xlane.xlu0 %2448  ;;  %6690 = vmatprep.subr.mxu1 %v6340_v43 }
 0x299   : > { %v9013_v36 = vmax.f32 %v9001_v48, %v2455_v5  ;;  %v9016_v44 = vmax.f32 %v9003_v12, %v2449_v15  ;;  %v9037_v48 = vpop.eup %7034  ;;  %v9058_v12 = vld [vmem:[#allocation2 + $0xe8] sm:$0xff]  ;;  %6691 = vmatpush3.msra.mxu1 %v6340_v43 }
 0x29a   : > { %11347 = vst [vmem:[#allocation70_spill] sm:$0xff] %v9037_v48 }
 0x29b   : > { %3088 = vst.msk [vmem:[#allocation2 + $0xd0] sm:$0xff] %vm11202_vm0, %v9013_v36  ;;  %3085 = vst.msk [vmem:[#allocation2 + $0xb8] sm:$0xff] %vm11202_vm0, %v9016_v44  ;;  %1979 = vperm.xlu1 %7023, %v9018_v61  }
 0x29c   : > { %v2459_v4 = vpop.xlane.xlu1 %2458  ;;  %v2453_v2 = vpop.xlane.xlu0 %2452 }
 0x29d   : > { %v9032_v5 = vmax.f32 %v9020_v35, %v2459_v4  ;;  %v9035_v15 = vmax.f32 %v9022_v46, %v2453_v2  ;;  %v9050_v2 = vpop.eup %7036 }
 0x29e   : > { %11350 = vst [vmem:[#allocation73_spill] sm:$0xff] %v9050_v2  ;;  %v9071_v46 = vpop.eup %7038 }
 0x29f   : > { %11346 = vst [vmem:[#allocation69_spill] sm:$0xff] %v9032_v5  ;;  %3090 = vst.msk [vmem:[#allocation2 + $0xe0] sm:$0xff] %vm11202_vm0, %v9032_v5  ;;  %1989 = vperm.xlu1 %7023, %v9037_v48  }
 0x2a0   : > { %3087 = vst.msk [vmem:[#allocation2 + $0xc8] sm:$0xff] %vm11202_vm0, %v9035_v15  ;;  %v2463_v24 = vpop.xlane.xlu1 %2462  ;;  %v2457_v4 = vpop.xlane.xlu0 %2456 }
 0x2a1   : > { %v9053_v35 = vmax.f32 %v9039_v31, %v2463_v24  ;;  %v9056_v61 = vmax.f32 %v9041_v26, %v2457_v4 }
 0x2a2   : > { %v9078_v26 = vpop.eup %7040 }
 0x2a3   : > { %11351 = vst [vmem:[#allocation74_spill] sm:$0xff] %v9053_v35  ;;  %3092 = vst.msk [vmem:[#allocation2 + $0xf0] sm:$0xff] %vm11202_vm0, %v9053_v35  ;;  %1999 = vperm.xlu1 %7023, %v9050_v2  }
 0x2a4   : > { %3089 = vst.msk [vmem:[#allocation2 + $0xd8] sm:$0xff] %vm11202_vm0, %v9056_v61  ;;  %v2345_v48 = vpop.permute.xlu1 %2344  ;;  %v2461_v24 = vpop.xlane.xlu0 %2460 }
 0x2a5   : > { %v2368_v31 = vadd.f32 %v8734_v22, %v2345_v48  ;;  %v9069_v4 = vmax.f32 %v9058_v12, %v2461_v24  ;;  %v2053_v48 = vld [vmem:[%s8173_s20 + $0x78] sm:$0xff]  ;;  %v2052_v24 = vld [vmem:[%s8173_s20 + $0x70] sm:$0xff] }
 0x2a6   : > { %6634 = vmatprep.subr.mxu0 %v2053_v48 }
 0x2a7   : > { %v2384_v7 = vmul.f32 0.2, %v2368_v31  ;;  %3091 = vst.msk [vmem:[#allocation2 + $0xe8] sm:$0xff] %vm11202_vm0, %v9069_v4  ;;  %2009 = vperm.xlu1 %7023, %v9071_v46   ;;  %6635 = vmatpush3.msra.mxu0 %v2053_v48  ;;  %v2048_v48 = vld [vmem:[%s8173_s20 + $0x50] sm:$0xff] }
 0x2a8   : > { %6636 = vmatprep.subr.mxu0 %v2052_v24 }
 0x2a9   : > { %v2400_v2 = vmax.f32 %v2368_v31, %v2384_v7  ;;  %6637 = vmatpush3.msra.mxu0 %v2052_v24  ;;  %v2051_v7 = vld [vmem:[%s8173_s20 + $0x68] sm:$0xff]  ;;  %v2050_v31 = vld [vmem:[%s8173_s20 + $0x60] sm:$0xff] }
 0x2aa   : > { %6638 = vmatprep.subr.mxu0 %v2051_v7  ;;  %v2047_v24 = vld [vmem:[%s8173_s20 + $0x48] sm:$0xff] }
 0x2ab   : > { %2019 = vperm.xlu1 %7023, %v9078_v26   ;;  %v9083_v22 = vsel %vm11261_vm1, %v2400_v2, -1e+09  ;;  %6639 = vmatpush3.msra.mxu0 %v2051_v7  ;;  %v2049_v2 = vld [vmem:[%s8173_s20 + $0x58] sm:$0xff]  ;;  %v2046_v7 = vld [vmem:[%s8173_s20 + $0x40] sm:$0xff] }
 0x2ac   : > { %11352 = vst [vmem:[#allocation75_spill] sm:$0xff] %v9083_v22  ;;  %2464 = vmax.xlane.f32.xlu0 %v9083_v22  ;;  %6640 = vmatprep.subr.mxu0 %v2050_v31  ;;  %v2039_v22 = vld [vmem:[%s8173_s20 + $0x8] sm:$0xff] }
 0x2ad   : > { %6641 = vmatpush3.msra.mxu0 %v2050_v31  ;;  %v2045_v31 = vld [vmem:[%s8173_s20 + $0x38] sm:$0xff] }
 0x2ae   : > { %6642 = vmatprep.subr.mxu0 %v2049_v2 }
 0x2af   : > { %2484 = vperm.xlu1 %7023, %v8939_v57   ;;  %6643 = vmatpush3.msra.mxu0 %v2049_v2  ;;  %v2044_v2 = vld [vmem:[%s8173_s20 + $0x30] sm:$0xff] }
 0x2b0   : > { %6644 = vmatprep.subr.mxu0 %v2048_v48 }
 0x2b1   : > { %6645 = vmatpush3.msra.mxu0 %v2048_v48  ;;  %v2043_v48 = vld [vmem:[%s8173_s20 + $0x28] sm:$0xff] }
 0x2b2   : > { %6646 = vmatprep.subr.mxu0 %v2047_v24 }
 0x2b3   : > { %2494 = vperm.xlu1 %7023, %v8957_v8   ;;  %6647 = vmatpush3.msra.mxu0 %v2047_v24  ;;  %v2042_v24 = vld [vmem:[%s8173_s20 + $0x20] sm:$0xff] }
 0x2b4   : > { %6648 = vmatprep.subr.mxu0 %v2046_v7 }
 0x2b5   : > { %6649 = vmatpush3.msra.mxu0 %v2046_v7  ;;  %v1782_v7 = vsub.f32 %v8858_v29, %v8862_v41  ;;  %v2038_v29 = vld [vmem:[%s8173_s20] sm:$0xff] }
 0x2b6   : > { %6650 = vmatprep.subr.mxu0 %v2045_v31 }
 0x2b7   : > { %2499 = vperm.xlu1 %7023, %v8979_v56   ;;  %6651 = vmatpush3.msra.mxu0 %v2045_v31  ;;  %v2041_v31 = vld [vmem:[%s8173_s20 + $0x18] sm:$0xff] }
 0x2b8   : > { %6652 = vmatprep.subr.mxu0 %v2044_v2 }
 0x2b9   : > { %6653 = vmatpush3.msra.mxu0 %v2044_v2  ;;  %v2040_v2 = vld [vmem:[%s8173_s20 + $0x10] sm:$0xff] }
 0x2ba   : > { %6654 = vmatprep.subr.mxu0 %v2043_v48 }
 0x2bb   : > { %2509 = vperm.xlu1 %7023, %v8997_v27   ;;  %6655 = vmatpush3.msra.mxu0 %v2043_v48  ;;  %v1799_v48 = vmul.f32 1.442695, %v1782_v7 }
 0x2bc   : > { %6656 = vmatprep.subr.mxu0 %v2042_v24 }
 0x2bd   : > { %6657 = vmatpush3.msra.mxu0 %v2042_v24  ;;  %7042 = vpow2.f32 %v1799_v48  ;;  %v1787_v24 = vsub.f32 %v8872_v14, %v8878_v0 }
 0x2be   : > { %6658 = vmatprep.subr.mxu0 %v2041_v31 }
 0x2bf   : > { %2519 = vperm.xlu1 %7023, %v9016_v44   ;;  %6659 = vmatpush3.msra.mxu0 %v2041_v31  ;;  %v1809_v7 = vmul.f32 1.442695, %v1787_v24 }
 0x2c0   : > { %6660 = vmatprep.subr.mxu0 %v2040_v2 }
 0x2c1   : > { %6661 = vmatpush3.msra.mxu0 %v2040_v2 }
 0x2c2   : > { %1644 = vperm.xlu0 %7022, %v8862_v41   ;;  %6662 = vmatprep.subr.mxu0 %v2039_v22  ;;  %v1805_v41 = vmul.f32 1.442695, %v1785_v11 }
 0x2c3   : > { %2529 = vperm.xlu1 %7023, %v9035_v15   ;;  %6663 = vmatpush3.msra.mxu0 %v2039_v22  ;;  %v1791_v22 = vsub.f32 %v8888_v20, %v8896_v17 }
 0x2c4   : > { %6664 = vmatprep.subr.mxu0 %v2038_v29  ;;  %7044 = vpow2.f32 %v1805_v41  ;;  %v6338_v41 = vld [vmem:[%s8173_s20 + $0xe8] sm:$0xff] }
 0x2c5   : > { %6665 = vmatpush3.msra.mxu0 %v2038_v29  ;;  %7046 = vpow2.f32 %v1809_v7  ;;  %v1817_v11 = vmul.f32 1.442695, %v1791_v22  ;;  %v6339_v29 = vld [vmem:[%s8173_s20 + $0xf0] sm:$0xff] }
 0x2c6   : > { %1659 = vperm.xlu0 %7022, %v8870_v63   ;;  %v1813_v63 = vmul.f32 1.442695, %v1789_v47  ;;  %6692 = vmatprep.subr.mxu1 %v6339_v29  ;;  %v6337_v47 = vld [vmem:[%s8173_s20 + $0xe0] sm:$0xff] }
 0x2c7   : > { %2539 = vperm.xlu1 %7023, %v9056_v61   ;;  %6693 = vmatpush3.msra.mxu1 %v6339_v29  ;;  %v6331_v29 = vld [vmem:[%s8173_s20 + $0xb0] sm:$0xff] }
 0x2c8   : > { %7048 = vpow2.f32 %v1813_v63  ;;  %6694 = vmatprep.subr.mxu1 %v6338_v41  ;;  %v6336_v63 = vld [vmem:[%s8173_s20 + $0xd8] sm:$0xff] }
 0x2c9   : > { %7050 = vpow2.f32 %v1817_v11  ;;  %6695 = vmatpush3.msra.mxu1 %v6338_v41  ;;  %v6330_v41 = vld [vmem:[%s8173_s20 + $0xa8] sm:$0xff] }
 0x2ca   : > { %1669 = vperm.xlu0 %7022, %v8878_v0   ;;  %v1793_v0 = vsub.f32 %v8899_v13, %v8907_v34  ;;  %v9129_v14 = vpop.eup %7042  ;;  %v1825_v13 = vmul.f32 1.442695, %v1795_v38  ;;  %6696 = vmatprep.subr.mxu1 %v6337_v47 }
 0x2cb   : > { %2549 = vperm.xlu1 %7023, %v9069_v4   ;;  %6697 = vmatpush3.msra.mxu1 %v6337_v47 }
 0x2cc   : > { %6698 = vmatprep.subr.mxu1 %v6336_v63 }
 0x2cd   : > { %6699 = vmatpush3.msra.mxu1 %v6336_v63  ;;  %v6329_v63 = vld [vmem:[%s8173_s20 + $0xa0] sm:$0xff] }
 0x2ce   : > { %1679 = vperm.xlu0 %7022, %v8886_v54   ;;  %v1821_v54 = vmul.f32 1.442695, %v1793_v0  ;;  %v6335_v0 = vld [vmem:[%s8173_s20 + $0xd0] sm:$0xff] }
 0x2cf   : > { %6700 = vmatprep.subr.mxu1 %v6335_v0 }
 0x2d0   : > { %7052 = vpow2.f32 %v1821_v54  ;;  %v6334_v54 = vld [vmem:[%s8173_s20 + $0xc8] sm:$0xff]  ;;  %6701 = vmatpush3.msra.mxu1 %v6335_v0  ;;  %v6328_v0 = vld [vmem:[%s8173_s20 + $0x98] sm:$0xff] }
 0x2d1   : > { %v9134_v31 = vpop.eup %7044  ;;  %6702 = vmatprep.subr.mxu1 %v6334_v54 }
 0x2d2   : > { %1689 = vperm.xlu0 %7022, %v8896_v17   ;;  %6703 = vmatpush3.msra.mxu1 %v6334_v54 }
 0x2d6   : > { %1699 = vperm.xlu0 %7022, %v8907_v34   ;;  %v9138_v34 = vpop.eup %7046 }
 0x2da   : > { %1709 = vperm.xlu0 %7022, %v8918_v51   ;;  %v9144_v51 = vpop.eup %7048 }
 0x2db   : > { %v9151_v24 = vpop.eup %7050 }
 0x2dd   : > { %v9158_v22 = vpop.eup %7052 }
 0x2de   : > { %1949 = vperm.xlu0 %7022, %v9129_v14  }
 0x2e2   : > { %1964 = vperm.xlu0 %7022, %v9134_v31   ;;  %v1640_v20 = vpop.permute.xlu1 %1639 }
 0x2e3   : > { %v1717_v17 = vsub.f32 %v8624_v9, %v1640_v20 }
 0x2e5   : > { %v1733_v2 = vmul.f32 1.442695, %v1717_v17 }
 0x2e6   : > { %1974 = vperm.xlu0 %7022, %v9138_v34   ;;  %v9141_v48 = vpop.permute.xlu1 %1649 }
 0x2e7   : > { %7054 = vpow2.f32 %v1733_v2  ;;  %v6332_v2 = vld [vmem:[%s8173_s20 + $0xb8] sm:$0xff] }
 0x2e8   : > { %7056 = vpow2.f32 %v1825_v13  ;;  %v6333_v13 = vld [vmem:[%s8173_s20 + $0xc0] sm:$0xff] }
 0x2e9   : > { %6704 = vmatprep.subr.mxu1 %v6333_v13 }
 0x2ea   : > { %1984 = vperm.xlu0 %7022, %v9144_v51   ;;  %v9147_v9 = vpop.permute.xlu1 %1654  ;;  %6705 = vmatpush3.msra.mxu1 %v6333_v13  ;;  %v6327_v13 = vld [vmem:[%s8173_s20 + $0x90] sm:$0xff] }
 0x2eb   : > { %6706 = vmatprep.subr.mxu1 %v6332_v2 }
 0x2ec   : > { %6707 = vmatpush3.msra.mxu1 %v6332_v2  ;;  %v6326_v2 = vld [vmem:[%s8173_s20 + $0x88] sm:$0xff] }
 0x2ed   : > { %6708 = vmatprep.subr.mxu1 %v6331_v29 }
 0x2ee   : > { %1994 = vperm.xlu0 %7022, %v9151_v24   ;;  %v9154_v7 = vpop.permute.xlu1 %1664  ;;  %6709 = vmatpush3.msra.mxu1 %v6331_v29 }
 0x2ef   : > { %6710 = vmatprep.subr.mxu1 %v6330_v41 }
 0x2f0   : > { %6711 = vmatpush3.msra.mxu1 %v6330_v41  ;;  %v6325_v41 = vld [vmem:[%s8173_s20 + $0x80] sm:$0xff] }
 0x2f1   : > { %6712 = vmatprep.subr.mxu1 %v6329_v63 }
 0x2f2   : > { %2004 = vperm.xlu0 %7022, %v9158_v22   ;;  %v9161_v11 = vpop.permute.xlu1 %1674  ;;  %6713 = vmatpush3.msra.mxu1 %v6329_v63 }
 0x2f3   : > { %6714 = vmatprep.subr.mxu1 %v6328_v0 }
 0x2f4   : > { %v9165_v38 = vpop.eup %7054  ;;  %6715 = vmatpush3.msra.mxu1 %v6328_v0 }
 0x2f5   : > { %v9167_v20 = vpop.eup %7056  ;;  %6666 = vmatprep.mubr.msk.f32.mxu0 %vm11201_vm2, %v9165_v38  ;;  %6716 = vmatprep.subr.mxu1 %v6327_v13 }
 0x2f6   : > { %2014 = vperm.xlu0 %7022, %v9167_v20   ;;  %v9173_v17 = vpop.permute.xlu1 %1684  ;;  %6717 = vmatpush3.msra.mxu1 %v6327_v13 }
 0x2f7   : > { %6718 = vmatprep.subr.mxu1 %v6326_v2 }
 0x2f8   : > { %6719 = vmatpush3.msra.mxu1 %v6326_v2  ;;  %v1719_v2 = vsub.f32 %v8635_v16, %v9141_v48  ;;  %v1724_v16 = vsub.f32 %v8695_v52, %v9161_v11 }
 0x2f9   : > { %6720 = vmatprep.subr.mxu1 %v6325_v41 }
 0x2fa   : > { %2489 = vperm.xlu0 %7022, %v8929_v19   ;;  %v9178_v43 = vpop.permute.xlu1 %1694  ;;  %6721 = vmatpush3.msra.mxu1 %v6325_v41 }
 0x2fe   : > { %2504 = vperm.xlu0 %7022, %v8954_v60   ;;  %v9183_v47 = vpop.permute.xlu1 %1704 }
 0x302   : > { %2514 = vperm.xlu0 %7022, %v8976_v39   ;;  %v9188_v54 = vpop.permute.xlu1 %1714 }
 0x306   : > { %2524 = vperm.xlu0 %7022, %v8994_v53   ;;  %v9193_v29 = vpop.permute.xlu1 %1944 }
 0x307   : > { %11353 = vst [vmem:[#allocation76_spill] sm:$0xff] %v9193_v29  ;;  %v1737_v29 = vmul.f32 1.442695, %v1719_v2 }
 0x309   : > { %7058 = vpow2.f32 %v1737_v29 }
 0x30a   : > { %2534 = vperm.xlu0 %7022, %v9013_v36   ;;  %v9197_v63 = vpop.permute.xlu1 %1954 }
 0x30b   : > { %11354 = vst [vmem:[#allocation77_spill] sm:$0xff] %v9197_v63  ;;  %v1720_v63 = vsub.f32 %v8655_v28, %v9147_v9  ;;  %v1726_v28 = vsub.f32 %v8715_v3, %v9173_v17 }
 0x30d   : > { %v1751_v29 = vmul.f32 1.442695, %v1726_v28 }
 0x30e   : > { %2544 = vperm.xlu0 %7022, %v9032_v5   ;;  %v9200_v0 = vpop.permute.xlu1 %1959 }
 0x30f   : > { %11355 = vst [vmem:[#allocation78_spill] sm:$0xff] %v9200_v0  ;;  %v1739_v0 = vmul.f32 1.442695, %v1720_v63 }
 0x311   : > { %7060 = vpow2.f32 %v1739_v0  ;;  %v1732_v0 = vsub.f32 %v8767_v50, %v9188_v54 }
 0x312   : > { %2554 = vperm.xlu0 %7022, %v9053_v35   ;;  %v9203_v13 = vpop.permute.xlu1 %1969 }
 0x313   : > { %11356 = vst [vmem:[#allocation79_spill] sm:$0xff] %v9203_v13  ;;  %v1722_v13 = vsub.f32 %v8675_v40, %v9154_v7  ;;  %v1728_v40 = vsub.f32 %v8738_v23, %v9178_v43  ;;  %v1765_v7 = vsel %vm11201_vm2, %v9165_v38, 0.0 }
 0x315   : > { %v1755_v3 = vmul.f32 1.442695, %v1728_v40 }
 0x316   : > { %v9205_v39 = vpop.permute.xlu1 %1979  ;;  %v9231_v52 = vpop.eup %7058 }
 0x317   : > { %11357 = vst [vmem:[#allocation80_spill] sm:$0xff] %v9205_v39  ;;  %v1767_v17 = vsel %vm1392_vm3, %v9231_v52, 0.0  ;;  %v11388_v39 = vld [vmem:[#allocation44_spill] sm:$0xff] }
 0x31a   : > { %v9207_v53 = vpop.permute.xlu1 %1989 }
 0x31b   : > { %11358 = vst [vmem:[#allocation81_spill] sm:$0xff] %v9207_v53  ;;  %v1743_v53 = vmul.f32 1.442695, %v1722_v13 }
 0x31d   : > { %7062 = vpow2.f32 %v1743_v53  ;;  %v9235_v53 = vld [vmem:[#allocation2 + $0xf8] sm:$0xff] }
 0x31e   : > { %v9211_v41 = vpop.permute.xlu1 %1999  ;;  %v9240_v23 = vpop.eup %7060 }
 0x31f   : > { %11359 = vst [vmem:[#allocation82_spill] sm:$0xff] %v9211_v41  ;;  %v1747_v41 = vmul.f32 1.442695, %v1724_v16 }
 0x322   : > { %v9215_v5 = vpop.permute.xlu1 %2009 }
 0x323   : > { %11360 = vst [vmem:[#allocation83_spill] sm:$0xff] %v9215_v5 }
 0x326   : > { %v9219_v35 = vpop.permute.xlu1 %2019 }
 0x327   : > { %11361 = vst [vmem:[#allocation84_spill] sm:$0xff] %v9219_v35 }
 0x32a   : > { %v2485_v48 = vpop.permute.xlu1 %2484  ;;  %v9252_v13 = vpop.eup %7062 }
 0x32b   : > { %v2562_v2 = vsub.f32 %v8780_v10, %v2485_v48  ;;  %v1730_v10 = vsub.f32 %v8755_v37, %v9183_v47  ;;  %v1768_v47 = vsel %vm1393_vm5, %v9240_v23, 0.0  ;;  %v1770_v50 = vsel %vm1395_vm7, %v9252_v13, 0.0 }
 0x32d   : > { %v2578_v9 = vmul.f32 1.442695, %v2562_v2  ;;  %v1759_v63 = vmul.f32 1.442695, %v1730_v10 }
 0x32e   : > { %v2495_v11 = vpop.permute.xlu1 %2494 }
 0x32f   : > { %7064 = vpow2.f32 %v2578_v9  ;;  %v2564_v9 = vsub.f32 %v8791_v32, %v2495_v11 }
 0x330   : > { %7066 = vpow2.f32 %v1747_v41  ;;  %v1763_v41 = vmul.f32 1.442695, %v1732_v0 }
 0x331   : > { %1861 = vadd.xlane.f32.xlu0 %v1765_v7  ;;  %7068 = vpow2.f32 %v1751_v29 }
 0x332   : > { %v2500_v37 = vpop.permute.xlu1 %2499  ;;  %7070 = vpow2.f32 %v1755_v3 }
 0x333   : > { %7072 = vpow2.f32 %v1759_v63  ;;  %v2565_v63 = vsub.f32 %v8803_v49, %v2500_v37 }
 0x334   : > { %7074 = vpow2.f32 %v1763_v41 }
 0x335   : > { %1865 = vadd.xlane.f32.xlu0 %v1767_v17  ;;  %v2465_v43 = vpop.xlane.xlu0 %2464  ;;  %v2582_v17 = vmul.f32 1.442695, %v2564_v9 }
 0x336   : > { %v9243_v38 = vmax.f32 %v9235_v53, %v2465_v43  ;;  %v2510_v48 = vpop.permute.xlu1 %2509 }
 0x338   : > { %3093 = vst.msk [vmem:[#allocation2 + $0xf8] sm:$0xff] %vm11202_vm0, %v9243_v38 }
 0x339   : > { %1867 = vadd.xlane.f32.xlu0 %v1768_v47 }
 0x33a   : > { %v2520_v43 = vpop.permute.xlu1 %2519 }
 0x33c   : > { %v9254_v16 = vpop.eup %7064 }
 0x33d   : > { %v9259_v54 = vpop.eup %7066  ;;  %1871 = vadd.xlane.f32.xlu0 %v1770_v50  ;;  %6722 = vmatprep.mubr.msk.f32.mxu1 %vm11201_vm2, %v9254_v16  ;;  %v1645_v2 = vpop.permute.xlu0 %1644  ;;  %v2567_v50 = vsub.f32 %v8815_v1, %v2510_v48  ;;  %v11363_v1 = vld [vmem:[#allocation43_spill] sm:$0xff] }
 0x33e   : > { %v1718_v28 = vsub.f32 %v8643_v21, %v1645_v2  ;;  %v1772_v40 = vsel %vm1397_vm9, %v9259_v54, 0.0  ;;  %v9269_v7 = vpop.eup %7068  ;;  %v2530_v37 = vpop.permute.xlu1 %2529  ;;  %v2569_v48 = vsub.f32 %v11363_v1, %v2520_v43  ;;  %v2610_v1 = vsel %vm11201_vm2, %v9254_v16, 0.0  ;;  %v11370_v16 = vld [vmem:[#allocation38_spill] sm:$0xff] }
 0x33f   : > { %v1774_v32 = vsel %vm1399_vm11, %v9269_v7, 0.0  ;;  %v9276_v11 = vpop.eup %7070 }
 0x340   : > { %v1735_v29 = vmul.f32 1.442695, %v1718_v28  ;;  %v9279_v41 = vpop.eup %7072  ;;  %v1776_v49 = vsel %vm1401_vm13, %v9276_v11, 0.0 }
 0x341   : > { %1875 = vadd.xlane.f32.xlu0 %v1772_v40  ;;  %v1660_v10 = vpop.permute.xlu0 %1659  ;;  %v9289_v40 = vpop.eup %7074 }
 0x342   : > { %7076 = vpow2.f32 %v1735_v29  ;;  %v1721_v3 = vsub.f32 %v8663_v33, %v1660_v10  ;;  %v2584_v33 = vmul.f32 1.442695, %v2565_v63  ;;  %v11362_v29 = vld [vmem:[#allocation33_spill] sm:$0xff]  ;;  %v2588_v10 = vmul.f32 1.442695, %v2567_v50  ;;  %v11364_v63 = vld [vmem:[#allocation34_spill] sm:$0xff] }
 0x344   : > { %v1741_v21 = vmul.f32 1.442695, %v1721_v3 }
 0x345   : > { %1879 = vadd.xlane.f32.xlu0 %v1774_v32  ;;  %v1670_v0 = vpop.permute.xlu0 %1669 }
 0x346   : > { %7078 = vpow2.f32 %v1741_v21  ;;  %v1723_v47 = vsub.f32 %v8683_v45, %v1670_v0  ;;  %v1778_v45 = vsel %vm11207_vm15, %v9279_v41, 0.0  ;;  %v11365_v0 = vld [vmem:[#allocation45_spill] sm:$0xff] }
 0x347   : > { %7080 = vpow2.f32 %v2582_v17 }
 0x348   : > { %v1745_v2 = vmul.f32 1.442695, %v1723_v47  ;;  %v2571_v47 = vsub.f32 %v11365_v0, %v2530_v37 }
 0x349   : > { %1883 = vadd.xlane.f32.xlu0 %v1776_v49  ;;  %v1680_v28 = vpop.permute.xlu0 %1679  ;;  %v2592_v49 = vmul.f32 1.442695, %v2569_v48 }
 0x34a   : > { %7082 = vpow2.f32 %v1745_v2  ;;  %v1725_v9 = vsub.f32 %v8703_v58, %v1680_v28  ;;  %v2540_v58 = vpop.permute.xlu1 %2539  ;;  %v1780_v2 = vsel %vm11261_vm1, %v9289_v40, 0.0  ;;  %v11367_v28 = vld [vmem:[#allocation37_spill] sm:$0xff] }
 0x34b   : > { %7084 = vpow2.f32 %v2584_v33 }
 0x34c   : > { %v1749_v3 = vmul.f32 1.442695, %v1725_v9 }
 0x34d   : > { %1887 = vadd.xlane.f32.xlu0 %v1778_v45  ;;  %v1690_v17 = vpop.permute.xlu0 %1689 }
 0x34e   : > { %7086 = vpow2.f32 %v1749_v3  ;;  %v1727_v21 = vsub.f32 %v11364_v63, %v1690_v17  ;;  %v11368_v3 = vld [vmem:[#allocation48_spill] sm:$0xff] }
 0x34f   : > { %v7077_v32 = vpop.eup %7076  ;;  %7088 = vpow2.f32 %v2588_v10  ;;  %v2596_v10 = vmul.f32 1.442695, %v2571_v47  ;;  %v2573_v17 = vsub.f32 %v11368_v3, %v2540_v58 }
 0x350   : > { %v1753_v33 = vmul.f32 1.442695, %v1727_v21  ;;  %6667 = vmatmul.mubr.msk.f32.vlgmr.msra.gmra.mxu0 %vm1391_vm4, %v7077_v32  ;;  %v1766_v43 = vsel %vm1391_vm4, %v7077_v32, 0.0  ;;  %v2550_v32 = vpop.permute.xlu1 %2549 }
 0x351   : > { %1891 = vadd.xlane.f32.xlu0 %v1780_v2  ;;  %6669 = vmatprep.mubr.msk.f32.mxu0 %vm1392_vm3, %v9231_v52  ;;  %v1700_v37 = vpop.permute.xlu0 %1699 }
 0x352   : > { %7090 = vpow2.f32 %v1753_v33  ;;  %1863 = vadd.xlane.f32.xlu1 %v1766_v43  ;;  %v1729_v9 = vsub.f32 %v11367_v28, %v1700_v37 }
 0x353   : > { %v7079_v45 = vpop.eup %7078  ;;  %7092 = vpow2.f32 %v2592_v49  ;;  %v11371_v49 = vld [vmem:[#allocation49_spill] sm:$0xff] }
 0x354   : > { %v9308_v48 = vpop.eup %7080  ;;  %v1757_v63 = vmul.f32 1.442695, %v1729_v9  ;;  %6670 = vmatmul.mubr.msk.f32.gmra.mxu0 %vm1393_vm5, %v9240_v23  ;;  %v1769_v21 = vsel %vm1394_vm6, %v7079_v45, 0.0  ;;  %v2600_v23 = vmul.f32 1.442695, %v2573_v17  ;;  %v2575_v33 = vsub.f32 %v11371_v49, %v2550_v32  ;;  %v11376_v49 = vld [vmem:[#allocation32_spill] sm:$0xff] }
 0x355   : > { %2707 = vadd.xlane.f32.xlu0 %v2610_v1  ;;  %6672 = vmatprep.mubr.msk.f32.mxu0 %vm1394_vm6, %v7079_v45  ;;  %v1710_v0 = vpop.permute.xlu0 %1709  ;;  %v2612_v58 = vsel %vm1392_vm3, %v9308_v48, 0.0 }
 0x356   : > { %7094 = vpow2.f32 %v1757_v63  ;;  %1869 = vadd.xlane.f32.xlu1 %v1769_v21  ;;  %v1731_v47 = vsub.f32 %v11370_v16, %v1710_v0  ;;  %v2604_v1 = vmul.f32 1.442695, %v2575_v33 }
 0x357   : > { %v7083_v2 = vpop.eup %7082  ;;  %7096 = vpow2.f32 %v2596_v10 }
 0x358   : > { %v1761_v43 = vmul.f32 1.442695, %v1731_v47  ;;  %6673 = vmatmul.mubr.msk.f32.gmra.mxu0 %vm1395_vm7, %v9252_v13  ;;  %v1771_v28 = vsel %vm1396_vm8, %v7083_v2, 0.0  ;;  %v9328_v9 = vpop.eup %7084 }
 0x359   : > { %2711 = vadd.xlane.f32.xlu0 %v2612_v58  ;;  %6675 = vmatprep.mubr.msk.f32.mxu0 %vm1396_vm8, %v7083_v2  ;;  %v9332_v45 = vpop.permute.xlu0 %1949  ;;  %v2613_v13 = vsel %vm1393_vm5, %v9328_v9, 0.0 }
 0x35a   : > { %7098 = vpow2.f32 %v1761_v43  ;;  %1873 = vadd.xlane.f32.xlu1 %v1771_v28 }
 0x35b   : > { %v7087_v10 = vpop.eup %7086  ;;  %7100 = vpow2.f32 %v2600_v23 }
 0x35c   : > { %6676 = vmatmul.mubr.msk.f32.gmra.mxu0 %vm1397_vm9, %v9259_v54  ;;  %v1773_v17 = vsel %vm1398_vm10, %v7087_v10, 0.0  ;;  %v9342_v63 = vpop.eup %7088  ;;  %7102 = vpow2.f32 %v2604_v1 }
 0x35d   : > { %2713 = vadd.xlane.f32.xlu0 %v2613_v13  ;;  %6678 = vmatprep.mubr.msk.f32.mxu0 %vm1398_vm10, %v7087_v10  ;;  %v9346_v21 = vpop.permute.xlu0 %1964  ;;  %v2615_v54 = vsel %vm1395_vm7, %v9342_v63, 0.0  ;;  %v11378_v10 = vld [vmem:[#allocation35_spill] sm:$0xff] }
 0x35e   : > { %1877 = vadd.xlane.f32.xlu1 %v1773_v17  ;;  %vm11379_vm2 = vcmp.gt.f32.partialorder %v11378_v10, 0.0 }
 0x35f   : > { %v7091_v32 = vpop.eup %7090  ;;  %vm11380_vm0 = vmmov %vm11379_vm2 }
 0x360   : > { %6679 = vmatmul.mubr.msk.f32.gmra.mxu0 %vm1399_vm11, %v9269_v7  ;;  %v1775_v16 = vsel %vm1400_vm12, %v7091_v32, 0.0  ;;  %v9356_v47 = vpop.eup %7092 }
 0x361   : > { %2717 = vadd.xlane.f32.xlu0 %v2615_v54  ;;  %6681 = vmatprep.mubr.msk.f32.mxu0 %vm1400_vm12, %v7091_v32  ;;  %v9360_v2 = vpop.permute.xlu0 %1974  ;;  %v2617_v7 = vsel %vm1397_vm9, %v9356_v47, 0.0 }
 0x362   : > { %11375 = vst [vmem:[#allocation33_spill] sm:$0xff] %v9360_v2  ;;  %1881 = vadd.xlane.f32.xlu1 %v1775_v16 }
 0x363   : > { %v7095_v58 = vpop.eup %7094 }
 0x364   : > { %v9362_v23 = vpop.eup %7096  ;;  %6682 = vmatmul.mubr.msk.f32.gmra.mxu0 %vm1401_vm13, %v9276_v11  ;;  %v1777_v33 = vsel %vm11208_vm14, %v7095_v58, 0.0 }
 0x365   : > { %2721 = vadd.xlane.f32.xlu0 %v2617_v7  ;;  %6684 = vmatprep.mubr.msk.f32.mxu0 %vm11208_vm14, %v7095_v58  ;;  %v9374_v43 = vpop.permute.xlu0 %1984  ;;  %v2619_v11 = vsel %vm1399_vm11, %v9362_v23, 0.0 }
 0x366   : > { %11377 = vst [vmem:[#allocation43_spill] sm:$0xff] %v9374_v43  ;;  %1885 = vadd.xlane.f32.xlu1 %v1777_v33  ;;  %v11384_v33 = vld [vmem:[#allocation39_spill] sm:$0xff]  ;;  %v11387_v43 = vld [vmem:[#allocation42_spill] sm:$0xff] }
 0x367   : > { %v7099_v28 = vpop.eup %7098 }
 0x368   : > { %6685 = vmatmul.mubr.msk.f32.gmra.mxu0 %vm11207_vm15, %v9279_v41  ;;  %v1779_v1 = vsel %vm11379_vm2, %v7099_v28, 0.0  ;;  %v9384_v13 = vpop.eup %7100  ;;  %vm11391_vm2 = vmmov %vm11380_vm0 }
 0x369   : > { %2725 = vadd.xlane.f32.xlu0 %v2619_v11  ;;  %6687 = vmatprep.mubr.msk.f32.mxu0 %vm11380_vm0, %v7099_v28  ;;  %v9388_v17 = vpop.permute.xlu0 %1994  ;;  %v2621_v41 = vsel %vm1401_vm13, %v9384_v13, 0.0  ;;  %v9396_v32 = vpop.eup %7102 }
 0x36a   : > { %11381 = vst [vmem:[#allocation34_spill] sm:$0xff] %v9388_v17  ;;  %1889 = vadd.xlane.f32.xlu1 %v1779_v1  ;;  %v2623_v16 = vsel %vm11207_vm15, %v9396_v32, 0.0  ;;  %v11385_v1 = vld [vmem:[#allocation40_spill] sm:$0xff] }
 0x36c   : > { %6688 = vmatmul.mubr.msk.f32.gmra.mxu0 %vm11261_vm1, %v9289_v40 }
 0x36d   : > { %2729 = vadd.xlane.f32.xlu0 %v2621_v41  ;;  %v9398_v54 = vpop.permute.xlu0 %2004  ;;  %v11386_v41 = vld [vmem:[#allocation41_spill] sm:$0xff] }
 0x36e   : > { %11382 = vst [vmem:[#allocation45_spill] sm:$0xff] %v9398_v54 }
 0x371   : > { %2733 = vadd.xlane.f32.xlu0 %v2623_v16  ;;  %v9403_v58 = vpop.permute.xlu0 %2014 }
 0x372   : > { %11383 = vst [vmem:[#allocation27_spill] sm:$0xff] %v9403_v58 }
 0x375   : > { %v2490_v7 = vpop.permute.xlu0 %2489 }
 0x376   : > { %v2563_v28 = vsub.f32 %v11384_v33, %v2490_v7 }
 0x378   : > { %v2580_v40 = vmul.f32 1.442695, %v2563_v28 }
 0x379   : > { %v2505_v11 = vpop.permute.xlu0 %2504 }
 0x37a   : > { %7104 = vpow2.f32 %v2580_v40  ;;  %v2566_v59 = vsub.f32 %v11385_v1, %v2505_v11 }
 0x37c   : > { %v2586_v25 = vmul.f32 1.442695, %v2566_v59 }
 0x37d   : > { %v2515_v35 = vpop.permute.xlu0 %2514 }
 0x37e   : > { %7106 = vpow2.f32 %v2586_v25  ;;  %v2568_v54 = vsub.f32 %v11386_v41, %v2515_v35  ;;  %v11389_v35 = vld [vmem:[#allocation46_spill] sm:$0xff] }
 0x380   : > { %v2590_v5 = vmul.f32 1.442695, %v2568_v54 }
 0x381   : > { %v2525_v17 = vpop.permute.xlu0 %2524 }
 0x382   : > { %7108 = vpow2.f32 %v2590_v5  ;;  %v2570_v16 = vsub.f32 %v11387_v43, %v2525_v17 }
 0x384   : > { %v2594_v2 = vmul.f32 1.442695, %v2570_v16 }
 0x385   : > { %v2535_v58 = vpop.permute.xlu0 %2534 }
 0x386   : > { %7110 = vpow2.f32 %v2594_v2  ;;  %v2572_v7 = vsub.f32 %v11388_v39, %v2535_v58 }
 0x387   : > { %v7105_v33 = vpop.eup %7104 }
 0x388   : > { %v2598_v28 = vmul.f32 1.442695, %v2572_v7  ;;  %6723 = vmatmul.mubr.msk.f32.vlgmr.msra.gmra.mxu1 %vm1391_vm4, %v7105_v33  ;;  %v2611_v59 = vsel %vm1391_vm4, %v7105_v33, 0.0 }
 0x389   : > { %6725 = vmatprep.mubr.msk.f32.mxu1 %vm1392_vm3, %v9308_v48  ;;  %2709 = vadd.xlane.f32.xlu1 %v2611_v59  ;;  %v2545_v25 = vpop.permute.xlu0 %2544  ;;  %v11390_v48 = vld [vmem:[#allocation47_spill] sm:$0xff]  ;;  %v11394_v59 = vld [vmem:[#allocation54_spill] sm:$0xff] }
 0x38a   : > { %7112 = vpow2.f32 %v2598_v28  ;;  %v2574_v5 = vsub.f32 %v11389_v35, %v2545_v25  ;;  %v11395_v25 = vsub.f32 %v11394_v59, %v8957_v8  ;;  %v1829_v8 = vld [vmem:[#allocation3] sm:$0xff] }
 0x38b   : > { %v7107_v2 = vpop.eup %7106 }
 0x38c   : > { %v2602_v43 = vmul.f32 1.442695, %v2574_v5  ;;  %6726 = vmatmul.mubr.msk.f32.gmra.mxu1 %vm1393_vm5, %v9328_v9  ;;  %v2614_v39 = vsel %vm1394_vm6, %v7107_v2, 0.0  ;;  %v2646_v35 = vmul.f32 1.442695, %v11395_v25  ;;  %v11396_v5 = vld [vmem:[#allocation57_spill] sm:$0xff]  ;;  %v11409_v25 = vsub.f32 %v9058_v12, %v9069_v4 }
 0x38d   : > { %6728 = vmatprep.mubr.msk.f32.mxu1 %vm1394_vm6, %v7107_v2  ;;  %2715 = vadd.xlane.f32.xlu1 %v2614_v39  ;;  %v2555_v17 = vpop.permute.xlu0 %2554  ;;  %v11413_v12 = vld [vmem:[#allocation63_spill] sm:$0xff] }
 0x38e   : > { %7114 = vpow2.f32 %v2602_v43  ;;  %v2576_v54 = vsub.f32 %v11390_v48, %v2555_v17  ;;  %v11398_v43 = vld [vmem:[#allocation61_spill] sm:$0xff] }
 0x38f   : > { %v7109_v58 = vpop.eup %7108  ;;  %v11399_v39 = vsub.f32 %v11398_v43, %v8997_v27  ;;  %v11404_v27 = vld [vmem:[#allocation52_spill] sm:$0xff] }
 0x390   : > { %v2606_v40 = vmul.f32 1.442695, %v2576_v54  ;;  %6729 = vmatmul.mubr.msk.f32.gmra.mxu1 %vm1395_vm7, %v9342_v63  ;;  %v2616_v9 = vsel %vm1396_vm8, %v7109_v58, 0.0 }
 0x391   : > { %6731 = vmatprep.mubr.msk.f32.mxu1 %vm1396_vm8, %v7109_v58  ;;  %2719 = vadd.xlane.f32.xlu1 %v2616_v9  ;;  %v2652_v17 = vmul.f32 1.442695, %v11399_v39  ;;  %v1834_v39 = vld [vmem:[#allocation3 + $0x28] sm:$0xff] }
 0x392   : > { %7116 = vpow2.f32 %v2606_v40  ;;  %v1850_v4 = vmul.f32 %v11413_v12, %v1834_v39  ;;  %v1830_v39 = vld [vmem:[#allocation3 + $0x8] sm:$0xff] }
 0x393   : > { %v7111_v11 = vpop.eup %7110  ;;  %v1846_v12 = vmul.f32 %v9129_v14, %v1830_v39  ;;  %v2677_v14 = vld [vmem:[#allocation3 + $0x90] sm:$0xff] }
 0x394   : > { %6732 = vmatmul.mubr.msk.f32.gmra.mxu1 %vm1397_vm9, %v9356_v47  ;;  %v2618_v1 = vsel %vm1398_vm10, %v7111_v11, 0.0 }
 0x395   : > { %6734 = vmatprep.mubr.msk.f32.mxu1 %vm1398_vm10, %v7111_v11  ;;  %2723 = vadd.xlane.f32.xlu1 %v2618_v1  ;;  %v1845_v1 = vmul.f32 %v11404_v27, %v1829_v8  ;;  %v1838_v27 = vld [vmem:[#allocation3 + $0x48] sm:$0xff] }
 0x397   : > { %v7113_v63 = vpop.eup %7112 }
 0x398   : > { %6735 = vmatmul.mubr.msk.f32.gmra.mxu1 %vm1399_vm11, %v9362_v23  ;;  %v2620_v41 = vsel %vm1400_vm12, %v7113_v63, 0.0 }
 0x399   : > { %6737 = vmatprep.mubr.msk.f32.mxu1 %vm1400_vm12, %v7113_v63  ;;  %2727 = vadd.xlane.f32.xlu1 %v2620_v41  ;;  %v1831_v41 = vld [vmem:[#allocation3 + $0x10] sm:$0xff] }
 0x39b   : > { %v7115_v47 = vpop.eup %7114 }
 0x39c   : > { %6738 = vmatmul.mubr.msk.f32.gmra.mxu1 %vm1401_vm13, %v9384_v13  ;;  %v2622_v16 = vsel %vm11208_vm14, %v7115_v47, 0.0  ;;  %v11392_v13 = vld [vmem:[#allocation51_spill] sm:$0xff] }
 0x39d   : > { %6740 = vmatprep.mubr.msk.f32.mxu1 %vm11208_vm14, %v7115_v47  ;;  %2731 = vadd.xlane.f32.xlu1 %v2622_v16  ;;  %v11393_v33 = vsub.f32 %v11392_v13, %v8939_v57  ;;  %v11400_v57 = vld [vmem:[#allocation65_spill] sm:$0xff]  ;;  %v11405_v47 = vld [vmem:[#allocation72_spill] sm:$0xff] }
 0x39e   : > { %v11401_v48 = vsub.f32 %v11400_v57, %v9016_v44  ;;  %v11406_v16 = vsub.f32 %v11405_v47, %v9056_v61  ;;  %v2641_v61 = vsub.f32 %v9235_v53, %v9243_v38 }
 0x39f   : > { %v7117_v23 = vpop.eup %7116  ;;  %v2642_v28 = vmul.f32 1.442695, %v11393_v33 }
 0x3a0   : > { %6741 = vmatmul.mubr.msk.f32.gmra.mxu1 %vm11207_vm15, %v9396_v32  ;;  %v2624_v7 = vsel %vm11391_vm2, %v7117_v23, 0.0  ;;  %v11397_v32 = vsub.f32 %v11396_v5, %v8979_v56  ;;  %v2656_v54 = vmul.f32 1.442695, %v11401_v48  ;;  %v11402_v56 = vld [vmem:[#allocation68_spill] sm:$0xff]  ;;  %vm11407_vm2 = vcmask 7168  }
 0x3a1   : > { %6743 = vmatprep.mubr.msk.f32.mxu1 %vm11380_vm0, %v7117_v23  ;;  %2735 = vadd.xlane.f32.xlu1 %v2624_v7  ;;  %7118 = vpow2.f32 %v2642_v28  ;;  %v11403_v40 = vsub.f32 %v11402_v56, %v9035_v15  ;;  %v2664_v23 = vmul.f32 1.442695, %v11406_v16  ;;  %v11408_v15 = vld [vmem:[#allocation55_spill] sm:$0xff]  ;;  %v1832_v28 = vld [vmem:[#allocation3 + $0x18] sm:$0xff]  ;;  %vm11410_vm0 = vmmov %vm11407_vm2  ;;  %v2672_v57 = vmul.f32 1.442695, %v2641_v61 }
 0x3a2   : > { %7120 = vpow2.f32 %v2646_v35  ;;  %v2648_v2 = vmul.f32 1.442695, %v11397_v32  ;;  %v1847_v13 = vmul.f32 %v11408_v15, %v1831_v41  ;;  %v2668_v35 = vmul.f32 1.442695, %v11409_v25  ;;  %v11411_v32 = vld [vmem:[#allocation58_spill] sm:$0xff]  ;;  %v1840_v16 = vld [vmem:[#allocation3 + $0x58] sm:$0xff]  ;;  %vm11420_vm15 = vmmov %vm11410_vm0 }
 0x3a3   : > { %v2660_v9 = vmul.f32 1.442695, %v11403_v40  ;;  %v11414_v56 = vld [vmem:[#allocation66_spill] sm:$0xff]  ;;  %vm11427_vm14 = vmmov %vm11410_vm0 }
 0x3a4   : > { %7122 = vpow2.f32 %v2648_v2  ;;  %v1848_v2 = vmul.f32 %v11411_v32, %v1832_v28  ;;  %v11416_v41 = vld [vmem:[#allocation70_spill] sm:$0xff] }
 0x3a5   : > { %7124 = vpow2.f32 %v2652_v17 }
 0x3a6   : > { %7126 = vpow2.f32 %v2656_v54 }
 0x3a7   : > { %7128 = vpow2.f32 %v2660_v9 }
 0x3a8   : > { %7130 = vpow2.f32 %v2664_v23 }
 0x3a9   : > { %7132 = vpow2.f32 %v2668_v35 }
 0x3aa   : > { %7134 = vpow2.f32 %v2672_v57 }
 0x3ae   : > { %v9477_v58 = vpop.eup %7118 }
 0x3af   : > { %v9483_v11 = vpop.eup %7120 }
 0x3b1   : > { %v9490_v7 = vpop.eup %7122 }
 0x3b2   : > { %2559 = vperm.xlu1 %7023, %v9243_v38   ;;  %v9500_v5 = vpop.eup %7124  ;;  %v1836_v38 = vld [vmem:[#allocation3 + $0x38] sm:$0xff] }
 0x3b3   : > { %v9505_v48 = vpop.eup %7126  ;;  %v1852_v40 = vmul.f32 %v11414_v56, %v1836_v38  ;;  %v6360_v56 = vld [vmem:[%s8177_s7 + $0x118] sm:$0xff] }
 0x3b4   : > { %v9510_v8 = vpop.eup %7128 }
 0x3b6   : > { %2790 = vperm.xlu1 %7023, %v9477_v58  }
 0x3ba   : > { %2800 = vperm.xlu1 %7023, %v9483_v11   ;;  %v1862_v63 = vpop.xlane.xlu0 %1861 }
 0x3bb   : > { %v1893_v44 = vadd.f32 %v1862_v63, %v1845_v1  ;;  %v9515_v63 = vpop.eup %7130 }
 0x3bc   : > { %v9520_v15 = vpop.eup %7132 }
 0x3bd   : > { %1910 = vst.msk [vmem:[#allocation3] sm:$0xff] %vm11407_vm2, %v1893_v44  ;;  %vm11412_vm2 = vmmov %vm11410_vm0  ;;  %v1854_v44 = vmul.f32 %v11416_v41, %v1838_v27  ;;  %v9525_v35 = vpop.eup %7134 }
 0x3be   : > { %2805 = vperm.xlu1 %7023, %v9490_v7   ;;  %v1866_v33 = vpop.xlane.xlu0 %1865 }
 0x3bf   : > { %v1895_v59 = vadd.f32 %v1866_v33, %v1847_v13  ;;  %v11417_v13 = vld [vmem:[#allocation73_spill] sm:$0xff] }
 0x3c0   : > { %v1856_v33 = vmul.f32 %v11417_v13, %v1840_v16 }
 0x3c1   : > { %1912 = vst.msk [vmem:[#allocation3 + $0x10] sm:$0xff] %vm11410_vm0, %v1895_v59  ;;  %v1842_v59 = vld [vmem:[#allocation3 + $0x68] sm:$0xff] }
 0x3c2   : > { %2815 = vperm.xlu1 %7023, %v9500_v5   ;;  %v1868_v43 = vpop.xlane.xlu0 %1867  ;;  %v1858_v61 = vmul.f32 %v9071_v46, %v1842_v59  ;;  %v1837_v59 = vld [vmem:[#allocation3 + $0x40] sm:$0xff] }
 0x3c3   : > { %v1896_v17 = vadd.f32 %v1868_v43, %v1848_v2  ;;  %v1844_v2 = vld [vmem:[#allocation3 + $0x78] sm:$0xff] }
 0x3c4   : > { %v1860_v57 = vmul.f32 %v9078_v26, %v1844_v2 }
 0x3c5   : > { %1913 = vst.msk [vmem:[#allocation3 + $0x18] sm:$0xff] %vm11412_vm2, %v1896_v17  ;;  %vm11415_vm2 = vmmov %vm11410_vm0  ;;  %v6358_v17 = vld [vmem:[%s8177_s7 + $0x108] sm:$0xff] }
 0x3c6   : > { %2825 = vperm.xlu1 %7023, %v9505_v48   ;;  %v1872_v53 = vpop.xlane.xlu0 %1871 }
 0x3c7   : > { %v1898_v54 = vadd.f32 %v1872_v53, %v1850_v4  ;;  %v2675_v53 = vld [vmem:[#allocation3 + $0x80] sm:$0xff] }
 0x3c9   : > { %1915 = vst.msk [vmem:[#allocation3 + $0x28] sm:$0xff] %vm11410_vm0, %v1898_v54  ;;  %v1833_v54 = vld [vmem:[#allocation3 + $0x20] sm:$0xff] }
 0x3ca   : > { %2835 = vperm.xlu1 %7023, %v9510_v8   ;;  %v1876_v9 = vpop.xlane.xlu0 %1875  ;;  %v1849_v27 = vmul.f32 %v9134_v31, %v1833_v54  ;;  %v2678_v31 = vld [vmem:[#allocation3 + $0x98] sm:$0xff]  ;;  %v1841_v54 = vld [vmem:[#allocation3 + $0x60] sm:$0xff] }
 0x3cb   : > { %v1900_v1 = vadd.f32 %v1876_v9, %v1852_v40  ;;  %v2691_v9 = vmul.f32 %v9477_v58, %v2675_v53 }
 0x3cd   : > { %1917 = vst.msk [vmem:[#allocation3 + $0x38] sm:$0xff] %vm11415_vm2, %v1900_v1  ;;  %vm11418_vm2 = vmmov %vm11410_vm0 }
 0x3ce   : > { %2845 = vperm.xlu1 %7023, %v9515_v63   ;;  %v1880_v47 = vpop.xlane.xlu0 %1879 }
 0x3cf   : > { %v1902_v23 = vadd.f32 %v1880_v47, %v1854_v44  ;;  %v1835_v44 = vld [vmem:[#allocation3 + $0x30] sm:$0xff]  ;;  %v6362_v47 = vld [vmem:[%s8177_s7 + $0x128] sm:$0xff] }
 0x3d0   : > { %v1851_v58 = vmul.f32 %v9138_v34, %v1835_v44  ;;  %v2680_v34 = vld [vmem:[#allocation3 + $0xa8] sm:$0xff] }
 0x3d1   : > { %1919 = vst.msk [vmem:[#allocation3 + $0x48] sm:$0xff] %vm11410_vm0, %v1902_v23  ;;  %v2693_v23 = vmul.f32 %v9483_v11, %v2677_v14  ;;  %v1853_v11 = vmul.f32 %v9144_v51, %v1837_v59  ;;  %v2682_v51 = vld [vmem:[#allocation3 + $0xb8] sm:$0xff] }
 0x3d2   : > { %2855 = vperm.xlu1 %7023, %v9520_v15   ;;  %v1884_v28 = vpop.xlane.xlu0 %1883 }
 0x3d3   : > { %v1904_v25 = vadd.f32 %v1884_v28, %v1856_v33 }
 0x3d5   : > { %1921 = vst.msk [vmem:[#allocation3 + $0x58] sm:$0xff] %vm11418_vm2, %v1904_v25  ;;  %vm11419_vm2 = vmmov %vm11410_vm0  ;;  %v6364_v25 = vld [vmem:[%s8177_s7 + $0x138] sm:$0xff] }
 0x3d6   : > { %2865 = vperm.xlu1 %7023, %v9525_v35   ;;  %v1888_v32 = vpop.xlane.xlu0 %1887 }
 0x3d7   : > { %v1906_v43 = vadd.f32 %v1888_v32, %v1858_v61  ;;  %v2694_v32 = vmul.f32 %v9490_v7, %v2678_v31 }
 0x3d9   : > { %1923 = vst.msk [vmem:[#allocation3 + $0x68] sm:$0xff] %vm11410_vm0, %v1906_v43 }
 0x3da   : > { %3120 = vperm.xlu1 %7023, %v6358_v17   ;;  %v1892_v4 = vpop.xlane.xlu0 %1891  ;;  %v1839_v17 = vld [vmem:[#allocation3 + $0x50] sm:$0xff] }
 0x3db   : > { %v1864_v38 = vpop.xlane.xlu1 %1863  ;;  %v1908_v46 = vadd.f32 %v1892_v4, %v1860_v57  ;;  %v6366_v57 = vld [vmem:[%s8177_s7 + $0x148] sm:$0xff]  ;;  %v2696_v4 = vmul.f32 %v9500_v5, %v2680_v34  ;;  %v1855_v7 = vmul.f32 %v9151_v24, %v1839_v17  ;;  %v1857_v5 = vmul.f32 %v9158_v22, %v1841_v54  ;;  %v11439_v54 = vld [vmem:[#allocation67_spill] sm:$0xff] }
 0x3dc   : > { %v1894_v40 = vadd.f32 %v1864_v38, %v1846_v12  ;;  %v2684_v24 = vld [vmem:[#allocation3 + $0xc8] sm:$0xff] }
 0x3dd   : > { %1925 = vst.msk [vmem:[#allocation3 + $0x78] sm:$0xff] %vm11419_vm2, %v1908_v46  ;;  %vm11421_vm2 = vmmov %vm11410_vm0 }
 0x3de   : > { %1911 = vst.msk [vmem:[#allocation3 + $0x8] sm:$0xff] %vm11420_vm15, %v1894_v40  ;;  %3130 = vperm.xlu1 %7023, %v6360_v56   ;;  %v2708_v26 = vpop.xlane.xlu0 %2707  ;;  %vm11422_vm15 = vmmov %vm11410_vm0  ;;  %v6368_v56 = vld [vmem:[%s8177_s7 + $0x158] sm:$0xff] }
 0x3df   : > { %v1870_v1 = vpop.xlane.xlu1 %1869  ;;  %v2739_v41 = vadd.f32 %v2708_v26, %v2691_v9  ;;  %v2698_v9 = vmul.f32 %v9505_v48, %v2682_v51 }
 0x3e0   : > { %v1897_v16 = vadd.f32 %v1870_v1, %v1849_v27  ;;  %v1843_v1 = vld [vmem:[#allocation3 + $0x70] sm:$0xff] }
 0x3e1   : > { %2755 = vst.msk [vmem:[#allocation3 + $0x80] sm:$0xff] %vm11410_vm0, %v2739_v41  ;;  %v6370_v41 = vld [vmem:[%s8177_s7 + $0x168] sm:$0xff]  ;;  %v1859_v48 = vmul.f32 %v9167_v20, %v1843_v1 }
 0x3e2   : > { %1914 = vst.msk [vmem:[#allocation3 + $0x20] sm:$0xff] %vm11421_vm2, %v1897_v16  ;;  %3140 = vperm.xlu1 %7023, %v6362_v47   ;;  %v2712_v13 = vpop.xlane.xlu0 %2711  ;;  %vm11423_vm2 = vmmov %vm11410_vm0  ;;  %v2700_v47 = vmul.f32 %v9510_v8, %v2684_v24  ;;  %v11429_v8 = vld [vmem:[#allocation50_spill] sm:$0xff] }
 0x3e3   : > { %v1874_v33 = vpop.xlane.xlu1 %1873  ;;  %v2741_v28 = vadd.f32 %v2712_v13, %v2693_v23  ;;  %v2686_v23 = vld [vmem:[#allocation3 + $0xd8] sm:$0xff]  ;;  %v11440_v1 = vld [vmem:[#allocation74_spill] sm:$0xff] }
 0x3e4   : > { %v1899_v61 = vadd.f32 %v1874_v33, %v1851_v58  ;;  %v2702_v31 = vmul.f32 %v9515_v63, %v2686_v23  ;;  %v2679_v23 = vld [vmem:[#allocation3 + $0xa0] sm:$0xff] }
 0x3e5   : > { %2757 = vst.msk [vmem:[#allocation3 + $0x90] sm:$0xff] %vm11422_vm15, %v2741_v28  ;;  %vm11424_vm15 = vmmov %vm11410_vm0  ;;  %v2688_v28 = vld [vmem:[#allocation3 + $0xe8] sm:$0xff] }
 0x3e6   : > { %1916 = vst.msk [vmem:[#allocation3 + $0x30] sm:$0xff] %vm11410_vm0, %v1899_v61  ;;  %3150 = vperm.xlu1 %7023, %v6364_v25   ;;  %v2714_v2 = vpop.xlane.xlu0 %2713  ;;  %v2627_v25 = vsub.f32 %v11429_v8, %v8929_v19  ;;  %v2704_v20 = vmul.f32 %v9520_v15, %v2688_v28  ;;  %v11435_v19 = vld [vmem:[#allocation62_spill] sm:$0xff]  ;;  %v11437_v15 = vld [vmem:[#allocation64_spill] sm:$0xff] }
 0x3e7   : > { %v1878_v43 = vpop.xlane.xlu1 %1877  ;;  %v2742_v39 = vadd.f32 %v2714_v2, %v2694_v32  ;;  %v11431_v2 = vld [vmem:[#allocation53_spill] sm:$0xff] }
 0x3e8   : > { %v1901_v12 = vadd.f32 %v1878_v43, %v1853_v11  ;;  %v2644_v11 = vmul.f32 1.442695, %v2627_v25  ;;  %v2630_v34 = vsub.f32 %v11431_v2, %v8954_v60  ;;  %v11433_v43 = vld [vmem:[#allocation59_spill] sm:$0xff] }
 0x3e9   : > { %2758 = vst.msk [vmem:[#allocation3 + $0x98] sm:$0xff] %vm11423_vm2, %v2742_v39  ;;  %vm11425_vm2 = vmmov %vm11410_vm0  ;;  %v11434_v39 = vld [vmem:[#allocation56_spill] sm:$0xff] }
 0x3ea   : > { %1918 = vst.msk [vmem:[#allocation3 + $0x40] sm:$0xff] %vm11424_vm15, %v1901_v12  ;;  %3160 = vperm.xlu1 %7023, %v6366_v57   ;;  %v2718_v53 = vpop.xlane.xlu0 %2717  ;;  %vm11426_vm15 = vmmov %vm11410_vm0  ;;  %7136 = vpow2.f32 %v2644_v11  ;;  %v2650_v63 = vmul.f32 1.442695, %v2630_v34  ;;  %v2632_v17 = vsub.f32 %v11434_v39, %v11433_v43  ;;  %v11436_v12 = vld [vmem:[#allocation60_spill] sm:$0xff]  ;;  %v1930_v34 = vld [vmem:[#allocation4 + $0x20] sm:$0xff] }
 0x3eb   : > { %v1882_v38 = vpop.xlane.xlu1 %1881  ;;  %v2744_v46 = vadd.f32 %v2718_v53, %v2696_v4  ;;  %v2634_v4 = vsub.f32 %v11436_v12, %v11435_v19  ;;  %v2681_v39 = vld [vmem:[#allocation3 + $0xb0] sm:$0xff] }
 0x3ec   : > { %v1903_v40 = vadd.f32 %v1882_v38, %v1855_v7  ;;  %7138 = vpow2.f32 %v2650_v63  ;;  %v2654_v57 = vmul.f32 1.442695, %v2632_v17  ;;  %v2636_v7 = vsub.f32 %v11437_v15, %v9013_v36  ;;  %v1927_v38 = vld [vmem:[#allocation4 + $0x8] sm:$0xff]  ;;  %v11445_v17 = vld [vmem:[#allocation79_spill] sm:$0xff] }
 0x3ed   : > { %2760 = vst.msk [vmem:[#allocation3 + $0xa8] sm:$0xff] %vm11410_vm0, %v2744_v46  ;;  %v2658_v53 = vmul.f32 1.442695, %v2634_v4  ;;  %v11438_v46 = vld [vmem:[#allocation69_spill] sm:$0xff]  ;;  %v1933_v4 = vld [vmem:[#allocation4 + $0x38] sm:$0xff] }
 0x3ee   : > { %1920 = vst.msk [vmem:[#allocation3 + $0x50] sm:$0xff] %vm11425_vm2, %v1903_v40  ;;  %3170 = vperm.xlu1 %7023, %v6368_v56   ;;  %v2722_v27 = vpop.xlane.xlu0 %2721  ;;  %vm11428_vm2 = vmmov %vm11410_vm0  ;;  %7140 = vpow2.f32 %v2654_v57  ;;  %v2662_v51 = vmul.f32 1.442695, %v2636_v7  ;;  %v2638_v56 = vsub.f32 %v11439_v54, %v11438_v46  ;;  %v2676_v40 = vld [vmem:[#allocation3 + $0x88] sm:$0xff]  ;;  %v2026_v7 = vmul.f32 %v9346_v21, %v1930_v34  ;;  %v1932_v46 = vld [vmem:[#allocation4 + $0x30] sm:$0xff] }
 0x3ef   : > { %v1886_v26 = vpop.xlane.xlu1 %1885  ;;  %v2746_v14 = vadd.f32 %v2722_v27, %v2698_v9  ;;  %7142 = vpow2.f32 %v2658_v53  ;;  %v1926_v9 = vld [vmem:[#allocation4] sm:$0xff]  ;;  %v1929_v27 = vld [vmem:[#allocation4 + $0x18] sm:$0xff]  ;;  %v1935_v21 = vld [vmem:[#allocation4 + $0x48] sm:$0xff] }
 0x3f0   : > { %v1905_v44 = vadd.f32 %v1886_v26, %v1857_v5  ;;  %v2023_v5 = vmul.f32 %v9332_v45, %v1927_v38  ;;  %7144 = vpow2.f32 %v2662_v51  ;;  %v11443_v45 = vld [vmem:[#allocation78_spill] sm:$0xff] }
 0x3f1   : > { %2762 = vst.msk [vmem:[#allocation3 + $0xb8] sm:$0xff] %vm11426_vm15, %v2746_v14  ;;  %vm11432_vm15 = vmmov %vm11410_vm0  ;;  %v2666_v14 = vmul.f32 1.442695, %v2638_v56 }
 0x3f2   : > { %1922 = vst.msk [vmem:[#allocation3 + $0x60] sm:$0xff] %vm11427_vm14, %v1905_v44  ;;  %3180 = vperm.xlu1 %7023, %v6370_v41   ;;  %v2726_v16 = vpop.xlane.xlu0 %2725  ;;  %vm11430_vm14 = vmmov %vm11410_vm0  ;;  %v11441_v41 = vld [vmem:[#allocation71_spill] sm:$0xff] }
 0x3f3   : > { %v1890_v22 = vpop.xlane.xlu1 %1889  ;;  %v2748_v58 = vadd.f32 %v2726_v16, %v2700_v47  ;;  %v2640_v44 = vsub.f32 %v11441_v41, %v11440_v1  ;;  %v11442_v47 = vld [vmem:[#allocation76_spill] sm:$0xff]  ;;  %7146 = vpow2.f32 %v2666_v14  ;;  %v11448_v1 = vld [vmem:[#allocation33_spill] sm:$0xff] }
 0x3f4   : > { %v1907_v13 = vadd.f32 %v1890_v22, %v1859_v48  ;;  %v2022_v48 = vmul.f32 %v11442_v47, %v1926_v9  ;;  %v1928_v22 = vld [vmem:[#allocation4 + $0x10] sm:$0xff]  ;;  %v11447_v9 = vld [vmem:[#allocation80_spill] sm:$0xff]  ;;  %v2028_v41 = vmul.f32 %v11448_v1, %v1932_v46  ;;  %v1938_v46 = vld [vmem:[#allocation4 + $0x60] sm:$0xff] }
 0x3f5   : > { %2764 = vst.msk [vmem:[#allocation3 + $0xc8] sm:$0xff] %vm11410_vm0, %v2748_v58  ;;  %vm11255_vm0 = vcmask 130048   ;;  %v11456_v1 = vld [vmem:[#allocation45_spill] sm:$0xff] }
 0x3f6   : > { %1924 = vst.msk [vmem:[#allocation3 + $0x70] sm:$0xff] %vm11428_vm2, %v1907_v13  ;;  %v2730_v33 = vpop.xlane.xlu0 %2729 }
 0x3f7   : > { %v2750_v59 = vadd.f32 %v2730_v33, %v2702_v31  ;;  %v9580_v60 = vpop.eup %7136  ;;  %v2025_v31 = vmul.f32 %v11443_v45, %v1929_v27 }
 0x3f8   : > { %v2692_v36 = vmul.f32 %v9580_v60, %v2676_v40  ;;  %v2683_v40 = vld [vmem:[#allocation3 + $0xc0] sm:$0xff] }
 0x3f9   : > { %2766 = vst.msk [vmem:[#allocation3 + $0xd8] sm:$0xff] %vm11430_vm14, %v2750_v59  ;;  %v9586_v26 = vpop.eup %7138  ;;  %v1931_v59 = vld [vmem:[#allocation4 + $0x28] sm:$0xff]  ;;  %vm11446_vm14 = vmmov %vm11428_vm2 }
 0x3fa   : > { %v2734_v61 = vpop.xlane.xlu0 %2733  ;;  %v2695_v25 = vmul.f32 %v9586_v26, %v2679_v23  ;;  %v2027_v57 = vmul.f32 %v11445_v17, %v1931_v59  ;;  %v11451_v59 = vld [vmem:[#allocation43_spill] sm:$0xff] }
 0x3fb   : > { %v2752_v32 = vadd.f32 %v2734_v61, %v2704_v20  ;;  %v2670_v20 = vmul.f32 1.442695, %v2640_v44  ;;  %v11444_v61 = vld [vmem:[#allocation77_spill] sm:$0xff]  ;;  %v9597_v2 = vpop.eup %7140 }
 0x3fc   : > { %v2697_v51 = vmul.f32 %v9597_v2, %v2681_v39  ;;  %v9605_v38 = vpop.eup %7142 }
 0x3fd   : > { %2768 = vst.msk [vmem:[#allocation3 + $0xe8] sm:$0xff] %vm11432_vm15, %v2752_v32  ;;  %v2024_v32 = vmul.f32 %v11444_v61, %v1928_v22  ;;  %7148 = vpow2.f32 %v2670_v20  ;;  %v9609_v14 = vpop.eup %7144  ;;  %vm11449_vm15 = vmmov %vm11428_vm2  ;;  %v2699_v47 = vmul.f32 %v9605_v38, %v2683_v40  ;;  %v2685_v22 = vld [vmem:[#allocation3 + $0xd0] sm:$0xff] }
 0x3fe   : > { %v2701_v20 = vmul.f32 %v9609_v14, %v2685_v22  ;;  %v2689_v40 = vld [vmem:[#allocation3 + $0xf0] sm:$0xff]  ;;  %v11458_v22 = vld [vmem:[#allocation84_spill] sm:$0xff] }
 0x400   : > { %v9621_v61 = vpop.eup %7146 }
 0x410   : > { %v6668_v24 = vpop.f32.mrf.mxu0 }
 0x411   : > { %v2200_v16 = vadd.f32 %v6668_v24, %v2023_v5  ;;  %v2029_v5 = vmul.f32 %v11447_v9, %v1933_v4  ;;  %v11453_v4 = vld [vmem:[#allocation34_spill] sm:$0xff]  ;;  %v11455_v9 = vld [vmem:[#allocation83_spill] sm:$0xff] }
 0x412   : > { %v2120_v58 = vpop.f32.mrf.mxu0  ;;  %v2710_v13 = vpop.xlane.xlu1 %2709 }
 0x413   : > { %2217 = vst.msk [vmem:[#allocation4 + $0x8] sm:$0xff] %vm11255_vm0, %v2200_v16  ;;  %v2199_v33 = vadd.f32 %v2120_v58, %v2022_v48  ;;  %v2740_v28 = vadd.f32 %v2710_v13, %v2692_v36  ;;  %v1934_v48 = vld [vmem:[#allocation4 + $0x40] sm:$0xff] }
 0x414   : > { %v6671_v8 = vpop.f32.mrf.mxu0  ;;  %v11450_v58 = vld [vmem:[#allocation81_spill] sm:$0xff] }
 0x415   : > { %2216 = vst.msk [vmem:[#allocation4] sm:$0xff] %vm11255_vm0, %v2199_v33  ;;  %v2202_v11 = vadd.f32 %v6671_v8, %v2025_v31  ;;  %v2031_v13 = vmul.f32 %v11450_v58, %v1935_v21  ;;  %v1937_v33 = vld [vmem:[#allocation4 + $0x58] sm:$0xff]  ;;  %v2030_v8 = vmul.f32 %v11451_v59, %v1934_v48  ;;  %v1940_v48 = vld [vmem:[#allocation4 + $0x70] sm:$0xff] }
 0x416   : > { %2756 = vst.msk [vmem:[#allocation3 + $0x88] sm:$0xff] %vm11428_vm2, %v2740_v28  ;;  %v2130_v63 = vpop.f32.mrf.mxu0  ;;  %v2716_v43 = vpop.xlane.xlu1 %2715  ;;  %v1941_v21 = vld [vmem:[#allocation4 + $0x78] sm:$0xff] }
 0x417   : > { %2219 = vst.msk [vmem:[#allocation4 + $0x18] sm:$0xff] %vm11255_vm0, %v2202_v11  ;;  %v2201_v19 = vadd.f32 %v2130_v63, %v2024_v32  ;;  %v2743_v12 = vadd.f32 %v2716_v43, %v2695_v25  ;;  %v1936_v32 = vld [vmem:[#allocation4 + $0x50] sm:$0xff]  ;;  %v2687_v63 = vld [vmem:[#allocation3 + $0xe0] sm:$0xff]  ;;  %v11452_v43 = vld [vmem:[#allocation82_spill] sm:$0xff]  ;;  %v2037_v58 = vmul.f32 %v11458_v22, %v1941_v21 }
 0x418   : > { %v6674_v15 = vpop.f32.mrf.mxu0  ;;  %v2033_v39 = vmul.f32 %v11452_v43, %v1937_v33  ;;  %v11459_v33 = vld [vmem:[#allocation27_spill] sm:$0xff] }
 0x419   : > { %2218 = vst.msk [vmem:[#allocation4 + $0x10] sm:$0xff] %vm11255_vm0, %v2201_v19  ;;  %v2204_v53 = vadd.f32 %v6674_v15, %v2027_v57  ;;  %v1939_v19 = vld [vmem:[#allocation4 + $0x68] sm:$0xff]  ;;  %v2032_v15 = vmul.f32 %v11453_v4, %v1936_v32  ;;  %v11460_v32 = vld [vmem:[#allocation75_spill] sm:$0xff] }
 0x41a   : > { %2759 = vst.msk [vmem:[#allocation3 + $0xa0] sm:$0xff] %vm11446_vm14, %v2743_v12  ;;  %v2140_v54 = vpop.f32.mrf.mxu0  ;;  %v2720_v56 = vpop.xlane.xlu1 %2719  ;;  %vm11454_vm14 = vmmov %vm11428_vm2 }
 0x41b   : > { %2221 = vst.msk [vmem:[#allocation4 + $0x28] sm:$0xff] %vm11255_vm0, %v2204_v53  ;;  %v2203_v27 = vadd.f32 %v2140_v54, %v2026_v7  ;;  %v2745_v24 = vadd.f32 %v2720_v56, %v2697_v51  ;;  %v2703_v53 = vmul.f32 %v9621_v61, %v2687_v63  ;;  %v9629_v51 = vpop.eup %7148 }
 0x41c   : > { %v6677_v36 = vpop.f32.mrf.mxu0 }
 0x41d   : > { %2220 = vst.msk [vmem:[#allocation4 + $0x20] sm:$0xff] %vm11255_vm0, %v2203_v27  ;;  %v2206_v44 = vadd.f32 %v6677_v36, %v2029_v5  ;;  %v2035_v5 = vmul.f32 %v11455_v9, %v1939_v19  ;;  %v11461_v19 = vld [vmem:[#allocation36_spill] sm:$0xff] }
 0x41e   : > { %2761 = vst.msk [vmem:[#allocation3 + $0xb0] sm:$0xff] %vm11449_vm15, %v2745_v24  ;;  %v2150_v16 = vpop.f32.mrf.mxu0  ;;  %v2724_v23 = vpop.xlane.xlu1 %2723  ;;  %vm11457_vm15 = vmmov %vm11428_vm2 }
 0x41f   : > { %2223 = vst.msk [vmem:[#allocation4 + $0x38] sm:$0xff] %vm11255_vm0, %v2206_v44  ;;  %v2205_v45 = vadd.f32 %v2150_v16, %v2028_v41  ;;  %v2747_v31 = vadd.f32 %v2724_v23, %v2699_v47  ;;  %v2034_v41 = vmul.f32 %v11456_v1, %v1938_v46  ;;  %v2705_v47 = vmul.f32 %v9629_v51, %v2689_v40 }
 0x420   : > { %v6680_v28 = vpop.f32.mrf.mxu0 }
 0x421   : > { %2222 = vst.msk [vmem:[#allocation4 + $0x30] sm:$0xff] %vm11255_vm0, %v2205_v45  ;;  %v2208_v25 = vadd.f32 %v6680_v28, %v2031_v13  ;;  %v2036_v28 = vmul.f32 %v11459_v33, %v1940_v48 }
 0x422   : > { %2763 = vst.msk [vmem:[#allocation3 + $0xc0] sm:$0xff] %vm11428_vm2, %v2747_v31  ;;  %v2160_v11 = vpop.f32.mrf.mxu0  ;;  %v2728_v34 = vpop.xlane.xlu1 %2727 }
 0x423   : > { %2225 = vst.msk [vmem:[#allocation4 + $0x48] sm:$0xff] %vm11255_vm0, %v2208_v25  ;;  %v2207_v17 = vadd.f32 %v2160_v11, %v2030_v8  ;;  %v2749_v57 = vadd.f32 %v2728_v34, %v2701_v20 }
 0x424   : > { %v6683_v12 = vpop.f32.mrf.mxu0 }
 0x425   : > { %2224 = vst.msk [vmem:[#allocation4 + $0x40] sm:$0xff] %vm11255_vm0, %v2207_v17  ;;  %v2210_v7 = vadd.f32 %v6683_v12, %v2033_v39 }
 0x426   : > { %2765 = vst.msk [vmem:[#allocation3 + $0xd0] sm:$0xff] %vm11454_vm14, %v2749_v57  ;;  %v2170_v54 = vpop.f32.mrf.mxu0  ;;  %v2732_v56 = vpop.xlane.xlu1 %2731  ;;  %vm11462_vm14 = vmmov %vm11428_vm2 }
 0x427   : > { %2227 = vst.msk [vmem:[#allocation4 + $0x58] sm:$0xff] %vm11255_vm0, %v2210_v7  ;;  %v2209_v27 = vadd.f32 %v2170_v54, %v2032_v15  ;;  %v2751_v24 = vadd.f32 %v2732_v56, %v2703_v53  ;;  %v2772_v15 = vld [vmem:[#allocation4 + $0x80] sm:$0xff]  ;;  %v2775_v53 = vld [vmem:[#allocation4 + $0x98] sm:$0xff]  ;;  %v2774_v56 = vld [vmem:[#allocation4 + $0x90] sm:$0xff] }
 0x428   : > { %v6686_v36 = vpop.f32.mrf.mxu0 }
 0x429   : > { %2226 = vst.msk [vmem:[#allocation4 + $0x50] sm:$0xff] %vm11255_vm0, %v2209_v27  ;;  %v2212_v44 = vadd.f32 %v6686_v36, %v2035_v5 }
 0x42a   : > { %2767 = vst.msk [vmem:[#allocation3 + $0xe0] sm:$0xff] %vm11457_vm15, %v2751_v24  ;;  %v2180_v16 = vpop.f32.mrf.mxu0  ;;  %v2736_v23 = vpop.xlane.xlu1 %2735  ;;  %v2777_v24 = vld [vmem:[#allocation4 + $0xa8] sm:$0xff]  ;;  %vm11463_vm15 = vmmov %vm11428_vm2 }
 0x42b   : > { %2229 = vst.msk [vmem:[#allocation4 + $0x68] sm:$0xff] %vm11255_vm0, %v2212_v44  ;;  %v2211_v13 = vadd.f32 %v2180_v16, %v2034_v41  ;;  %v2753_v45 = vadd.f32 %v2736_v23, %v2705_v47  ;;  %v2779_v16 = vld [vmem:[#allocation4 + $0xb8] sm:$0xff] }
 0x42c   : > { %v6689_v31 = vpop.f32.mrf.mxu0 }
 0x42d   : > { %2228 = vst.msk [vmem:[#allocation4 + $0x60] sm:$0xff] %vm11255_vm0, %v2211_v13  ;;  %v2214_v59 = vadd.f32 %v6689_v31, %v2037_v58  ;;  %v2781_v31 = vld [vmem:[#allocation4 + $0xc8] sm:$0xff] }
 0x42e   : > { %2769 = vst.msk [vmem:[#allocation3 + $0xf0] sm:$0xff] %vm11428_vm2, %v2753_v45  ;;  %v2190_v8 = vpop.f32.mrf.mxu0  ;;  %v2560_v25 = vpop.permute.xlu1 %2559 }
 0x42f   : > { %2231 = vst.msk [vmem:[#allocation4 + $0x78] sm:$0xff] %vm11255_vm0, %v2214_v59  ;;  %v2213_v20 = vadd.f32 %v2190_v8, %v2036_v28  ;;  %v2577_v11 = vsub.f32 %v11460_v32, %v2560_v25  ;;  %v9660_v28 = vld [vmem:[%s8179_s9 + $0x2] ss:$0 sm:$0xff] }
 0x431   : > { %2230 = vst.msk [vmem:[#allocation4 + $0x70] sm:$0xff] %vm11255_vm0, %v2213_v20  ;;  %v2608_v34 = vmul.f32 1.442695, %v2577_v11  ;;  %v2783_v11 = vld [vmem:[#allocation4 + $0xd8] sm:$0xff] }
 0x432   : > { %v2791_v63 = vpop.permute.xlu1 %2790 }
 0x433   : > { %7150 = vpow2.f32 %v2608_v34  ;;  %v2868_v54 = vmul.f32 %v2791_v63, %v2772_v15 }
 0x436   : > { %v2801_v43 = vpop.permute.xlu1 %2800 }
 0x437   : > { %v2870_v36 = vmul.f32 %v2801_v43, %v2774_v56  ;;  %v6357_v56 = vld [vmem:[%s8177_s7 + $0x100] sm:$0xff] }
 0x43a   : > { %v2806_v39 = vpop.permute.xlu1 %2805 }
 0x43b   : > { %v2871_v5 = vmul.f32 %v2806_v39, %v2775_v53 }
 0x43e   : > { %v2816_v17 = vpop.permute.xlu1 %2815 }
 0x43f   : > { %v2873_v47 = vmul.f32 %v2816_v17, %v2777_v24  ;;  %v2690_v24 = vld [vmem:[#allocation3 + $0xf8] sm:$0xff] }
 0x440   : > { %v7151_v57 = vpop.eup %7150 }
 0x441   : > { %6744 = vmatmul.mubr.msk.f32.gmra.mxu1 %vm11261_vm1, %v7151_v57  ;;  %v2625_v12 = vsel %vm11261_vm1, %v7151_v57, 0.0 }
 0x442   : > { %2737 = vadd.xlane.f32.xlu0 %v2625_v12  ;;  %v2826_v4 = vpop.permute.xlu1 %2825  ;;  %v2785_v12 = vld [vmem:[#allocation4 + $0xe8] sm:$0xff] }
 0x443   : > { %v2875_v45 = vmul.f32 %v2826_v4, %v2779_v16  ;;  %v2776_v16 = vld [vmem:[#allocation4 + $0xa0] sm:$0xff] }
 0x446   : > { %v2836_v7 = vpop.permute.xlu1 %2835 }
 0x447   : > { %v2877_v20 = vmul.f32 %v2836_v7, %v2781_v31 }
 0x448   : > { %v9649_v46 = vpop.f32.mrf.mxu1 }
 0x44a   : > { %v2967_v40 = vpop.f32.mrf.mxu1  ;;  %v2846_v9 = vpop.permute.xlu1 %2845 }
 0x44b   : > { %v3046_v27 = vadd.f32 %v2967_v40, %v2868_v54  ;;  %v2879_v17 = vmul.f32 %v2846_v9, %v2783_v11  ;;  %v6359_v40 = vld [vmem:[%s8177_s7 + $0x110] sm:$0xff]  ;;  %v6361_v9 = vld [vmem:[%s8177_s7 + $0x120] sm:$0xff] }
 0x44c   : > { %v6727_v21 = vpop.f32.mrf.mxu1 }
 0x44d   : > { %3062 = vst.msk [vmem:[#allocation4 + $0x80] sm:$0xff] %vm11255_vm0, %v3046_v27  ;;  %v3049_v1 = vadd.f32 %v6727_v21, %v2871_v5  ;;  %v6365_v5 = vld [vmem:[%s8177_s7 + $0x140] sm:$0xff]  ;;  %v6367_v27 = vld [vmem:[%s8177_s7 + $0x150] sm:$0xff] }
 0x44e   : > { %v2977_v41 = vpop.f32.mrf.mxu1  ;;  %v2856_v44 = vpop.permute.xlu1 %2855 }
 0x44f   : > { %3065 = vst.msk [vmem:[#allocation4 + $0x98] sm:$0xff] %vm11255_vm0, %v3049_v1  ;;  %v3048_v48 = vadd.f32 %v2977_v41, %v2870_v36  ;;  %v2881_v53 = vmul.f32 %v2856_v44, %v2785_v12  ;;  %v2773_v44 = vld [vmem:[#allocation4 + $0x88] sm:$0xff] }
 0x450   : > { %v6730_v23 = vpop.f32.mrf.mxu1  ;;  %v9707_v12 = vld [vmem:[#allocation2 + $0x108] sm:$0xff] }
 0x451   : > { %3064 = vst.msk [vmem:[#allocation4 + $0x90] sm:$0xff] %vm11255_vm0, %v3048_v48  ;;  %v3051_v22 = vadd.f32 %v6730_v23, %v2873_v47 }
 0x452   : > { %v9654_v58 = vpop.f32.mrf.mxu1  ;;  %v9656_v13 = vpop.permute.xlu1 %2865 }
 0x453   : > { %3067 = vst.msk [vmem:[#allocation4 + $0xa8] sm:$0xff] %vm11255_vm0, %v3051_v22 }
 0x454   : > { %v6733_v33 = vpop.f32.mrf.mxu1 }
 0x455   : > { %v3053_v59 = vadd.f32 %v6733_v33, %v2875_v45  ;;  %v2778_v33 = vld [vmem:[#allocation4 + $0xb0] sm:$0xff] }
 0x456   : > { %v9662_v8 = vpop.f32.mrf.mxu1  ;;  %v3121_v25 = vpop.permute.xlu1 %3120 }
 0x457   : > { %3069 = vst.msk [vmem:[#allocation4 + $0xb8] sm:$0xff] %vm11255_vm0, %v3053_v59  ;;  %v3200_v32 = vadd.f32 %v9660_v28, %v3121_v25 }
 0x458   : > { %v6736_v34 = vpop.f32.mrf.mxu1  ;;  %2795 = vperm.xlu0 %7022, %v9580_v60  }
 0x459   : > { %v3216_v63 = vmul.f32 0.2, %v3200_v32  ;;  %v3055_v43 = vadd.f32 %v6736_v34, %v2877_v20 }
 0x45a   : > { %v9667_v39 = vpop.f32.mrf.mxu1 }
 0x45b   : > { %3071 = vst.msk [vmem:[#allocation4 + $0xc8] sm:$0xff] %vm11255_vm0, %v3055_v43  ;;  %v3232_v57 = vmax.f32 %v3200_v32, %v3216_v63  ;;  %v2780_v32 = vld [vmem:[#allocation4 + $0xc0] sm:$0xff]  ;;  %v2782_v63 = vld [vmem:[#allocation4 + $0xd0] sm:$0xff] }
 0x45c   : > { %v6739_v4 = vpop.f32.mrf.mxu1  ;;  %2810 = vperm.xlu0 %7022, %v9586_v26  }
 0x45d   : > { %v3057_v15 = vadd.f32 %v6739_v4, %v2879_v17  ;;  %v9673_v7 = vsel %vm1391_vm4, %v3232_v57, -1e+09  ;;  %v2784_v4 = vld [vmem:[#allocation4 + $0xe0] sm:$0xff] }
 0x45e   : > { %v9675_v60 = vpop.f32.mrf.mxu1  ;;  %3282 = vmax.xlane.f32.xlu1 %v9673_v7 }
 0x45f   : > { %3073 = vst.msk [vmem:[#allocation4 + $0xd8] sm:$0xff] %vm11255_vm0, %v3057_v15 }
 0x460   : > { %v6742_v54 = vpop.f32.mrf.mxu1  ;;  %2820 = vperm.xlu0 %7022, %v9597_v2   ;;  %v6363_v2 = vld [vmem:[%s8177_s7 + $0x130] sm:$0xff] }
 0x461   : > { %v3059_v26 = vadd.f32 %v6742_v54, %v2881_v53 }
 0x463   : > { %3075 = vst.msk [vmem:[#allocation4 + $0xe8] sm:$0xff] %vm11255_vm0, %v3059_v26 }
 0x464   : > { %2830 = vperm.xlu0 %7022, %v9605_v38   ;;  %v6369_v38 = vld [vmem:[%s8177_s7 + $0x160] sm:$0xff] }
 0x468   : > { %2840 = vperm.xlu0 %7022, %v9609_v14   ;;  %v6371_v14 = vld [vmem:[%s8177_s7 + $0x170] sm:$0xff] }
 0x46c   : > { %2850 = vperm.xlu0 %7022, %v9621_v61   ;;  %v3131_v61 = vpop.permute.xlu1 %3130 }
 0x470   : > { %2860 = vperm.xlu0 %7022, %v9629_v51   ;;  %v2706_v51 = vmul.f32 %v9525_v35, %v2690_v24  ;;  %v3141_v21 = vpop.permute.xlu1 %3140 }
 0x471   : > { %v3204_v24 = vadd.f32 %v9660_v28, %v3141_v21 }
 0x474   : > { %3115 = vperm.xlu0 %7022, %v6357_v56   ;;  %v3151_v41 = vpop.permute.xlu1 %3150 }
 0x478   : > { %3125 = vperm.xlu0 %7022, %v6359_v40   ;;  %v3161_v22 = vpop.permute.xlu1 %3160 }
 0x47c   : > { %3135 = vperm.xlu0 %7022, %v6361_v9   ;;  %v9699_v20 = vpop.permute.xlu1 %3170 }
 0x480   : > { %3145 = vperm.xlu0 %7022, %v6363_v2   ;;  %v9704_v17 = vpop.permute.xlu1 %3180 }
 0x484   : > { %3155 = vperm.xlu0 %7022, %v6365_v5  }
 0x488   : > { %3165 = vperm.xlu0 %7022, %v6367_v27  }
 0x48c   : > { %3175 = vperm.xlu0 %7022, %v6369_v38  }
 0x490   : > { %3185 = vperm.xlu0 %7022, %v6371_v14  }
 0x4cb   : > { %v2738_v36 = vpop.xlane.xlu0 %2737 }
 0x4cc   : > { %v2754_v1 = vadd.f32 %v2738_v36, %v2706_v51 }
 0x4ce   : > { %2770 = vst.msk [vmem:[#allocation3 + $0xf8] sm:$0xff] %vm11462_vm14, %v2754_v1  ;;  %v11464_v1 = vld [vmem:[#allocation26_spill] sm:$0xff]  ;;  %vm11466_vm14 = vcmp.gt.f32.partialorder %v11376_v49, 0.0 }
 0x4cf   : > { %vm11465_vm2 = vcmp.gt.f32.partialorder %v11464_v1, 0.0 }
 0x4d3   : > { %v2796_v47 = vpop.permute.xlu0 %2795 }
 0x4d4   : > { %v2869_v48 = vmul.f32 %v2796_v47, %v2773_v44 }
 0x4d6   : > { %v3047_v23 = vadd.f32 %v9649_v46, %v2869_v48 }
 0x4d7   : > { %v2811_v45 = vpop.permute.xlu0 %2810 }
 0x4d8   : > { %3063 = vst.msk [vmem:[#allocation4 + $0x88] sm:$0xff] %vm11255_vm0, %v3047_v23  ;;  %v2872_v31 = vmul.f32 %v2811_v45, %v2776_v16  ;;  %v3206_v23 = vadd.f32 %v9660_v28, %v3151_v41 }
 0x4da   : > { %v3050_v35 = vadd.f32 %v9654_v58, %v2872_v31 }
 0x4db   : > { %v2821_v59 = vpop.permute.xlu0 %2820 }
 0x4dc   : > { %3066 = vst.msk [vmem:[#allocation4 + $0xa0] sm:$0xff] %vm11255_vm0, %v3050_v35  ;;  %v2874_v25 = vmul.f32 %v2821_v59, %v2778_v33 }
 0x4de   : > { %v3052_v11 = vadd.f32 %v9662_v8, %v2874_v25  ;;  %v2787_v25 = vld [vmem:[#allocation4 + $0xf8] sm:$0xff] }
 0x4df   : > { %v2831_v34 = vpop.permute.xlu0 %2830 }
 0x4e0   : > { %3068 = vst.msk [vmem:[#allocation4 + $0xb0] sm:$0xff] %vm11255_vm0, %v3052_v11  ;;  %v2876_v46 = vmul.f32 %v2831_v34, %v2780_v32  ;;  %v3222_v32 = vmul.f32 0.2, %v3206_v23  ;;  %v3208_v11 = vadd.f32 %v9660_v28, %v3161_v22 }
 0x4e2   : > { %v3054_v43 = vadd.f32 %v9667_v39, %v2876_v46  ;;  %v3027_v39 = vpop.f32.mrf.mxu1 }
 0x4e3   : > { %v2841_v57 = vpop.permute.xlu0 %2840 }
 0x4e4   : > { %3070 = vst.msk [vmem:[#allocation4 + $0xc0] sm:$0xff] %vm11255_vm0, %v3054_v43  ;;  %v2878_v58 = vmul.f32 %v2841_v57, %v2782_v63  ;;  %v2786_v43 = vld [vmem:[#allocation4 + $0xf0] sm:$0xff] }
 0x4e6   : > { %v3056_v15 = vadd.f32 %v9675_v60, %v2878_v58  ;;  %v3202_v60 = vadd.f32 %v9660_v28, %v3131_v61  ;;  %v3220_v61 = vmul.f32 0.2, %v3204_v24  ;;  %v2883_v58 = vmul.f32 %v9656_v13, %v2787_v25 }
 0x4e7   : > { %v3283_v53 = vpop.xlane.xlu1 %3282  ;;  %v2851_v8 = vpop.permute.xlu0 %2850 }
 0x4e8   : > { %3072 = vst.msk [vmem:[#allocation4 + $0xd0] sm:$0xff] %vm11255_vm0, %v3056_v15  ;;  %v9712_v54 = vmax.f32 %v9707_v12, %v3283_v53  ;;  %v2880_v26 = vmul.f32 %v2851_v8, %v2784_v4  ;;  %v3218_v51 = vmul.f32 0.2, %v3202_v60  ;;  %v3236_v34 = vmax.f32 %v3204_v24, %v3220_v61 }
 0x4e9   : > { %v3224_v15 = vmul.f32 0.2, %v3208_v11  ;;  %v3210_v53 = vadd.f32 %v9660_v28, %v9699_v20 }
 0x4ea   : > { %3925 = vst.msk [vmem:[#allocation2 + $0x108] sm:$0xff] %vm11463_vm15, %v9712_v54  ;;  %v3058_v56 = vadd.f32 %v3027_v39, %v2880_v26  ;;  %v3234_v21 = vmax.f32 %v3202_v60, %v3218_v51  ;;  %v9751_v26 = vsel %vm1395_vm7, %v3236_v34, -1e+09  ;;  %v3238_v39 = vmax.f32 %v3206_v23, %v3222_v32 }
 0x4eb   : > { %v2861_v40 = vpop.permute.xlu0 %2860  ;;  %v3226_v24 = vmul.f32 0.2, %v3210_v53  ;;  %v3212_v51 = vadd.f32 %v9660_v28, %v9704_v17  ;;  %vm11467_vm15 = vcmp.gt.f32.partialorder %v11362_v29, 0.0 }
 0x4ec   : > { %3074 = vst.msk [vmem:[#allocation4 + $0xe0] sm:$0xff] %vm11255_vm0, %v3058_v56  ;;  %v9737_v41 = vsel %vm1393_vm5, %v3234_v21, -1e+09  ;;  %v2882_v56 = vmul.f32 %v2861_v40, %v2786_v43  ;;  %v9763_v40 = vsel %vm1397_vm9, %v3238_v39, -1e+09 }
 0x4ed   : > { %v3228_v17 = vmul.f32 0.2, %v3212_v51 }
 0x4ef   : > { %v3116_v9 = vpop.permute.xlu0 %3115 }
 0x4f0   : > { %v3199_v2 = vadd.f32 %v9660_v28, %v3116_v9 }
 0x4f2   : > { %v3215_v5 = vmul.f32 0.2, %v3199_v2 }
 0x4f3   : > { %v3126_v27 = vpop.permute.xlu0 %3125 }
 0x4f4   : > { %v3201_v38 = vadd.f32 %v9660_v28, %v3126_v27  ;;  %v3231_v14 = vmax.f32 %v3199_v2, %v3215_v5 }
 0x4f6   : > { %v3217_v36 = vmul.f32 0.2, %v3201_v38  ;;  %v9723_v44 = vsel %vm11465_vm2, %v3231_v14, -1e+09  ;;  %v3240_v14 = vmax.f32 %v3208_v11, %v3224_v15  ;;  %vm11468_vm2 = vcmp.gt.f32.partialorder %v11378_v10, 0.0 }
 0x4f7   : > { %3280 = vmax.xlane.f32.xlu0 %v9723_v44  ;;  %v3136_v47 = vpop.permute.xlu0 %3135 }
 0x4f8   : > { %v3203_v48 = vadd.f32 %v9660_v28, %v3136_v47  ;;  %v3233_v16 = vmax.f32 %v3201_v38, %v3217_v36  ;;  %v9777_v23 = vsel %vm1399_vm11, %v3240_v14, -1e+09 }
 0x4fa   : > { %v3219_v45 = vmul.f32 0.2, %v3203_v48  ;;  %v9730_v31 = vsel %vm1392_vm3, %v3233_v16, -1e+09 }
 0x4fb   : > { %3284 = vmax.xlane.f32.xlu0 %v9730_v31  ;;  %v3146_v33 = vpop.permute.xlu0 %3145 }
 0x4fc   : > { %v3205_v35 = vadd.f32 %v9660_v28, %v3146_v33  ;;  %v3235_v59 = vmax.f32 %v3203_v48, %v3219_v45  ;;  %v3242_v33 = vmax.f32 %v3210_v53, %v3226_v24  ;;  %v9837_v24 = vld [vmem:[#allocation2 + $0x130] sm:$0xff] }
 0x4fe   : > { %v3221_v46 = vmul.f32 0.2, %v3205_v35  ;;  %v9741_v63 = vsel %vm1394_vm6, %v3235_v59, -1e+09  ;;  %v9788_v11 = vsel %vm1401_vm13, %v3242_v33, -1e+09 }
 0x4ff   : > { %3286 = vmax.xlane.f32.xlu0 %v9737_v41  ;;  %3288 = vmax.xlane.f32.xlu1 %v9741_v63  ;;  %v3156_v57 = vpop.permute.xlu0 %3155  ;;  %v9856_v33 = vld [vmem:[#allocation2 + $0x140] sm:$0xff] }
 0x500   : > { %v3207_v22 = vadd.f32 %v9660_v28, %v3156_v57  ;;  %v3237_v4 = vmax.f32 %v3205_v35, %v3221_v46  ;;  %v3244_v46 = vmax.f32 %v3212_v51, %v3228_v17  ;;  %v9839_v51 = vld [vmem:[#allocation2 + $0x128] sm:$0xff]  ;;  %11474 = vst [vmem:[#allocation48_spill] sm:$0xff] %v9856_v33 }
 0x501   : > { %v6745_v8 = vpop.f32.mrf.mxu1 }
 0x502   : > { %v3223_v9 = vmul.f32 0.2, %v3207_v22  ;;  %v3061_v2 = vadd.f32 %v6745_v8, %v2883_v58  ;;  %v9755_v60 = vsel %vm1396_vm8, %v3237_v4, -1e+09  ;;  %v9798_v57 = vsel %vm11467_vm15, %v3244_v46, -1e+09 }
 0x503   : > { %v3037_v13 = vpop.f32.mrf.mxu1  ;;  %3290 = vmax.xlane.f32.xlu0 %v9751_v26  ;;  %3292 = vmax.xlane.f32.xlu1 %v9755_v60  ;;  %v3166_v5 = vpop.permute.xlu0 %3165  ;;  %v9807_v4 = vld [vmem:[#allocation2 + $0x100] sm:$0xff]  ;;  %v9812_v8 = vld [vmem:[#allocation2 + $0x110] sm:$0xff] }
 0x504   : > { %3077 = vst.msk [vmem:[#allocation4 + $0xf8] sm:$0xff] %vm11255_vm0, %v3061_v2  ;;  %v3060_v20 = vadd.f32 %v3037_v13, %v2882_v56  ;;  %v3209_v27 = vadd.f32 %v9660_v28, %v3166_v5  ;;  %v3239_v38 = vmax.f32 %v3207_v22, %v3223_v9  ;;  %v6372_v22 = vld [vmem:[%s8177_s7 + $0x178] sm:$0xff]  ;;  %v9822_v2 = vld [vmem:[#allocation2 + $0x120] sm:$0xff]  ;;  %v9915_v5 = vld [vmem:[#allocation2 + $0x168] sm:$0xff] }
 0x505   : > { %v9824_v13 = vld [vmem:[#allocation2 + $0x118] sm:$0xff]  ;;  %11491 = vst [vmem:[#allocation44_spill] sm:$0xff] %v9915_v5 }
 0x506   : > { %3076 = vst.msk [vmem:[#allocation4 + $0xf0] sm:$0xff] %vm11255_vm0, %v3060_v20  ;;  %v3225_v36 = vmul.f32 0.2, %v3209_v27  ;;  %v9770_v47 = vsel %vm1398_vm10, %v3239_v38, -1e+09 }
 0x507   : > { %3294 = vmax.xlane.f32.xlu0 %v9763_v40  ;;  %3296 = vmax.xlane.f32.xlu1 %v9770_v47  ;;  %v3176_v48 = vpop.permute.xlu0 %3175 }
 0x508   : > { %v3211_v16 = vadd.f32 %v9660_v28, %v3176_v48  ;;  %v3241_v61 = vmax.f32 %v3209_v27, %v3225_v36 }
 0x50a   : > { %v3227_v45 = vmul.f32 0.2, %v3211_v16  ;;  %v9781_v21 = vsel %vm1400_vm12, %v3241_v61, -1e+09 }
 0x50b   : > { %3298 = vmax.xlane.f32.xlu0 %v9777_v23  ;;  %3300 = vmax.xlane.f32.xlu1 %v9781_v21  ;;  %v3186_v35 = vpop.permute.xlu0 %3185 }
 0x50c   : > { %v3213_v59 = vadd.f32 %v9660_v28, %v3186_v35  ;;  %v3243_v25 = vmax.f32 %v3211_v16, %v3227_v45  ;;  %v9858_v35 = vld [vmem:[#allocation2 + $0x138] sm:$0xff] }
 0x50d   : > { %11475 = vst [vmem:[#allocation28_spill] sm:$0xff] %v9858_v35 }
 0x50e   : > { %v3229_v32 = vmul.f32 0.2, %v3213_v59  ;;  %v9792_v34 = vsel %vm11466_vm14, %v3243_v25, -1e+09  ;;  %vm11469_vm14 = vcmask 7168   ;;  %v9896_v25 = vld [vmem:[#allocation2 + $0x158] sm:$0xff] }
 0x50f   : > { %3302 = vmax.xlane.f32.xlu0 %v9788_v11  ;;  %3304 = vmax.xlane.f32.xlu1 %v9792_v34  ;;  %vm11470_vm15 = vmmov %vm11469_vm14  ;;  %11486 = vst [vmem:[#allocation39_spill] sm:$0xff] %v9896_v25 }
 0x510   : > { %v3245_v43 = vmax.f32 %v3213_v59, %v3229_v32  ;;  %v6388_v59 = vld [vmem:[%s8173_s20 + $0x168] sm:$0xff] }
 0x512   : > { %v9802_v58 = vsel %vm11468_vm2, %v3245_v43, -1e+09  ;;  %vm11471_vm2 = vmmov %vm11469_vm14 }
 0x513   : > { %3306 = vmax.xlane.f32.xlu0 %v9798_v57  ;;  %3308 = vmax.xlane.f32.xlu1 %v9802_v58 }
 0x524   : > { %3190 = vperm.xlu1 %7023, %v6372_v22  }
 0x580   : > { %v3281_v15 = vpop.xlane.xlu0 %3280 }
 0x581   : > { %v9810_v53 = vmax.f32 %v9807_v4, %v3281_v15  ;;  %v9875_v15 = vld [vmem:[#allocation2 + $0x150] sm:$0xff] }
 0x582   : > { %11479 = vst [vmem:[#allocation29_spill] sm:$0xff] %v9875_v15 }
 0x583   : > { %3924 = vst.msk [vmem:[#allocation2 + $0x100] sm:$0xff] %vm11469_vm14, %v9810_v53  ;;  %3330 = vperm.xlu1 %7023, %v9810_v53   ;;  %vm11472_vm14 = vmmov %vm11471_vm2 }
 0x584   : > { %v3285_v56 = vpop.xlane.xlu0 %3284 }
 0x585   : > { %v9820_v9 = vmax.f32 %v9812_v8, %v3285_v56  ;;  %v9877_v56 = vld [vmem:[#allocation2 + $0x148] sm:$0xff] }
 0x586   : > { %11480 = vst [vmem:[#allocation30_spill] sm:$0xff] %v9877_v56 }
 0x587   : > { %3926 = vst.msk [vmem:[#allocation2 + $0x110] sm:$0xff] %vm11470_vm15, %v9820_v9  ;;  %3340 = vperm.xlu1 %7023, %v9820_v9   ;;  %vm11476_vm15 = vmmov %vm11471_vm2 }
 0x588   : > { %v3289_v20 = vpop.xlane.xlu1 %3288  ;;  %v3287_v27 = vpop.xlane.xlu0 %3286 }
 0x589   : > { %v9832_v38 = vmax.f32 %v9822_v2, %v3289_v20  ;;  %v9835_v14 = vmax.f32 %v9824_v13, %v3287_v27  ;;  %v9894_v20 = vld [vmem:[#allocation2 + $0x160] sm:$0xff]  ;;  %v9913_v27 = vld [vmem:[#allocation2 + $0x170] sm:$0xff] }
 0x58a   : > { %11485 = vst [vmem:[#allocation35_spill] sm:$0xff] %v9894_v20  ;;  %11490 = vst [vmem:[#allocation42_spill] sm:$0xff] %v9913_v27 }
 0x58b   : > { %3928 = vst.msk [vmem:[#allocation2 + $0x120] sm:$0xff] %vm11471_vm2, %v9832_v38  ;;  %3345 = vperm.xlu1 %7023, %v9835_v14  }
 0x58c   : > { %3927 = vst.msk [vmem:[#allocation2 + $0x118] sm:$0xff] %vm11472_vm14, %v9835_v14  ;;  %v3293_v16 = vpop.xlane.xlu1 %3292  ;;  %v3291_v61 = vpop.xlane.xlu0 %3290  ;;  %vm11481_vm14 = vmmov %vm11471_vm2 }
 0x58d   : > { %v9851_v17 = vmax.f32 %v9837_v24, %v3293_v16  ;;  %v9854_v45 = vmax.f32 %v9839_v51, %v3291_v61 }
 0x58f   : > { %11473 = vst [vmem:[#allocation37_spill] sm:$0xff] %v9854_v45  ;;  %3930 = vst.msk [vmem:[#allocation2 + $0x130] sm:$0xff] %vm11476_vm15, %v9851_v17  ;;  %3355 = vperm.xlu1 %7023, %v9854_v45  }
 0x590   : > { %3929 = vst.msk [vmem:[#allocation2 + $0x128] sm:$0xff] %vm11471_vm2, %v9854_v45  ;;  %v3297_v32 = vpop.xlane.xlu1 %3296  ;;  %v3295_v46 = vpop.xlane.xlu0 %3294  ;;  %vm11482_vm15 = vmmov %vm11471_vm2 }
 0x591   : > { %v9870_v43 = vmax.f32 %v9856_v33, %v3297_v32  ;;  %v9873_v22 = vmax.f32 %v9858_v35, %v3295_v46 }
 0x593   : > { %11477 = vst [vmem:[#allocation38_spill] sm:$0xff] %v9870_v43  ;;  %11478 = vst [vmem:[#allocation49_spill] sm:$0xff] %v9873_v22  ;;  %3365 = vperm.xlu1 %7023, %v9873_v22  }
 0x594   : > { %3932 = vst.msk [vmem:[#allocation2 + $0x140] sm:$0xff] %vm11481_vm14, %v9870_v43  ;;  %v3301_v16 = vpop.xlane.xlu1 %3300  ;;  %v3299_v61 = vpop.xlane.xlu0 %3298  ;;  %vm11487_vm14 = vmmov %vm11471_vm2 }
 0x595   : > { %3931 = vst.msk [vmem:[#allocation2 + $0x138] sm:$0xff] %vm11482_vm15, %v9873_v22  ;;  %v9889_v32 = vmax.f32 %v9875_v15, %v3301_v16  ;;  %v9892_v46 = vmax.f32 %v9877_v56, %v3299_v61  ;;  %vm11492_vm15 = vmmov %vm11471_vm2 }
 0x597   : > { %11483 = vst [vmem:[#allocation31_spill] sm:$0xff] %v9889_v32  ;;  %11484 = vst [vmem:[#allocation32_spill] sm:$0xff] %v9892_v46  ;;  %3375 = vperm.xlu1 %7023, %v9892_v46  }
 0x598   : > { %3934 = vst.msk [vmem:[#allocation2 + $0x150] sm:$0xff] %vm11471_vm2, %v9889_v32  ;;  %v3305_v16 = vpop.xlane.xlu1 %3304  ;;  %v3303_v61 = vpop.xlane.xlu0 %3302 }
 0x599   : > { %3933 = vst.msk [vmem:[#allocation2 + $0x148] sm:$0xff] %vm11487_vm14, %v9892_v46  ;;  %v9908_v48 = vmax.f32 %v9894_v20, %v3305_v16  ;;  %v9911_v36 = vmax.f32 %v9896_v25, %v3303_v61  ;;  %vm11495_vm14 = vmmov %vm11471_vm2  ;;  %v6410_v20 = vld [vmem:[%s8177_s7 + $0x198] sm:$0xff] }
 0x59b   : > { %11488 = vst [vmem:[#allocation40_spill] sm:$0xff] %v9908_v48  ;;  %11489 = vst [vmem:[#allocation41_spill] sm:$0xff] %v9911_v36  ;;  %3385 = vperm.xlu1 %7023, %v9911_v36  }
 0x59c   : > { %3936 = vst.msk [vmem:[#allocation2 + $0x160] sm:$0xff] %vm11492_vm15, %v9908_v48  ;;  %v3309_v16 = vpop.xlane.xlu1 %3308  ;;  %v3307_v61 = vpop.xlane.xlu0 %3306  ;;  %vm11496_vm15 = vmmov %vm11471_vm2 }
 0x59d   : > { %3935 = vst.msk [vmem:[#allocation2 + $0x158] sm:$0xff] %vm11471_vm2, %v9911_v36  ;;  %v9927_v46 = vmax.f32 %v9913_v27, %v3309_v16  ;;  %v9930_v56 = vmax.f32 %v9915_v5, %v3307_v61  ;;  %v6390_v16 = vld [vmem:[%s8173_s20 + $0x178] sm:$0xff]  ;;  %v6389_v36 = vld [vmem:[%s8173_s20 + $0x170] sm:$0xff]  ;;  %v6387_v5 = vld [vmem:[%s8173_s20 + $0x160] sm:$0xff]  ;;  %vm11497_vm2 = vcmp.gt.f32.partialorder %v11464_v1, 0.0 }
 0x59e   : > { %6746 = vmatprep.subr.mxu0 %v6390_v16 }
 0x59f   : > { %11493 = vst [vmem:[#allocation46_spill] sm:$0xff] %v9927_v46  ;;  %11494 = vst [vmem:[#allocation47_spill] sm:$0xff] %v9930_v56  ;;  %3395 = vperm.xlu1 %7023, %v9930_v56   ;;  %6747 = vmatpush3.msra.mxu0 %v6390_v16  ;;  %v6379_v16 = vld [vmem:[%s8173_s20 + $0x120] sm:$0xff] }
 0x5a0   : > { %3938 = vst.msk [vmem:[#allocation2 + $0x170] sm:$0xff] %vm11495_vm14, %v9927_v46  ;;  %v3191_v25 = vpop.permute.xlu1 %3190  ;;  %6748 = vmatprep.subr.mxu0 %v6389_v36  ;;  %vm11498_vm14 = vmmov %vm11497_vm2 }
 0x5a1   : > { %3937 = vst.msk [vmem:[#allocation2 + $0x168] sm:$0xff] %vm11496_vm15, %v9930_v56  ;;  %v3214_v61 = vadd.f32 %v9660_v28, %v3191_v25  ;;  %6749 = vmatpush3.msra.mxu0 %v6389_v36  ;;  %v6386_v28 = vld [vmem:[%s8173_s20 + $0x158] sm:$0xff]  ;;  %v6385_v25 = vld [vmem:[%s8173_s20 + $0x150] sm:$0xff]  ;;  %v6384_v36 = vld [vmem:[%s8173_s20 + $0x148] sm:$0xff] }
 0x5a2   : > { %6750 = vmatprep.subr.mxu0 %v6388_v59 }
 0x5a3   : > { %v3230_v27 = vmul.f32 0.2, %v3214_v61  ;;  %6751 = vmatpush3.msra.mxu0 %v6388_v59  ;;  %v6382_v59 = vld [vmem:[%s8173_s20 + $0x138] sm:$0xff] }
 0x5a4   : > { %6752 = vmatprep.subr.mxu0 %v6387_v5 }
 0x5a5   : > { %v3246_v39 = vmax.f32 %v3214_v61, %v3230_v27  ;;  %6753 = vmatpush3.msra.mxu0 %v6387_v5  ;;  %v6381_v5 = vld [vmem:[%s8173_s20 + $0x130] sm:$0xff]  ;;  %v6380_v27 = vld [vmem:[%s8173_s20 + $0x128] sm:$0xff]  ;;  %v6378_v61 = vld [vmem:[%s8173_s20 + $0x118] sm:$0xff] }
 0x5a6   : > { %6754 = vmatprep.subr.mxu0 %v6386_v28 }
 0x5a7   : > { %v9947_v56 = vsel %vm11261_vm1, %v3246_v39, -1e+09  ;;  %6755 = vmatpush3.msra.mxu0 %v6386_v28  ;;  %v6383_v39 = vld [vmem:[%s8173_s20 + $0x140] sm:$0xff]  ;;  %v6377_v28 = vld [vmem:[%s8173_s20 + $0x110] sm:$0xff] }
 0x5a8   : > { %3310 = vmax.xlane.f32.xlu0 %v9947_v56  ;;  %6756 = vmatprep.subr.mxu0 %v6385_v25 }
 0x5a9   : > { %6757 = vmatpush3.msra.mxu0 %v6385_v25  ;;  %v6376_v25 = vld [vmem:[%s8173_s20 + $0x108] sm:$0xff] }
 0x5aa   : > { %6758 = vmatprep.subr.mxu0 %v6384_v36 }
 0x5ab   : > { %6759 = vmatpush3.msra.mxu0 %v6384_v36  ;;  %v6375_v36 = vld [vmem:[%s8173_s20 + $0x100] sm:$0xff] }
 0x5ac   : > { %6760 = vmatprep.subr.mxu0 %v6383_v39 }
 0x5ad   : > { %6761 = vmatpush3.msra.mxu0 %v6383_v39  ;;  %v6407_v39 = vld [vmem:[%s8177_s7 + $0x180] sm:$0xff] }
 0x5ae   : > { %6762 = vmatprep.subr.mxu0 %v6382_v59 }
 0x5af   : > { %6763 = vmatpush3.msra.mxu0 %v6382_v59  ;;  %v6409_v59 = vld [vmem:[%s8177_s7 + $0x190] sm:$0xff] }
 0x5b0   : > { %6764 = vmatprep.subr.mxu0 %v6381_v5 }
 0x5b1   : > { %6765 = vmatpush3.msra.mxu0 %v6381_v5  ;;  %v6411_v5 = vld [vmem:[%s8177_s7 + $0x1a0] sm:$0xff] }
 0x5b2   : > { %6766 = vmatprep.subr.mxu0 %v6380_v27 }
 0x5b3   : > { %6767 = vmatpush3.msra.mxu0 %v6380_v27  ;;  %v6413_v27 = vld [vmem:[%s8177_s7 + $0x1b0] sm:$0xff] }
 0x5b4   : > { %6768 = vmatprep.subr.mxu0 %v6379_v16 }
 0x5b5   : > { %6769 = vmatpush3.msra.mxu0 %v6379_v16  ;;  %v6415_v16 = vld [vmem:[%s8177_s7 + $0x1c0] sm:$0xff] }
 0x5b6   : > { %6770 = vmatprep.subr.mxu0 %v6378_v61 }
 0x5b7   : > { %6771 = vmatpush3.msra.mxu0 %v6378_v61  ;;  %v6417_v61 = vld [vmem:[%s8177_s7 + $0x1d0] sm:$0xff] }
 0x5b8   : > { %6772 = vmatprep.subr.mxu0 %v6377_v28 }
 0x5b9   : > { %6773 = vmatpush3.msra.mxu0 %v6377_v28  ;;  %v6419_v28 = vld [vmem:[%s8177_s7 + $0x1e0] sm:$0xff] }
 0x5ba   : > { %6774 = vmatprep.subr.mxu0 %v6376_v25 }
 0x5bb   : > { %6775 = vmatpush3.msra.mxu0 %v6376_v25  ;;  %v6421_v25 = vld [vmem:[%s8177_s7 + $0x1f0] sm:$0xff] }
 0x5bc   : > { %6776 = vmatprep.subr.mxu0 %v6375_v36 }
 0x5bd   : > { %6777 = vmatpush3.msra.mxu0 %v6375_v36 }
 0x5be   : > { %3335 = vperm.xlu0 %7022, %v9712_v54  }
 0x5c2   : > { %3350 = vperm.xlu0 %7022, %v9832_v38  }
 0x5c6   : > { %3360 = vperm.xlu0 %7022, %v9851_v17  }
 0x5ca   : > { %3370 = vperm.xlu0 %7022, %v9870_v43  }
 0x5ce   : > { %3380 = vperm.xlu0 %7022, %v9889_v32  }
 0x5d2   : > { %3390 = vperm.xlu0 %7022, %v9908_v48  }
 0x5d6   : > { %3400 = vperm.xlu0 %7022, %v9927_v46  }
 0x5da   : > { %3961 = vperm.xlu0 %7022, %v6407_v39  }
 0x5de   : > { %3971 = vperm.xlu0 %7022, %v6409_v59  }
 0x5e2   : > { %3981 = vperm.xlu0 %7022, %v6411_v5  }
 0x5e6   : > { %3991 = vperm.xlu0 %7022, %v6413_v27  }
 0x5ea   : > { %4001 = vperm.xlu0 %7022, %v6415_v16   ;;  %v9983_v16 = vld [vmem:[#allocation2 + $0x178] sm:$0xff] }
 0x5eb   : > { %11499 = vst [vmem:[#allocation51_spill] sm:$0xff] %v9983_v16 }
 0x5ee   : > { %4011 = vperm.xlu0 %7022, %v6417_v61  }
 0x5f2   : > { %4021 = vperm.xlu0 %7022, %v6419_v28  }
 0x5f6   : > { %4031 = vperm.xlu0 %7022, %v6421_v25  }
 0x5fe   : > { %v3331_v36 = vpop.permute.xlu1 %3330 }
 0x5ff   : > { %v3408_v48 = vsub.f32 %v9723_v44, %v3331_v36 }
 0x601   : > { %v3424_v46 = vmul.f32 1.442695, %v3408_v48 }
 0x602   : > { %v3341_v5 = vpop.permute.xlu1 %3340 }
 0x603   : > { %7152 = vpow2.f32 %v3424_v46  ;;  %v6408_v46 = vld [vmem:[%s8177_s7 + $0x188] sm:$0xff]  ;;  %v3410_v25 = vsub.f32 %v9730_v31, %v3341_v5 }
 0x605   : > { %v3428_v32 = vmul.f32 1.442695, %v3410_v25  ;;  %v6418_v25 = vld [vmem:[%s8177_s7 + $0x1d8] sm:$0xff] }
 0x606   : > { %v3346_v27 = vpop.permute.xlu1 %3345 }
 0x60a   : > { %v3356_v28 = vpop.permute.xlu1 %3355 }
 0x60e   : > { %v3366_v36 = vpop.permute.xlu1 %3365 }
 0x610   : > { %v7153_v39 = vpop.eup %7152 }
 0x611   : > { %6778 = vmatprep.mubr.msk.f32.mxu0 %vm11497_vm2, %v7153_v39  ;;  %v3456_v59 = vsel %vm11498_vm14, %v7153_v39, 0.0  ;;  %v3411_v39 = vsub.f32 %v9737_v41, %v3346_v27  ;;  %vm11501_vm2 = vcmp.gt.f32.partialorder %v11376_v49, 0.0  ;;  %vm11502_vm14 = vcmp.gt.f32.partialorder %v11362_v29, 0.0 }
 0x612   : > { %v3376_v35 = vpop.permute.xlu1 %3375 }
 0x613   : > { %v3430_v48 = vmul.f32 1.442695, %v3411_v39 }
 0x615   : > { %3553 = vadd.xlane.f32.xlu0 %v3456_v59 }
 0x631   : > { %v3311_v61 = vpop.xlane.xlu0 %3310 }
 0x632   : > { %v9986_v44 = vmax.f32 %v9983_v16, %v3311_v61  ;;  %v3413_v16 = vsub.f32 %v9751_v26, %v3356_v28  ;;  %v3386_v26 = vpop.permute.xlu1 %3385 }
 0x634   : > { %11500 = vst [vmem:[#allocation54_spill] sm:$0xff] %v9986_v44  ;;  %3939 = vst.msk [vmem:[#allocation2 + $0x178] sm:$0xff] %vm11496_vm15, %v9986_v44  ;;  %3405 = vperm.xlu1 %7023, %v9986_v44   ;;  %v6412_v44 = vld [vmem:[%s8177_s7 + $0x1a8] sm:$0xff]  ;;  %v3434_v41 = vmul.f32 1.442695, %v3413_v16  ;;  %vm11503_vm15 = vcmp.gt.f32.partialorder %v11378_v10, 0.0 }
 0x638   : > { %3966 = vperm.xlu1 %7023, %v6408_v46   ;;  %v6414_v46 = vld [vmem:[%s8177_s7 + $0x1b8] sm:$0xff] }
 0x639   : > { %v3336_v59 = vpop.permute.xlu0 %3335 }
 0x63a   : > { %v3409_v61 = vsub.f32 %v9673_v7, %v3336_v59  ;;  %v3415_v7 = vsub.f32 %v9763_v40, %v3366_v36  ;;  %v3396_v36 = vpop.permute.xlu1 %3395 }
 0x63c   : > { %v3426_v15 = vmul.f32 1.442695, %v3409_v61  ;;  %3976 = vperm.xlu1 %7023, %v6410_v20   ;;  %v6420_v61 = vld [vmem:[%s8177_s7 + $0x1e8] sm:$0xff] }
 0x63d   : > { %v3351_v22 = vpop.permute.xlu0 %3350 }
 0x63e   : > { %7154 = vpow2.f32 %v3426_v15  ;;  %v3412_v31 = vsub.f32 %v9741_v63, %v3351_v22  ;;  %v3438_v15 = vmul.f32 1.442695, %v3415_v7  ;;  %v3417_v63 = vsub.f32 %v9777_v23, %v3376_v35 }
 0x63f   : > { %7156 = vpow2.f32 %v3428_v32  ;;  %v6416_v32 = vld [vmem:[%s8177_s7 + $0x1c8] sm:$0xff] }
 0x640   : > { %v3432_v5 = vmul.f32 1.442695, %v3412_v31  ;;  %3986 = vperm.xlu1 %7023, %v6412_v44   ;;  %7158 = vpow2.f32 %v3430_v48  ;;  %v3442_v40 = vmul.f32 1.442695, %v3417_v63  ;;  %v3419_v48 = vsub.f32 %v9788_v11, %v3386_v26 }
 0x641   : > { %v3361_v27 = vpop.permute.xlu0 %3360  ;;  %v3421_v11 = vsub.f32 %v9798_v57, %v3396_v36 }
 0x642   : > { %7160 = vpow2.f32 %v3432_v5  ;;  %v3414_v20 = vsub.f32 %v9755_v60, %v3361_v27 }
 0x643   : > { %7162 = vpow2.f32 %v3434_v41  ;;  %v3450_v57 = vmul.f32 1.442695, %v3421_v11 }
 0x644   : > { %v3436_v28 = vmul.f32 1.442695, %v3414_v20  ;;  %3996 = vperm.xlu1 %7023, %v6414_v46   ;;  %v6422_v46 = vld [vmem:[%s8177_s7 + $0x1f8] sm:$0xff] }
 0x645   : > { %v3371_v22 = vpop.permute.xlu0 %3370 }
 0x646   : > { %7164 = vpow2.f32 %v3436_v28  ;;  %v3416_v16 = vsub.f32 %v9770_v47, %v3371_v22  ;;  %v3446_v47 = vmul.f32 1.442695, %v3419_v48  ;;  %v10086_v48 = vld [vmem:[%s8179_s9 + $0x3] ss:$0 sm:$0xff] }
 0x647   : > { %7166 = vpow2.f32 %v3438_v15 }
 0x648   : > { %v3440_v44 = vmul.f32 1.442695, %v3416_v16  ;;  %4006 = vperm.xlu1 %7023, %v6416_v32  }
 0x649   : > { %v3381_v60 = vpop.permute.xlu0 %3380 }
 0x64a   : > { %7168 = vpow2.f32 %v3440_v44  ;;  %v3418_v39 = vsub.f32 %v9781_v21, %v3381_v60 }
 0x64b   : > { %v10010_v59 = vpop.eup %7154  ;;  %7170 = vpow2.f32 %v3442_v40 }
 0x64c   : > { %v10012_v23 = vpop.eup %7156  ;;  %v3444_v35 = vmul.f32 1.442695, %v3418_v39  ;;  %4016 = vperm.xlu1 %7023, %v6418_v25   ;;  %6779 = vmatmul.mubr.msk.f32.vlgmr.msra.gmra.mxu0 %vm1391_vm4, %v10010_v59 }
 0x64d   : > { %6781 = vmatprep.mubr.msk.f32.mxu0 %vm1392_vm3, %v10012_v23  ;;  %v3391_v21 = vpop.permute.xlu0 %3390  ;;  %v10022_v31 = vpop.eup %7158 }
 0x64e   : > { %7172 = vpow2.f32 %v3444_v35  ;;  %v3420_v5 = vsub.f32 %v9792_v34, %v3391_v21 }
 0x64f   : > { %v10025_v41 = vpop.eup %7160  ;;  %7174 = vpow2.f32 %v3446_v47 }
 0x650   : > { %v3448_v7 = vmul.f32 1.442695, %v3420_v5  ;;  %4026 = vperm.xlu1 %7023, %v6420_v61   ;;  %6782 = vmatmul.mubr.msk.f32.gmra.mxu0 %vm1393_vm5, %v10022_v31  ;;  %v10034_v20 = vpop.eup %7162  ;;  %v11506_v5 = vsub.f32 %v9807_v4, %v9810_v53 }
 0x651   : > { %6784 = vmatprep.mubr.msk.f32.mxu0 %vm1394_vm6, %v10025_v41  ;;  %v3401_v27 = vpop.permute.xlu0 %3400 }
 0x652   : > { %7176 = vpow2.f32 %v3448_v7  ;;  %v3422_v34 = vsub.f32 %v9802_v58, %v3401_v27  ;;  %v3488_v7 = vmul.f32 1.442695, %v11506_v5 }
 0x653   : > { %v10037_v26 = vpop.eup %7164  ;;  %7178 = vpow2.f32 %v3450_v57 }
 0x654   : > { %v3452_v28 = vmul.f32 1.442695, %v3422_v34  ;;  %4036 = vperm.xlu1 %7023, %v6422_v46   ;;  %6785 = vmatmul.mubr.msk.f32.gmra.mxu0 %vm1395_vm7, %v10034_v20  ;;  %v10045_v15 = vpop.eup %7166 }
 0x655   : > { %6787 = vmatprep.mubr.msk.f32.mxu0 %vm1396_vm8, %v10037_v26  ;;  %v3962_v60 = vpop.permute.xlu0 %3961 }
 0x656   : > { %7180 = vpow2.f32 %v3452_v28  ;;  %v4045_v25 = vadd.f32 %v10086_v48, %v3962_v60  ;;  %v3521_v28 = vld [vmem:[#allocation3 + $0x100] sm:$0xff] }
 0x657   : > { %v10047_v63 = vpop.eup %7168  ;;  %7182 = vpow2.f32 %v3488_v7 }
 0x658   : > { %6788 = vmatmul.mubr.msk.f32.gmra.mxu0 %vm1397_vm9, %v10045_v15  ;;  %v10055_v58 = vpop.eup %7170  ;;  %v4061_v36 = vmul.f32 0.2, %v4045_v25 }
 0x659   : > { %6790 = vmatprep.mubr.msk.f32.mxu0 %vm1398_vm10, %v10047_v63  ;;  %v3972_v35 = vpop.permute.xlu0 %3971 }
 0x65a   : > { %v4077_v39 = vmax.f32 %v4045_v25, %v4061_v36  ;;  %v4047_v4 = vadd.f32 %v10086_v48, %v3972_v35 }
 0x65b   : > { %v10057_v22 = vpop.eup %7172 }
 0x65c   : > { %6791 = vmatmul.mubr.msk.f32.gmra.mxu0 %vm1399_vm11, %v10055_v58  ;;  %v10065_v32 = vpop.eup %7174 }
 0x65d   : > { %6793 = vmatprep.mubr.msk.f32.mxu0 %vm1400_vm12, %v10057_v22  ;;  %v3982_v11 = vpop.permute.xlu0 %3981 }
 0x65e   : > { %v4049_v43 = vadd.f32 %v10086_v48, %v3982_v11 }
 0x65f   : > { %v10067_v16 = vpop.eup %7176 }
 0x660   : > { %6794 = vmatmul.mubr.msk.f32.gmra.mxu0 %vm1401_vm13, %v10065_v32  ;;  %v10075_v44 = vpop.eup %7178 }
 0x661   : > { %6796 = vmatprep.mubr.msk.f32.mxu0 %vm11501_vm2, %v10067_v16  ;;  %vm11504_vm2 = vcmp.gt.f32.partialorder %v11464_v1, 0.0  ;;  %v3992_v21 = vpop.permute.xlu0 %3991 }
 0x662   : > { %v10091_v47 = vsel %vm11504_vm2, %v4077_v39, -1e+09  ;;  %vm11514_vm2 = vcmp.gt.f32.partialorder %v11376_v49, 0.0 }
 0x663   : > { %v10077_v40 = vpop.eup %7180  ;;  %11505 = vst [vmem:[#allocation57_spill] sm:$0xff] %v10091_v47 }
 0x664   : > { %6797 = vmatmul.mubr.msk.f32.gmra.mxu0 %vm11502_vm14, %v10075_v44  ;;  %v10097_v46 = vpop.eup %7182  ;;  %vm11508_vm14 = vcmask 7168  }
 0x665   : > { %6799 = vmatprep.mubr.msk.f32.mxu0 %vm11503_vm15, %v10077_v40  ;;  %v4002_v61 = vpop.permute.xlu0 %4001  ;;  %11507 = vst [vmem:[#allocation61_spill] sm:$0xff] %v10097_v46  ;;  %v3537_v60 = vmul.f32 %v10097_v46, %v3521_v28  ;;  %v4051_v46 = vadd.f32 %v10086_v48, %v3992_v21  ;;  %vm11513_vm15 = vcmp.gt.f32.partialorder %v11362_v29, 0.0 }
 0x669   : > { %v4012_v57 = vpop.permute.xlu0 %4011 }
 0x66d   : > { %v4022_v27 = vpop.permute.xlu0 %4021 }
 0x671   : > { %v10099_v34 = vpop.permute.xlu0 %4031 }
 0x678   : > { %4126 = vmax.xlane.f32.xlu1 %v10091_v47  ;;  %v4063_v47 = vmul.f32 0.2, %v4047_v4 }
 0x69e   : > { %v3554_v25 = vpop.xlane.xlu0 %3553 }
 0x69f   : > { %v3585_v36 = vadd.f32 %v3554_v25, %v3537_v60  ;;  %v4079_v25 = vmax.f32 %v4047_v4, %v4063_v47 }
 0x6a1   : > { %3601 = vst.msk [vmem:[#allocation3 + $0x100] sm:$0xff] %vm11508_vm14, %v3585_v36  ;;  %v4065_v36 = vmul.f32 0.2, %v4049_v43  ;;  %vm11515_vm14 = vcmp.gt.f32.partialorder %v11378_v10, 0.0 }
 0x6a3   : > { %v4081_v4 = vmax.f32 %v4049_v43, %v4065_v36 }
 0x6a5   : > { %v10139_v36 = vsel %vm1394_vm6, %v4081_v4, -1e+09 }
 0x6af   : > { %v3406_v39 = vpop.permute.xlu1 %3405 }
 0x6b0   : > { %v3423_v1 = vsub.f32 %v9947_v56, %v3406_v39 }
 0x6b2   : > { %v3454_v53 = vmul.f32 1.442695, %v3423_v1 }
 0x6b3   : > { %v3967_v5 = vpop.permute.xlu1 %3966 }
 0x6b4   : > { %7184 = vpow2.f32 %v3454_v53  ;;  %v4046_v7 = vadd.f32 %v10086_v48, %v3967_v5  ;;  %v4053_v53 = vadd.f32 %v10086_v48, %v4002_v61 }
 0x6b6   : > { %v4062_v33 = vmul.f32 0.2, %v4046_v7 }
 0x6b7   : > { %v3977_v45 = vpop.permute.xlu1 %3976 }
 0x6b8   : > { %v4048_v28 = vadd.f32 %v10086_v48, %v3977_v45  ;;  %v4078_v60 = vmax.f32 %v4046_v7, %v4062_v33  ;;  %v10118_v45 = vsel %vm1392_vm3, %v4079_v25, -1e+09  ;;  %v4067_v33 = vmul.f32 0.2, %v4051_v46 }
 0x6b9   : > { %11509 = vst [vmem:[#allocation65_spill] sm:$0xff] %v10118_v45  ;;  %v4055_v25 = vadd.f32 %v10086_v48, %v4012_v57 }
 0x6ba   : > { %v4064_v56 = vmul.f32 0.2, %v4048_v28  ;;  %v10111_v1 = vsel %vm1391_vm4, %v4078_v60, -1e+09  ;;  %v4069_v60 = vmul.f32 0.2, %v4053_v53 }
 0x6bb   : > { %4128 = vmax.xlane.f32.xlu0 %v10111_v1  ;;  %v3987_v35 = vpop.permute.xlu1 %3986 }
 0x6bc   : > { %v4050_v39 = vadd.f32 %v10086_v48, %v3987_v35  ;;  %v4080_v11 = vmax.f32 %v4048_v28, %v4064_v56  ;;  %v4083_v35 = vmax.f32 %v4051_v46, %v4067_v33 }
 0x6be   : > { %v4066_v47 = vmul.f32 0.2, %v4050_v39  ;;  %v10122_v21 = vsel %vm1393_vm5, %v4080_v11, -1e+09  ;;  %v10151_v46 = vsel %vm1396_vm8, %v4083_v35, -1e+09 }
 0x6bf   : > { %11510 = vst [vmem:[#allocation68_spill] sm:$0xff] %v10122_v21  ;;  %v3997_v5 = vpop.permute.xlu1 %3996  ;;  %4132 = vmax.xlane.f32.xlu1 %v10122_v21  ;;  %4130 = vmax.xlane.f32.xlu0 %v10118_v45  ;;  %v4057_v21 = vadd.f32 %v10086_v48, %v4022_v27 }
 0x6c0   : > { %v4052_v7 = vadd.f32 %v10086_v48, %v3997_v5  ;;  %v4082_v28 = vmax.f32 %v4050_v39, %v4066_v47  ;;  %v4071_v47 = vmul.f32 0.2, %v4055_v25  ;;  %v4085_v5 = vmax.f32 %v4053_v53, %v4069_v60 }
 0x6c1   : > { %v10127_v61 = vpop.eup %7184  ;;  %v4073_v60 = vmul.f32 0.2, %v4057_v21 }
 0x6c2   : > { %v4068_v56 = vmul.f32 0.2, %v4052_v7  ;;  %6800 = vmatmul.mubr.msk.f32.gmra.mxu0 %vm11261_vm1, %v10127_v61  ;;  %v10135_v43 = vsel %vm1395_vm7, %v4082_v28, -1e+09  ;;  %v10158_v27 = vsel %vm1398_vm10, %v4085_v5, -1e+09  ;;  %v4087_v53 = vmax.f32 %v4055_v25, %v4071_v47 }
 0x6c3   : > { %v4007_v39 = vpop.permute.xlu1 %4006  ;;  %4136 = vmax.xlane.f32.xlu1 %v10135_v43  ;;  %4134 = vmax.xlane.f32.xlu0 %v10139_v36  ;;  %11511 = vst [vmem:[#allocation52_spill] sm:$0xff] %v10158_v27 }
 0x6c4   : > { %v4054_v57 = vadd.f32 %v10086_v48, %v4007_v39  ;;  %v4084_v11 = vmax.f32 %v4052_v7, %v4068_v56  ;;  %v4059_v56 = vadd.f32 %v10086_v48, %v10099_v34  ;;  %v10171_v25 = vsel %vm1400_vm12, %v4087_v53, -1e+09 }
 0x6c6   : > { %v4070_v45 = vmul.f32 0.2, %v4054_v57  ;;  %v10147_v28 = vsel %vm1397_vm9, %v4084_v11, -1e+09  ;;  %v4075_v47 = vmul.f32 0.2, %v4059_v56 }
 0x6c7   : > { %v4017_v33 = vpop.permute.xlu1 %4016  ;;  %4140 = vmax.xlane.f32.xlu1 %v10147_v28  ;;  %4138 = vmax.xlane.f32.xlu0 %v10151_v46 }
 0x6c8   : > { %v4056_v4 = vadd.f32 %v10086_v48, %v4017_v33  ;;  %v4086_v7 = vmax.f32 %v4054_v57, %v4070_v45  ;;  %v4089_v33 = vmax.f32 %v4057_v21, %v4073_v60 }
 0x6ca   : > { %v4072_v39 = vmul.f32 0.2, %v4056_v4  ;;  %v10164_v35 = vsel %vm1399_vm11, %v4086_v7, -1e+09 }
 0x6cb   : > { %11512 = vst [vmem:[#allocation72_spill] sm:$0xff] %v10164_v35  ;;  %v4027_v11 = vpop.permute.xlu1 %4026  ;;  %4144 = vmax.xlane.f32.xlu1 %v10164_v35  ;;  %4142 = vmax.xlane.f32.xlu0 %v10158_v27  ;;  %v10186_v27 = vsel %vm11514_vm2, %v4089_v33, -1e+09  ;;  %v6438_v33 = vld [vmem:[%s8173_s20 + $0x1e8] sm:$0xff] }
 0x6cc   : > { %v4058_v45 = vadd.f32 %v10086_v48, %v4027_v11  ;;  %v4088_v57 = vmax.f32 %v4056_v4, %v4072_v39  ;;  %v4091_v4 = vmax.f32 %v4059_v56, %v4075_v47  ;;  %v3458_v56 = vsel %vm1392_vm3, %v10012_v23, 0.0 }
 0x6cd   : > { %v3462_v23 = vsel %vm1396_vm8, %v10037_v26, 0.0  ;;  %v3466_v26 = vsel %vm1400_vm12, %v10057_v22, 0.0 }
 0x6ce   : > { %v4074_v5 = vmul.f32 0.2, %v4058_v45  ;;  %v10175_v34 = vsel %vm1401_vm13, %v4088_v57, -1e+09  ;;  %v3459_v57 = vsel %vm1393_vm5, %v10022_v31, 0.0  ;;  %v3463_v31 = vsel %vm1397_vm9, %v10045_v15, 0.0 }
 0x6cf   : > { %v4037_v7 = vpop.permute.xlu1 %4036  ;;  %4148 = vmax.xlane.f32.xlu1 %v10175_v34  ;;  %4146 = vmax.xlane.f32.xlu0 %v10171_v25  ;;  %v3467_v15 = vsel %vm1401_vm13, %v10065_v32, 0.0  ;;  %v10245_v32 = vld [vmem:[#allocation2 + $0x180] sm:$0xff] }
 0x6d0   : > { %v4060_v35 = vadd.f32 %v10086_v48, %v4037_v7  ;;  %v4090_v11 = vmax.f32 %v4058_v45, %v4074_v5  ;;  %v10196_v48 = vsel %vm11515_vm14, %v4091_v4, -1e+09  ;;  %v3460_v45 = vsel %vm1394_vm6, %v10025_v41, 0.0  ;;  %v6437_v7 = vld [vmem:[%s8173_s20 + $0x1e0] sm:$0xff]  ;;  %v6435_v4 = vld [vmem:[%s8173_s20 + $0x1d0] sm:$0xff] }
 0x6d1   : > { %v3464_v41 = vsel %vm1398_vm10, %v10047_v63, 0.0 }
 0x6d2   : > { %v4076_v39 = vmul.f32 0.2, %v4060_v35  ;;  %v10182_v53 = vsel %vm11513_vm15, %v4090_v11, -1e+09  ;;  %vm11516_vm15 = vmmov %vm11514_vm2  ;;  %v6436_v11 = vld [vmem:[%s8173_s20 + $0x1d8] sm:$0xff] }
 0x6d3   : > { %4152 = vmax.xlane.f32.xlu1 %v10182_v53  ;;  %4150 = vmax.xlane.f32.xlu0 %v10186_v27  ;;  %v3468_v63 = vsel %vm11516_vm15, %v10067_v16, 0.0  ;;  %vm11517_vm2 = vmmov %vm11515_vm14  ;;  %vm11518_vm14 = vcmp.gt.f32.partialorder %v11362_v29, 0.0  ;;  %v3471_v16 = vsel %vm11261_vm1, %v10127_v61, 0.0  ;;  %vm11519_vm15 = vcmask 7168   ;;  %v6439_v61 = vld [vmem:[%s8173_s20 + $0x1f0] sm:$0xff] }
 0x6d4   : > { %v4092_v21 = vmax.f32 %v4060_v35, %v4076_v39  ;;  %v3457_v35 = vsel %vm1391_vm4, %v10010_v59, 0.0  ;;  %v3461_v59 = vsel %vm1395_vm7, %v10034_v20, 0.0  ;;  %v3465_v20 = vsel %vm1399_vm11, %v10055_v58, 0.0  ;;  %v6434_v39 = vld [vmem:[%s8173_s20 + $0x1c8] sm:$0xff] }
 0x6d5   : > { %v3470_v22 = vsel %vm11517_vm2, %v10077_v40, 0.0  ;;  %v3469_v58 = vsel %vm11518_vm14, %v10075_v44, 0.0  ;;  %v6440_v44 = vld [vmem:[%s8173_s20 + $0x1f8] sm:$0xff]  ;;  %vm11520_vm2 = vmmov %vm11519_vm15 }
 0x6d6   : > { %v10192_v60 = vsel %vm11261_vm1, %v4092_v21, -1e+09  ;;  %6802 = vmatprep.subr.mxu1 %v6440_v44  ;;  %v10262_v21 = vld [vmem:[#allocation2 + $0x188] sm:$0xff]  ;;  %vm11522_vm14 = vmmov %vm11520_vm2 }
 0x6d7   : > { %4156 = vmax.xlane.f32.xlu1 %v10192_v60  ;;  %4154 = vmax.xlane.f32.xlu0 %v10196_v48  ;;  %vm11592_vm0 = vmmov %vm11520_vm2 }
 0x6d8   : > { %6803 = vmatpush3.msra.mxu1 %v6440_v44 }
 0x6d9   : > { %6804 = vmatprep.subr.mxu1 %v6439_v61 }
 0x6da   : > { %6805 = vmatpush3.msra.mxu1 %v6439_v61 }
 0x6db   : > { %3557 = vadd.xlane.f32.xlu1 %v3458_v56  ;;  %3555 = vadd.xlane.f32.xlu0 %v3457_v35  ;;  %v6433_v56 = vld [vmem:[%s8173_s20 + $0x1c0] sm:$0xff] }
 0x6dc   : > { %6806 = vmatprep.subr.mxu1 %v6438_v33 }
 0x6dd   : > { %6807 = vmatpush3.msra.mxu1 %v6438_v33 }
 0x6de   : > { %6808 = vmatprep.subr.mxu1 %v6437_v7 }
 0x6df   : > { %3561 = vadd.xlane.f32.xlu1 %v3460_v45  ;;  %3559 = vadd.xlane.f32.xlu0 %v3459_v57  ;;  %v6432_v57 = vld [vmem:[%s8173_s20 + $0x1b8] sm:$0xff] }
 0x6e0   : > { %6809 = vmatpush3.msra.mxu1 %v6437_v7 }
 0x6e1   : > { %6810 = vmatprep.subr.mxu1 %v6436_v11 }
 0x6e2   : > { %6811 = vmatpush3.msra.mxu1 %v6436_v11 }
 0x6e3   : > { %3565 = vadd.xlane.f32.xlu1 %v3462_v23  ;;  %3563 = vadd.xlane.f32.xlu0 %v3461_v59  ;;  %v10269_v23 = vld [vmem:[#allocation2 + $0x198] sm:$0xff]  ;;  %v10271_v59 = vld [vmem:[#allocation2 + $0x190] sm:$0xff] }
 0x6e4   : > { %6812 = vmatprep.subr.mxu1 %v6435_v4 }
 0x6e5   : > { %6813 = vmatpush3.msra.mxu1 %v6435_v4 }
 0x6e6   : > { %6814 = vmatprep.subr.mxu1 %v6434_v39 }
 0x6e7   : > { %3569 = vadd.xlane.f32.xlu1 %v3464_v41  ;;  %3567 = vadd.xlane.f32.xlu0 %v3463_v31  ;;  %v6431_v31 = vld [vmem:[%s8173_s20 + $0x1b0] sm:$0xff]  ;;  %v11553_v41 = vld [vmem:[#allocation28_spill] sm:$0xff] }
 0x6e8   : > { %6815 = vmatpush3.msra.mxu1 %v6434_v39  ;;  %v6428_v39 = vld [vmem:[%s8173_s20 + $0x198] sm:$0xff] }
 0x6e9   : > { %6816 = vmatprep.subr.mxu1 %v6433_v56 }
 0x6ea   : > { %6817 = vmatpush3.msra.mxu1 %v6433_v56  ;;  %v11526_v56 = vsub.f32 %v9812_v8, %v9820_v9  ;;  %v6427_v8 = vld [vmem:[%s8173_s20 + $0x190] sm:$0xff] }
 0x6eb   : > { %3573 = vadd.xlane.f32.xlu1 %v3466_v26  ;;  %3571 = vadd.xlane.f32.xlu0 %v3465_v20 }
 0x6ec   : > { %6818 = vmatprep.subr.mxu1 %v6432_v57 }
 0x6ed   : > { %6819 = vmatpush3.msra.mxu1 %v6432_v57  ;;  %v10312_v57 = vld [vmem:[#allocation2 + $0x1b8] sm:$0xff] }
 0x6ee   : > { %6820 = vmatprep.subr.mxu1 %v6431_v31  ;;  %11527 = vst [vmem:[#allocation66_spill] sm:$0xff] %v10312_v57 }
 0x6ef   : > { %3577 = vadd.xlane.f32.xlu1 %v3468_v63  ;;  %3575 = vadd.xlane.f32.xlu0 %v3467_v15  ;;  %v3473_v63 = vsub.f32 %v9707_v12, %v9712_v54  ;;  %v6429_v54 = vld [vmem:[%s8173_s20 + $0x1a0] sm:$0xff] }
 0x6f0   : > { %6821 = vmatpush3.msra.mxu1 %v6431_v31  ;;  %v10314_v31 = vld [vmem:[#allocation2 + $0x1b0] sm:$0xff]  ;;  %v11554_v12 = vld [vmem:[#allocation49_spill] sm:$0xff] }
 0x6f1   : > { %v3490_v7 = vmul.f32 1.442695, %v3473_v63  ;;  %11528 = vst [vmem:[#allocation70_spill] sm:$0xff] %v10314_v31  ;;  %v11555_v40 = vsub.f32 %v11553_v41, %v11554_v12 }
 0x6f3   : > { %3581 = vadd.xlane.f32.xlu1 %v3470_v22  ;;  %3579 = vadd.xlane.f32.xlu0 %v3469_v58  ;;  %v6430_v58 = vld [vmem:[%s8173_s20 + $0x1a8] sm:$0xff]  ;;  %7186 = vpow2.f32 %v3490_v7  ;;  %v11535_v7 = vsub.f32 %v9824_v13, %v9835_v14 }
 0x6f4   : > { %6822 = vmatprep.subr.mxu1 %v6430_v58 }
 0x6f5   : > { %6823 = vmatpush3.msra.mxu1 %v6430_v58 }
 0x6f6   : > { %6824 = vmatprep.subr.mxu1 %v6429_v54 }
 0x6f7   : > { %3583 = vadd.xlane.f32.xlu0 %v3471_v16  ;;  %v10288_v16 = vld [vmem:[#allocation2 + $0x1a8] sm:$0xff]  ;;  %6825 = vmatpush3.msra.mxu1 %v6429_v54 }
 0x6f8   : > { %6826 = vmatprep.subr.mxu1 %v6428_v39 }
 0x6f9   : > { %6827 = vmatpush3.msra.mxu1 %v6428_v39  ;;  %v3494_v39 = vmul.f32 1.442695, %v11535_v7  ;;  %v10364_v7 = vld [vmem:[#allocation2 + $0x1d8] sm:$0xff] }
 0x6fa   : > { %6828 = vmatprep.subr.mxu1 %v6427_v8  ;;  %11540 = vst [vmem:[#allocation60_spill] sm:$0xff] %v10364_v7 }
 0x6fb   : > { %6829 = vmatpush3.msra.mxu1 %v6427_v8 }
 0x700   : > { %v10413_v12 = vpop.eup %7186 }
 0x701   : > { %v4127_v47 = vpop.xlane.xlu1 %4126 }
 0x702   : > { %v10248_v5 = vmax.f32 %v10245_v32, %v4127_v47  ;;  %v10290_v47 = vld [vmem:[#allocation2 + $0x1a0] sm:$0xff] }
 0x703   : > { %11521 = vst [vmem:[#allocation55_spill] sm:$0xff] %v10290_v47 }
 0x704   : > { %4770 = vst.msk [vmem:[#allocation2 + $0x180] sm:$0xff] %vm11519_vm15, %v10248_v5  ;;  %4176 = vperm.xlu1 %7023, %v10248_v5   ;;  %vm11523_vm15 = vmmov %vm11520_vm2 }
 0x744   : > { %v4129_v35 = vpop.xlane.xlu0 %4128 }
 0x745   : > { %v10266_v45 = vmax.f32 %v10262_v21, %v4129_v35  ;;  %v3492_v35 = vmul.f32 1.442695, %v11526_v56 }
 0x747   : > { %4771 = vst.msk [vmem:[#allocation2 + $0x188] sm:$0xff] %vm11520_vm2, %v10266_v45  ;;  %4181 = vperm.xlu0 %7022, %v10266_v45   ;;  %7188 = vpow2.f32 %v3492_v35  ;;  %v10366_v35 = vld [vmem:[#allocation2 + $0x1d0] sm:$0xff] }
 0x748   : > { %v4133_v26 = vpop.xlane.xlu1 %4132  ;;  %v4131_v20 = vpop.xlane.xlu0 %4130  ;;  %11541 = vst [vmem:[#allocation64_spill] sm:$0xff] %v10366_v35 }
 0x749   : > { %v10282_v15 = vmax.f32 %v10269_v23, %v4133_v26  ;;  %v10285_v22 = vmax.f32 %v10271_v59, %v4131_v20  ;;  %v10337_v20 = vld [vmem:[#allocation2 + $0x1c8] sm:$0xff]  ;;  %v10339_v26 = vld [vmem:[#allocation2 + $0x1c0] sm:$0xff] }
 0x74a   : > { %11533 = vst [vmem:[#allocation53_spill] sm:$0xff] %v10337_v20  ;;  %11534 = vst [vmem:[#allocation59_spill] sm:$0xff] %v10339_v26 }
 0x74b   : > { %4773 = vst.msk [vmem:[#allocation2 + $0x198] sm:$0xff] %vm11522_vm14, %v10282_v15  ;;  %4186 = vperm.xlu1 %7023, %v10285_v22   ;;  %vm11529_vm14 = vmmov %vm11520_vm2 }
 0x74c   : > { %4772 = vst.msk [vmem:[#allocation2 + $0x190] sm:$0xff] %vm11523_vm15, %v10285_v22  ;;  %v4137_v61 = vpop.xlane.xlu1 %4136  ;;  %v4135_v33 = vpop.xlane.xlu0 %4134  ;;  %vm11536_vm15 = vmmov %vm11520_vm2 }
 0x74d   : > { %v10303_v11 = vmax.f32 %v10288_v16, %v4137_v61  ;;  %v10306_v4 = vmax.f32 %v10290_v47, %v4135_v33  ;;  %v6426_v61 = vld [vmem:[%s8173_s20 + $0x188] sm:$0xff]  ;;  %v11532_v33 = vsub.f32 %v9822_v2, %v9832_v38  ;;  %v6425_v2 = vld [vmem:[%s8173_s20 + $0x180] sm:$0xff] }
 0x74e   : > { %6830 = vmatprep.subr.mxu1 %v6426_v61 }
 0x74f   : > { %11524 = vst [vmem:[#allocation58_spill] sm:$0xff] %v10303_v11  ;;  %11525 = vst [vmem:[#allocation63_spill] sm:$0xff] %v10306_v4  ;;  %4191 = vperm.xlu1 %7023, %v10282_v15   ;;  %4196 = vperm.xlu0 %7022, %v10306_v4   ;;  %v3496_v56 = vmul.f32 1.442695, %v11532_v33 }
 0x750   : > { %4775 = vst.msk [vmem:[#allocation2 + $0x1a8] sm:$0xff] %vm11520_vm2, %v10303_v11  ;;  %v4141_v9 = vpop.xlane.xlu1 %4140  ;;  %v4139_v63 = vpop.xlane.xlu0 %4138  ;;  %6831 = vmatpush3.msra.mxu1 %v6426_v61 }
 0x751   : > { %4774 = vst.msk [vmem:[#allocation2 + $0x1a0] sm:$0xff] %vm11529_vm14, %v10306_v4  ;;  %v10328_v58 = vmax.f32 %v10312_v57, %v4141_v9  ;;  %v10331_v54 = vmax.f32 %v10314_v31, %v4139_v63  ;;  %7190 = vpow2.f32 %v3496_v56  ;;  %v11539_v63 = vsub.f32 %v9837_v24, %v9851_v17  ;;  %6832 = vmatprep.subr.mxu1 %v6425_v2  ;;  %v11542_v9 = vld [vmem:[#allocation37_spill] sm:$0xff]  ;;  %vm11544_vm14 = vmmov %vm11520_vm2  ;;  %v11548_v56 = vld [vmem:[#allocation48_spill] sm:$0xff] }
 0x752   : > { %7192 = vpow2.f32 %v3494_v39  ;;  %v11543_v44 = vsub.f32 %v9839_v51, %v11542_v9  ;;  %6833 = vmatpush3.msra.mxu1 %v6425_v2  ;;  %v11549_v39 = vld [vmem:[#allocation38_spill] sm:$0xff]  ;;  %v3502_v2 = vmul.f32 1.442695, %v11555_v40 }
 0x753   : > { %11530 = vst [vmem:[#allocation73_spill] sm:$0xff] %v10328_v58  ;;  %11531 = vst [vmem:[#allocation50_spill] sm:$0xff] %v10331_v54  ;;  %4201 = vperm.xlu1 %7023, %v10303_v11   ;;  %4206 = vperm.xlu0 %7022, %v10331_v54   ;;  %v3500_v33 = vmul.f32 1.442695, %v11539_v63  ;;  %v11550_v9 = vsub.f32 %v11548_v56, %v11549_v39  ;;  %v10390_v24 = vld [vmem:[#allocation2 + $0x1e8] sm:$0xff]  ;;  %v11559_v56 = vld [vmem:[#allocation29_spill] sm:$0xff] }
 0x754   : > { %4777 = vst.msk [vmem:[#allocation2 + $0x1b8] sm:$0xff] %vm11536_vm15, %v10328_v58  ;;  %v4145_v38 = vpop.xlane.xlu1 %4144  ;;  %v4143_v13 = vpop.xlane.xlu0 %4142  ;;  %vm11545_vm15 = vmmov %vm11520_vm2  ;;  %v11560_v39 = vld [vmem:[#allocation31_spill] sm:$0xff] }
 0x755   : > { %4776 = vst.msk [vmem:[#allocation2 + $0x1b0] sm:$0xff] %vm11520_vm2, %v10331_v54  ;;  %v10356_v14 = vmax.f32 %v10337_v20, %v4145_v38  ;;  %v10359_v8 = vmax.f32 %v10339_v26, %v4143_v13  ;;  %v3498_v38 = vmul.f32 1.442695, %v11543_v44  ;;  %7194 = vpow2.f32 %v3500_v33  ;;  %11551 = vst [vmem:[#allocation74_spill] sm:$0xff] %v10390_v24  ;;  %v10392_v13 = vld [vmem:[#allocation2 + $0x1e0] sm:$0xff] }
 0x756   : > { %v3504_v63 = vmul.f32 1.442695, %v11550_v9  ;;  %11552 = vst [vmem:[#allocation71_spill] sm:$0xff] %v10392_v13  ;;  %v11561_v9 = vsub.f32 %v11559_v56, %v11560_v39  ;;  %v3522_v56 = vld [vmem:[#allocation3 + $0x108] sm:$0xff]  ;;  %v11574_v20 = vld [vmem:[#allocation41_spill] sm:$0xff] }
 0x757   : > { %11537 = vst [vmem:[#allocation56_spill] sm:$0xff] %v10356_v14  ;;  %11538 = vst [vmem:[#allocation62_spill] sm:$0xff] %v10359_v8  ;;  %4211 = vperm.xlu1 %7023, %v10328_v58   ;;  %4216 = vperm.xlu0 %7022, %v10359_v8   ;;  %7196 = vpow2.f32 %v3498_v38 }
 0x758   : > { %4779 = vst.msk [vmem:[#allocation2 + $0x1c8] sm:$0xff] %vm11544_vm14, %v10356_v14  ;;  %v4149_v17 = vpop.xlane.xlu1 %4148  ;;  %v4147_v61 = vpop.xlane.xlu0 %4146  ;;  %vm11556_vm14 = vmmov %vm11520_vm2  ;;  %7198 = vpow2.f32 %v3504_v63  ;;  %v3508_v33 = vmul.f32 1.442695, %v11561_v9  ;;  %v11571_v63 = vld [vmem:[#allocation40_spill] sm:$0xff] }
 0x759   : > { %4778 = vst.msk [vmem:[#allocation2 + $0x1c0] sm:$0xff] %vm11545_vm15, %v10359_v8  ;;  %v10382_v51 = vmax.f32 %v10364_v7, %v4149_v17  ;;  %v10385_v44 = vmax.f32 %v10366_v35, %v4147_v61  ;;  %v10418_v17 = vld [vmem:[#allocation2 + $0x1f8] sm:$0xff]  ;;  %v10420_v35 = vld [vmem:[#allocation2 + $0x1f0] sm:$0xff]  ;;  %7200 = vpow2.f32 %v3502_v2  ;;  %v11564_v7 = vld [vmem:[#allocation30_spill] sm:$0xff] }
 0x75a   : > { %11562 = vst [vmem:[#allocation77_spill] sm:$0xff] %v10418_v17  ;;  %11563 = vst [vmem:[#allocation79_spill] sm:$0xff] %v10420_v35  ;;  %v3523_v2 = vld [vmem:[#allocation3 + $0x110] sm:$0xff]  ;;  %7202 = vpow2.f32 %v3508_v33 }
 0x75b   : > { %11546 = vst [vmem:[#allocation69_spill] sm:$0xff] %v10382_v51  ;;  %11547 = vst [vmem:[#allocation67_spill] sm:$0xff] %v10385_v44  ;;  %4221 = vperm.xlu1 %7023, %v10356_v14   ;;  %4226 = vperm.xlu0 %7022, %v10385_v44   ;;  %v11573_v14 = vld [vmem:[#allocation39_spill] sm:$0xff] }
 0x75c   : > { %4781 = vst.msk [vmem:[#allocation2 + $0x1d8] sm:$0xff] %vm11520_vm2, %v10382_v51  ;;  %v4153_v38 = vpop.xlane.xlu1 %4152  ;;  %v4151_v61 = vpop.xlane.xlu0 %4150  ;;  %vm11567_vm15 = vmmov %vm11520_vm2  ;;  %v11575_v54 = vsub.f32 %v11573_v14, %v11574_v20  ;;  %v3525_v14 = vld [vmem:[#allocation3 + $0x120] sm:$0xff] }
 0x75d   : > { %4780 = vst.msk [vmem:[#allocation2 + $0x1d0] sm:$0xff] %vm11556_vm14, %v10385_v44  ;;  %v10408_v40 = vmax.f32 %v10390_v24, %v4153_v38  ;;  %v10411_v41 = vmax.f32 %v10392_v13, %v4151_v61  ;;  %v10422_v44 = vpop.eup %7188  ;;  %v11565_v38 = vld [vmem:[#allocation32_spill] sm:$0xff]  ;;  %vm11576_vm14 = vmmov %vm11520_vm2 }
 0x75e   : > { %v11566_v8 = vsub.f32 %v11564_v7, %v11565_v38  ;;  %v11570_v38 = vld [vmem:[#allocation35_spill] sm:$0xff]  ;;  %v3539_v24 = vmul.f32 %v10422_v44, %v3523_v2 }
 0x75f   : > { %11557 = vst [vmem:[#allocation76_spill] sm:$0xff] %v10408_v40  ;;  %11558 = vst [vmem:[#allocation78_spill] sm:$0xff] %v10411_v41  ;;  %4231 = vperm.xlu1 %7023, %v10382_v51   ;;  %4236 = vperm.xlu0 %7022, %v10411_v41   ;;  %v11572_v61 = vsub.f32 %v11570_v38, %v11571_v63  ;;  %v3538_v51 = vmul.f32 %v10413_v12, %v3522_v56  ;;  %v11578_v56 = vld [vmem:[#allocation42_spill] sm:$0xff] }
 0x760   : > { %v3506_v26 = vmul.f32 1.442695, %v11566_v8  ;;  %4783 = vst.msk [vmem:[#allocation2 + $0x1e8] sm:$0xff] %vm11567_vm15, %v10408_v40  ;;  %v4157_v7 = vpop.xlane.xlu1 %4156  ;;  %v4155_v8 = vpop.xlane.xlu0 %4154  ;;  %vm11577_vm15 = vmmov %vm11520_vm2  ;;  %v11579_v38 = vld [vmem:[#allocation46_spill] sm:$0xff] }
 0x761   : > { %4782 = vst.msk [vmem:[#allocation2 + $0x1e0] sm:$0xff] %vm11520_vm2, %v10411_v41  ;;  %v10438_v39 = vmax.f32 %v10418_v17, %v4157_v7  ;;  %v10441_v9 = vmax.f32 %v10420_v35, %v4155_v8  ;;  %v3512_v13 = vmul.f32 1.442695, %v11572_v61  ;;  %v10448_v41 = vpop.eup %7190  ;;  %v3510_v7 = vmul.f32 1.442695, %v11575_v54  ;;  %v3524_v61 = vld [vmem:[#allocation3 + $0x118] sm:$0xff] }
 0x762   : > { %7204 = vpow2.f32 %v3506_v26  ;;  %v10463_v26 = vpop.eup %7192  ;;  %v11580_v8 = vsub.f32 %v11578_v56, %v11579_v38  ;;  %v11581_v17 = vld [vmem:[#allocation44_spill] sm:$0xff] }
 0x763   : > { %11568 = vst [vmem:[#allocation80_spill] sm:$0xff] %v10438_v39  ;;  %11569 = vst [vmem:[#allocation33_spill] sm:$0xff] %v10441_v9  ;;  %4241 = vperm.xlu1 %7023, %v10408_v40   ;;  %4246 = vperm.xlu0 %7022, %v10441_v9   ;;  %7206 = vpow2.f32 %v3512_v13  ;;  %v10468_v35 = vpop.eup %7194  ;;  %v11582_v40 = vld [vmem:[#allocation47_spill] sm:$0xff]  ;;  %v3540_v13 = vmul.f32 %v10463_v26, %v3524_v61 }
 0x764   : > { %4785 = vst.msk [vmem:[#allocation2 + $0x1f8] sm:$0xff] %vm11576_vm14, %v10438_v39  ;;  %v3558_v20 = vpop.xlane.xlu1 %3557  ;;  %v3556_v54 = vpop.xlane.xlu0 %3555  ;;  %v3516_v33 = vmul.f32 1.442695, %v11580_v8  ;;  %7208 = vpow2.f32 %v3510_v7  ;;  %v11583_v31 = vsub.f32 %v11581_v17, %v11582_v40  ;;  %vm11584_vm14 = vmmov %vm11520_vm2  ;;  %v3526_v7 = vld [vmem:[#allocation3 + $0x128] sm:$0xff]  ;;  %v11585_v17 = vld [vmem:[#allocation51_spill] sm:$0xff] }
 0x765   : > { %4784 = vst.msk [vmem:[#allocation2 + $0x1f0] sm:$0xff] %vm11577_vm15, %v10441_v9  ;;  %v3587_v63 = vadd.f32 %v3558_v20, %v3539_v24  ;;  %v3586_v2 = vadd.f32 %v3556_v54, %v3538_v51  ;;  %v3541_v24 = vmul.f32 %v10448_v41, %v3525_v14  ;;  %v10478_v51 = vpop.eup %7196  ;;  %v3527_v54 = vld [vmem:[#allocation3 + $0x130] sm:$0xff]  ;;  %v11586_v40 = vld [vmem:[#allocation54_spill] sm:$0xff]  ;;  %vm11588_vm15 = vmmov %vm11520_vm2 }
 0x766   : > { %v3514_v9 = vmul.f32 1.442695, %v11583_v31  ;;  %7210 = vpow2.f32 %v3516_v33  ;;  %v10480_v31 = vpop.eup %7198  ;;  %v3543_v14 = vmul.f32 %v10468_v35, %v3527_v54  ;;  %v3542_v61 = vmul.f32 %v10478_v51, %v3526_v7  ;;  %v3529_v33 = vld [vmem:[#allocation3 + $0x140] sm:$0xff] }
 0x767   : > { %3603 = vst.msk [vmem:[#allocation3 + $0x110] sm:$0xff] %vm11520_vm2, %v3587_v63  ;;  %4251 = vperm.xlu1 %7023, %v10438_v39   ;;  %v11587_v63 = vsub.f32 %v11585_v17, %v11586_v40  ;;  %v10489_v39 = vpop.eup %7200  ;;  %v3531_v40 = vld [vmem:[#allocation3 + $0x150] sm:$0xff] }
 0x768   : > { %3602 = vst.msk [vmem:[#allocation3 + $0x108] sm:$0xff] %vm11584_vm14, %v3586_v2  ;;  %v3562_v8 = vpop.xlane.xlu1 %3561  ;;  %v3560_v20 = vpop.xlane.xlu0 %3559  ;;  %7212 = vpow2.f32 %v3514_v9  ;;  %vm11590_vm14 = vmmov %vm11520_vm2 }
 0x769   : > { %v3589_v56 = vadd.f32 %v3562_v8, %v3541_v24  ;;  %v3588_v38 = vadd.f32 %v3560_v20, %v3540_v13  ;;  %v3518_v2 = vmul.f32 1.442695, %v11587_v63  ;;  %v3528_v8 = vld [vmem:[#allocation3 + $0x138] sm:$0xff]  ;;  %v10491_v58 = vpop.eup %7202  ;;  %v3530_v63 = vld [vmem:[#allocation3 + $0x148] sm:$0xff] }
 0x76a   : > { %11589 = vst [vmem:[#allocation81_spill] sm:$0xff] %v10491_v58  ;;  %v3544_v54 = vmul.f32 %v10489_v39, %v3528_v8 }
 0x76b   : > { %3605 = vst.msk [vmem:[#allocation3 + $0x120] sm:$0xff] %vm11588_vm15, %v3589_v56  ;;  %7214 = vpow2.f32 %v3518_v2  ;;  %vm11591_vm15 = vmmov %vm11520_vm2  ;;  %v3545_v56 = vmul.f32 %v10480_v31, %v3529_v33  ;;  %v3547_v2 = vmul.f32 %v10491_v58, %v3531_v40 }
 0x76c   : > { %3604 = vst.msk [vmem:[#allocation3 + $0x118] sm:$0xff] %vm11520_vm2, %v3588_v38  ;;  %v3566_v24 = vpop.xlane.xlu1 %3565  ;;  %v3564_v13 = vpop.xlane.xlu0 %3563 }
 0x76d   : > { %v3591_v20 = vadd.f32 %v3566_v24, %v3543_v14  ;;  %v3590_v9 = vadd.f32 %v3564_v13, %v3542_v61 }
 0x76f   : > { %3607 = vst.msk [vmem:[#allocation3 + $0x130] sm:$0xff] %vm11590_vm14, %v3591_v20  ;;  %v10497_v7 = vpop.eup %7204  ;;  %v3533_v20 = vld [vmem:[#allocation3 + $0x160] sm:$0xff]  ;;  %vm11594_vm14 = vmmov %vm11592_vm0 }
 0x770   : > { %3606 = vst.msk [vmem:[#allocation3 + $0x128] sm:$0xff] %vm11591_vm15, %v3590_v9  ;;  %v3570_v38 = vpop.xlane.xlu1 %3569  ;;  %v3568_v17 = vpop.xlane.xlu0 %3567  ;;  %v3546_v24 = vmul.f32 %v10497_v7, %v3530_v63  ;;  %v3532_v9 = vld [vmem:[#allocation3 + $0x158] sm:$0xff]  ;;  %vm11595_vm15 = vmmov %vm11592_vm0  ;;  %v3535_v63 = vld [vmem:[#allocation3 + $0x170] sm:$0xff] }
 0x771   : > { %v3593_v57 = vadd.f32 %v3570_v38, %v3545_v56  ;;  %v3592_v14 = vadd.f32 %v3568_v17, %v3544_v54  ;;  %v10499_v61 = vpop.eup %7206 }
 0x772   : > { %v10505_v13 = vpop.eup %7208 }
 0x773   : > { %3609 = vst.msk [vmem:[#allocation3 + $0x140] sm:$0xff] %vm11520_vm2, %v3593_v57  ;;  %v10507_v56 = vpop.eup %7210  ;;  %v3549_v57 = vmul.f32 %v10499_v61, %v3533_v20  ;;  %v3548_v54 = vmul.f32 %v10505_v13, %v3532_v9  ;;  %vm11596_vm2 = vmmov %vm11592_vm0 }
 0x774   : > { %3608 = vst.msk [vmem:[#allocation3 + $0x138] sm:$0xff] %vm11592_vm0, %v3592_v14  ;;  %v3574_v33 = vpop.xlane.xlu1 %3573  ;;  %v3572_v8 = vpop.xlane.xlu0 %3571  ;;  %11593 = vst [vmem:[#allocation43_spill] sm:$0xff] %v10507_v56  ;;  %v3534_v14 = vld [vmem:[#allocation3 + $0x168] sm:$0xff] }
 0x775   : > { %v3595_v4 = vadd.f32 %v3574_v33, %v3547_v2  ;;  %v3594_v47 = vadd.f32 %v3572_v8, %v3546_v24  ;;  %v10513_v38 = vpop.eup %7212  ;;  %v3536_v8 = vld [vmem:[#allocation3 + $0x178] sm:$0xff] }
 0x777   : > { %3611 = vst.msk [vmem:[#allocation3 + $0x150] sm:$0xff] %vm11594_vm14, %v3595_v4  ;;  %v3551_v4 = vmul.f32 %v10507_v56, %v3535_v63  ;;  %vm11597_vm14 = vmmov %vm11592_vm0  ;;  %v11600_v56 = vld [vmem:[#allocation26_spill] sm:$0xff] }
 0x778   : > { %3610 = vst.msk [vmem:[#allocation3 + $0x148] sm:$0xff] %vm11595_vm15, %v3594_v47  ;;  %v3578_v17 = vpop.xlane.xlu1 %3577  ;;  %v3576_v40 = vpop.xlane.xlu0 %3575  ;;  %v3550_v47 = vmul.f32 %v10513_v38, %v3534_v14  ;;  %vm11598_vm15 = vmmov %vm11592_vm0 }
 0x779   : > { %v3597_v58 = vadd.f32 %v3578_v17, %v3549_v57  ;;  %v3596_v11 = vadd.f32 %v3576_v40, %v3548_v54  ;;  %v10519_v2 = vpop.eup %7214 }
 0x77a   : > { %v3552_v57 = vmul.f32 %v10519_v2, %v3536_v8 }
 0x77b   : > { %3613 = vst.msk [vmem:[#allocation3 + $0x160] sm:$0xff] %vm11592_vm0, %v3597_v58 }
 0x77c   : > { %3612 = vst.msk [vmem:[#allocation3 + $0x158] sm:$0xff] %vm11596_vm2, %v3596_v11  ;;  %v3582_v24 = vpop.xlane.xlu1 %3581  ;;  %v3580_v33 = vpop.xlane.xlu0 %3579  ;;  %v11599_v11 = vld [vmem:[#allocation57_spill] sm:$0xff]  ;;  %vm11601_vm2 = vcmp.gt.f32.partialorder %v11600_v56, 0.0 }
 0x77d   : > { %v3599_v20 = vadd.f32 %v3582_v24, %v3551_v4  ;;  %v3598_v9 = vadd.f32 %v3580_v33, %v3550_v47  ;;  %vm11602_vm1 = vmmov %vm11601_vm2 }
 0x77f   : > { %3615 = vst.msk [vmem:[#allocation3 + $0x170] sm:$0xff] %vm11597_vm14, %v3599_v20  ;;  %v11603_v20 = vld [vmem:[#allocation65_spill] sm:$0xff]  ;;  %vm11661_vm14 = vmmov %vm11592_vm0 }
 0x780   : > { %3614 = vst.msk [vmem:[#allocation3 + $0x168] sm:$0xff] %vm11598_vm15, %v3598_v9  ;;  %v4177_v58 = vpop.permute.xlu1 %4176  ;;  %v3584_v54 = vpop.xlane.xlu0 %3583  ;;  %vm11662_vm15 = vmmov %vm11592_vm0 }
 0x781   : > { %v4254_v17 = vsub.f32 %v11599_v11, %v4177_v58  ;;  %v3600_v40 = vadd.f32 %v3584_v54, %v3552_v57  ;;  %v11604_v11 = vld [vmem:[#allocation68_spill] sm:$0xff] }
 0x783   : > { %v4270_v63 = vmul.f32 1.442695, %v4254_v17  ;;  %3616 = vst.msk [vmem:[#allocation3 + $0x178] sm:$0xff] %vm11592_vm0, %v3600_v40 }
 0x785   : > { %7216 = vpow2.f32 %v4270_v63 }
 0x792   : > { %v7217_v14 = vpop.eup %7216 }
 0x793   : > { %6834 = vmatprep.mubr.msk.f32.mxu1 %vm11601_vm2, %v7217_v14  ;;  %v4302_v4 = vsel %vm11602_vm1, %v7217_v14, 0.0  ;;  %vm11660_vm1 = vmmov %vm11592_vm0 }
 0x794   : > { %4399 = vadd.xlane.f32.xlu0 %v4302_v4  ;;  %vm11663_vm2 = vmmov %vm11592_vm0 }
 0x7c2   : > { %v4182_v47 = vpop.permute.xlu0 %4181 }
 0x7c3   : > { %v4255_v24 = vsub.f32 %v10111_v1, %v4182_v47 }
 0x7c5   : > { %v4272_v33 = vmul.f32 1.442695, %v4255_v24 }
 0x7c6   : > { %v4187_v8 = vpop.permute.xlu1 %4186 }
 0x7c7   : > { %7218 = vpow2.f32 %v4272_v33  ;;  %v4256_v9 = vsub.f32 %v11603_v20, %v4187_v8 }
 0x7c9   : > { %v4274_v57 = vmul.f32 1.442695, %v4256_v9 }
 0x7ca   : > { %v4192_v58 = vpop.permute.xlu1 %4191  ;;  %v4197_v54 = vpop.permute.xlu0 %4196 }
 0x7cb   : > { %7220 = vpow2.f32 %v4274_v57  ;;  %v4257_v17 = vsub.f32 %v11604_v11, %v4192_v58  ;;  %v4258_v40 = vsub.f32 %v10139_v36, %v4197_v54  ;;  %v11605_v57 = vld [vmem:[#allocation52_spill] sm:$0xff] }
 0x7cd   : > { %v4276_v63 = vmul.f32 1.442695, %v4257_v17  ;;  %v4278_v56 = vmul.f32 1.442695, %v4258_v40  ;;  %v11606_v40 = vld [vmem:[#allocation72_spill] sm:$0xff] }
 0x7ce   : > { %v4202_v14 = vpop.permute.xlu1 %4201  ;;  %v4207_v4 = vpop.permute.xlu0 %4206 }
 0x7cf   : > { %7222 = vpow2.f32 %v4276_v63  ;;  %v4259_v1 = vsub.f32 %v10135_v43, %v4202_v14  ;;  %v4260_v47 = vsub.f32 %v10151_v46, %v4207_v4 }
 0x7d0   : > { %7224 = vpow2.f32 %v4278_v56 }
 0x7d1   : > { %v4280_v24 = vmul.f32 1.442695, %v4259_v1  ;;  %v4282_v33 = vmul.f32 1.442695, %v4260_v47 }
 0x7d2   : > { %v4212_v8 = vpop.permute.xlu1 %4211  ;;  %v4217_v20 = vpop.permute.xlu0 %4216 }
 0x7d3   : > { %7226 = vpow2.f32 %v4280_v24  ;;  %v4261_v9 = vsub.f32 %v10147_v28, %v4212_v8  ;;  %v4262_v58 = vsub.f32 %v11605_v57, %v4217_v20 }
 0x7d4   : > { %v7219_v36 = vpop.eup %7218  ;;  %7228 = vpow2.f32 %v4282_v33 }
 0x7d5   : > { %v4284_v54 = vmul.f32 1.442695, %v4261_v9  ;;  %v4286_v11 = vmul.f32 1.442695, %v4262_v58  ;;  %6835 = vmatmul.mubr.msk.f32.vlgmr.msra.gmra.mxu1 %vm1391_vm4, %v7219_v36  ;;  %v4303_v43 = vsel %vm1391_vm4, %v7219_v36, 0.0 }
 0x7d6   : > { %v4222_v46 = vpop.permute.xlu1 %4221  ;;  %4401 = vadd.xlane.f32.xlu1 %v4303_v43  ;;  %v4227_v17 = vpop.permute.xlu0 %4226 }
 0x7d7   : > { %7230 = vpow2.f32 %v4284_v54  ;;  %v4263_v63 = vsub.f32 %v11606_v40, %v4222_v46  ;;  %v4264_v28 = vsub.f32 %v10171_v25, %v4227_v17 }
 0x7d8   : > { %v7221_v56 = vpop.eup %7220  ;;  %7232 = vpow2.f32 %v4286_v11 }
 0x7d9   : > { %v4288_v14 = vmul.f32 1.442695, %v4263_v63  ;;  %v4290_v4 = vmul.f32 1.442695, %v4264_v28  ;;  %6837 = vmatprep.mubr.msk.f32.mxu1 %vm1392_vm3, %v7221_v56  ;;  %v4304_v1 = vsel %vm1392_vm3, %v7221_v56, 0.0  ;;  %vm11607_vm3 = vcmp.gt.f32.partialorder %v11376_v49, 0.0 }
 0x7da   : > { %v4232_v50 = vpop.permute.xlu1 %4231  ;;  %4403 = vadd.xlane.f32.xlu0 %v4304_v1  ;;  %v4237_v47 = vpop.permute.xlu0 %4236  ;;  %vm11608_vm4 = vmmov %vm11607_vm3 }
 0x7db   : > { %7234 = vpow2.f32 %v4288_v14  ;;  %v4265_v24 = vsub.f32 %v10175_v34, %v4232_v50  ;;  %v4266_v33 = vsub.f32 %v10186_v27, %v4237_v47 }
 0x7dc   : > { %v7223_v8 = vpop.eup %7222  ;;  %7236 = vpow2.f32 %v4290_v4 }
 0x7dd   : > { %v7225_v25 = vpop.eup %7224  ;;  %v4292_v20 = vmul.f32 1.442695, %v4265_v24  ;;  %v4294_v9 = vmul.f32 1.442695, %v4266_v33  ;;  %6838 = vmatmul.mubr.msk.f32.gmra.mxu1 %vm1393_vm5, %v7223_v8  ;;  %v4305_v62 = vsel %vm1393_vm5, %v7223_v8, 0.0  ;;  %vm11609_vm5 = vcmp.gt.f32.partialorder %v11362_v29, 0.0 }
 0x7de   : > { %v4242_v57 = vpop.permute.xlu1 %4241  ;;  %4405 = vadd.xlane.f32.xlu0 %v4305_v62  ;;  %6840 = vmatprep.mubr.msk.f32.mxu1 %vm1394_vm6, %v7225_v25  ;;  %v4306_v34 = vsel %vm1394_vm6, %v7225_v25, 0.0  ;;  %v4247_v27 = vpop.permute.xlu0 %4246  ;;  %vm11610_vm6 = vmmov %vm11609_vm5  ;;  %v11615_v29 = vsub.f32 %v10245_v32, %v10248_v5 }
 0x7df   : > { %7238 = vpow2.f32 %v4292_v20  ;;  %v4267_v58 = vsub.f32 %v10182_v53, %v4242_v57  ;;  %4407 = vadd.xlane.f32.xlu1 %v4306_v34  ;;  %v4268_v36 = vsub.f32 %v10196_v48, %v4247_v27  ;;  %v11631_v20 = vld [vmem:[#allocation50_spill] sm:$0xff]  ;;  %v11633_v57 = vld [vmem:[#allocation53_spill] sm:$0xff]  ;;  %v11634_v34 = vld [vmem:[#allocation56_spill] sm:$0xff] }
 0x7e0   : > { %v7227_v54 = vpop.eup %7226  ;;  %7240 = vpow2.f32 %v4294_v9  ;;  %v4334_v24 = vmul.f32 1.442695, %v11615_v29  ;;  %v11635_v27 = vsub.f32 %v11633_v57, %v11634_v34  ;;  %v4373_v34 = vld [vmem:[#allocation3 + $0x1b0] sm:$0xff] }
 0x7e1   : > { %v7229_v11 = vpop.eup %7228  ;;  %v4296_v6 = vmul.f32 1.442695, %v4267_v58  ;;  %v4298_v43 = vmul.f32 1.442695, %v4268_v36  ;;  %6841 = vmatmul.mubr.msk.f32.gmra.mxu1 %vm1395_vm7, %v7227_v54  ;;  %v4307_v46 = vsel %vm1395_vm7, %v7227_v54, 0.0  ;;  %vm11611_vm7 = vcmp.gt.f32.partialorder %v11378_v10, 0.0 }
 0x7e2   : > { %v4252_v52 = vpop.permute.xlu1 %4251  ;;  %4409 = vadd.xlane.f32.xlu0 %v4307_v46  ;;  %6843 = vmatprep.mubr.msk.f32.mxu1 %vm1396_vm8, %v7229_v11  ;;  %v4308_v53 = vsel %vm1396_vm8, %v7229_v11, 0.0  ;;  %vm11612_vm8 = vmmov %vm11611_vm7  ;;  %v11616_v10 = vld [vmem:[#allocation61_spill] sm:$0xff]  ;;  %v11636_v58 = vld [vmem:[#allocation59_spill] sm:$0xff] }
 0x7e3   : > { %7242 = vpow2.f32 %v4296_v6  ;;  %v4269_v48 = vsub.f32 %v10192_v60, %v4252_v52  ;;  %4411 = vadd.xlane.f32.xlu1 %v4308_v53  ;;  %v11637_v36 = vld [vmem:[#allocation62_spill] sm:$0xff]  ;;  %v11640_v46 = vld [vmem:[#allocation60_spill] sm:$0xff]  ;;  %v11641_v52 = vld [vmem:[#allocation69_spill] sm:$0xff] }
 0x7e4   : > { %v7231_v17 = vpop.eup %7230  ;;  %7244 = vpow2.f32 %v4298_v43  ;;  %v11638_v54 = vsub.f32 %v11636_v58, %v11637_v36  ;;  %v11639_v43 = vld [vmem:[#allocation43_spill] sm:$0xff]  ;;  %v11642_v53 = vsub.f32 %v11640_v46, %v11641_v52  ;;  %v4375_v46 = vld [vmem:[#allocation3 + $0x1c0] sm:$0xff] }
 0x7e5   : > { %v7233_v40 = vpop.eup %7232  ;;  %v4300_v63 = vmul.f32 1.442695, %v4269_v48  ;;  %6844 = vmatmul.mubr.msk.f32.gmra.mxu1 %vm1397_vm9, %v7231_v17  ;;  %v4309_v18 = vsel %vm1397_vm9, %v7231_v17, 0.0  ;;  %vm11613_vm9 = vcmp.gt.f32.partialorder %v11461_v19, 0.0  ;;  %v11617_v19 = vsub.f32 %v10271_v59, %v10285_v22  ;;  %v11620_v22 = vld [vmem:[#allocation58_spill] sm:$0xff]  ;;  %v11643_v17 = vld [vmem:[#allocation64_spill] sm:$0xff] }
 0x7e6   : > { %4413 = vadd.xlane.f32.xlu0 %v4309_v18  ;;  %6846 = vmatprep.mubr.msk.f32.mxu1 %vm1398_vm10, %v7233_v40  ;;  %v4310_v37 = vsel %vm1398_vm10, %v7233_v40, 0.0  ;;  %vm11614_vm10 = vmmov %vm11613_vm9  ;;  %v4350_v11 = vmul.f32 1.442695, %v11638_v54  ;;  %v4356_v48 = vmul.f32 1.442695, %v11642_v53  ;;  %v11644_v40 = vld [vmem:[#allocation67_spill] sm:$0xff] }
 0x7e7   : > { %7246 = vpow2.f32 %v4300_v63  ;;  %4415 = vadd.xlane.f32.xlu1 %v4310_v37  ;;  %v4338_v32 = vmul.f32 1.442695, %v11617_v19  ;;  %v11645_v63 = vsub.f32 %v11643_v17, %v11644_v40  ;;  %v4374_v54 = vld [vmem:[#allocation3 + $0x1b8] sm:$0xff]  ;;  %v4376_v17 = vld [vmem:[#allocation3 + $0x1c8] sm:$0xff] }
 0x7e8   : > { %v7235_v60 = vpop.eup %7234  ;;  %7248 = vpow2.f32 %v4334_v24  ;;  %v11655_v24 = vld [vmem:[#allocation79_spill] sm:$0xff] }
 0x7e9   : > { %v7237_v28 = vpop.eup %7236  ;;  %6847 = vmatmul.mubr.msk.f32.gmra.mxu1 %vm1399_vm11, %v7235_v60  ;;  %v4311_v56 = vsel %vm1399_vm11, %v7235_v60, 0.0  ;;  %7250 = vpow2.f32 %v4338_v32  ;;  %vm11625_vm11 = vmmov %vm11592_vm0  ;;  %v4354_v18 = vmul.f32 1.442695, %v11645_v63  ;;  %v11646_v60 = vld [vmem:[#allocation74_spill] sm:$0xff] }
 0x7ea   : > { %4417 = vadd.xlane.f32.xlu0 %v4311_v56  ;;  %6849 = vmatprep.mubr.msk.f32.mxu1 %vm1400_vm12, %v7237_v28  ;;  %v4312_v30 = vsel %vm1400_vm12, %v7237_v28, 0.0  ;;  %v11647_v28 = vld [vmem:[#allocation76_spill] sm:$0xff]  ;;  %vm11658_vm12 = vmmov %vm11592_vm0 }
 0x7eb   : > { %4419 = vadd.xlane.f32.xlu1 %v4312_v30  ;;  %v11648_v56 = vsub.f32 %v11646_v60, %v11647_v28 }
 0x7ec   : > { %v7239_v3 = vpop.eup %7238 }
 0x7ed   : > { %v7241_v14 = vpop.eup %7240  ;;  %6850 = vmatmul.mubr.msk.f32.gmra.mxu1 %vm1401_vm13, %v7239_v3  ;;  %v4313_v4 = vsel %vm1401_vm13, %v7239_v3, 0.0  ;;  %v4360_v30 = vmul.f32 1.442695, %v11648_v56  ;;  %vm11659_vm13 = vmmov %vm11592_vm0 }
 0x7ee   : > { %4421 = vadd.xlane.f32.xlu0 %v4313_v4  ;;  %6852 = vmatprep.mubr.msk.f32.mxu1 %vm11607_vm3, %v7241_v14  ;;  %v4314_v42 = vsel %vm11608_vm4, %v7241_v14, 0.0  ;;  %v11649_v14 = vld [vmem:[#allocation71_spill] sm:$0xff]  ;;  %v11650_v4 = vld [vmem:[#allocation78_spill] sm:$0xff]  ;;  %vm11664_vm3 = vmmov %vm11592_vm0 }
 0x7ef   : > { %4423 = vadd.xlane.f32.xlu1 %v4314_v42  ;;  %v11651_v42 = vsub.f32 %v11649_v14, %v11650_v4  ;;  %vm11665_vm4 = vmmov %vm11592_vm0 }
 0x7f0   : > { %v7243_v1 = vpop.eup %7242 }
 0x7f1   : > { %v7245_v0 = vpop.eup %7244  ;;  %6853 = vmatmul.mubr.msk.f32.gmra.mxu1 %vm11609_vm5, %v7243_v1  ;;  %v4315_v50 = vsel %vm11610_vm6, %v7243_v1, 0.0  ;;  %v4358_v1 = vmul.f32 1.442695, %v11651_v42  ;;  %vm11666_vm5 = vmmov %vm11592_vm0 }
 0x7f2   : > { %4425 = vadd.xlane.f32.xlu0 %v4315_v50  ;;  %6855 = vmatprep.mubr.msk.f32.mxu1 %vm11611_vm7, %v7245_v0  ;;  %v4316_v55 = vsel %vm11612_vm8, %v7245_v0, 0.0  ;;  %v11652_v50 = vld [vmem:[#allocation77_spill] sm:$0xff]  ;;  %vm11667_vm6 = vmmov %vm11592_vm0 }
 0x7f3   : > { %4427 = vadd.xlane.f32.xlu1 %v4316_v55  ;;  %v11653_v55 = vld [vmem:[#allocation80_spill] sm:$0xff]  ;;  %vm11668_vm7 = vmmov %vm11592_vm0 }
 0x7f4   : > { %v7247_v47 = vpop.eup %7246  ;;  %vm11669_vm8 = vmmov %vm11592_vm0 }
 0x7f5   : > { %6856 = vmatmul.mubr.msk.f32.gmra.mxu1 %vm11613_vm9, %v7247_v47  ;;  %v4317_v49 = vsel %vm11614_vm10, %v7247_v47, 0.0  ;;  %v7249_v5 = vpop.eup %7248  ;;  %v11654_v47 = vsub.f32 %v11652_v50, %v11653_v55  ;;  %vm11670_vm9 = vmmov %vm11592_vm0 }
 0x7f6   : > { %4429 = vadd.xlane.f32.xlu0 %v4317_v49  ;;  %v7251_v6 = vpop.eup %7250  ;;  %vm11671_vm10 = vmmov %vm11592_vm0 }
 0x7f7   : > { %v4364_v49 = vmul.f32 1.442695, %v11654_v47 }
 0x804   : > { %3641 = vperm.xlu1 %7023, %v10413_v12   ;;  %v11618_v12 = vsub.f32 %v10262_v21, %v10266_v45  ;;  %v11622_v21 = vld [vmem:[#allocation55_spill] sm:$0xff] }
 0x805   : > { %v11623_v45 = vld [vmem:[#allocation63_spill] sm:$0xff] }
 0x808   : > { %3651 = vperm.xlu1 %7023, %v10463_v26   ;;  %v4336_v26 = vmul.f32 1.442695, %v11618_v12 }
 0x80a   : > { %7252 = vpow2.f32 %v4336_v26 }
 0x80c   : > { %3661 = vperm.xlu1 %7023, %v10478_v51   ;;  %3636 = vperm.xlu0 %7022, %v11616_v10   ;;  %v11656_v10 = vld [vmem:[#allocation33_spill] sm:$0xff] }
 0x80d   : > { %v11657_v19 = vsub.f32 %v11655_v24, %v11656_v10 }
 0x80f   : > { %v4362_v32 = vmul.f32 1.442695, %v11657_v19  ;;  %v4381_v19 = vld [vmem:[#allocation3 + $0x1f0] sm:$0xff] }
 0x810   : > { %3671 = vperm.xlu1 %7023, %v10489_v39   ;;  %3646 = vperm.xlu0 %7022, %v10422_v44   ;;  %v4367_v39 = vld [vmem:[#allocation3 + $0x180] sm:$0xff]  ;;  %v11619_v44 = vsub.f32 %v10269_v23, %v10282_v15  ;;  %v11627_v15 = vld [vmem:[#allocation66_spill] sm:$0xff] }
 0x811   : > { %v4383_v59 = vmul.f32 %v7249_v5, %v4367_v39  ;;  %v11626_v23 = vld [vmem:[#allocation81_spill] sm:$0xff] }
 0x812   : > { %v4340_v51 = vmul.f32 1.442695, %v11619_v44 }
 0x814   : > { %3681 = vperm.xlu1 %7023, %v10497_v7   ;;  %3656 = vperm.xlu0 %7022, %v10448_v41   ;;  %7254 = vpow2.f32 %v4340_v51 }
 0x818   : > { %3691 = vperm.xlu1 %7023, %v10505_v13   ;;  %3666 = vperm.xlu0 %7022, %v10468_v35   ;;  %v11621_v35 = vsub.f32 %v10288_v16, %v11620_v22  ;;  %v11624_v13 = vsub.f32 %v11622_v21, %v11623_v45  ;;  %v11630_v16 = vld [vmem:[#allocation70_spill] sm:$0xff]  ;;  %v4369_v45 = vld [vmem:[#allocation3 + $0x190] sm:$0xff] }
 0x819   : > { %v11632_v9 = vsub.f32 %v11630_v16, %v11631_v20  ;;  %v4372_v20 = vld [vmem:[#allocation3 + $0x1a8] sm:$0xff] }
 0x81a   : > { %v4344_v41 = vmul.f32 1.442695, %v11621_v35  ;;  %v4342_v33 = vmul.f32 1.442695, %v11624_v13 }
 0x81b   : > { %v4346_v62 = vmul.f32 1.442695, %v11632_v9  ;;  %v10687_v9 = vpop.f32.mrf.mxu0 }
 0x81c   : > { %3701 = vperm.xlu1 %7023, %v10513_v38   ;;  %3676 = vperm.xlu0 %7022, %v10480_v31   ;;  %7256 = vpow2.f32 %v4344_v41  ;;  %v11628_v31 = vld [vmem:[#allocation73_spill] sm:$0xff]  ;;  %v4368_v41 = vld [vmem:[#allocation3 + $0x188] sm:$0xff] }
 0x81d   : > { %v4400_v7 = vpop.xlane.xlu0 %4399  ;;  %v11629_v38 = vsub.f32 %v11627_v15, %v11628_v31  ;;  %7258 = vpow2.f32 %v4342_v33  ;;  %v4385_v33 = vmul.f32 %v7251_v6, %v4369_v45  ;;  %v4371_v31 = vld [vmem:[#allocation3 + $0x1a0] sm:$0xff] }
 0x81e   : > { %v4431_v8 = vadd.f32 %v4400_v7, %v4383_v59 }
 0x81f   : > { %v4348_v25 = vmul.f32 1.442695, %v11629_v38 }
 0x820   : > { %4447 = vst.msk [vmem:[#allocation3 + $0x180] sm:$0xff] %vm11625_vm11, %v4431_v8  ;;  %3711 = vperm.xlu1 %7023, %v10519_v2   ;;  %3686 = vperm.xlu0 %7022, %v11626_v23   ;;  %v4352_v2 = vmul.f32 1.442695, %v11635_v27  ;;  %v4370_v23 = vld [vmem:[#allocation3 + $0x198] sm:$0xff]  ;;  %vm11672_vm11 = vcmask 130048  }
 0x821   : > { %7260 = vpow2.f32 %v4348_v25 }
 0x822   : > { %7262 = vpow2.f32 %v4346_v62 }
 0x823   : > { %7264 = vpow2.f32 %v4352_v2 }
 0x824   : > { %4482 = vperm.xlu1 %7023, %v7249_v5   ;;  %3696 = vperm.xlu0 %7022, %v10499_v61   ;;  %v7253_v61 = vpop.eup %7252  ;;  %7266 = vpow2.f32 %v4350_v11  ;;  %v10691_v11 = vpop.f32.mrf.mxu0 }
 0x825   : > { %v7255_v37 = vpop.eup %7254  ;;  %7268 = vpow2.f32 %v4356_v48  ;;  %v4384_v7 = vmul.f32 %v7253_v61, %v4368_v41 }
 0x826   : > { %7270 = vpow2.f32 %v4354_v18  ;;  %v4386_v38 = vmul.f32 %v7255_v37, %v4370_v23  ;;  %v6783_v40 = vpop.f32.mrf.mxu0 }
 0x827   : > { %7272 = vpow2.f32 %v4360_v30 }
 0x828   : > { %4492 = vperm.xlu1 %7023, %v7251_v6   ;;  %3706 = vperm.xlu0 %7022, %v11639_v43   ;;  %7274 = vpow2.f32 %v4358_v1  ;;  %v10697_v14 = vpop.f32.mrf.mxu0  ;;  %v4379_v1 = vld [vmem:[#allocation3 + $0x1e0] sm:$0xff] }
 0x829   : > { %v7257_v3 = vpop.eup %7256  ;;  %7276 = vpow2.f32 %v4364_v49  ;;  %v4380_v49 = vld [vmem:[#allocation3 + $0x1e8] sm:$0xff] }
 0x82a   : > { %v7259_v0 = vpop.eup %7258  ;;  %7278 = vpow2.f32 %v4362_v32  ;;  %v4388_v2 = vmul.f32 %v7257_v3, %v4372_v20  ;;  %v3623_v20 = vld [vmem:[#allocation4 + $0x128] sm:$0xff] }
 0x82b   : > { %v4387_v25 = vmul.f32 %v7259_v0, %v4371_v31 }
 0x82c   : > { %4497 = vperm.xlu1 %7023, %v7255_v37   ;;  %4487 = vperm.xlu0 %7022, %v7253_v61   ;;  %v4377_v37 = vld [vmem:[#allocation3 + $0x1d0] sm:$0xff] }
 0x82e   : > { %v7261_v29 = vpop.eup %7260 }
 0x82f   : > { %v7263_v5 = vpop.eup %7262  ;;  %v4390_v53 = vmul.f32 %v7261_v29, %v4374_v54  ;;  %v3625_v54 = vld [vmem:[#allocation4 + $0x138] sm:$0xff] }
 0x830   : > { %4507 = vperm.xlu1 %7023, %v7257_v3   ;;  %4502 = vperm.xlu0 %7022, %v7259_v0   ;;  %v7265_v12 = vpop.eup %7264  ;;  %v4389_v58 = vmul.f32 %v7263_v5, %v4373_v34  ;;  %v4378_v3 = vld [vmem:[#allocation3 + $0x1d8] sm:$0xff] }
 0x831   : > { %v7267_v26 = vpop.eup %7266  ;;  %v4392_v28 = vmul.f32 %v7265_v12, %v4376_v17  ;;  %v3627_v17 = vld [vmem:[#allocation4 + $0x148] sm:$0xff] }
 0x832   : > { %v10670_v39 = vpop.eup %7268  ;;  %v4391_v48 = vmul.f32 %v7267_v26, %v4375_v46 }
 0x833   : > { %v7271_v44 = vpop.eup %7270  ;;  %v4394_v50 = vmul.f32 %v10670_v39, %v4378_v3 }
 0x834   : > { %4517 = vperm.xlu1 %7023, %v7261_v29   ;;  %4512 = vperm.xlu0 %7022, %v7263_v5   ;;  %v10673_v51 = vpop.eup %7272  ;;  %v4393_v56 = vmul.f32 %v7271_v44, %v4377_v37  ;;  %v6786_v29 = vpop.f32.mrf.mxu0 }
 0x835   : > { %v10675_v59 = vpop.eup %7274  ;;  %v4396_v5 = vmul.f32 %v10673_v51, %v4380_v49 }
 0x836   : > { %v10679_v22 = vpop.eup %7276  ;;  %v4395_v55 = vmul.f32 %v10675_v59, %v4379_v1 }
 0x837   : > { %v10681_v35 = vpop.eup %7278 }
 0x838   : > { %4527 = vperm.xlu1 %7023, %v7265_v12   ;;  %4522 = vperm.xlu0 %7022, %v7267_v26   ;;  %v4397_v12 = vmul.f32 %v10681_v35, %v4381_v19 }
 0x83c   : > { %4537 = vperm.xlu1 %7023, %v10670_v39   ;;  %4532 = vperm.xlu0 %7022, %v7271_v44   ;;  %v4382_v39 = vld [vmem:[#allocation3 + $0x1f8] sm:$0xff]  ;;  %v3833_v44 = vpop.f32.mrf.mxu0 }
 0x83d   : > { %v4398_v45 = vmul.f32 %v10679_v22, %v4382_v39  ;;  %v3633_v39 = vld [vmem:[#allocation4 + $0x178] sm:$0xff] }
 0x840   : > { %4547 = vperm.xlu1 %7023, %v10673_v51   ;;  %4542 = vperm.xlu0 %7022, %v10675_v59  }
 0x844   : > { %4557 = vperm.xlu1 %7023, %v10679_v22   ;;  %4552 = vperm.xlu0 %7022, %v10681_v35   ;;  %v3621_v35 = vld [vmem:[#allocation4 + $0x118] sm:$0xff] }
 0x85f   : > { %v4402_v21 = vpop.xlane.xlu1 %4401 }
 0x860   : > { %v4432_v13 = vadd.f32 %v4402_v21, %v4384_v7  ;;  %v3619_v21 = vld [vmem:[#allocation4 + $0x108] sm:$0xff] }
 0x862   : > { %4448 = vst.msk [vmem:[#allocation3 + $0x188] sm:$0xff] %vm11658_vm12, %v4432_v13  ;;  %vm11673_vm12 = vmmov %vm11672_vm11 }
 0x863   : > { %v4404_v8 = vpop.xlane.xlu0 %4403 }
 0x864   : > { %v4433_v15 = vadd.f32 %v4404_v8, %v4385_v33  ;;  %v6789_v33 = vpop.f32.mrf.mxu0 }
 0x866   : > { %4449 = vst.msk [vmem:[#allocation3 + $0x190] sm:$0xff] %vm11659_vm13, %v4433_v15  ;;  %v3843_v31 = vpop.f32.mrf.mxu0  ;;  %vm11674_vm13 = vmmov %vm11672_vm11 }
 0x867   : > { %v4406_v16 = vpop.xlane.xlu0 %4405 }
 0x868   : > { %v4408_v62 = vpop.xlane.xlu1 %4407  ;;  %v4434_v57 = vadd.f32 %v4406_v16, %v4386_v38  ;;  %v3618_v16 = vld [vmem:[#allocation4 + $0x100] sm:$0xff] }
 0x869   : > { %v4435_v27 = vadd.f32 %v4408_v62, %v4387_v25 }
 0x86a   : > { %4450 = vst.msk [vmem:[#allocation3 + $0x198] sm:$0xff] %vm11660_vm1, %v4434_v57  ;;  %v6792_v57 = vpop.f32.mrf.mxu0  ;;  %vm11675_vm1 = vmmov %vm11672_vm11 }
 0x86b   : > { %4451 = vst.msk [vmem:[#allocation3 + $0x1a0] sm:$0xff] %vm11661_vm14, %v4435_v27  ;;  %v4410_v36 = vpop.xlane.xlu0 %4409  ;;  %vm11676_vm14 = vmmov %vm11675_vm1 }
 0x86c   : > { %v4412_v6 = vpop.xlane.xlu1 %4411  ;;  %v4436_v43 = vadd.f32 %v4410_v36, %v4388_v2 }
 0x86d   : > { %v4437_v52 = vadd.f32 %v4412_v6, %v4389_v58  ;;  %v3620_v58 = vld [vmem:[#allocation4 + $0x110] sm:$0xff] }
 0x86e   : > { %4452 = vst.msk [vmem:[#allocation3 + $0x1a8] sm:$0xff] %vm11662_vm15, %v4436_v43  ;;  %v3853_v43 = vpop.f32.mrf.mxu0  ;;  %vm11677_vm15 = vmmov %vm11675_vm1 }
 0x86f   : > { %4453 = vst.msk [vmem:[#allocation3 + $0x1b0] sm:$0xff] %vm11592_vm0, %v4437_v52  ;;  %v4414_v61 = vpop.xlane.xlu0 %4413  ;;  %vm11678_vm0 = vmmov %vm11675_vm1 }
 0x870   : > { %v4416_v63 = vpop.xlane.xlu1 %4415  ;;  %v4438_v18 = vadd.f32 %v4414_v61, %v4390_v53 }
 0x871   : > { %v4439_v60 = vadd.f32 %v4416_v63, %v4391_v48  ;;  %v3622_v48 = vld [vmem:[#allocation4 + $0x120] sm:$0xff] }
 0x872   : > { %4454 = vst.msk [vmem:[#allocation3 + $0x1b8] sm:$0xff] %vm11663_vm2, %v4438_v18  ;;  %v6795_v18 = vpop.f32.mrf.mxu0  ;;  %vm11679_vm2 = vmmov %vm11678_vm0 }
 0x873   : > { %4455 = vst.msk [vmem:[#allocation3 + $0x1c0] sm:$0xff] %vm11664_vm3, %v4439_v60  ;;  %v4418_v30 = vpop.xlane.xlu0 %4417  ;;  %vm11680_vm3 = vmmov %vm11678_vm0 }
 0x874   : > { %v4420_v4 = vpop.xlane.xlu1 %4419  ;;  %v4440_v42 = vadd.f32 %v4418_v30, %v4392_v28  ;;  %v3624_v28 = vld [vmem:[#allocation4 + $0x130] sm:$0xff]  ;;  %v3629_v30 = vld [vmem:[#allocation4 + $0x158] sm:$0xff] }
 0x875   : > { %v4441_v0 = vadd.f32 %v4420_v4, %v4393_v56 }
 0x876   : > { %4456 = vst.msk [vmem:[#allocation3 + $0x1c8] sm:$0xff] %vm11665_vm4, %v4440_v42  ;;  %v3863_v42 = vpop.f32.mrf.mxu0  ;;  %vm11681_vm4 = vmmov %vm11678_vm0 }
 0x877   : > { %4457 = vst.msk [vmem:[#allocation3 + $0x1d0] sm:$0xff] %vm11666_vm5, %v4441_v0  ;;  %v4422_v47 = vpop.xlane.xlu0 %4421  ;;  %vm11682_vm5 = vmmov %vm11678_vm0 }
 0x878   : > { %v4424_v24 = vpop.xlane.xlu1 %4423  ;;  %v4442_v10 = vadd.f32 %v4422_v47, %v4394_v50  ;;  %v3626_v50 = vld [vmem:[#allocation4 + $0x140] sm:$0xff]  ;;  %v3631_v47 = vld [vmem:[#allocation4 + $0x168] sm:$0xff] }
 0x879   : > { %v4443_v32 = vadd.f32 %v4424_v24, %v4395_v55 }
 0x87a   : > { %4458 = vst.msk [vmem:[#allocation3 + $0x1d8] sm:$0xff] %vm11667_vm6, %v4442_v10  ;;  %v6798_v10 = vpop.f32.mrf.mxu0  ;;  %vm11683_vm6 = vmmov %vm11678_vm0 }
 0x87b   : > { %4459 = vst.msk [vmem:[#allocation3 + $0x1e0] sm:$0xff] %vm11668_vm7, %v4443_v32  ;;  %v4426_v26 = vpop.xlane.xlu0 %4425  ;;  %vm11684_vm7 = vmmov %vm11678_vm0 }
 0x87c   : > { %v4428_v41 = vpop.xlane.xlu1 %4427  ;;  %v4444_v59 = vadd.f32 %v4426_v26, %v4396_v5 }
 0x87d   : > { %v4445_v7 = vadd.f32 %v4428_v41, %v4397_v12  ;;  %v3628_v12 = vld [vmem:[#allocation4 + $0x150] sm:$0xff] }
 0x87e   : > { %4460 = vst.msk [vmem:[#allocation3 + $0x1e8] sm:$0xff] %vm11669_vm8, %v4444_v59  ;;  %vm11685_vm8 = vmmov %vm11678_vm0 }
 0x87f   : > { %4461 = vst.msk [vmem:[#allocation3 + $0x1f0] sm:$0xff] %vm11670_vm9, %v4445_v7  ;;  %v4430_v13 = vpop.xlane.xlu0 %4429  ;;  %v3873_v7 = vpop.f32.mrf.mxu0  ;;  %vm11686_vm9 = vmmov %vm11678_vm0 }
 0x880   : > { %v3642_v51 = vpop.permute.xlu1 %3641  ;;  %v4446_v8 = vadd.f32 %v4430_v13, %v4398_v45 }
 0x881   : > { %v3715_v23 = vmul.f32 %v3642_v51, %v3619_v21  ;;  %v3630_v51 = vld [vmem:[#allocation4 + $0x160] sm:$0xff] }
 0x882   : > { %4462 = vst.msk [vmem:[#allocation3 + $0x1f8] sm:$0xff] %vm11671_vm10, %v4446_v8  ;;  %v6801_v8 = vpop.f32.mrf.mxu0  ;;  %vm11687_vm10 = vmmov %vm11678_vm0 }
 0x883   : > { %v3893_v15 = vadd.f32 %v10687_v9, %v3715_v23 }
 0x884   : > { %v3652_v38 = vpop.permute.xlu1 %3651 }
 0x885   : > { %3909 = vst.msk [vmem:[#allocation4 + $0x108] sm:$0xff] %vm11672_vm11, %v3893_v15  ;;  %v3717_v25 = vmul.f32 %v3652_v38, %v3621_v35  ;;  %v4464_v35 = vld [vmem:[#allocation4 + $0x180] sm:$0xff]  ;;  %vm11688_vm11 = vmmov %vm11678_vm0 }
 0x887   : > { %v3895_v22 = vadd.f32 %v6783_v40, %v3717_v25  ;;  %v3637_v62 = vpop.permute.xlu0 %3636 }
 0x888   : > { %v3662_v34 = vpop.permute.xlu1 %3661  ;;  %v3714_v27 = vmul.f32 %v3637_v62, %v3618_v16  ;;  %v3632_v62 = vld [vmem:[#allocation4 + $0x170] sm:$0xff] }
 0x889   : > { %3911 = vst.msk [vmem:[#allocation4 + $0x118] sm:$0xff] %vm11673_vm12, %v3895_v22  ;;  %v3719_v2 = vmul.f32 %v3662_v34, %v3623_v20  ;;  %v4466_v34 = vld [vmem:[#allocation4 + $0x190] sm:$0xff]  ;;  %vm11689_vm12 = vmmov %vm11678_vm0 }
 0x88a   : > { %v3892_v36 = vadd.f32 %v10691_v11, %v3714_v27 }
 0x88b   : > { %v3897_v9 = vadd.f32 %v6786_v29, %v3719_v2  ;;  %v3647_v6 = vpop.permute.xlu0 %3646 }
 0x88c   : > { %3908 = vst.msk [vmem:[#allocation4 + $0x100] sm:$0xff] %vm11674_vm13, %v3892_v36  ;;  %v3672_v46 = vpop.permute.xlu1 %3671  ;;  %v3716_v52 = vmul.f32 %v3647_v6, %v3620_v58  ;;  %vm11690_vm13 = vmmov %vm11678_vm0 }
 0x88d   : > { %3913 = vst.msk [vmem:[#allocation4 + $0x128] sm:$0xff] %vm11675_vm1, %v3897_v9  ;;  %v3721_v53 = vmul.f32 %v3672_v46, %v3625_v54  ;;  %v3883_v9 = vpop.f32.mrf.mxu0  ;;  %v4465_v46 = vld [vmem:[#allocation4 + $0x188] sm:$0xff]  ;;  %vm11691_vm1 = vmmov %vm11678_vm0 }
 0x88e   : > { %v3894_v61 = vadd.f32 %v10697_v14, %v3716_v52 }
 0x88f   : > { %v3899_v40 = vadd.f32 %v6789_v33, %v3721_v53  ;;  %v3657_v63 = vpop.permute.xlu0 %3656  ;;  %v4467_v53 = vld [vmem:[#allocation4 + $0x198] sm:$0xff] }
 0x890   : > { %3910 = vst.msk [vmem:[#allocation4 + $0x110] sm:$0xff] %vm11676_vm14, %v3894_v61  ;;  %v3682_v11 = vpop.permute.xlu1 %3681  ;;  %v3718_v37 = vmul.f32 %v3657_v63, %v3622_v48  ;;  %vm11692_vm14 = vmmov %vm11678_vm0 }
 0x891   : > { %3915 = vst.msk [vmem:[#allocation4 + $0x138] sm:$0xff] %vm11677_vm15, %v3899_v40  ;;  %v3723_v60 = vmul.f32 %v3682_v11, %v3627_v17  ;;  %vm11693_vm15 = vmmov %vm11678_vm0 }
 0x892   : > { %v3896_v56 = vadd.f32 %v3833_v44, %v3718_v37  ;;  %v4468_v37 = vld [vmem:[#allocation4 + $0x1a0] sm:$0xff] }
 0x893   : > { %v3901_v3 = vadd.f32 %v6792_v57, %v3723_v60  ;;  %v3667_v4 = vpop.permute.xlu0 %3666 }
 0x894   : > { %3912 = vst.msk [vmem:[#allocation4 + $0x120] sm:$0xff] %vm11678_vm0, %v3896_v56  ;;  %v3692_v14 = vpop.permute.xlu1 %3691  ;;  %v3720_v1 = vmul.f32 %v3667_v4, %v3624_v28  ;;  %v4469_v28 = vld [vmem:[#allocation4 + $0x1a8] sm:$0xff] }
 0x895   : > { %3917 = vst.msk [vmem:[#allocation4 + $0x148] sm:$0xff] %vm11679_vm2, %v3901_v3  ;;  %v3725_v0 = vmul.f32 %v3692_v14, %v3629_v30  ;;  %v6836_v29 = vpop.f32.mrf.mxu1  ;;  %vm11694_vm2 = vmmov %vm11678_vm0 }
 0x896   : > { %v3898_v55 = vadd.f32 %v3843_v31, %v3720_v1 }
 0x897   : > { %v3903_v49 = vadd.f32 %v6795_v18, %v3725_v0  ;;  %v3677_v24 = vpop.permute.xlu0 %3676  ;;  %v4659_v44 = vpop.f32.mrf.mxu1  ;;  %v4470_v0 = vld [vmem:[#allocation4 + $0x1b0] sm:$0xff] }
 0x898   : > { %3914 = vst.msk [vmem:[#allocation4 + $0x130] sm:$0xff] %vm11680_vm3, %v3898_v55  ;;  %v3702_v19 = vpop.permute.xlu1 %3701  ;;  %v3722_v32 = vmul.f32 %v3677_v24, %v3626_v50  ;;  %v4471_v55 = vld [vmem:[#allocation4 + $0x1b8] sm:$0xff]  ;;  %vm11695_vm3 = vmmov %vm11678_vm0 }
 0x899   : > { %3919 = vst.msk [vmem:[#allocation4 + $0x158] sm:$0xff] %vm11681_vm4, %v3903_v49  ;;  %v3727_v5 = vmul.f32 %v3702_v19, %v3631_v47  ;;  %vm11696_vm4 = vmmov %vm11678_vm0 }
 0x89a   : > { %v3900_v26 = vadd.f32 %v3853_v43, %v3722_v32  ;;  %v4472_v32 = vld [vmem:[#allocation4 + $0x1c0] sm:$0xff] }
 0x89b   : > { %v3905_v41 = vadd.f32 %v6798_v10, %v3727_v5  ;;  %v3687_v59 = vpop.permute.xlu0 %3686 }
 0x89c   : > { %3916 = vst.msk [vmem:[#allocation4 + $0x140] sm:$0xff] %vm11682_vm5, %v3900_v26  ;;  %v3712_v21 = vpop.permute.xlu1 %3711  ;;  %v3724_v45 = vmul.f32 %v3687_v59, %v3628_v12  ;;  %v4473_v12 = vld [vmem:[#allocation4 + $0x1c8] sm:$0xff]  ;;  %vm11697_vm5 = vmmov %vm11678_vm0 }
 0x89d   : > { %3921 = vst.msk [vmem:[#allocation4 + $0x168] sm:$0xff] %vm11683_vm6, %v3905_v41  ;;  %v3729_v13 = vmul.f32 %v3712_v21, %v3633_v39  ;;  %v6839_v33 = vpop.f32.mrf.mxu1  ;;  %v4474_v21 = vld [vmem:[#allocation4 + $0x1d0] sm:$0xff]  ;;  %vm11698_vm6 = vmmov %vm11678_vm0 }
 0x89e   : > { %v3902_v23 = vadd.f32 %v3863_v42, %v3724_v45 }
 0x89f   : > { %v3907_v15 = vadd.f32 %v6801_v8, %v3729_v13  ;;  %v4669_v31 = vpop.f32.mrf.mxu1  ;;  %v3697_v38 = vpop.permute.xlu0 %3696  ;;  %v4475_v13 = vld [vmem:[#allocation4 + $0x1d8] sm:$0xff] }
 0x8a0   : > { %3918 = vst.msk [vmem:[#allocation4 + $0x150] sm:$0xff] %vm11684_vm7, %v3902_v23  ;;  %v4483_v25 = vpop.permute.xlu1 %4482  ;;  %v3726_v16 = vmul.f32 %v3697_v38, %v3630_v51  ;;  %vm11699_vm7 = vmmov %vm11678_vm0 }
 0x8a1   : > { %3923 = vst.msk [vmem:[#allocation4 + $0x178] sm:$0xff] %vm11685_vm8, %v3907_v15  ;;  %v4560_v20 = vmul.f32 %v4483_v25, %v4464_v35  ;;  %v6842_v22 = vpop.f32.mrf.mxu1  ;;  %v4477_v25 = vld [vmem:[#allocation4 + $0x1e8] sm:$0xff]  ;;  %vm11700_vm8 = vmmov %vm11678_vm0 }
 0x8a2   : > { %v3904_v57 = vadd.f32 %v3873_v7, %v3726_v16 }
 0x8a3   : > { %v4738_v27 = vadd.f32 %v4659_v44, %v4560_v20  ;;  %v4679_v2 = vpop.f32.mrf.mxu1  ;;  %v3707_v58 = vpop.permute.xlu0 %3706 }
 0x8a4   : > { %3920 = vst.msk [vmem:[#allocation4 + $0x160] sm:$0xff] %vm11686_vm9, %v3904_v57  ;;  %v4493_v36 = vpop.permute.xlu1 %4492  ;;  %v3728_v54 = vmul.f32 %v3707_v58, %v3632_v62  ;;  %v4479_v58 = vld [vmem:[#allocation4 + $0x1f8] sm:$0xff]  ;;  %vm11701_vm9 = vmmov %vm11678_vm0 }
 0x8a5   : > { %4754 = vst.msk [vmem:[#allocation4 + $0x180] sm:$0xff] %vm11687_vm10, %v4738_v27  ;;  %v4562_v6 = vmul.f32 %v4493_v36, %v4466_v34  ;;  %v6845_v43 = vpop.f32.mrf.mxu1  ;;  %v4478_v27 = vld [vmem:[#allocation4 + $0x1f0] sm:$0xff]  ;;  %vm11702_vm10 = vmmov %vm11678_vm0 }
 0x8a6   : > { %v3906_v52 = vadd.f32 %v3883_v9, %v3728_v54 }
 0x8a7   : > { %v4740_v48 = vadd.f32 %v4669_v31, %v4562_v6  ;;  %v4689_v61 = vpop.f32.mrf.mxu1  ;;  %v4488_v17 = vpop.permute.xlu0 %4487  ;;  %v4476_v31 = vld [vmem:[#allocation4 + $0x1e0] sm:$0xff] }
 0x8a8   : > { %3922 = vst.msk [vmem:[#allocation4 + $0x170] sm:$0xff] %vm11688_vm11, %v3906_v52  ;;  %v4498_v40 = vpop.permute.xlu1 %4497  ;;  %v4561_v63 = vmul.f32 %v4488_v17, %v4465_v46 }
 0x8a9   : > { %4756 = vst.msk [vmem:[#allocation4 + $0x190] sm:$0xff] %vm11689_vm12, %v4740_v48  ;;  %v4563_v18 = vmul.f32 %v4498_v40, %v4467_v53  ;;  %v6848_v11 = vpop.f32.mrf.mxu1 }
 0x8aa   : > { %v4739_v60 = vadd.f32 %v6836_v29, %v4561_v63 }
 0x8ab   : > { %v4741_v56 = vadd.f32 %v6839_v33, %v4563_v18  ;;  %v4699_v30 = vpop.f32.mrf.mxu1  ;;  %v4503_v3 = vpop.permute.xlu0 %4502 }
 0x8ac   : > { %4755 = vst.msk [vmem:[#allocation4 + $0x188] sm:$0xff] %vm11690_vm13, %v4739_v60  ;;  %v4508_v4 = vpop.permute.xlu1 %4507  ;;  %v4564_v42 = vmul.f32 %v4503_v3, %v4468_v37 }
 0x8ad   : > { %4757 = vst.msk [vmem:[#allocation4 + $0x198] sm:$0xff] %vm11691_vm1, %v4741_v56  ;;  %v4565_v14 = vmul.f32 %v4508_v4, %v4469_v28  ;;  %v6851_v1 = vpop.f32.mrf.mxu1 }
 0x8ae   : > { %v4742_v50 = vadd.f32 %v4679_v2, %v4564_v42 }
 0x8af   : > { %v4743_v47 = vadd.f32 %v6842_v22, %v4565_v14  ;;  %v4513_v49 = vpop.permute.xlu0 %4512  ;;  %v4709_v10 = vpop.f32.mrf.mxu1 }
 0x8b0   : > { %4758 = vst.msk [vmem:[#allocation4 + $0x1a0] sm:$0xff] %vm11692_vm14, %v4742_v50  ;;  %v4518_v29 = vpop.permute.xlu1 %4517  ;;  %v4566_v24 = vmul.f32 %v4513_v49, %v4470_v0 }
 0x8b1   : > { %4759 = vst.msk [vmem:[#allocation4 + $0x1a8] sm:$0xff] %vm11693_vm15, %v4743_v47  ;;  %v4567_v19 = vmul.f32 %v4518_v29, %v4471_v55  ;;  %v6854_v59 = vpop.f32.mrf.mxu1 }
 0x8b2   : > { %v4744_v5 = vadd.f32 %v4689_v61, %v4566_v24 }
 0x8b3   : > { %v4745_v26 = vadd.f32 %v6845_v43, %v4567_v19  ;;  %v4523_v39 = vpop.permute.xlu0 %4522  ;;  %v4719_v35 = vpop.f32.mrf.mxu1 }
 0x8b4   : > { %4760 = vst.msk [vmem:[#allocation4 + $0x1b0] sm:$0xff] %vm11678_vm0, %v4744_v5  ;;  %v4528_v44 = vpop.permute.xlu1 %4527  ;;  %v4568_v41 = vmul.f32 %v4523_v39, %v4472_v32 }
 0x8b5   : > { %4761 = vst.msk [vmem:[#allocation4 + $0x1b8] sm:$0xff] %vm11694_vm2, %v4745_v26  ;;  %v4569_v7 = vmul.f32 %v4528_v44, %v4473_v12  ;;  %v6857_v57 = vpop.f32.mrf.mxu1 }
 0x8b6   : > { %v4746_v45 = vadd.f32 %v4699_v30, %v4568_v41 }
 0x8b7   : > { %v4747_v33 = vadd.f32 %v6848_v11, %v4569_v7  ;;  %v4533_v51 = vpop.permute.xlu0 %4532  ;;  %v4729_v43 = vpop.f32.mrf.mxu1 }
 0x8b8   : > { %4762 = vst.msk [vmem:[#allocation4 + $0x1c0] sm:$0xff] %vm11695_vm3, %v4746_v45  ;;  %v4538_v8 = vpop.permute.xlu1 %4537  ;;  %v4570_v23 = vmul.f32 %v4533_v51, %v4474_v21 }
 0x8b9   : > { %4763 = vst.msk [vmem:[#allocation4 + $0x1c8] sm:$0xff] %vm11696_vm4, %v4747_v33  ;;  %v4571_v15 = vmul.f32 %v4538_v8, %v4475_v13 }
 0x8ba   : > { %v4748_v38 = vadd.f32 %v4709_v10, %v4570_v23 }
 0x8bb   : > { %v4749_v16 = vadd.f32 %v6851_v1, %v4571_v15  ;;  %v4543_v20 = vpop.permute.xlu0 %4542 }
 0x8bc   : > { %4764 = vst.msk [vmem:[#allocation4 + $0x1d0] sm:$0xff] %vm11697_vm5, %v4748_v38  ;;  %v4548_v22 = vpop.permute.xlu1 %4547  ;;  %v4572_v62 = vmul.f32 %v4543_v20, %v4476_v31 }
 0x8bd   : > { %4765 = vst.msk [vmem:[#allocation4 + $0x1d8] sm:$0xff] %vm11698_vm6, %v4749_v16  ;;  %v4573_v34 = vmul.f32 %v4548_v22, %v4477_v25 }
 0x8be   : > { %v4750_v2 = vadd.f32 %v4719_v35, %v4572_v62 }
 0x8bf   : > { %v4751_v36 = vadd.f32 %v6854_v59, %v4573_v34  ;;  %v4553_v54 = vpop.permute.xlu0 %4552 }
 0x8c0   : > { %4766 = vst.msk [vmem:[#allocation4 + $0x1e0] sm:$0xff] %vm11699_vm7, %v4750_v2  ;;  %v4558_v9 = vpop.permute.xlu1 %4557  ;;  %v4574_v6 = vmul.f32 %v4553_v54, %v4478_v27 }
 0x8c1   : > { %4767 = vst.msk [vmem:[#allocation4 + $0x1e8] sm:$0xff] %vm11700_vm8, %v4751_v36  ;;  %v4575_v46 = vmul.f32 %v4558_v9, %v4479_v58 }
 0x8c2   : > { %v4752_v52 = vadd.f32 %v4729_v43, %v4574_v6 }
 0x8c3   : > { %v4753_v53 = vadd.f32 %v6857_v57, %v4575_v46 }
 0x8c4   : > { %4768 = vst.msk [vmem:[#allocation4 + $0x1f0] sm:$0xff] %vm11701_vm9, %v4752_v52 }
 0x8c5   : > { %4769 = vst.msk [vmem:[#allocation4 + $0x1f8] sm:$0xff] %vm11702_vm10, %v4753_v53 }
 0x8c6 PF: > { %s11703_s11 = sld [smem:[#allocation19_spill]] }
 0x8cc   : > { %p6457_p9 = scmp.ne.s32.totalorder %s11703_s11, 1 }
 0x8cd   : > { %s11704_s28 = sld [smem:[#allocation90_spill]] (!%p6457_p9) }
 0x8ce   : > { %4789 = sbr.rel (%p6457_p9) target bundleno = 3045 (0xbe5), region = 212  ;;  %s11705_s18 = sld [smem:[#allocation91_spill]] (!%p6457_p9) }
 0x8cf   : > { %s11706_s19 = sld [smem:[#allocation92_spill]] (!%p6457_p9) }
 0x8d3   : > { %v5224_v48 = vld [vmem:[#allocation3 + $0x178] sm:$0xff]  ;;  %v7615_v40 = vmov 0   ;;  %v4804_v63 = vld [vmem:[#allocation3 + $0x70] sm:$0xff]  ;;  %v4803_v30 = vld [vmem:[#allocation3 + $0x68] sm:$0xff] }
 0x8d4   : > { %v4805_v61 = vld [vmem:[#allocation3 + $0x78] sm:$0xff]  ;;  %7281 = vset.pattern.permute.xlu1 %v7615_v40  ;;  %7280 = vset.pattern.permute.xlu0 %v7615_v40  ;;  %vm5240_vm11 = vcmp.gt.f32.partialorder %v5224_v48, 0.0  ;;  %v5013_v18 = vld [vmem:[#allocation3 + $0xf0] sm:$0xff]  ;;  %vm4820_vm1 = vcmp.gt.f32.partialorder %v4804_v63, 0.0  ;;  %vm4819_vm0 = vcmp.gt.f32.partialorder %v4803_v30, 0.0  ;;  %v5012_v1 = vld [vmem:[#allocation3 + $0xe8] sm:$0xff] }
 0x8d5   : > { %v5014_v17 = vld [vmem:[#allocation3 + $0xf8] sm:$0xff]  ;;  %vm4821_vm12 = vcmp.gt.f32.partialorder %v4805_v61, 0.0  ;;  %v5256_v37 = vsel %vm5240_vm11, %v5224_v48, 1.0  ;;  %v4836_v56 = vsel %vm4820_vm1, %v4804_v63, 1.0  ;;  %vm5029_vm15 = vcmp.gt.f32.partialorder %v5013_v18, 0.0  ;;  %v5223_v3 = vld [vmem:[#allocation3 + $0x170] sm:$0xff] }
 0x8d6   : > { %vm5030_vm13 = vcmp.gt.f32.partialorder %v5014_v17, 0.0  ;;  %v5434_v11 = vld [vmem:[#allocation3 + $0x1f8] sm:$0xff]  ;;  %v4837_v60 = vsel %vm4821_vm12, %v4805_v61, 1.0  ;;  %7282 = vrcp.f32 %v5256_v37  ;;  %v5045_v42 = vsel %vm5029_vm15, %v5013_v18, 1.0  ;;  %v5433_v14 = vld [vmem:[#allocation3 + $0x1f0] sm:$0xff]  ;;  %v4802_v55 = vld [vmem:[#allocation3 + $0x60] sm:$0xff] }
 0x8d7   : > { %v5046_v28 = vsel %vm5030_vm13, %v5014_v17, 1.0  ;;  %vm5450_vm14 = vcmp.gt.f32.partialorder %v5434_v11, 0.0  ;;  %7284 = vrcp.f32 %v4837_v60  ;;  %vm5239_vm2 = vcmp.gt.f32.partialorder %v5223_v3, 0.0  ;;  %v5222_v47 = vld [vmem:[#allocation3 + $0x168] sm:$0xff]  ;;  %v5011_v32 = vld [vmem:[#allocation3 + $0xe0] sm:$0xff]  ;;  %v4801_v44 = vld [vmem:[#allocation3 + $0x58] sm:$0xff] }
 0x8d8   : > { %7286 = vrcp.f32 %v5046_v28  ;;  %v5466_v4 = vsel %vm5450_vm14, %v5434_v11, 1.0  ;;  %v4835_v0 = vsel %vm4819_vm0, %v4803_v30, 1.0  ;;  %v5255_v50 = vsel %vm5239_vm2, %v5223_v3, 1.0  ;;  %v5432_v10 = vld [vmem:[#allocation3 + $0x1e8] sm:$0xff]  ;;  %v5221_v41 = vld [vmem:[#allocation3 + $0x160] sm:$0xff]  ;;  %v5010_v33 = vld [vmem:[#allocation3 + $0xd8] sm:$0xff] }
 0x8d9   : > { %7288 = vrcp.f32 %v4836_v56  ;;  %vm5449_vm3 = vcmp.gt.f32.partialorder %v5433_v14, 0.0  ;;  %vm5028_vm4 = vcmp.gt.f32.partialorder %v5012_v1, 0.0  ;;  %vm4818_vm5 = vcmp.gt.f32.partialorder %v4802_v55, 0.0  ;;  %v5431_v13 = vld [vmem:[#allocation3 + $0x1e0] sm:$0xff]  ;;  %v4800_v15 = vld [vmem:[#allocation3 + $0x50] sm:$0xff]  ;;  %v5220_v31 = vld [vmem:[#allocation3 + $0x158] sm:$0xff] }
 0x8da   : > { %7290 = vrcp.f32 %v5466_v4  ;;  %v5465_v49 = vsel %vm5449_vm3, %v5433_v14, 1.0  ;;  %v5044_v29 = vsel %vm5028_vm4, %v5012_v1, 1.0  ;;  %vm5238_vm6 = vcmp.gt.f32.partialorder %v5222_v47, 0.0  ;;  %v5430_v22 = vld [vmem:[#allocation3 + $0x1d8] sm:$0xff]  ;;  %v5009_v62 = vld [vmem:[#allocation3 + $0xd0] sm:$0xff]  ;;  %v4799_v58 = vld [vmem:[#allocation3 + $0x48] sm:$0xff] }
 0x8db   : > { %7292 = vrcp.f32 %v5045_v42  ;;  %v4834_v12 = vsel %vm4818_vm5, %v4802_v55, 1.0  ;;  %v5254_v39 = vsel %vm5238_vm6, %v5222_v47, 1.0  ;;  %vm5448_vm7 = vcmp.gt.f32.partialorder %v5432_v10, 0.0  ;;  %v5219_v36 = vld [vmem:[#allocation3 + $0x150] sm:$0xff]  ;;  %v5008_v52 = vld [vmem:[#allocation3 + $0xc8] sm:$0xff]  ;;  %v4798_v40 = vld [vmem:[#allocation3 + $0x40] sm:$0xff] }
 0x8dc   : > { %7294 = vrcp.f32 %v4835_v0  ;;  %vm5027_vm8 = vcmp.gt.f32.partialorder %v5011_v32, 0.0  ;;  %v5464_v7 = vsel %vm5448_vm7, %v5432_v10, 1.0  ;;  %vm4817_vm9 = vcmp.gt.f32.partialorder %v4801_v44, 0.0  ;;  %v5429_v46 = vld [vmem:[#allocation3 + $0x1d0] sm:$0xff]  ;;  %v5218_v63 = vld [vmem:[#allocation3 + $0x148] sm:$0xff]  ;;  %v5007_v56 = vld [vmem:[#allocation3 + $0xc0] sm:$0xff] }
 0x8dd   : > { %7296 = vrcp.f32 %v5255_v50  ;;  %v5043_v45 = vsel %vm5027_vm8, %v5011_v32, 1.0  ;;  %vm5237_vm10 = vcmp.gt.f32.partialorder %v5221_v41, 0.0  ;;  %v4833_v8 = vsel %vm4817_vm9, %v4801_v44, 1.0  ;;  %v5428_v28 = vld [vmem:[#allocation3 + $0x1c8] sm:$0xff]  ;;  %v4797_v14 = vld [vmem:[#allocation3 + $0x38] sm:$0xff]  ;;  %v5217_v1 = vld [vmem:[#allocation3 + $0x140] sm:$0xff] }
 0x8de   : > { %7298 = vrcp.f32 %v5465_v49  ;;  %v5253_v35 = vsel %vm5237_vm10, %v5221_v41, 1.0  ;;  %vm5447_vm11 = vcmp.gt.f32.partialorder %v5431_v13, 0.0  ;;  %vm5026_vm12 = vcmp.gt.f32.partialorder %v5010_v33, 0.0  ;;  %v5427_v49 = vld [vmem:[#allocation3 + $0x1c0] sm:$0xff] }
 0x8df   : > { %7300 = vrcp.f32 %v5044_v29  ;;  %v5463_v25 = vsel %vm5447_vm11, %v5431_v13, 1.0  ;;  %v5042_v20 = vsel %vm5026_vm12, %v5010_v33, 1.0  ;;  %vm4816_vm13 = vcmp.gt.f32.partialorder %v4800_v15, 0.0  ;;  %v5006_v29 = vld [vmem:[#allocation3 + $0xb8] sm:$0xff] }
 0x8e0   : > { %7302 = vrcp.f32 %v4834_v12  ;;  %vm5236_vm1 = vcmp.gt.f32.partialorder %v5220_v31, 0.0  ;;  %v4832_v34 = vsel %vm4816_vm13, %v4800_v15, 1.0  ;;  %vm5446_vm14 = vcmp.gt.f32.partialorder %v5430_v22, 0.0  ;;  %v5216_v12 = vld [vmem:[#allocation3 + $0x138] sm:$0xff] }
 0x8e1   : > { %7304 = vrcp.f32 %v5254_v39  ;;  %v5252_v2 = vsel %vm5236_vm1, %v5220_v31, 1.0  ;;  %vm5025_vm15 = vcmp.gt.f32.partialorder %v5009_v62, 0.0  ;;  %v5462_v9 = vsel %vm5446_vm14, %v5430_v22, 1.0 }
 0x8e2   : > { %7306 = vrcp.f32 %v5464_v7  ;;  %v5041_v43 = vsel %vm5025_vm15, %v5009_v62, 1.0  ;;  %vm4815_vm0 = vcmp.gt.f32.partialorder %v4799_v58, 0.0  ;;  %vm5235_vm2 = vcmp.gt.f32.partialorder %v5219_v36, 0.0  ;;  %v5005_v7 = vld [vmem:[#allocation3 + $0xb0] sm:$0xff] }
 0x8e3   : > { %v7283_v24 = vpop.eup %7282  ;;  %7308 = vrcp.f32 %v5043_v45  ;;  %v4831_v48 = vsel %vm4815_vm0, %v4799_v58, 1.0  ;;  %v5251_v17 = vsel %vm5235_vm2, %v5219_v36, 1.0  ;;  %vm5445_vm3 = vcmp.gt.f32.partialorder %v5429_v46, 0.0 }
 0x8e4   : > { %v7285_v19 = vpop.eup %7284  ;;  %5383 = vperm.xlu1 %7281, %v7283_v24   ;;  %7310 = vrcp.f32 %v4833_v8  ;;  %vm5024_vm4 = vcmp.gt.f32.partialorder %v5008_v52, 0.0  ;;  %v5461_v11 = vsel %vm5445_vm3, %v5429_v46, 1.0  ;;  %vm4814_vm5 = vcmp.gt.f32.partialorder %v4798_v40, 0.0  ;;  %v5215_v8 = vld [vmem:[#allocation3 + $0x130] sm:$0xff] }
 0x8e5   : > { %v7287_v5 = vpop.eup %7286  ;;  %4963 = vperm.xlu0 %7280, %v7285_v19   ;;  %7312 = vrcp.f32 %v5253_v35  ;;  %v5040_v60 = vsel %vm5024_vm4, %v5008_v52, 1.0  ;;  %vm5234_vm6 = vcmp.gt.f32.partialorder %v5218_v63, 0.0  ;;  %v4830_v3 = vsel %vm4814_vm5, %v4798_v40, 1.0 }
 0x8e6   : > { %v7289_v26 = vpop.eup %7288  ;;  %7314 = vrcp.f32 %v5463_v25  ;;  %v5250_v42 = vsel %vm5234_vm6, %v5218_v63, 1.0  ;;  %vm5444_vm7 = vcmp.gt.f32.partialorder %v5428_v28, 0.0  ;;  %vm5023_vm8 = vcmp.gt.f32.partialorder %v5007_v56, 0.0  ;;  %v5004_v25 = vld [vmem:[#allocation3 + $0xa8] sm:$0xff] }
 0x8e7   : > { %v7291_v59 = vpop.eup %7290  ;;  %7316 = vrcp.f32 %v5042_v20  ;;  %v5460_v50 = vsel %vm5444_vm7, %v5428_v28, 1.0  ;;  %v5039_v47 = vsel %vm5023_vm8, %v5007_v56, 1.0  ;;  %vm4813_vm9 = vcmp.gt.f32.partialorder %v4797_v14, 0.0 }
 0x8e8   : > { %4958 = vperm.xlu1 %7281, %v7289_v26   ;;  %v7293_v21 = vpop.eup %7292  ;;  %7318 = vrcp.f32 %v4832_v34  ;;  %vm5233_vm10 = vcmp.gt.f32.partialorder %v5217_v1, 0.0  ;;  %v4829_v10 = vsel %vm4813_vm9, %v4797_v14, 1.0  ;;  %vm5443_vm11 = vcmp.gt.f32.partialorder %v5427_v49, 0.0  ;;  %v5214_v34 = vld [vmem:[#allocation3 + $0x128] sm:$0xff] }
 0x8e9   : > { %5173 = vperm.xlu0 %7280, %v7287_v5   ;;  %v7295_v51 = vpop.eup %7294  ;;  %7320 = vrcp.f32 %v5252_v2  ;;  %v5249_v32 = vsel %vm5233_vm10, %v5217_v1, 1.0  ;;  %vm5022_vm12 = vcmp.gt.f32.partialorder %v5006_v29, 0.0  ;;  %v4796_v5 = vld [vmem:[#allocation3 + $0x30] sm:$0xff]  ;;  %v5459_v39 = vsel %vm5443_vm11, %v5427_v49, 1.0 }
 0x8ea   : > { %v7297_v23 = vpop.eup %7296  ;;  %7322 = vrcp.f32 %v5462_v9  ;;  %v5038_v41 = vsel %vm5022_vm12, %v5006_v29, 1.0  ;;  %vm4812_vm13 = vcmp.gt.f32.partialorder %v4796_v5, 0.0  ;;  %vm5232_vm1 = vcmp.gt.f32.partialorder %v5216_v12, 0.0  ;;  %v5003_v9 = vld [vmem:[#allocation3 + $0xa0] sm:$0xff] }
 0x8eb   : > { %v7299_v38 = vpop.eup %7298  ;;  %7324 = vrcp.f32 %v5041_v43  ;;  %v4828_v45 = vsel %vm4812_vm13, %v4796_v5, 1.0  ;;  %v5248_v33 = vsel %vm5232_vm1, %v5216_v12, 1.0  ;;  %vm5021_vm15 = vcmp.gt.f32.partialorder %v5005_v7, 0.0 }
 0x8ec   : > { %5593 = vperm.xlu1 %7281, %v7291_v59   ;;  %v7301_v16 = vpop.eup %7300  ;;  %7326 = vrcp.f32 %v4831_v48  ;;  %v5426_v59 = vld [vmem:[#allocation3 + $0x1b8] sm:$0xff]  ;;  %v5037_v31 = vsel %vm5021_vm15, %v5005_v7, 1.0  ;;  %vm5231_vm2 = vcmp.gt.f32.partialorder %v5215_v8, 0.0  ;;  %vm5020_vm4 = vcmp.gt.f32.partialorder %v5004_v25, 0.0  ;;  %v5213_v48 = vld [vmem:[#allocation3 + $0x120] sm:$0xff] }
 0x8ed   : > { %5168 = vperm.xlu0 %7280, %v7293_v21   ;;  %v7303_v57 = vpop.eup %7302  ;;  %7328 = vrcp.f32 %v5251_v17  ;;  %vm5442_vm14 = vcmp.gt.f32.partialorder %v5426_v59, 0.0  ;;  %v5247_v62 = vsel %vm5231_vm2, %v5215_v8, 1.0  ;;  %v5036_v36 = vsel %vm5020_vm4, %v5004_v25, 1.0 }
 0x8ee   : > { %v7305_v27 = vpop.eup %7304  ;;  %7330 = vrcp.f32 %v5461_v11  ;;  %v5458_v35 = vsel %vm5442_vm14, %v5426_v59, 1.0  ;;  %vm5230_vm6 = vcmp.gt.f32.partialorder %v5214_v34, 0.0  ;;  %vm5019_vm8 = vcmp.gt.f32.partialorder %v5003_v9, 0.0  ;;  %v5002_v11 = vld [vmem:[#allocation3 + $0x98] sm:$0xff] }
 0x8ef   : > { %v7307_v54 = vpop.eup %7306  ;;  %7332 = vrcp.f32 %v5040_v60  ;;  %v5246_v52 = vsel %vm5230_vm6, %v5214_v34, 1.0  ;;  %v5035_v63 = vsel %vm5019_vm8, %v5003_v9, 1.0  ;;  %vm5229_vm10 = vcmp.gt.f32.partialorder %v5213_v48, 0.0 }
 0x8f0   : > { %4953 = vperm.xlu1 %7281, %v7295_v51   ;;  %v7309_v6 = vpop.eup %7308  ;;  %7334 = vrcp.f32 %v4830_v3  ;;  %v4795_v51 = vld [vmem:[#allocation3 + $0x28] sm:$0xff]  ;;  %v5245_v56 = vsel %vm5229_vm10, %v5213_v48, 1.0  ;;  %vm5018_vm12 = vcmp.gt.f32.partialorder %v5002_v11, 0.0  ;;  %v5212_v3 = vld [vmem:[#allocation3 + $0x118] sm:$0xff] }
 0x8f1   : > { %5378 = vperm.xlu0 %7280, %v7297_v23   ;;  %v7311_v53 = vpop.eup %7310  ;;  %7336 = vrcp.f32 %v5250_v42  ;;  %vm4811_vm0 = vcmp.gt.f32.partialorder %v4795_v51, 0.0  ;;  %v5034_v1 = vsel %vm5018_vm12, %v5002_v11, 1.0  ;;  %vm5228_vm1 = vcmp.gt.f32.partialorder %v5212_v3, 0.0  ;;  %v4885_v11 = vld [vmem:[#allocation4 + $0x78] sm:$0xff] }
 0x8f2   : > { %v7313_v61 = vpop.eup %7312  ;;  %7338 = vrcp.f32 %v5460_v50  ;;  %v4827_v20 = vsel %vm4811_vm0, %v4795_v51, 1.0  ;;  %v5001_v50 = vld [vmem:[#allocation3 + $0x90] sm:$0xff]  ;;  %v5244_v29 = vsel %vm5228_vm1, %v5212_v3, 1.0 }
 0x8f3   : > { %v7315_v18 = vpop.eup %7314  ;;  %7340 = vrcp.f32 %v5039_v47  ;;  %vm5017_vm15 = vcmp.gt.f32.partialorder %v5001_v50, 0.0 }
 0x8f4   : > { %5588 = vperm.xlu1 %7281, %v7299_v38   ;;  %v7317_v37 = vpop.eup %7316  ;;  %7342 = vrcp.f32 %v4829_v10  ;;  %v5425_v38 = vld [vmem:[#allocation3 + $0x1b0] sm:$0xff]  ;;  %v5033_v12 = vsel %vm5017_vm15, %v5001_v50, 1.0 }
 0x8f5   : > { %5163 = vperm.xlu0 %7280, %v7301_v16   ;;  %v7319_v30 = vpop.eup %7318  ;;  %7344 = vrcp.f32 %v5249_v32  ;;  %vm5441_vm3 = vcmp.gt.f32.partialorder %v5425_v38, 0.0  ;;  %v5211_v10 = vld [vmem:[#allocation3 + $0x110] sm:$0xff] }
 0x8f6   : > { %v7321_v4 = vpop.eup %7320  ;;  %7346 = vrcp.f32 %v5459_v39  ;;  %v5457_v2 = vsel %vm5441_vm3, %v5425_v38, 1.0  ;;  %vm5227_vm2 = vcmp.gt.f32.partialorder %v5211_v10, 0.0  ;;  %v5000_v39 = vld [vmem:[#allocation3 + $0x88] sm:$0xff]  ;;  %v4884_v50 = vld [vmem:[#allocation4 + $0x70] sm:$0xff] }
 0x8f7   : > { %v7323_v0 = vpop.eup %7322  ;;  %7348 = vrcp.f32 %v5038_v41  ;;  %v5243_v7 = vsel %vm5227_vm2, %v5211_v10, 1.0  ;;  %vm5016_vm4 = vcmp.gt.f32.partialorder %v5000_v39, 0.0 }
 0x8f8   : > { %4948 = vperm.xlu1 %7281, %v7303_v57   ;;  %v7325_v55 = vpop.eup %7324  ;;  %7350 = vrcp.f32 %v4828_v45  ;;  %v4794_v57 = vld [vmem:[#allocation3 + $0x20] sm:$0xff]  ;;  %v5210_v45 = vld [vmem:[#allocation3 + $0x108] sm:$0xff]  ;;  %v5032_v8 = vsel %vm5016_vm4, %v5000_v39, 1.0 }
 0x8f9   : > { %5373 = vperm.xlu0 %7280, %v7305_v27   ;;  %v7327_v24 = vpop.eup %7326  ;;  %7352 = vrcp.f32 %v5248_v33  ;;  %vm4810_vm5 = vcmp.gt.f32.partialorder %v4794_v57, 0.0  ;;  %vm5226_vm6 = vcmp.gt.f32.partialorder %v5210_v45, 0.0 }
 0x8fa   : > { %v7329_v19 = vpop.eup %7328  ;;  %7354 = vrcp.f32 %v5458_v35  ;;  %v4826_v43 = vsel %vm4810_vm5, %v4794_v57, 1.0  ;;  %v4999_v35 = vld [vmem:[#allocation3 + $0x80] sm:$0xff]  ;;  %v5242_v25 = vsel %vm5226_vm6, %v5210_v45, 1.0 }
 0x8fb   : > { %v7331_v26 = vpop.eup %7330  ;;  %7356 = vrcp.f32 %v5037_v31  ;;  %vm5015_vm8 = vcmp.gt.f32.partialorder %v4999_v35, 0.0 }
 0x8fc   : > { %5583 = vperm.xlu1 %7281, %v7307_v54   ;;  %v7333_v44 = vpop.eup %7332  ;;  %7358 = vrcp.f32 %v4827_v20  ;;  %v5424_v54 = vld [vmem:[#allocation3 + $0x1a8] sm:$0xff]  ;;  %v5209_v20 = vld [vmem:[#allocation3 + $0x100] sm:$0xff]  ;;  %v5031_v34 = vsel %vm5015_vm8, %v4999_v35, 1.0 }
 0x8fd   : > { %5158 = vperm.xlu0 %7280, %v7309_v6   ;;  %v7335_v21 = vpop.eup %7334  ;;  %7360 = vrcp.f32 %v5247_v62  ;;  %vm5440_vm7 = vcmp.gt.f32.partialorder %v5424_v54, 0.0  ;;  %vm5225_vm10 = vcmp.gt.f32.partialorder %v5209_v20, 0.0 }
 0x8fe   : > { %v7337_v13 = vpop.eup %7336  ;;  %7362 = vrcp.f32 %v5457_v2  ;;  %v5456_v17 = vsel %vm5440_vm7, %v5424_v54, 1.0 }
 0x8ff   : > { %v7339_v23 = vpop.eup %7338  ;;  %7364 = vrcp.f32 %v5036_v36  ;;  %v5241_v36 = vsel %vm5225_vm10, %v5209_v20, 1.0 }
 0x900   : > { %4943 = vperm.xlu1 %7281, %v7311_v53   ;;  %v7341_v15 = vpop.eup %7340  ;;  %v4793_v53 = vld [vmem:[#allocation3 + $0x18] sm:$0xff]  ;;  %7366 = vrcp.f32 %v4826_v43 }
 0x901   : > { %5368 = vperm.xlu0 %7280, %v7313_v61   ;;  %v7343_v16 = vpop.eup %7342  ;;  %7368 = vrcp.f32 %v5246_v52  ;;  %vm4809_vm9 = vcmp.gt.f32.partialorder %v4793_v53, 0.0 }
 0x902   : > { %v7345_v22 = vpop.eup %7344  ;;  %7370 = vrcp.f32 %v5456_v17  ;;  %v4825_v60 = vsel %vm4809_vm9, %v4793_v53, 1.0 }
 0x903   : > { %v7347_v27 = vpop.eup %7346  ;;  %7372 = vrcp.f32 %v5035_v63  ;;  %v5095_v63 = vld [vmem:[#allocation4 + $0xf8] sm:$0xff] }
 0x904   : > { %5578 = vperm.xlu1 %7281, %v7315_v18   ;;  %v7349_v58 = vpop.eup %7348  ;;  %v5423_v18 = vld [vmem:[#allocation3 + $0x1a0] sm:$0xff]  ;;  %7374 = vrcp.f32 %v4825_v60 }
 0x905   : > { %5153 = vperm.xlu0 %7280, %v7317_v37   ;;  %v7351_v6 = vpop.eup %7350  ;;  %vm5439_vm11 = vcmp.gt.f32.partialorder %v5423_v18, 0.0  ;;  %7376 = vrcp.f32 %v5245_v56 }
 0x906   : > { %v7353_v46 = vpop.eup %7352  ;;  %v5455_v42 = vsel %vm5439_vm11, %v5423_v18, 1.0  ;;  %vm5667_vm11 = vcmask 130048  }
 0x907   : > { %v7355_v61 = vpop.eup %7354  ;;  %7378 = vrcp.f32 %v5455_v42  ;;  %v5094_v42 = vld [vmem:[#allocation4 + $0xf0] sm:$0xff] }
 0x908   : > { %4938 = vperm.xlu1 %7281, %v7319_v30   ;;  %v7357_v40 = vpop.eup %7356  ;;  %v4792_v30 = vld [vmem:[#allocation3 + $0x10] sm:$0xff]  ;;  %7380 = vrcp.f32 %v5034_v1 }
 0x909   : > { %5363 = vperm.xlu0 %7280, %v7321_v4   ;;  %v7359_v37 = vpop.eup %7358  ;;  %vm4808_vm13 = vcmp.gt.f32.partialorder %v4792_v30, 0.0 }
 0x90a   : > { %v7361_v28 = vpop.eup %7360  ;;  %v4824_v47 = vsel %vm4808_vm13, %v4792_v30, 1.0  ;;  %v5305_v30 = vld [vmem:[#allocation4 + $0x178] sm:$0xff] }
 0x90b   : > { %v7363_v4 = vpop.eup %7362  ;;  %7382 = vrcp.f32 %v4824_v47 }
 0x90c   : > { %5573 = vperm.xlu1 %7281, %v7323_v0   ;;  %v7365_v14 = vpop.eup %7364  ;;  %v5422_v0 = vld [vmem:[#allocation3 + $0x198] sm:$0xff]  ;;  %7384 = vrcp.f32 %v5244_v29 }
 0x90d   : > { %5148 = vperm.xlu0 %7280, %v7325_v55   ;;  %v7367_v55 = vpop.eup %7366  ;;  %vm5438_vm14 = vcmp.gt.f32.partialorder %v5422_v0, 0.0 }
 0x90e   : > { %v7369_v49 = vpop.eup %7368  ;;  %v5454_v32 = vsel %vm5438_vm14, %v5422_v0, 1.0 }
 0x90f   : > { %7386 = vrcp.f32 %v5454_v32  ;;  %v5514_v32 = vld [vmem:[#allocation4 + $0x1f0] sm:$0xff] }
 0x910   : > { %4933 = vperm.xlu1 %7281, %v7327_v24   ;;  %v4791_v24 = vld [vmem:[#allocation3 + $0x8] sm:$0xff]  ;;  %7388 = vrcp.f32 %v5033_v12 }
 0x911   : > { %5358 = vperm.xlu0 %7280, %v7329_v19   ;;  %v7371_v19 = vpop.eup %7370  ;;  %vm4807_vm0 = vcmp.gt.f32.partialorder %v4791_v24, 0.0 }
 0x912   : > { %v7373_v5 = vpop.eup %7372  ;;  %v4823_v41 = vsel %vm4807_vm0, %v4791_v24, 1.0  ;;  %v5093_v24 = vld [vmem:[#allocation4 + $0xe8] sm:$0xff] }
 0x913   : > { %7390 = vrcp.f32 %v4823_v41 }
 0x914   : > { %5568 = vperm.xlu1 %7281, %v7331_v26   ;;  %v5421_v26 = vld [vmem:[#allocation3 + $0x190] sm:$0xff]  ;;  %7392 = vrcp.f32 %v5243_v7 }
 0x915   : > { %5143 = vperm.xlu0 %7280, %v7333_v44   ;;  %v7375_v44 = vpop.eup %7374  ;;  %vm5437_vm3 = vcmp.gt.f32.partialorder %v5421_v26, 0.0 }
 0x916   : > { %v7377_v59 = vpop.eup %7376  ;;  %v5453_v33 = vsel %vm5437_vm3, %v5421_v26, 1.0  ;;  %v4883_v26 = vld [vmem:[#allocation4 + $0x68] sm:$0xff] }
 0x917   : > { %7394 = vrcp.f32 %v5453_v33 }
 0x918   : > { %4928 = vperm.xlu1 %7281, %v7335_v21   ;;  %v4790_v21 = vld [vmem:[#allocation3] sm:$0xff]  ;;  %7396 = vrcp.f32 %v5032_v8  ;;  %v5513_v8 = vld [vmem:[#allocation4 + $0x1e8] sm:$0xff] }
 0x919   : > { %5353 = vperm.xlu0 %7280, %v7337_v13   ;;  %v7379_v13 = vpop.eup %7378  ;;  %vm4806_vm5 = vcmp.gt.f32.partialorder %v4790_v21, 0.0 }
 0x91a   : > { %v7381_v51 = vpop.eup %7380  ;;  %v4822_v31 = vsel %vm4806_vm5, %v4790_v21, 1.0 }
 0x91b   : > { %7398 = vrcp.f32 %v4822_v31  ;;  %v5092_v31 = vld [vmem:[#allocation4 + $0xe0] sm:$0xff] }
 0x91c   : > { %5563 = vperm.xlu1 %7281, %v7339_v23   ;;  %v5420_v23 = vld [vmem:[#allocation3 + $0x188] sm:$0xff]  ;;  %7400 = vrcp.f32 %v5242_v25 }
 0x91d   : > { %5138 = vperm.xlu0 %7280, %v7341_v15   ;;  %v7383_v15 = vpop.eup %7382  ;;  %vm5436_vm7 = vcmp.gt.f32.partialorder %v5420_v23, 0.0 }
 0x91e   : > { %v7385_v38 = vpop.eup %7384  ;;  %v5452_v62 = vsel %vm5436_vm7, %v5420_v23, 1.0 }
 0x91f   : > { %7402 = vrcp.f32 %v5452_v62  ;;  %v4882_v62 = vld [vmem:[#allocation4 + $0x60] sm:$0xff] }
 0x920   : > { %4923 = vperm.xlu1 %7281, %v7343_v16   ;;  %v5419_v16 = vld [vmem:[#allocation3 + $0x180] sm:$0xff]  ;;  %7404 = vrcp.f32 %v5031_v34 }
 0x921   : > { %5348 = vperm.xlu0 %7280, %v7345_v22   ;;  %v7387_v22 = vpop.eup %7386  ;;  %vm5435_vm9 = vcmp.gt.f32.partialorder %v5419_v16, 0.0 }
 0x922   : > { %v7389_v57 = vpop.eup %7388  ;;  %v5451_v2 = vsel %vm5435_vm9, %v5419_v16, 1.0 }
 0x923   : > { %7406 = vrcp.f32 %v5451_v2 }
 0x924   : > { %5558 = vperm.xlu1 %7281, %v7347_v27   ;;  %v7391_v27 = vpop.eup %7390  ;;  %7408 = vrcp.f32 %v5241_v36 }
 0x925   : > { %5133 = vperm.xlu0 %7280, %v7349_v58   ;;  %v7393_v58 = vpop.eup %7392 }
 0x926   : > { %v7395_v54 = vpop.eup %7394 }
 0x927   : > { %v7397_v9 = vpop.eup %7396 }
 0x928   : > { %4918 = vperm.xlu1 %7281, %v7351_v6   ;;  %v7399_v6 = vpop.eup %7398 }
 0x929   : > { %5343 = vperm.xlu0 %7280, %v7353_v46   ;;  %v7401_v43 = vpop.eup %7400 }
 0x92c   : > { %5553 = vperm.xlu1 %7281, %v7355_v61   ;;  %v7403_v46 = vpop.eup %7402 }
 0x92d   : > { %5128 = vperm.xlu0 %7280, %v7357_v40   ;;  %v7405_v52 = vpop.eup %7404 }
 0x930   : > { %4913 = vperm.xlu1 %7281, %v7359_v37   ;;  %v7407_v53 = vpop.eup %7406 }
 0x931   : > { %5338 = vperm.xlu0 %7280, %v7361_v28   ;;  %v7409_v48 = vpop.eup %7408 }
 0x934   : > { %5548 = vperm.xlu1 %7281, %v7363_v4  }
 0x935   : > { %5123 = vperm.xlu0 %7280, %v7365_v14   ;;  %v5515_v14 = vld [vmem:[#allocation4 + $0x1f8] sm:$0xff] }
 0x938   : > { %4908 = vperm.xlu1 %7281, %v7367_v55   ;;  %v5304_v55 = vld [vmem:[#allocation4 + $0x170] sm:$0xff] }
 0x939   : > { %5333 = vperm.xlu0 %7280, %v7369_v49  }
 0x93c   : > { %5543 = vperm.xlu1 %7281, %v7371_v19  }
 0x93d   : > { %5118 = vperm.xlu0 %7280, %v7373_v5  }
 0x940   : > { %4903 = vperm.xlu1 %7281, %v7375_v44   ;;  %v5303_v44 = vld [vmem:[#allocation4 + $0x168] sm:$0xff] }
 0x941   : > { %5328 = vperm.xlu0 %7280, %v7377_v59  }
 0x944   : > { %5538 = vperm.xlu1 %7281, %v7379_v13  }
 0x945   : > { %5113 = vperm.xlu0 %7280, %v7381_v51  }
 0x948   : > { %4898 = vperm.xlu1 %7281, %v7383_v15  }
 0x949   : > { %5323 = vperm.xlu0 %7280, %v7385_v38  }
 0x94c   : > { %5533 = vperm.xlu1 %7281, %v7387_v22   ;;  %v10750_v22 = vld [vmem:[%s11704_s28] ss:$0 sm:$0xff] }
 0x94d   : > { %5108 = vperm.xlu0 %7280, %v7389_v57  }
 0x950   : > { %4893 = vperm.xlu1 %7281, %v7391_v27   ;;  %v5302_v27 = vld [vmem:[#allocation4 + $0x160] sm:$0xff] }
 0x951   : > { %5318 = vperm.xlu0 %7280, %v7393_v58  }
 0x954   : > { %5528 = vperm.xlu1 %7281, %v7395_v54  }
 0x955   : > { %5103 = vperm.xlu0 %7280, %v7397_v9  }
 0x958   : > { %4888 = vperm.xlu1 %7281, %v7399_v6  }
 0x959   : > { %5313 = vperm.xlu0 %7280, %v7401_v43  }
 0x95c   : > { %5523 = vperm.xlu1 %7281, %v7403_v46   ;;  %v5512_v46 = vld [vmem:[#allocation4 + $0x1e0] sm:$0xff] }
 0x95d   : > { %5098 = vperm.xlu0 %7280, %v7405_v52  }
 0x95f   : > { %v5384_v61 = vpop.permute.xlu1 %5383 }
 0x960   : > { %v4964_v17 = vpop.permute.xlu0 %4963  ;;  %5518 = vperm.xlu1 %7281, %v7407_v53   ;;  %v5401_v0 = vmul.f32 %v5384_v61, %v5305_v30  ;;  %v5091_v53 = vld [vmem:[#allocation4 + $0xd8] sm:$0xff] }
 0x961   : > { %5308 = vperm.xlu0 %7280, %v7409_v48   ;;  %v4981_v56 = vmul.f32 %v4964_v17, %v4885_v11 }
 0x963   : > { %v4959_v40 = vpop.permute.xlu1 %4958 }
 0x964   : > { %v5174_v18 = vpop.permute.xlu0 %5173  ;;  %v4980_v5 = vmul.f32 %v4959_v40, %v4884_v50  ;;  %v5511_v50 = vld [vmem:[#allocation4 + $0x1d8] sm:$0xff] }
 0x965   : > { %v5191_v37 = vmul.f32 %v5174_v18, %v5095_v63 }
 0x967   : > { %v5594_v60 = vpop.permute.xlu1 %5593  ;;  %v5207_v3 = vadd.f32 %v5191_v37, %v4981_v56  ;;  %v4881_v37 = vld [vmem:[#allocation4 + $0x58] sm:$0xff] }
 0x968   : > { %v5169_v28 = vpop.permute.xlu0 %5168  ;;  %v5611_v29 = vmul.f32 %v5594_v60, %v5515_v14  ;;  %v5301_v56 = vld [vmem:[#allocation4 + $0x158] sm:$0xff] }
 0x969   : > { %v5190_v47 = vmul.f32 %v5169_v28, %v5094_v42  ;;  %v5417_v49 = vadd.f32 %v5401_v0, %v5207_v3 }
 0x96b   : > { %v4954_v4 = vpop.permute.xlu1 %4953  ;;  %v5206_v41 = vadd.f32 %v5190_v47, %v4980_v5  ;;  %v5627_v59 = vadd.f32 %v5611_v29, %v5417_v49  ;;  %v5090_v49 = vld [vmem:[#allocation4 + $0xd0] sm:$0xff] }
 0x96c   : > { %v5379_v1 = vpop.permute.xlu0 %5378  ;;  %v4979_v45 = vmul.f32 %v4954_v4, %v4883_v26  ;;  %v4880_v5 = vld [vmem:[#allocation4 + $0x50] sm:$0xff] }
 0x96d   : > { %v5400_v12 = vmul.f32 %v5379_v1, %v5304_v55  ;;  %v5643_v35 = vmul.f32 0.25, %v5627_v59 }
 0x96f   : > { %v5589_v10 = vpop.permute.xlu1 %5588  ;;  %v5416_v33 = vadd.f32 %v5400_v12, %v5206_v41  ;;  %v10753_v36 = vadd.f32 %v10750_v22, %v5643_v35 }
 0x970   : > { %v5164_v19 = vpop.permute.xlu0 %5163  ;;  %v5610_v7 = vmul.f32 %v5589_v10, %v5514_v32 }
 0x971   : > { %v5189_v39 = vmul.f32 %v5164_v19, %v5093_v24  ;;  %v5713_v48 = vsel %vm5667_vm11, %v10753_v36, 0.0 }
 0x972   : > { %v5626_v15 = vadd.f32 %v5610_v7, %v5416_v33 }
 0x973   : > { %v4949_v21 = vpop.permute.xlu1 %4948  ;;  %v5205_v23 = vadd.f32 %v5189_v39, %v4979_v45  ;;  %v5300_v39 = vld [vmem:[#allocation4 + $0x150] sm:$0xff] }
 0x974   : > { %v5374_v13 = vpop.permute.xlu0 %5373  ;;  %v5642_v2 = vmul.f32 0.25, %v5626_v15  ;;  %v4978_v54 = vmul.f32 %v4949_v21, %v4882_v62  ;;  %v5510_v45 = vld [vmem:[#allocation4 + $0x1d0] sm:$0xff] }
 0x975   : > { %v5399_v51 = vmul.f32 %v5374_v13, %v5303_v44 }
 0x976   : > { %v10761_v40 = vadd.f32 %v10750_v22, %v5642_v2 }
 0x977   : > { %v5584_v38 = vpop.permute.xlu1 %5583  ;;  %v5415_v25 = vadd.f32 %v5399_v51, %v5205_v23  ;;  %v5089_v51 = vld [vmem:[#allocation4 + $0xc8] sm:$0xff] }
 0x978   : > { %v5159_v16 = vpop.permute.xlu0 %5158  ;;  %v5609_v20 = vmul.f32 %v5584_v38, %v5513_v8  ;;  %v5710_v4 = vsel %vm5667_vm11, %v10761_v40, 0.0  ;;  %v4879_v38 = vld [vmem:[#allocation4 + $0x48] sm:$0xff] }
 0x979   : > { %v5188_v57 = vmul.f32 %v5159_v16, %v5092_v31 }
 0x97a   : > { %v5625_v34 = vadd.f32 %v5609_v20, %v5415_v25  ;;  %v5299_v20 = vld [vmem:[#allocation4 + $0x148] sm:$0xff] }
 0x97b   : > { %v4944_v58 = vpop.permute.xlu1 %4943  ;;  %v5204_v52 = vadd.f32 %v5188_v57, %v4978_v54 }
 0x97c   : > { %v5641_v9 = vmul.f32 0.25, %v5625_v34  ;;  %v5369_v6 = vpop.permute.xlu0 %5368  ;;  %v4977_v42 = vmul.f32 %v4944_v58, %v4881_v37  ;;  %v5509_v58 = vld [vmem:[#allocation4 + $0x1c8] sm:$0xff] }
 0x97d   : > { %v5398_v43 = vmul.f32 %v5369_v6, %v5302_v27  ;;  %v5088_v6 = vld [vmem:[#allocation4 + $0xc0] sm:$0xff] }
 0x97e   : > { %v10758_v17 = vadd.f32 %v10750_v22, %v5641_v9 }
 0x97f   : > { %v5579_v61 = vpop.permute.xlu1 %5578  ;;  %v5414_v63 = vadd.f32 %v5398_v43, %v5204_v52 }
 0x980   : > { %v5154_v18 = vpop.permute.xlu0 %5153  ;;  %5714 = vadd.xlane.f32.xlu0 %v5713_v48  ;;  %v5608_v11 = vmul.f32 %v5579_v61, %v5512_v46  ;;  %v5707_v30 = vsel %vm5667_vm11, %v10758_v17, 0.0  ;;  %v4878_v61 = vld [vmem:[#allocation4 + $0x40] sm:$0xff] }
 0x981   : > { %v5187_v60 = vmul.f32 %v5154_v18, %v5091_v53 }
 0x982   : > { %v5624_v28 = vadd.f32 %v5608_v11, %v5414_v63  ;;  %v5298_v11 = vld [vmem:[#allocation4 + $0x140] sm:$0xff] }
 0x983   : > { %v4939_v3 = vpop.permute.xlu1 %4938  ;;  %v5203_v55 = vadd.f32 %v5187_v60, %v4977_v42 }
 0x984   : > { %v5640_v14 = vmul.f32 0.25, %v5624_v28  ;;  %v5364_v1 = vpop.permute.xlu0 %5363  ;;  %5708 = vadd.xlane.f32.xlu0 %v5707_v30  ;;  %5711 = vadd.xlane.f32.xlu1 %v5710_v4  ;;  %v4976_v41 = vmul.f32 %v4939_v3, %v4880_v5  ;;  %v5508_v3 = vld [vmem:[#allocation4 + $0x1c0] sm:$0xff] }
 0x985   : > { %v5397_v0 = vmul.f32 %v5364_v1, %v5301_v56 }
 0x986   : > { %v10768_v47 = vadd.f32 %v10750_v22, %v5640_v14  ;;  %v5087_v14 = vld [vmem:[#allocation4 + $0xb8] sm:$0xff] }
 0x987   : > { %v5574_v29 = vpop.permute.xlu1 %5573  ;;  %v5413_v24 = vadd.f32 %v5397_v0, %v5203_v55 }
 0x988   : > { %v5149_v10 = vpop.permute.xlu0 %5148  ;;  %v5607_v19 = vmul.f32 %v5574_v29, %v5511_v50  ;;  %v5704_v32 = vsel %vm5667_vm11, %v10768_v47, 0.0  ;;  %v4877_v29 = vld [vmem:[#allocation4 + $0x38] sm:$0xff] }
 0x989   : > { %5705 = vadd.xlane.f32.xlu0 %v5704_v32  ;;  %v5186_v12 = vmul.f32 %v5149_v10, %v5090_v49 }
 0x98a   : > { %v5623_v26 = vadd.f32 %v5607_v19, %v5413_v24  ;;  %v5297_v19 = vld [vmem:[#allocation4 + $0x138] sm:$0xff] }
 0x98b   : > { %v4934_v44 = vpop.permute.xlu1 %4933  ;;  %v5202_v13 = vadd.f32 %v5186_v12, %v4976_v41 }
 0x98c   : > { %v5639_v59 = vmul.f32 0.25, %v5623_v26  ;;  %v5359_v7 = vpop.permute.xlu0 %5358  ;;  %v4975_v57 = vmul.f32 %v4934_v44, %v4879_v38  ;;  %v5507_v44 = vld [vmem:[#allocation4 + $0x1b8] sm:$0xff] }
 0x98d   : > { %v5396_v21 = vmul.f32 %v5359_v7, %v5300_v39  ;;  %v5086_v7 = vld [vmem:[#allocation4 + $0xb0] sm:$0xff] }
 0x98e   : > { %v10773_v33 = vadd.f32 %v10750_v22, %v5639_v59 }
 0x98f   : > { %v5569_v8 = vpop.permute.xlu1 %5568  ;;  %v5412_v23 = vadd.f32 %v5396_v21, %v5202_v13 }
 0x990   : > { %v5144_v35 = vpop.permute.xlu0 %5143  ;;  %v5606_v15 = vmul.f32 %v5569_v8, %v5510_v45  ;;  %v5701_v31 = vsel %vm5667_vm11, %v10773_v33, 0.0 }
 0x991   : > { %5702 = vadd.xlane.f32.xlu1 %v5701_v31  ;;  %v5185_v25 = vmul.f32 %v5144_v35, %v5089_v51  ;;  %v5296_v31 = vld [vmem:[#allocation4 + $0x130] sm:$0xff] }
 0x992   : > { %v5622_v16 = vadd.f32 %v5606_v15, %v5412_v23  ;;  %v4876_v23 = vld [vmem:[#allocation4 + $0x30] sm:$0xff] }
 0x993   : > { %v4929_v62 = vpop.permute.xlu1 %4928  ;;  %v5201_v54 = vadd.f32 %v5185_v25, %v4975_v57  ;;  %v5506_v57 = vld [vmem:[#allocation4 + $0x1b0] sm:$0xff] }
 0x994   : > { %v5638_v34 = vmul.f32 0.25, %v5622_v16  ;;  %v5354_v27 = vpop.permute.xlu0 %5353  ;;  %v4974_v60 = vmul.f32 %v4929_v62, %v4878_v61  ;;  %v5295_v61 = vld [vmem:[#allocation4 + $0x128] sm:$0xff] }
 0x995   : > { %v5395_v2 = vmul.f32 %v5354_v27, %v5299_v20 }
 0x996   : > { %v10778_v9 = vadd.f32 %v10750_v22, %v5638_v34 }
 0x997   : > { %v5564_v43 = vpop.permute.xlu1 %5563  ;;  %v5411_v46 = vadd.f32 %v5395_v2, %v5201_v54  ;;  %v5085_v2 = vld [vmem:[#allocation4 + $0xa8] sm:$0xff] }
 0x998   : > { %v5139_v52 = vpop.permute.xlu0 %5138  ;;  %v5605_v53 = vmul.f32 %v5564_v43, %v5509_v58  ;;  %v5698_v48 = vsel %vm5667_vm11, %v10778_v9, 0.0 }
 0x999   : > { %5699 = vadd.xlane.f32.xlu0 %v5698_v48  ;;  %v5184_v63 = vmul.f32 %v5139_v52, %v5088_v6  ;;  %v4875_v52 = vld [vmem:[#allocation4 + $0x28] sm:$0xff] }
 0x99a   : > { %v5621_v18 = vadd.f32 %v5605_v53, %v5411_v46 }
 0x99b   : > { %v4924_v37 = vpop.permute.xlu1 %4923  ;;  %v5200_v4 = vadd.f32 %v5184_v63, %v4974_v60 }
 0x99c   : > { %v5637_v28 = vmul.f32 0.25, %v5621_v18  ;;  %v5349_v56 = vpop.permute.xlu0 %5348  ;;  %v4973_v5 = vmul.f32 %v4924_v37, %v4877_v29 }
 0x99d   : > { %v5394_v30 = vmul.f32 %v5349_v56, %v5298_v11 }
 0x99e   : > { %v10783_v42 = vadd.f32 %v10750_v22, %v5637_v28  ;;  %v5505_v28 = vld [vmem:[#allocation4 + $0x1a8] sm:$0xff] }
 0x99f   : > { %v5559_v1 = vpop.permute.xlu1 %5558  ;;  %v5410_v0 = vadd.f32 %v5394_v30, %v5200_v4 }
 0x9a0   : > { %v5134_v50 = vpop.permute.xlu0 %5133  ;;  %v5604_v55 = vmul.f32 %v5559_v1, %v5508_v3  ;;  %v5695_v49 = vsel %vm5667_vm11, %v10783_v42, 0.0  ;;  %v5084_v3 = vld [vmem:[#allocation4 + $0xa0] sm:$0xff] }
 0x9a1   : > { %5696 = vadd.xlane.f32.xlu1 %v5695_v49  ;;  %v5183_v24 = vmul.f32 %v5134_v50, %v5087_v14 }
 0x9a2   : > { %v5620_v10 = vadd.f32 %v5604_v55, %v5410_v0  ;;  %v4874_v55 = vld [vmem:[#allocation4 + $0x20] sm:$0xff] }
 0x9a3   : > { %v4919_v32 = vpop.permute.xlu1 %4918  ;;  %v5199_v41 = vadd.f32 %v5183_v24, %v4973_v5  ;;  %v5294_v24 = vld [vmem:[#allocation4 + $0x120] sm:$0xff] }
 0x9a4   : > { %v5636_v12 = vmul.f32 0.25, %v5620_v10  ;;  %v5344_v26 = vpop.permute.xlu0 %5343  ;;  %v4972_v25 = vmul.f32 %v4919_v32, %v4876_v23 }
 0x9a5   : > { %v5393_v39 = vmul.f32 %v5344_v26, %v5297_v19  ;;  %v5504_v26 = vld [vmem:[#allocation4 + $0x1a0] sm:$0xff] }
 0x9a6   : > { %v10788_v59 = vadd.f32 %v10750_v22, %v5636_v12 }
 0x9a7   : > { %v5554_v21 = vpop.permute.xlu1 %5553  ;;  %v5409_v45 = vadd.f32 %v5393_v39, %v5199_v41  ;;  %v5083_v41 = vld [vmem:[#allocation4 + $0x98] sm:$0xff] }
 0x9a8   : > { %v5129_v13 = vpop.permute.xlu0 %5128  ;;  %v5603_v51 = vmul.f32 %v5554_v21, %v5507_v44  ;;  %v5692_v8 = vsel %vm5667_vm11, %v10788_v59, 0.0 }
 0x9a9   : > { %5693 = vadd.xlane.f32.xlu0 %v5692_v8  ;;  %v5182_v35 = vmul.f32 %v5129_v13, %v5086_v7  ;;  %v4873_v8 = vld [vmem:[#allocation4 + $0x18] sm:$0xff] }
 0x9aa   : > { %v5619_v15 = vadd.f32 %v5603_v51, %v5409_v45 }
 0x9ab   : > { %v4914_v38 = vpop.permute.xlu1 %4913  ;;  %v5198_v34 = vadd.f32 %v5182_v35, %v4972_v25 }
 0x9ac   : > { %v5635_v16 = vmul.f32 0.25, %v5619_v15  ;;  %v5339_v20 = vpop.permute.xlu0 %5338  ;;  %v4971_v18 = vmul.f32 %v4914_v38, %v4875_v52  ;;  %v5293_v15 = vld [vmem:[#allocation4 + $0x118] sm:$0xff]  ;;  %v4872_v52 = vld [vmem:[#allocation4 + $0x10] sm:$0xff] }
 0x9ad   : > { %v5392_v62 = vmul.f32 %v5339_v20, %v5296_v31 }
 0x9ae   : > { %v10793_v27 = vadd.f32 %v10750_v22, %v5635_v16 }
 0x9af   : > { %v5549_v58 = vpop.permute.xlu1 %5548  ;;  %v5408_v54 = vadd.f32 %v5392_v62, %v5198_v34  ;;  %v5503_v62 = vld [vmem:[#allocation4 + $0x198] sm:$0xff] }
 0x9b0   : > { %v5124_v6 = vpop.permute.xlu0 %5123  ;;  %v5602_v43 = vmul.f32 %v5549_v58, %v5506_v57  ;;  %v5689_v46 = vsel %vm5667_vm11, %v10793_v27, 0.0 }
 0x9b1   : > { %5690 = vadd.xlane.f32.xlu1 %v5689_v46  ;;  %v5181_v53 = vmul.f32 %v5124_v6, %v5085_v2  ;;  %v5082_v2 = vld [vmem:[#allocation4 + $0x90] sm:$0xff] }
 0x9b2   : > { %v5618_v48 = vadd.f32 %v5602_v43, %v5408_v54 }
 0x9b3   : > { %v4909_v63 = vpop.permute.xlu1 %4908  ;;  %v5197_v56 = vadd.f32 %v5181_v53, %v4971_v18 }
 0x9b4   : > { %v5634_v11 = vmul.f32 0.25, %v5618_v48  ;;  %v5334_v37 = vpop.permute.xlu0 %5333  ;;  %v4970_v19 = vmul.f32 %v4909_v63, %v4874_v55 }
 0x9b5   : > { %v5391_v60 = vmul.f32 %v5334_v37, %v5295_v61  ;;  %v5292_v61 = vld [vmem:[#allocation4 + $0x110] sm:$0xff] }
 0x9b6   : > { %v10798_v30 = vadd.f32 %v10750_v22, %v5634_v11 }
 0x9b7   : > { %v5544_v4 = vpop.permute.xlu1 %5543  ;;  %v5407_v14 = vadd.f32 %v5391_v60, %v5197_v56 }
 0x9b8   : > { %v5119_v1 = vpop.permute.xlu0 %5118  ;;  %v5601_v0 = vmul.f32 %v5544_v4, %v5505_v28  ;;  %v5686_v50 = vsel %vm5667_vm11, %v10798_v30, 0.0  ;;  %v5502_v28 = vld [vmem:[#allocation4 + $0x190] sm:$0xff]  ;;  %v5081_v4 = vld [vmem:[#allocation4 + $0x88] sm:$0xff] }
 0x9b9   : > { %5687 = vadd.xlane.f32.xlu0 %v5686_v50  ;;  %v5180_v49 = vmul.f32 %v5119_v1, %v5084_v3 }
 0x9ba   : > { %v5617_v29 = vadd.f32 %v5601_v0, %v5407_v14 }
 0x9bb   : > { %v4904_v10 = vpop.permute.xlu1 %4903  ;;  %v5196_v39 = vadd.f32 %v5180_v49, %v4970_v19  ;;  %v4871_v49 = vld [vmem:[#allocation4 + $0x8] sm:$0xff] }
 0x9bc   : > { %v5633_v32 = vmul.f32 0.25, %v5617_v29  ;;  %v5329_v5 = vpop.permute.xlu0 %5328  ;;  %v4969_v38 = vmul.f32 %v4904_v10, %v4873_v8  ;;  %v5291_v10 = vld [vmem:[#allocation4 + $0x108] sm:$0xff] }
 0x9bd   : > { %v5390_v12 = vmul.f32 %v5329_v5, %v5294_v24 }
 0x9be   : > { %v10803_v44 = vadd.f32 %v10750_v22, %v5633_v32 }
 0x9bf   : > { %v5539_v7 = vpop.permute.xlu1 %5538  ;;  %v5406_v21 = vadd.f32 %v5390_v12, %v5196_v39  ;;  %v5501_v39 = vld [vmem:[#allocation4 + $0x188] sm:$0xff] }
 0x9c0   : > { %v5114_v45 = vpop.permute.xlu0 %5113  ;;  %v5600_v13 = vmul.f32 %v5539_v7, %v5504_v26  ;;  %v5683_v51 = vsel %vm5667_vm11, %v10803_v44, 0.0  ;;  %v5080_v7 = vld [vmem:[#allocation4 + $0x80] sm:$0xff] }
 0x9c1   : > { %5684 = vadd.xlane.f32.xlu1 %v5683_v51  ;;  %v5179_v23 = vmul.f32 %v5114_v45, %v5083_v41  ;;  %v4870_v51 = vld [vmem:[#allocation4] sm:$0xff] }
 0x9c2   : > { %v5616_v35 = vadd.f32 %v5600_v13, %v5406_v21 }
 0x9c3   : > { %v4899_v31 = vpop.permute.xlu1 %4898  ;;  %v5195_v57 = vadd.f32 %v5179_v23, %v4969_v38  ;;  %v5290_v38 = vld [vmem:[#allocation4 + $0x100] sm:$0xff] }
 0x9c4   : > { %v5632_v25 = vmul.f32 0.25, %v5616_v35  ;;  %v5324_v16 = vpop.permute.xlu0 %5323  ;;  %v4968_v18 = vmul.f32 %v4899_v31, %v4872_v52 }
 0x9c5   : > { %v5389_v20 = vmul.f32 %v5324_v16, %v5293_v15 }
 0x9c6   : > { %v10808_v34 = vadd.f32 %v10750_v22, %v5632_v25 }
 0x9c7   : > { %v5534_v58 = vpop.permute.xlu1 %5533  ;;  %v5405_v54 = vadd.f32 %v5389_v20, %v5195_v57 }
 0x9c8   : > { %v5109_v6 = vpop.permute.xlu0 %5108  ;;  %v5599_v43 = vmul.f32 %v5534_v58, %v5503_v62  ;;  %v5680_v46 = vsel %vm5667_vm11, %v10808_v34, 0.0  ;;  %v5500_v62 = vld [vmem:[#allocation4 + $0x180] sm:$0xff] }
 0x9c9   : > { %5681 = vadd.xlane.f32.xlu0 %v5680_v46  ;;  %v5178_v53 = vmul.f32 %v5109_v6, %v5082_v2 }
 0x9ca   : > { %v5615_v48 = vadd.f32 %v5599_v43, %v5405_v54 }
 0x9cb   : > { %v4894_v63 = vpop.permute.xlu1 %4893  ;;  %v5194_v56 = vadd.f32 %v5178_v53, %v4968_v18 }
 0x9cc   : > { %v5631_v11 = vmul.f32 0.25, %v5615_v48  ;;  %v5319_v37 = vpop.permute.xlu0 %5318  ;;  %v4967_v32 = vmul.f32 %v4894_v63, %v4871_v49 }
 0x9cd   : > { %v5388_v60 = vmul.f32 %v5319_v37, %v5292_v61 }
 0x9ce   : > { %v10813_v3 = vadd.f32 %v10750_v22, %v5631_v11 }
 0x9cf   : > { %v5529_v14 = vpop.permute.xlu1 %5528  ;;  %v5404_v1 = vadd.f32 %v5388_v60, %v5194_v56 }
 0x9d0   : > { %v5104_v0 = vpop.permute.xlu0 %5103  ;;  %v5598_v50 = vmul.f32 %v5529_v14, %v5502_v28  ;;  %v5677_v55 = vsel %vm5667_vm11, %v10813_v3, 0.0 }
 0x9d1   : > { %5678 = vadd.xlane.f32.xlu1 %v5677_v55  ;;  %v5177_v29 = vmul.f32 %v5104_v0, %v5081_v4 }
 0x9d2   : > { %v5614_v24 = vadd.f32 %v5598_v50, %v5404_v1 }
 0x9d3   : > { %v4889_v19 = vpop.permute.xlu1 %4888  ;;  %v5193_v41 = vadd.f32 %v5177_v29, %v4967_v32 }
 0x9d4   : > { %v5630_v5 = vmul.f32 0.25, %v5614_v24  ;;  %v5314_v12 = vpop.permute.xlu0 %5313  ;;  %v4966_v25 = vmul.f32 %v4889_v19, %v4870_v51 }
 0x9d5   : > { %v5387_v26 = vmul.f32 %v5314_v12, %v5291_v10 }
 0x9d6   : > { %v10818_v21 = vadd.f32 %v10750_v22, %v5630_v5 }
 0x9d7   : > { %v5524_v45 = vpop.permute.xlu1 %5523  ;;  %v5403_v13 = vadd.f32 %v5387_v26, %v5193_v41 }
 0x9d8   : > { %v5099_v8 = vpop.permute.xlu0 %5098  ;;  %v5597_v23 = vmul.f32 %v5524_v45, %v5501_v39  ;;  %v5674_v35 = vsel %vm5667_vm11, %v10818_v21, 0.0 }
 0x9d9   : > { %v5176_v15 = vmul.f32 %v5099_v8, %v5080_v7  ;;  %5675 = vadd.xlane.f32.xlu0 %v5674_v35 }
 0x9da   : > { %v5613_v31 = vadd.f32 %v5597_v23, %v5403_v13 }
 0x9db   : > { %v5519_v57 = vpop.permute.xlu1 %5518  ;;  %v5192_v2 = vadd.f32 %v5176_v15, %v4966_v25 }
 0x9dc   : > { %v5629_v16 = vmul.f32 0.25, %v5613_v31  ;;  %v5309_v20 = vpop.permute.xlu0 %5308  ;;  %v5596_v43 = vmul.f32 %v5519_v57, %v5500_v62 }
 0x9dd   : > { %v5386_v58 = vmul.f32 %v5309_v20, %v5290_v38 }
 0x9de   : > { %v10823_v54 = vadd.f32 %v10750_v22, %v5629_v16 }
 0x9df   : > { %v5402_v6 = vadd.f32 %v5386_v58, %v5192_v2 }
 0x9e0   : > { %v5671_v46 = vsel %vm5667_vm11, %v10823_v54, 0.0 }
 0x9e1   : > { %v5612_v52 = vadd.f32 %v5596_v43, %v5402_v6  ;;  %5672 = vadd.xlane.f32.xlu1 %v5671_v46 }
 0x9e3   : > { %v5628_v53 = vmul.f32 0.25, %v5612_v52 }
 0x9e5   : > { %v10828_v48 = vadd.f32 %v10750_v22, %v5628_v53 }
 0x9e7   : > { %v5668_v61 = vsel %vm5667_vm11, %v10828_v48, 0.0 }
 0x9e8   : > { %5669 = vadd.xlane.f32.xlu0 %v5668_v61 }
 0xa09   : > { %v5715_v63 = vpop.xlane.xlu0 %5714 }
 0xa0a   : > { %v5732_v18 = vmul.f32 0.0625, %v5715_v63 }
 0xa0c   : > { %v10833_v11 = vsub.f32 %v10753_v36, %v5732_v18 }
 0xa0d   : > { %v5709_v37 = vpop.xlane.xlu0 %5708  ;;  %v5712_v60 = vpop.xlane.xlu1 %5711 }
 0xa0e   : > { %v5730_v28 = vmul.f32 0.0625, %v5709_v37  ;;  %v5731_v56 = vmul.f32 0.0625, %v5712_v60  ;;  %v5764_v4 = vmul.f32 %v10833_v11, %v10833_v11 }
 0xa10   : > { %v10838_v14 = vsub.f32 %v10758_v17, %v5730_v28  ;;  %v10841_v22 = vsub.f32 %v10761_v40, %v5731_v56  ;;  %v5810_v1 = vsel %vm5667_vm11, %v5764_v4, 0.0 }
 0xa11   : > { %5811 = vadd.xlane.f32.xlu1 %v5810_v1 }
 0xa12   : > { %v5706_v0 = vpop.xlane.xlu0 %5705  ;;  %v5762_v36 = vmul.f32 %v10838_v14, %v10838_v14  ;;  %v5763_v50 = vmul.f32 %v10841_v22, %v10841_v22 }
 0xa13   : > { %v5729_v55 = vmul.f32 0.0625, %v5706_v0 }
 0xa14   : > { %v5804_v49 = vsel %vm5667_vm11, %v5762_v36, 0.0  ;;  %v5807_v29 = vsel %vm5667_vm11, %v5763_v50, 0.0 }
 0xa15   : > { %v10851_v17 = vsub.f32 %v10768_v47, %v5729_v55  ;;  %5805 = vadd.xlane.f32.xlu1 %v5804_v49  ;;  %5808 = vadd.xlane.f32.xlu0 %v5807_v29 }
 0xa17   : > { %v5761_v40 = vmul.f32 %v10851_v17, %v10851_v17 }
 0xa19   : > { %v5801_v24 = vsel %vm5667_vm11, %v5761_v40, 0.0 }
 0xa1a   : > { %5802 = vadd.xlane.f32.xlu0 %v5801_v24  ;;  %v5703_v10 = vpop.xlane.xlu1 %5702 }
 0xa1b   : > { %v5728_v19 = vmul.f32 0.0625, %v5703_v10 }
 0xa1d   : > { %v10857_v32 = vsub.f32 %v10773_v33, %v5728_v19 }
 0xa1f   : > { %v5760_v5 = vmul.f32 %v10857_v32, %v10857_v32 }
 0xa21   : > { %v5798_v12 = vsel %vm5667_vm11, %v5760_v5, 0.0  ;;  %v5955_v5 = vlaneseq }
 0xa22   : > { %v5700_v47 = vpop.xlane.xlu0 %5699  ;;  %5799 = vadd.xlane.f32.xlu1 %v5798_v12 }
 0xa23   : > { %v5727_v26 = vmul.f32 0.0625, %v5700_v47  ;;  %v5956_v47 = vshrl.u32 %v5955_v5, 7 }
 0xa25   : > { %v10863_v39 = vsub.f32 %v10778_v9, %v5727_v26  ;;  %v5959_v26 = vand.u32 127, %v5955_v5 }
 0xa27   : > { %v5759_v41 = vmul.f32 %v10863_v39, %v10863_v39  ;;  %vm5960_vm12 = vcmp.eq.s32.totalorder %v5956_v47, %v5959_v26 }
 0xa29   : > { %v5795_v7 = vsel %vm5667_vm11, %v5759_v41, 0.0 }
 0xa2a   : > { %5796 = vadd.xlane.f32.xlu0 %v5795_v7  ;;  %v5697_v45 = vpop.xlane.xlu1 %5696  ;;  %v5957_v7 = vadd.s32 8, %v5956_v47 }
 0xa2b   : > { %v5726_v33 = vmul.f32 0.0625, %v5697_v45 }
 0xa2c   : > { %vm5961_vm13 = vcmp.eq.s32.totalorder %v5957_v7, %v5959_v26 }
 0xa2d   : > { %v10869_v13 = vsub.f32 %v10783_v42, %v5726_v33 }
 0xa2f   : > { %v5758_v51 = vmul.f32 %v10869_v13, %v10869_v13 }
 0xa31   : > { %v5792_v8 = vsel %vm5667_vm11, %v5758_v51, 0.0 }
 0xa32   : > { %v5694_v23 = vpop.xlane.xlu0 %5693  ;;  %5793 = vadd.xlane.f32.xlu1 %v5792_v8  ;;  %v7616_v8 = vmov 0.0  }
 0xa33   : > { %v5725_v9 = vmul.f32 0.0625, %v5694_v23  ;;  %v6461_v23 = vsel %vm5960_vm12, 1.0, %v7616_v8 }
 0xa34   : > { %6890 = vmatprep.mubr.msk.f32.mxu0 %vm5667_vm11, %v6461_v23 }
 0xa35   : > { %v10875_v35 = vsub.f32 %v10788_v59, %v5725_v9  ;;  %v10928_v9 = vsel %vm5961_vm13, 1.0, %v7616_v8 }
 0xa37   : > { %v5757_v15 = vmul.f32 %v10875_v35, %v10875_v35 }
 0xa39   : > { %v5789_v31 = vsel %vm5667_vm11, %v5757_v15, 0.0 }
 0xa3a   : > { %5790 = vadd.xlane.f32.xlu0 %v5789_v31  ;;  %v5691_v38 = vpop.xlane.xlu1 %5690 }
 0xa3b   : > { %v5724_v42 = vmul.f32 0.0625, %v5691_v38 }
 0xa3d   : > { %v10881_v25 = vsub.f32 %v10793_v27, %v5724_v42 }
 0xa3f   : > { %v5756_v16 = vmul.f32 %v10881_v25, %v10881_v25 }
 0xa41   : > { %v5786_v20 = vsel %vm5667_vm11, %v5756_v16, 0.0 }
 0xa42   : > { %v5688_v62 = vpop.xlane.xlu0 %5687  ;;  %5787 = vadd.xlane.f32.xlu1 %v5786_v20 }
 0xa43   : > { %v5723_v59 = vmul.f32 0.0625, %v5688_v62 }
 0xa45   : > { %v10887_v57 = vsub.f32 %v10798_v30, %v5723_v59 }
 0xa47   : > { %v5755_v2 = vmul.f32 %v10887_v57, %v10887_v57 }
 0xa49   : > { %v5783_v58 = vsel %vm5667_vm11, %v5755_v2, 0.0  ;;  %v10934_v2 = vld [vmem:[%s11705_s18] ss:$0 sm:$0xff] }
 0xa4a   : > { %5784 = vadd.xlane.f32.xlu0 %v5783_v58  ;;  %v5685_v6 = vpop.xlane.xlu1 %5684 }
 0xa4b   : > { %v5722_v27 = vmul.f32 0.0625, %v5685_v6 }
 0xa4d   : > { %v10893_v43 = vsub.f32 %v10803_v44, %v5722_v27  ;;  %v10940_v27 = vld [vmem:[%s11706_s19] ss:$0 sm:$0xff] }
 0xa4f   : > { %v5754_v46 = vmul.f32 %v10893_v43, %v10893_v43 }
 0xa51   : > { %v5780_v52 = vsel %vm5667_vm11, %v5754_v46, 0.0 }
 0xa52   : > { %v5682_v53 = vpop.xlane.xlu0 %5681  ;;  %5781 = vadd.xlane.f32.xlu1 %v5780_v52 }
 0xa53   : > { %v5721_v30 = vmul.f32 0.0625, %v5682_v53  ;;  %v5938_v53 = vld [vmem:[%s8171_s13 + $0x78] sm:$0xff] }
 0xa55   : > { %v10899_v61 = vsub.f32 %v10808_v34, %v5721_v30 }
 0xa57   : > { %v5753_v63 = vmul.f32 %v10899_v61, %v10899_v61 }
 0xa59   : > { %v5777_v18 = vsel %vm5667_vm11, %v5753_v63, 0.0 }
 0xa5a   : > { %5778 = vadd.xlane.f32.xlu0 %v5777_v18  ;;  %v5679_v37 = vpop.xlane.xlu1 %5678 }
 0xa5b   : > { %v5720_v44 = vmul.f32 0.0625, %v5679_v37 }
 0xa5d   : > { %v10905_v60 = vsub.f32 %v10813_v3, %v5720_v44 }
 0xa5f   : > { %v5752_v28 = vmul.f32 %v10905_v60, %v10905_v60 }
 0xa61   : > { %v5774_v56 = vsel %vm5667_vm11, %v5752_v28, 0.0 }
 0xa62   : > { %v5676_v4 = vpop.xlane.xlu0 %5675  ;;  %5775 = vadd.xlane.f32.xlu1 %v5774_v56 }
 0xa63   : > { %v5719_v34 = vmul.f32 0.0625, %v5676_v4 }
 0xa65   : > { %v10911_v1 = vsub.f32 %v10818_v21, %v5719_v34 }
 0xa67   : > { %v5751_v0 = vmul.f32 %v10911_v1, %v10911_v1 }
 0xa69   : > { %v5771_v36 = vsel %vm5667_vm11, %v5751_v0, 0.0  ;;  %v5937_v0 = vld [vmem:[%s8171_s13 + $0x70] sm:$0xff] }
 0xa6a   : > { %5772 = vadd.xlane.f32.xlu0 %v5771_v36  ;;  %v5673_v50 = vpop.xlane.xlu1 %5672 }
 0xa6b   : > { %v5718_v3 = vmul.f32 0.0625, %v5673_v50 }
 0xa6d   : > { %v10917_v55 = vsub.f32 %v10823_v54, %v5718_v3  ;;  %v5936_v3 = vld [vmem:[%s8171_s13 + $0x68] sm:$0xff] }
 0xa6f   : > { %v5750_v49 = vmul.f32 %v10917_v55, %v10917_v55 }
 0xa71   : > { %v5670_v29 = vpop.xlane.xlu0 %5669  ;;  %v5768_v40 = vsel %vm5667_vm11, %v5750_v49, 0.0 }
 0xa72   : > { %v5717_v24 = vmul.f32 0.0625, %v5670_v29  ;;  %5769 = vadd.xlane.f32.xlu1 %v5768_v40  ;;  %v5935_v40 = vld [vmem:[%s8171_s13 + $0x60] sm:$0xff] }
 0xa74   : > { %v10923_v21 = vsub.f32 %v10828_v48, %v5717_v24 }
 0xa76   : > { %v5749_v10 = vmul.f32 %v10923_v21, %v10923_v21 }
 0xa78   : > { %v5765_v19 = vsel %vm5667_vm11, %v5749_v10, 0.0 }
 0xa79   : > { %5766 = vadd.xlane.f32.xlu0 %v5765_v19 }
 0xa9a   : > { %v5812_v54 = vpop.xlane.xlu1 %5811 }
 0xa9b   : > { %v5828_v12 = vmul.f32 0.0625, %v5812_v54 }
 0xa9d   : > { %v5844_v41 = vadd.f32 1e-05, %v5828_v12 }
 0xa9e   : > { %v5806_v45 = vpop.xlane.xlu1 %5805  ;;  %v5809_v33 = vpop.xlane.xlu0 %5808 }
 0xa9f   : > { %7410 = vrsqrt.f32 %v5844_v41  ;;  %v5826_v51 = vmul.f32 0.0625, %v5806_v45  ;;  %v5827_v48 = vmul.f32 0.0625, %v5809_v33  ;;  %v5934_v41 = vld [vmem:[%s8171_s13 + $0x58] sm:$0xff] }
 0xaa1   : > { %v5842_v15 = vadd.f32 1e-05, %v5826_v51  ;;  %v5843_v31 = vadd.f32 1e-05, %v5827_v48 }
 0xaa3   : > { %7412 = vrsqrt.f32 %v5842_v15  ;;  %v5803_v38 = vpop.xlane.xlu0 %5802  ;;  %v5933_v15 = vld [vmem:[%s8171_s13 + $0x50] sm:$0xff] }
 0xaa4   : > { %7414 = vrsqrt.f32 %v5843_v31  ;;  %v5825_v42 = vmul.f32 0.0625, %v5803_v38 }
 0xaa6   : > { %v5841_v16 = vadd.f32 1e-05, %v5825_v42 }
 0xaa8   : > { %7416 = vrsqrt.f32 %v5841_v16 }
 0xaab   : > { %v5800_v20 = vpop.xlane.xlu1 %5799 }
 0xaac   : > { %v7411_v62 = vpop.eup %7410  ;;  %v5824_v59 = vmul.f32 0.0625, %v5800_v20 }
 0xaad   : > { %v5876_v58 = vmul.f32 %v7411_v62, %v10833_v11 }
 0xaae   : > { %v5840_v6 = vadd.f32 1e-05, %v5824_v59 }
 0xaaf   : > { %v5899_v46 = vmul.f32 %v10934_v2, %v5876_v58  ;;  %v5932_v58 = vld [vmem:[%s8171_s13 + $0x48] sm:$0xff] }
 0xab0   : > { %v7413_v52 = vpop.eup %7412  ;;  %7418 = vrsqrt.f32 %v5840_v6 }
 0xab1   : > { %v7415_v30 = vpop.eup %7414  ;;  %v5922_v63 = vadd.f32 %v10940_v27, %v5899_v46  ;;  %v5874_v18 = vmul.f32 %v7413_v52, %v10838_v14 }
 0xab2   : > { %v5875_v11 = vmul.f32 %v7415_v30, %v10841_v22 }
 0xab3   : > { %v5797_v37 = vpop.xlane.xlu0 %5796  ;;  %v5954_v44 = vadd.f32 %v5938_v53, %v5922_v63  ;;  %v5897_v28 = vmul.f32 %v10934_v2, %v5874_v18 }
 0xab4   : > { %v5823_v56 = vmul.f32 0.0625, %v5797_v37  ;;  %v5898_v4 = vmul.f32 %v10934_v2, %v5875_v11  ;;  %v5931_v11 = vld [vmem:[%s8171_s13 + $0x40] sm:$0xff] }
 0xab5   : > { %v7417_v34 = vpop.eup %7416  ;;  %6858 = vmatprep.subr.msk.mxu0 %vm5667_vm11, %v5954_v44  ;;  %v5920_v14 = vadd.f32 %v10940_v27, %v5897_v28 }
 0xab6   : > { %v5839_v36 = vadd.f32 1e-05, %v5823_v56  ;;  %6859 = vmatpush3.xpose.msk.msra.mxu0 %vm5667_vm11, %v5954_v44  ;;  %v5921_v50 = vadd.f32 %v10940_v27, %v5898_v4  ;;  %v5873_v22 = vmul.f32 %v7417_v34, %v10851_v17 }
 0xab7   : > { %v5952_v24 = vadd.f32 %v5936_v3, %v5920_v14 }
 0xab8   : > { %7420 = vrsqrt.f32 %v5839_v36  ;;  %v5953_v49 = vadd.f32 %v5937_v0, %v5921_v50  ;;  %v5896_v29 = vmul.f32 %v10934_v2, %v5873_v22  ;;  %v5930_v36 = vld [vmem:[%s8171_s13 + $0x38] sm:$0xff] }
 0xaba   : > { %6860 = vmatprep.subr.msk.mxu0 %vm5667_vm11, %v5953_v49  ;;  %v5919_v10 = vadd.f32 %v10940_v27, %v5896_v29 }
 0xabb   : > { %6861 = vmatpush3.xpose.msk.msra.mxu0 %vm5667_vm11, %v5953_v49  ;;  %v5794_v19 = vpop.xlane.xlu1 %5793 }
 0xabc   : > { %6862 = vmatprep.subr.msk.mxu0 %vm5667_vm11, %v5952_v24  ;;  %v5822_v5 = vmul.f32 0.0625, %v5794_v19  ;;  %v5951_v54 = vadd.f32 %v5935_v40, %v5919_v10 }
 0xabd   : > { %v7419_v17 = vpop.eup %7418 }
 0xabe   : > { %v5838_v12 = vadd.f32 1e-05, %v5822_v5  ;;  %v5872_v47 = vmul.f32 %v7419_v17, %v10857_v32 }
 0xabf   : > { %6863 = vmatpush3.xpose.msk.msra.mxu0 %vm5667_vm11, %v5952_v24  ;;  %v5929_v24 = vld [vmem:[%s8171_s13 + $0x30] sm:$0xff] }
 0xac0   : > { %7422 = vrsqrt.f32 %v5838_v12  ;;  %6864 = vmatprep.subr.msk.mxu0 %vm5667_vm11, %v5951_v54  ;;  %v5895_v26 = vmul.f32 %v10934_v2, %v5872_v47 }
 0xac2   : > { %v5918_v7 = vadd.f32 %v10940_v27, %v5895_v26  ;;  %v5928_v26 = vld [vmem:[%s8171_s13 + $0x28] sm:$0xff] }
 0xac3   : > { %6865 = vmatpush3.xpose.msk.msra.mxu0 %vm5667_vm11, %v5951_v54  ;;  %v5791_v45 = vpop.xlane.xlu0 %5790 }
 0xac4   : > { %v5821_v33 = vmul.f32 0.0625, %v5791_v45  ;;  %v5950_v51 = vadd.f32 %v5934_v41, %v5918_v7 }
 0xac5   : > { %v7421_v48 = vpop.eup %7420 }
 0xac6   : > { %v5837_v8 = vadd.f32 1e-05, %v5821_v33  ;;  %6866 = vmatprep.subr.msk.mxu0 %vm5667_vm11, %v5950_v51  ;;  %v5871_v32 = vmul.f32 %v7421_v48, %v10863_v39 }
 0xac7   : > { %6867 = vmatpush3.xpose.msk.msra.mxu0 %vm5667_vm11, %v5950_v51 }
 0xac8   : > { %7424 = vrsqrt.f32 %v5837_v8  ;;  %v5894_v23 = vmul.f32 %v10934_v2, %v5871_v32  ;;  %v5927_v32 = vld [vmem:[%s8171_s13 + $0x20] sm:$0xff] }
 0xaca   : > { %v5917_v31 = vadd.f32 %v10940_v27, %v5894_v23 }
 0xacb   : > { %v5788_v38 = vpop.xlane.xlu1 %5787 }
 0xacc   : > { %v5820_v42 = vmul.f32 0.0625, %v5788_v38  ;;  %v5949_v16 = vadd.f32 %v5933_v15, %v5917_v31 }
 0xacd   : > { %v7423_v20 = vpop.eup %7422 }
 0xace   : > { %v5836_v62 = vadd.f32 1e-05, %v5820_v42  ;;  %6868 = vmatprep.subr.msk.mxu0 %vm5667_vm11, %v5949_v16  ;;  %v5870_v59 = vmul.f32 %v7423_v20, %v10869_v13 }
 0xacf   : > { %6869 = vmatpush3.xpose.msk.msra.mxu0 %vm5667_vm11, %v5949_v16 }
 0xad0   : > { %7426 = vrsqrt.f32 %v5836_v62  ;;  %v5893_v39 = vmul.f32 %v10934_v2, %v5870_v59  ;;  %v5926_v62 = vld [vmem:[%s8171_s13 + $0x18] sm:$0xff] }
 0xad2   : > { %v5916_v6 = vadd.f32 %v10940_v27, %v5893_v39 }
 0xad3   : > { %v5785_v46 = vpop.xlane.xlu0 %5784 }
 0xad4   : > { %v5819_v52 = vmul.f32 0.0625, %v5785_v46  ;;  %v5948_v53 = vadd.f32 %v5932_v58, %v5916_v6 }
 0xad5   : > { %v7425_v30 = vpop.eup %7424 }
 0xad6   : > { %v5835_v63 = vadd.f32 1e-05, %v5819_v52  ;;  %6870 = vmatprep.subr.msk.mxu0 %vm5667_vm11, %v5948_v53  ;;  %v5869_v18 = vmul.f32 %v7425_v30, %v10875_v35  ;;  %v5925_v30 = vld [vmem:[%s8171_s13 + $0x10] sm:$0xff] }
 0xad7   : > { %6871 = vmatpush3.xpose.msk.msra.mxu0 %vm5667_vm11, %v5948_v53 }
 0xad8   : > { %7428 = vrsqrt.f32 %v5835_v63  ;;  %v5892_v13 = vmul.f32 %v10934_v2, %v5869_v18 }
 0xada   : > { %v5915_v37 = vadd.f32 %v10940_v27, %v5892_v13 }
 0xadb   : > { %v5782_v44 = vpop.xlane.xlu1 %5781 }
 0xadc   : > { %v5818_v28 = vmul.f32 0.0625, %v5782_v44  ;;  %v5947_v56 = vadd.f32 %v5931_v11, %v5915_v37 }
 0xadd   : > { %v7427_v4 = vpop.eup %7426 }
 0xade   : > { %v5834_v34 = vadd.f32 1e-05, %v5818_v28  ;;  %6872 = vmatprep.subr.msk.mxu0 %vm5667_vm11, %v5947_v56  ;;  %v5868_v0 = vmul.f32 %v7427_v4, %v10881_v25 }
 0xadf   : > { %6873 = vmatpush3.xpose.msk.msra.mxu0 %vm5667_vm11, %v5947_v56 }
 0xae0   : > { %7430 = vrsqrt.f32 %v5834_v34  ;;  %v5891_v35 = vmul.f32 %v10934_v2, %v5868_v0 }
 0xae2   : > { %v5914_v50 = vadd.f32 %v10940_v27, %v5891_v35 }
 0xae3   : > { %v5779_v14 = vpop.xlane.xlu0 %5778 }
 0xae4   : > { %v5817_v22 = vmul.f32 0.0625, %v5779_v14  ;;  %v5946_v3 = vadd.f32 %v5930_v36, %v5914_v50 }
 0xae5   : > { %v7429_v49 = vpop.eup %7428 }
 0xae6   : > { %v5833_v29 = vadd.f32 1e-05, %v5817_v22  ;;  %6874 = vmatprep.subr.msk.mxu0 %vm5667_vm11, %v5946_v3  ;;  %v5867_v40 = vmul.f32 %v7429_v49, %v10887_v57 }
 0xae7   : > { %6875 = vmatpush3.xpose.msk.msra.mxu0 %vm5667_vm11, %v5946_v3 }
 0xae8   : > { %7432 = vrsqrt.f32 %v5833_v29  ;;  %v5890_v25 = vmul.f32 %v10934_v2, %v5867_v40 }
 0xaea   : > { %v5913_v10 = vadd.f32 %v10940_v27, %v5890_v25 }
 0xaeb   : > { %v5776_v19 = vpop.xlane.xlu1 %5775 }
 0xaec   : > { %v5816_v5 = vmul.f32 0.0625, %v5776_v19  ;;  %v5945_v54 = vadd.f32 %v5929_v24, %v5913_v10 }
 0xaed   : > { %v7431_v17 = vpop.eup %7430 }
 0xaee   : > { %v5832_v12 = vadd.f32 1e-05, %v5816_v5  ;;  %6876 = vmatprep.subr.msk.mxu0 %vm5667_vm11, %v5945_v54  ;;  %v5866_v47 = vmul.f32 %v7431_v17, %v10893_v43 }
 0xaef   : > { %6877 = vmatpush3.xpose.msk.msra.mxu0 %vm5667_vm11, %v5945_v54 }
 0xaf0   : > { %7434 = vrsqrt.f32 %v5832_v12  ;;  %v5889_v57 = vmul.f32 %v10934_v2, %v5866_v47 }
 0xaf2   : > { %v5912_v41 = vadd.f32 %v10940_v27, %v5889_v57 }
 0xaf3   : > { %v5773_v7 = vpop.xlane.xlu0 %5772 }
 0xaf4   : > { %v5815_v45 = vmul.f32 0.0625, %v5773_v7  ;;  %v5944_v33 = vadd.f32 %v5928_v26, %v5912_v41 }
 0xaf5   : > { %v7433_v51 = vpop.eup %7432 }
 0xaf6   : > { %v5831_v48 = vadd.f32 1e-05, %v5815_v45  ;;  %6878 = vmatprep.subr.msk.mxu0 %vm5667_vm11, %v5944_v33  ;;  %v5865_v8 = vmul.f32 %v7433_v51, %v10899_v61 }
 0xaf7   : > { %6879 = vmatpush3.xpose.msk.msra.mxu0 %vm5667_vm11, %v5944_v33 }
 0xaf8   : > { %7436 = vrsqrt.f32 %v5831_v48  ;;  %v5888_v43 = vmul.f32 %v10934_v2, %v5865_v8 }
 0xafa   : > { %v5911_v23 = vadd.f32 %v10940_v27, %v5888_v43 }
 0xafb   : > { %v5770_v15 = vpop.xlane.xlu1 %5769 }
 0xafc   : > { %v5814_v31 = vmul.f32 0.0625, %v5770_v15  ;;  %v5943_v38 = vadd.f32 %v5927_v32, %v5911_v23 }
 0xafd   : > { %v7435_v42 = vpop.eup %7434 }
 0xafe   : > { %v5830_v16 = vadd.f32 1e-05, %v5814_v31  ;;  %6880 = vmatprep.subr.msk.mxu0 %vm5667_vm11, %v5943_v38  ;;  %v5864_v20 = vmul.f32 %v7435_v42, %v10905_v60 }
 0xaff   : > { %6881 = vmatpush3.xpose.msk.msra.mxu0 %vm5667_vm11, %v5943_v38 }
 0xb00   : > { %7438 = vrsqrt.f32 %v5830_v16  ;;  %v5887_v61 = vmul.f32 %v10934_v2, %v5864_v20 }
 0xb02   : > { %v5767_v59 = vpop.xlane.xlu0 %5766  ;;  %v5910_v39 = vadd.f32 %v10940_v27, %v5887_v61 }
 0xb03   : > { %v5813_v58 = vmul.f32 0.0625, %v5767_v59 }
 0xb04   : > { %v5942_v6 = vadd.f32 %v5926_v62, %v5910_v39 }
 0xb05   : > { %v7437_v46 = vpop.eup %7436  ;;  %v5829_v52 = vadd.f32 1e-05, %v5813_v58 }
 0xb06   : > { %6882 = vmatprep.subr.msk.mxu0 %vm5667_vm11, %v5942_v6  ;;  %v5863_v53 = vmul.f32 %v7437_v46, %v10911_v1  ;;  %v5924_v1 = vld [vmem:[%s8171_s13 + $0x8] sm:$0xff] }
 0xb07   : > { %7440 = vrsqrt.f32 %v5829_v52  ;;  %6883 = vmatpush3.xpose.msk.msra.mxu0 %vm5667_vm11, %v5942_v6 }
 0xb08   : > { %v5886_v60 = vmul.f32 %v10934_v2, %v5863_v53 }
 0xb0a   : > { %v5909_v63 = vadd.f32 %v10940_v27, %v5886_v60 }
 0xb0c   : > { %v5941_v18 = vadd.f32 %v5925_v30, %v5909_v63 }
 0xb0d   : > { %v7439_v13 = vpop.eup %7438 }
 0xb0e   : > { %6884 = vmatprep.subr.msk.mxu0 %vm5667_vm11, %v5941_v18  ;;  %v5862_v11 = vmul.f32 %v7439_v13, %v10917_v55  ;;  %v5923_v55 = vld [vmem:[%s8171_s13] sm:$0xff] }
 0xb0f   : > { %6885 = vmatpush3.xpose.msk.msra.mxu0 %vm5667_vm11, %v5941_v18 }
 0xb10   : > { %v5885_v37 = vmul.f32 %v10934_v2, %v5862_v11 }
 0xb12   : > { %v5908_v44 = vadd.f32 %v10940_v27, %v5885_v37 }
 0xb14   : > { %v7441_v28 = vpop.eup %7440  ;;  %v5940_v56 = vadd.f32 %v5924_v1, %v5908_v44 }
 0xb15   : > { %v5861_v4 = vmul.f32 %v7441_v28, %v10923_v21 }
 0xb16   : > { %6886 = vmatprep.subr.msk.mxu0 %vm5667_vm11, %v5940_v56 }
 0xb17   : > { %6887 = vmatpush3.xpose.msk.msra.mxu0 %vm5667_vm11, %v5940_v56  ;;  %v5884_v34 = vmul.f32 %v10934_v2, %v5861_v4 }
 0xb19   : > { %v5907_v0 = vadd.f32 %v10940_v27, %v5884_v34 }
 0xb1b   : > { %v5939_v35 = vadd.f32 %v5923_v55, %v5907_v0 }
 0xb1d   : > { %6888 = vmatprep.subr.msk.mxu0 %vm5667_vm11, %v5939_v35 }
 0xb1e   : > { %6889 = vmatpush3.xpose.msk.msra.mxu0 %vm5667_vm11, %v5939_v35 }
 0xb21   : > { %6891 = vmatmul.mubr.msk.f32.vlgmr.msra.gmra.mxu0 %vm5667_vm11, %v10928_v9 }
 0xbe1   : > { %v6892_v36 = vpop.f32.mrf.mxu0 }
 0xbe2   : > { %6096 = vst [vmem:[%s8181_s21 + $0x8] sm:$0xff] %v6892_v36 }
 0xbe3   : > { %v6086_v21 = vpop.f32.mrf.mxu0 }
 0xbe4   : > { %6095 = vst [vmem:[%s8181_s21] sm:$0xff] %v6086_v21 }
 0xbe5 PF: > { %s11707_s7 = sld [smem:[#allocation20_spill]]  ;;  %s6110_s15 = sshll.u32 %s8181_s21, 4  ;;  %s11048_s15 = int_to_ptr.vmem [resolvable:$true] %s6110_s15 }
 0xbe6   : > { %s11708_s2 = sld [smem:[#allocation93_spill]]  ;;  %s6098_s11 = scalar_lea.sflag [#allocation13], %s8162_s4 }
 0xbe7   : > { %s7466_s17 = scalar_lea.vmem %s11048_s15, 256  ;;  %s7617_s26 = smov [#allocation12]  }
 0xbe8   : > { %p7467_p10 = scmp.ne.s32.totalorder %s11048_s15, %s7466_s17  ;;  %s7470_s28 = sshll.u32 %s7617_s26, 4  ;;  %s7471_s28 = int_to_ptr.vmem [resolvable:$false] %s7470_s28 }
 0xbe9   : > { %s7472_s16 = scalar_lea.vmem %s7471_s28, 512  ;;  %p7473_p1 = scmp.lt.s32.totalorder %s11048_s15, %s7471_s28 }
 0xbea   : > { %p7468_p11 = pnand %p7467_p10, %p7825_p12  ;;  %p7474_p6 = scmp.lt.s32.totalorder %s7472_s16, %s7466_s17 }
 0xbeb   : > { %s6482_s13 = sshll.u32 %s11707_s7, 7 }
 0xbec   : > { %s11045_s3 = scalar_lea.hbm %s11708_s2, %s6482_s13  ;;  %p7469_p13 = pneg %p7468_p11 }
 0xbed   : > { %p7475_p0 = por %p7474_p6, %p7473_p1 }
 0xbef   : > { %p7476_p2 = pnand %p7475_p0, %p7469_p13 }
 0xbf1   : > { %7479 = shalt.err (!%p7476_p2)
}
 0xbf2   : > { %s7480_s21 = scalar_lea.hbm %s11045_s3, 256  ;;  %s7484_s0 = scalar_lea.hbm %s11708_s2, 1024 }
 0xbf3   : > { %p7481_p4 = scmp.ne.s32.totalorder %s11045_s3, %s7480_s21  ;;  %p7485_p8 = scmp.lt.s32.totalorder %s11045_s3, %s11708_s2 }
 0xbf4   : > { %p7486_p9 = scmp.lt.s32.totalorder %s7484_s0, %s7480_s21 }
 0xbf5   : > { %p7482_p5 = pnand %p7481_p4, %p7825_p12 }
 0xbf6   : > { %p7487_p10 = por %p7486_p9, %p7485_p8 }
 0xbf7   : > { %p7483_p7 = pneg %p7482_p5 }
 0xbf9   : > { %p7488_p11 = pnand %p7487_p10, %p7483_p7 }
 0xbfb   : > { %7491 = shalt.err (!%p7488_p11)
}
 0xbfc   : > { %s7618_s7 = smov 128   ;;  %s7619_s13 = smov 512  }
 0xbfd   : > { %s7620_s9 = smov 8  }
 0xbfe   : > { %6893 = dma.vmem_to_hbm [thread:$0]  (%p7825_p12), %s11048_s15, 256, %s11045_s3, %s6098_s11, %s7618_s7, %s7619_s13, %s7620_s9  }
 0xbff PF: > { %p6899_p13 = scmp.ge.s32.totalorder %s7608_s14, 2  ;;  %s6125_s6 = sand.u32 1, %s7556_s1  }
 0xc00   : > { %s6126_s17 = scalar_lea.sflag [#allocation13], %s6125_s6 }
 0xc01   : > { %p6896_p1 = pnand %p6899_p13, %p7841_p3 }
 0xc03   : > { %p6897_p6 = pneg %p6896_p1 }
 0xc05   : > { %7551 = dma.done.wait (%p6897_p6), %s6126_s17, 256  }
 0xc06   : > { %7553 = vsyncadd (%p6897_p6), %s6126_s17, 4294967040  ;;  %s33_s14 = sadd.s32 1, %s7608_s14   ;;  %s11710_s4 = sld [smem:[#allocation25_spill]] }
 0xc07   : > { %p11078_p0 = scmp.ge.s32.totalorder %s33_s14, 10   ;;  %s11711_s12 = sld [smem:[#allocation21_spill]] }
 0xc08   : > { %s11712_s11 = sld [smem:[#allocation22_spill]]  ;;  %s11716_s1 = smov %s7568_s24 }
 0xc09   : > { %s11713_s3 = sld [smem:[#allocation23_spill]]  ;;  %s11717_s22 = smov %s7564_s23 }
 0xc0a   : > { %s11714_s13 = sld [smem:[#allocation24_spill]]  ;;  %s11718_s23 = smov %s7835_s8 }
 0xc0b   : > { %s11719_s24 = smov %s7572_s25  ;;  %s11721_s26 = smov %s7580_s27 }
 0xc0c   : > { %s11720_s25 = smov %s11710_s4  ;;  %s11722_s27 = smov %s7832_s30 }
 0xc0d   : > { %s11723_s28 = smov %s7588_s29  ;;  %s11724_s29 = smov %s7820_s5 }
 0xc0e   : > { %s11725_s30 = smov %s11711_s12  ;;  %32 = sbr.rel (!%p11078_p0) target bundleno = 36 (0x24), region = 303 }
 0xc0f   : > { %s11726_s12 = smov %s11713_s3 }
 0xc13   :  { %6131 = vsyncpa [#allocation13], 1 }
 0xc14   :  { %6133 = vsyncpa [#allocation13 + $0x1], 1 }

</bundles_post_ra>
